<compile_context>
chip_gen: v6e
topology: v6e:2x2x1
jax: 0.10.0
libtpu: 0.0.40
codegen_flags: <defaults>
</compile_context>

<pallas_src>
import functools

import jax
import jax.numpy as jnp
from jax.experimental import pallas as pl
from jax.experimental.pallas import tpu as pltpu

_BN_EPS = 1e-5


# ------------------------------ Pallas kernel -------------------------------

def _bottleneck_kernel(x_ref, w1_ref, b1_ref, w2_ref, b2_ref, w3_ref, b3_ref,
                       o_ref, y1p_ref, col_ref, *, img_per_step, H, W):
    """Fully fused Bottleneck forward for `img_per_step` images.

    x_ref:   (img_per_step*H*W, Cin)   bf16  flat NHWC rows (conv1 input + residual)
    w1_ref:  (Cin, width)              bf16  conv1 weight, bn1 folded in
    b1_ref:  (1, width)                f32   folded bn1 bias
    w2_ref:  (9*width, width)          bf16  conv2 taps stacked along K, bn2 folded
    b2_ref:  (1, width)                f32
    w3_ref:  (width, Cout)             bf16  conv3 weight, bn3 folded
    b3_ref:  (1, Cout)                 f32
    o_ref:   (img_per_step*H*W, Cout)  bf16  output rows
    y1p_ref: (img_per_step*(H+2), W+2, width) bf16 VMEM scratch (padded conv1 out)
    col_ref: (img_per_step*H*W, 9*width)      bf16 VMEM scratch (conv2 im2col)
    """
    HW = H * W
    Hp, Wp = H + 2, W + 2
    width = w1_ref.shape[1]

    # The pad ring of the scratch must be zero; only the interior is written
    # below and scratch persists across grid steps -> zero it once at step 0.
    @pl.when(pl.program_id(0) == 0)
    def _():
        y1p_ref[...] = jnp.zeros_like(y1p_ref)

    x = x_ref[...]                                                   # bf16

    # ---- conv1 (1x1) + bn1 + relu  (flat rows, no pad/mask math) ---------
    y1 = jnp.dot(x, w1_ref[...], preferred_element_type=jnp.float32)
    y1 = jnp.maximum(y1 + b1_ref[...], 0.0).astype(jnp.bfloat16)

    # ---- conv2 (3x3, stride 1, pad 1) + bn2 + relu ------------------------
    # Write conv1 output into the interior of the padded scratch, gather the
    # 9 shifted windows into one im2col buffer, then a single K=9*width MXU
    # matmul (no per-tap accumulate chain, full 256-wide MXU on v6e/v7x).
    for b in range(img_per_step):
        r0 = b * Hp
        y1p_ref[r0 + 1:r0 + 1 + H, 1:W + 1, :] = (
            y1[b * HW:(b + 1) * HW, :].reshape(H, W, width))
    for b in range(img_per_step):
        r0 = b * Hp
        for dy in range(3):
            for dx in range(3):
                k = dy * 3 + dx
                patch = y1p_ref[r0 + dy:r0 + dy + H, dx:dx + W, :]   # (H, W, width)
                col_ref[b * HW:(b + 1) * HW, k * width:(k + 1) * width] = (
                    patch.reshape(HW, width))
    y2 = jnp.dot(col_ref[...], w2_ref[...], preferred_element_type=jnp.float32)
    y2 = jnp.maximum(y2 + b2_ref[...], 0.0).astype(jnp.bfloat16)

    # ---- conv3 (1x1) + bn3 + residual + relu ------------------------------
    # NOTE: residual uses the bf16 copy of x (inference precision); the add
    # itself is done in f32.
    y3 = jnp.dot(y2, w3_ref[...], preferred_element_type=jnp.float32)
    y3 = y3 + b3_ref[...] + x.astype(jnp.float32)
    o_ref[...] = jnp.maximum(y3, 0.0).astype(o_ref.dtype)


# ------------------------------- wrapper -------------------------------------

def _fold_bn(w, gamma, beta, mean, var):
    """Fold inference-mode BN affine into the conv weight (out channels last)."""
    scale = gamma / jnp.sqrt(var + _BN_EPS)
    w_folded = (w * scale).astype(jnp.bfloat16)            # broadcast on last dim
    bias = (beta - mean * scale)[None, :].astype(jnp.float32)
    return w_folded, bias


def _pick_img_per_step(n, max_block=4):
    """Images per grid step: prefer >=2 grid steps (keeps both v7x TensorCores
    busy), otherwise block as many images as possible (amortize per-step
    overhead and weight reuse)."""
    for b in range(min(max_block, n), 0, -1):
        if n % b == 0 and n // b >= 2:
            return b
    return 1


def bottleneck_forward(x_nchw, params):
    """Pallas implementation of Bottleneck.forward (stride=1, no downsample)."""
    N, Cin, H, W = x_nchw.shape
    HW = H * W
    Hp, Wp = H + 2, W + 2

    # Single bf16 copy of x: conv1 input AND residual.
    x_rows = (jnp.transpose(x_nchw, (0, 2, 3, 1))          # NCHW -> NHWC
              .reshape(N * HW, Cin).astype(jnp.bfloat16))

    w1, b1 = _fold_bn(params["w1"], params["bn1_g"], params["bn1_b"],
                      params["bn1_m"], params["bn1_v"])
    w2, b2 = _fold_bn(params["w2"], params["bn2_g"], params["bn2_b"],
                      params["bn2_m"], params["bn2_v"])
    w3, b3 = _fold_bn(params["w3"], params["bn3_g"], params["bn3_b"],
                      params["bn3_m"], params["bn3_v"])
    width = w1.shape[1]
    Cout = w3.shape[1]
    assert Cout == Cin, "downsample=None requires inplanes == planes * 4"

    # conv2 taps stacked along the contraction dim: row k*width + cin.
    w2cat = w2.reshape(9 * width, width)

    img_per_step = _pick_img_per_step(N)
    rows = img_per_step * HW

    kernel = functools.partial(_bottleneck_kernel,
                               img_per_step=img_per_step, H=H, W=W)
    out2d = pl.pallas_call(
        kernel,
        out_shape=jax.ShapeDtypeStruct((N * HW, Cout), jnp.bfloat16),
        grid_spec=pltpu.PrefetchScalarGridSpec(
            num_scalar_prefetch=0,
            grid=(N // img_per_step,),
            in_specs=[
                pl.BlockSpec((rows, Cin), lambda n: (n, 0)),              # x rows
                pl.BlockSpec((Cin, width), lambda n: (0, 0)),             # w1
                pl.BlockSpec((1, width), lambda n: (0, 0)),               # b1
                pl.BlockSpec((9 * width, width), lambda n: (0, 0)),       # w2 (K-stacked)
                pl.BlockSpec((1, width), lambda n: (0, 0)),               # b2
                pl.BlockSpec((width, Cout), lambda n: (0, 0)),            # w3
                pl.BlockSpec((1, Cout), lambda n: (0, 0)),                # b3
            ],
            out_specs=pl.BlockSpec((rows, Cout), lambda n: (n, 0)),
            scratch_shapes=[
                pltpu.VMEM((img_per_step * Hp, Wp, width), jnp.bfloat16),  # padded conv1 out
                pltpu.VMEM((rows, 9 * width), jnp.bfloat16),               # conv2 im2col
            ],
        ),
        compiler_params=pltpu.CompilerParams(
            dimension_semantics=("parallel",),
            # ~4 MiB used at these shapes; re-derive against 64 MiB when
            # enlarging blocks on v7x (v5e/v6e can go much higher).
            vmem_limit_bytes=32 * 1024 * 1024,
        ),
    )(x_rows, w1, b1, w2cat, b2, w3, b3)

    out_nhwc = out2d.reshape(N, H, W, Cout).astype(jnp.float32)
    return jnp.transpose(out_nhwc, (0, 3, 1, 2))            # NHWC -> NCHW, f32


# ---------------------------- parameter creation ----------------------------

def make_params(key, inplanes, planes, groups=1, base_width=64):
    width = int(planes * (base_width / 64.0)) * groups
    cout = planes * 4
    ks = jax.random.split(key, 8)

    def bn_params(k, c):
        k1, k2, k3, k4 = jax.random.split(k, 4)
        return (1.0 + 0.1 * jax.random.normal(k1, (c,), jnp.float32),     # gamma
                0.1 * jax.random.normal(k2, (c,), jnp.float32),           # beta
                0.1 * jax.random.normal(k3, (c,), jnp.float32),           # running mean
                jnp.abs(jax.random.normal(k4, (c,), jnp.float32)) + 0.5)  # running var

    # PyTorch conv weights are (Cout, Cin, kh, kw); store matmul-ready layouts.
    w1_oihw = 0.05 * jax.random.normal(ks[0], (width, inplanes, 1, 1), jnp.float32)
    w2_oihw = 0.05 * jax.random.normal(ks[1], (width, width, 3, 3), jnp.float32)
    w3_oihw = 0.05 * jax.random.normal(ks[2], (cout, width, 1, 1), jnp.float32)

    g1, b1, m1, v1 = bn_params(ks[3], width)
    g2, b2, m2, v2 = bn_params(ks[4], width)
    g3, b3, m3, v3 = bn_params(ks[5], cout)

    params = dict(
        w1=jnp.transpose(w1_oihw[:, :, 0, 0], (1, 0)),                    # (Cin, width)
        # (kh, kw, Cin, Cout) -> (9, Cin, Cout); tap index k = dy*3 + dx
        w2=jnp.transpose(w2_oihw, (2, 3, 1, 0)).reshape(9, width, width),
        w3=jnp.transpose(w3_oihw[:, :, 0, 0], (1, 0)),                    # (width, Cout)
        bn1_g=g1, bn1_b=b1, bn1_m=m1, bn1_v=v1,
        bn2_g=g2, bn2_b=b2, bn2_m=m2, bn2_v=v2,
        bn3_g=g3, bn3_b=b3, bn3_m=m3, bn3_v=v3,
    )
    raw = dict(w1=w1_oihw, w2=w2_oihw, w3=w3_oihw)
    return params, raw


# ------------------------------ pure-JAX reference ---------------------------

def reference_forward(x_nchw, params, raw):
    def conv(x, w, pad):
        return jax.lax.conv_general_dilated(
            x, w, window_strides=(1, 1),
            padding=((pad, pad), (pad, pad)),
            dimension_numbers=("NCHW", "OIHW", "NCHW"))

    def bn(x, g, b, m, v):
        return ((x - m[None, :, None, None]) / jnp.sqrt(v + _BN_EPS)[None, :, None, None]
                * g[None, :, None, None] + b[None, :, None, None])

    out = jax.nn.relu(bn(conv(x_nchw, raw["w1"], 0),
                         params["bn1_g"], params["bn1_b"], params["bn1_m"], params["bn1_v"]))
    out = jax.nn.relu(bn(conv(out, raw["w2"], 1),
                         params["bn2_g"], params["bn2_b"], params["bn2_m"], params["bn2_v"]))
    out = bn(conv(out, raw["w3"], 0),
             params["bn3_g"], params["bn3_b"], params["bn3_m"], params["bn3_v"])
    return jax.nn.relu(out + x_nchw)


# ----------------------------------- main ------------------------------------

if __name__ == "__main__":
    # Small but lane-dense shapes; inplanes == planes*4 since downsample=None.
    # width = int(planes * base_width/64) = 128, Cout = 256.
    N, H, W = 2, 16, 16
    inplanes, planes, base_width = 256, 64, 128

    key = jax.random.PRNGKey(0)
    kx, kp = jax.random.split(key)
    x = jax.random.normal(kx, (N, inplanes, H, W), jnp.float32)
    params, raw = make_params(kp, inplanes, planes, base_width=base_width)

    out = jax.jit(bottleneck_forward)(x, params)
    out = jax.block_until_ready(out)

    ref = reference_forward(x, params, raw)
    assert out.shape == (N, planes * 4, H, W)
    # Matmuls run in bf16 (f32 accumulation) and the kernel emits bf16, so
    # allow a small bf16-sized error relative to the f32 reference scale.
    max_err = float(jnp.max(jnp.abs(out - ref)))
    ref_scale = float(jnp.max(jnp.abs(ref)))
    assert max_err <= 0.05 * max(1.0, ref_scale), \
        f"max abs err {max_err} vs ref scale {ref_scale}"

    print("KERNEL_OK")
</pallas_src>

<mosaic_0001>
module attributes {stable_mosaic.version = 11 : i64} {
  func.func @_bottleneck_kernel(%arg0: i32, %arg1: memref<256x256xbf16, #tpu.memory_space<vmem>>, %arg2: memref<256x128xbf16, #tpu.memory_space<vmem>>, %arg3: memref<1x128xf32, #tpu.memory_space<vmem>>, %arg4: memref<1152x128xbf16, #tpu.memory_space<vmem>>, %arg5: memref<1x128xf32, #tpu.memory_space<vmem>>, %arg6: memref<128x256xbf16, #tpu.memory_space<vmem>>, %arg7: memref<1x256xf32, #tpu.memory_space<vmem>>, %arg8: memref<256x256xbf16, #tpu.memory_space<vmem>>, %arg9: memref<18x18x128xbf16, #tpu.memory_space<vmem>>, %arg10: memref<256x1152xbf16, #tpu.memory_space<vmem>>) attributes {dimension_semantics = [#tpu.dimension_semantics<parallel>], iteration_bounds = array<i64: 2>, scalar_prefetch = 0 : i64, scratch_operands = 2 : i64, tpu.core_type = #tpu.core_type<tc>, window_params = [{transform_indices = @transform_0, window_bounds = array<i64: 256, 256>}, {pipeline_mode = #tpu.pipeline_mode<synchronous>, transform_indices = @transform_1, window_bounds = array<i64: 256, 128>}, {pipeline_mode = #tpu.pipeline_mode<synchronous>, transform_indices = @transform_2, window_bounds = array<i64: 1, 128>}, {pipeline_mode = #tpu.pipeline_mode<synchronous>, transform_indices = @transform_3, window_bounds = array<i64: 1152, 128>}, {pipeline_mode = #tpu.pipeline_mode<synchronous>, transform_indices = @transform_4, window_bounds = array<i64: 1, 128>}, {pipeline_mode = #tpu.pipeline_mode<synchronous>, transform_indices = @transform_5, window_bounds = array<i64: 128, 256>}, {pipeline_mode = #tpu.pipeline_mode<synchronous>, transform_indices = @transform_6, window_bounds = array<i64: 1, 256>}, {transform_indices = @transform_7, window_bounds = array<i64: 256, 256>}]} {
    %c0_i32 = arith.constant 0 : i32
    %0 = arith.cmpi eq, %arg0, %c0_i32 : i32
    %1 = arith.extui %0 : i1 to i32
    %c0_i32_0 = arith.constant 0 : i32
    %2 = arith.cmpi ne, %1, %c0_i32_0 : i32
    scf.if %2 {
      %cst_61 = arith.constant 0.000000e+00 : bf16
      %61 = vector.broadcast %cst_61 : bf16 to vector<18x18x128xbf16>
      %c0_62 = arith.constant 0 : index
      %c0_63 = arith.constant 0 : index
      %c0_64 = arith.constant 0 : index
      %62 = vector.load %arg9[%c0_62, %c0_63, %c0_64] : memref<18x18x128xbf16, #tpu.memory_space<vmem>>, vector<18x18x128xbf16>
      tpu.vector_store %arg9[%c0_62, %c0_63, %c0_64], %61 {strides = array<i32>} : memref<18x18x128xbf16, #tpu.memory_space<vmem>>, vector<18x18x128xbf16>,
    } else {
    }
    %c0 = arith.constant 0 : index
    %c0_1 = arith.constant 0 : index
    %3 = vector.load %arg1[%c0, %c0_1] : memref<256x256xbf16, #tpu.memory_space<vmem>>, vector<256x256xbf16>
    %c0_2 = arith.constant 0 : index
    %c0_3 = arith.constant 0 : index
    %4 = vector.load %arg2[%c0_2, %c0_3] : memref<256x128xbf16, #tpu.memory_space<vmem>>, vector<256x128xbf16>
    %cst = arith.constant dense<0.000000e+00> : vector<256x128xf32>
    %5 = tpu.matmul %3, %4, %cst {dimension_numbers = #tpu.dot_dimension_numbers<[1], [0], [0], [1], [0, 0, 1, 1], [], []>} : vector<256x256xbf16>, vector<256x128xbf16>, vector<256x128xf32> -> vector<256x128xf32>
    %c0_4 = arith.constant 0 : index
    %c0_5 = arith.constant 0 : index
    %6 = vector.load %arg3[%c0_4, %c0_5] : memref<1x128xf32, #tpu.memory_space<vmem>>, vector<1x128xf32>
    %7 = vector.broadcast %6 : vector<1x128xf32> to vector<256x128xf32>
    %8 = arith.addf %5, %7 : vector<256x128xf32>
    %cst_6 = arith.constant 0.000000e+00 : f32
    %9 = vector.broadcast %cst_6 : f32 to vector<256x128xf32>
    %10 = arith.maximumf %8, %9 : vector<256x128xf32>
    %11 = arith.truncf %10 : vector<256x128xf32> to vector<256x128xbf16>
    %12 = vector.shape_cast %11 : vector<256x128xbf16> to vector<16x16x128xbf16>
    %c1 = arith.constant 1 : index
    %c1_7 = arith.constant 1 : index
    %c0_8 = arith.constant 0 : index
    %13 = vector.load %arg9[%c1, %c1_7, %c0_8] : memref<18x18x128xbf16, #tpu.memory_space<vmem>>, vector<16x16x128xbf16>
    tpu.vector_store %arg9[%c1, %c1_7, %c0_8], %12 {strides = array<i32>} : memref<18x18x128xbf16, #tpu.memory_space<vmem>>, vector<16x16x128xbf16>,
    %c0_9 = arith.constant 0 : index
    %c0_10 = arith.constant 0 : index
    %c0_11 = arith.constant 0 : index
    %14 = vector.load %arg9[%c0_9, %c0_10, %c0_11] : memref<18x18x128xbf16, #tpu.memory_space<vmem>>, vector<16x16x128xbf16>
    %15 = vector.shape_cast %14 : vector<16x16x128xbf16> to vector<256x128xbf16>
    %c0_12 = arith.constant 0 : index
    %c0_13 = arith.constant 0 : index
    %16 = vector.load %arg10[%c0_12, %c0_13] : memref<256x1152xbf16, #tpu.memory_space<vmem>>, vector<256x128xbf16>
    tpu.vector_store %arg10[%c0_12, %c0_13], %15 {strides = array<i32>} : memref<256x1152xbf16, #tpu.memory_space<vmem>>, vector<256x128xbf16>,
    %c0_14 = arith.constant 0 : index
    %c1_15 = arith.constant 1 : index
    %c0_16 = arith.constant 0 : index
    %17 = vector.load %arg9[%c0_14, %c1_15, %c0_16] : memref<18x18x128xbf16, #tpu.memory_space<vmem>>, vector<16x16x128xbf16>
    %18 = vector.shape_cast %17 : vector<16x16x128xbf16> to vector<256x128xbf16>
    %c0_17 = arith.constant 0 : index
    %c128 = arith.constant 128 : index
    %19 = vector.load %arg10[%c0_17, %c128] : memref<256x1152xbf16, #tpu.memory_space<vmem>>, vector<256x128xbf16>
    tpu.vector_store %arg10[%c0_17, %c128], %18 {strides = array<i32>} : memref<256x1152xbf16, #tpu.memory_space<vmem>>, vector<256x128xbf16>,
    %c0_18 = arith.constant 0 : index
    %c2 = arith.constant 2 : index
    %c0_19 = arith.constant 0 : index
    %20 = vector.load %arg9[%c0_18, %c2, %c0_19] : memref<18x18x128xbf16, #tpu.memory_space<vmem>>, vector<16x16x128xbf16>
    %21 = vector.shape_cast %20 : vector<16x16x128xbf16> to vector<256x128xbf16>
    %c0_20 = arith.constant 0 : index
    %c256 = arith.constant 256 : index
    %22 = vector.load %arg10[%c0_20, %c256] : memref<256x1152xbf16, #tpu.memory_space<vmem>>, vector<256x128xbf16>
    tpu.vector_store %arg10[%c0_20, %c256], %21 {strides = array<i32>} : memref<256x1152xbf16, #tpu.memory_space<vmem>>, vector<256x128xbf16>,
    %c1_21 = arith.constant 1 : index
    %c0_22 = arith.constant 0 : index
    %c0_23 = arith.constant 0 : index
    %23 = vector.load %arg9[%c1_21, %c0_22, %c0_23] : memref<18x18x128xbf16, #tpu.memory_space<vmem>>, vector<16x16x128xbf16>
    %24 = vector.shape_cast %23 : vector<16x16x128xbf16> to vector<256x128xbf16>
    %c0_24 = arith.constant 0 : index
    %c384 = arith.constant 384 : index
    %25 = vector.load %arg10[%c0_24, %c384] : memref<256x1152xbf16, #tpu.memory_space<vmem>>, vector<256x128xbf16>
    tpu.vector_store %arg10[%c0_24, %c384], %24 {strides = array<i32>} : memref<256x1152xbf16, #tpu.memory_space<vmem>>, vector<256x128xbf16>,
    %c1_25 = arith.constant 1 : index
    %c1_26 = arith.constant 1 : index
    %c0_27 = arith.constant 0 : index
    %26 = vector.load %arg9[%c1_25, %c1_26, %c0_27] : memref<18x18x128xbf16, #tpu.memory_space<vmem>>, vector<16x16x128xbf16>
    %27 = vector.shape_cast %26 : vector<16x16x128xbf16> to vector<256x128xbf16>
    %c0_28 = arith.constant 0 : index
    %c512 = arith.constant 512 : index
    %28 = vector.load %arg10[%c0_28, %c512] : memref<256x1152xbf16, #tpu.memory_space<vmem>>, vector<256x128xbf16>
    tpu.vector_store %arg10[%c0_28, %c512], %27 {strides = array<i32>} : memref<256x1152xbf16, #tpu.memory_space<vmem>>, vector<256x128xbf16>,
    %c1_29 = arith.constant 1 : index
    %c2_30 = arith.constant 2 : index
    %c0_31 = arith.constant 0 : index
    %29 = vector.load %arg9[%c1_29, %c2_30, %c0_31] : memref<18x18x128xbf16, #tpu.memory_space<vmem>>, vector<16x16x128xbf16>
    %30 = vector.shape_cast %29 : vector<16x16x128xbf16> to vector<256x128xbf16>
    %c0_32 = arith.constant 0 : index
    %c640 = arith.constant 640 : index
    %31 = vector.load %arg10[%c0_32, %c640] : memref<256x1152xbf16, #tpu.memory_space<vmem>>, vector<256x128xbf16>
    tpu.vector_store %arg10[%c0_32, %c640], %30 {strides = array<i32>} : memref<256x1152xbf16, #tpu.memory_space<vmem>>, vector<256x128xbf16>,
    %c2_33 = arith.constant 2 : index
    %c0_34 = arith.constant 0 : index
    %c0_35 = arith.constant 0 : index
    %32 = vector.load %arg9[%c2_33, %c0_34, %c0_35] : memref<18x18x128xbf16, #tpu.memory_space<vmem>>, vector<16x16x128xbf16>
    %33 = vector.shape_cast %32 : vector<16x16x128xbf16> to vector<256x128xbf16>
    %c0_36 = arith.constant 0 : index
    %c768 = arith.constant 768 : index
    %34 = vector.load %arg10[%c0_36, %c768] : memref<256x1152xbf16, #tpu.memory_space<vmem>>, vector<256x128xbf16>
    tpu.vector_store %arg10[%c0_36, %c768], %33 {strides = array<i32>} : memref<256x1152xbf16, #tpu.memory_space<vmem>>, vector<256x128xbf16>,
    %c2_37 = arith.constant 2 : index
    %c1_38 = arith.constant 1 : index
    %c0_39 = arith.constant 0 : index
    %35 = vector.load %arg9[%c2_37, %c1_38, %c0_39] : memref<18x18x128xbf16, #tpu.memory_space<vmem>>, vector<16x16x128xbf16>
    %36 = vector.shape_cast %35 : vector<16x16x128xbf16> to vector<256x128xbf16>
    %c0_40 = arith.constant 0 : index
    %c896 = arith.constant 896 : index
    %37 = vector.load %arg10[%c0_40, %c896] : memref<256x1152xbf16, #tpu.memory_space<vmem>>, vector<256x128xbf16>
    tpu.vector_store %arg10[%c0_40, %c896], %36 {strides = array<i32>} : memref<256x1152xbf16, #tpu.memory_space<vmem>>, vector<256x128xbf16>,
    %c2_41 = arith.constant 2 : index
    %c2_42 = arith.constant 2 : index
    %c0_43 = arith.constant 0 : index
    %38 = vector.load %arg9[%c2_41, %c2_42, %c0_43] : memref<18x18x128xbf16, #tpu.memory_space<vmem>>, vector<16x16x128xbf16>
    %39 = vector.shape_cast %38 : vector<16x16x128xbf16> to vector<256x128xbf16>
    %c0_44 = arith.constant 0 : index
    %c1024 = arith.constant 1024 : index
    %40 = vector.load %arg10[%c0_44, %c1024] : memref<256x1152xbf16, #tpu.memory_space<vmem>>, vector<256x128xbf16>
    tpu.vector_store %arg10[%c0_44, %c1024], %39 {strides = array<i32>} : memref<256x1152xbf16, #tpu.memory_space<vmem>>, vector<256x128xbf16>,
    %c0_45 = arith.constant 0 : index
    %c0_46 = arith.constant 0 : index
    %41 = vector.load %arg10[%c0_45, %c0_46] : memref<256x1152xbf16, #tpu.memory_space<vmem>>, vector<256x1152xbf16>
    %c0_47 = arith.constant 0 : index
    %c0_48 = arith.constant 0 : index
    %42 = vector.load %arg4[%c0_47, %c0_48] : memref<1152x128xbf16, #tpu.memory_space<vmem>>, vector<1152x128xbf16>
    %cst_49 = arith.constant dense<0.000000e+00> : vector<256x128xf32>
    %43 = tpu.matmul %41, %42, %cst_49 {dimension_numbers = #tpu.dot_dimension_numbers<[1], [0], [0], [1], [0, 0, 1, 1], [], []>} : vector<256x1152xbf16>, vector<1152x128xbf16>, vector<256x128xf32> -> vector<256x128xf32>
    %c0_50 = arith.constant 0 : index
    %c0_51 = arith.constant 0 : index
    %44 = vector.load %arg5[%c0_50, %c0_51] : memref<1x128xf32, #tpu.memory_space<vmem>>, vector<1x128xf32>
    %45 = vector.broadcast %44 : vector<1x128xf32> to vector<256x128xf32>
    %46 = arith.addf %43, %45 : vector<256x128xf32>
    %cst_52 = arith.constant 0.000000e+00 : f32
    %47 = vector.broadcast %cst_52 : f32 to vector<256x128xf32>
    %48 = arith.maximumf %46, %47 : vector<256x128xf32>
    %49 = arith.truncf %48 : vector<256x128xf32> to vector<256x128xbf16>
    %c0_53 = arith.constant 0 : index
    %c0_54 = arith.constant 0 : index
    %50 = vector.load %arg6[%c0_53, %c0_54] : memref<128x256xbf16, #tpu.memory_space<vmem>>, vector<128x256xbf16>
    %cst_55 = arith.constant dense<0.000000e+00> : vector<256x256xf32>
    %51 = tpu.matmul %49, %50, %cst_55 {dimension_numbers = #tpu.dot_dimension_numbers<[1], [0], [0], [1], [0, 0, 1, 1], [], []>} : vector<256x128xbf16>, vector<128x256xbf16>, vector<256x256xf32> -> vector<256x256xf32>
    %c0_56 = arith.constant 0 : index
    %c0_57 = arith.constant 0 : index
    %52 = vector.load %arg7[%c0_56, %c0_57] : memref<1x256xf32, #tpu.memory_space<vmem>>, vector<1x256xf32>
    %53 = vector.broadcast %52 : vector<1x256xf32> to vector<256x256xf32>
    %54 = arith.addf %51, %53 : vector<256x256xf32>
    %55 = arith.extf %3 : vector<256x256xbf16> to vector<256x256xf32>
    %56 = arith.addf %54, %55 : vector<256x256xf32>
    %cst_58 = arith.constant 0.000000e+00 : f32
    %57 = vector.broadcast %cst_58 : f32 to vector<256x256xf32>
    %58 = arith.maximumf %56, %57 : vector<256x256xf32>
    %59 = arith.truncf %58 : vector<256x256xf32> to vector<256x256xbf16>
    %c0_59 = arith.constant 0 : index
    %c0_60 = arith.constant 0 : index
    %60 = vector.load %arg8[%c0_59, %c0_60] : memref<256x256xbf16, #tpu.memory_space<vmem>>, vector<256x256xbf16>
    tpu.vector_store %arg8[%c0_59, %c0_60], %59 {strides = array<i32>} : memref<256x256xbf16, #tpu.memory_space<vmem>>, vector<256x256xbf16>,
    return
  }
  func.func @transform_0(%arg0: i32) -> (i32, i32) {
    %c0_i32 = arith.constant 0 : i32
    %c0_i32_0 = arith.constant 0 : i32
    return %arg0, %c0_i32 : i32, i32
  }
  func.func @transform_1(%arg0: i32) -> (i32, i32) {
    %c0_i32 = arith.constant 0 : i32
    %c0_i32_0 = arith.constant 0 : i32
    %c0_i32_1 = arith.constant 0 : i32
    return %c0_i32, %c0_i32_0 : i32, i32
  }
  func.func @transform_2(%arg0: i32) -> (i32, i32) {
    %c0_i32 = arith.constant 0 : i32
    %c0_i32_0 = arith.constant 0 : i32
    %c0_i32_1 = arith.constant 0 : i32
    return %c0_i32, %c0_i32_0 : i32, i32
  }
  func.func @transform_3(%arg0: i32) -> (i32, i32) {
    %c0_i32 = arith.constant 0 : i32
    %c0_i32_0 = arith.constant 0 : i32
    %c0_i32_1 = arith.constant 0 : i32
    return %c0_i32, %c0_i32_0 : i32, i32
  }
  func.func @transform_4(%arg0: i32) -> (i32, i32) {
    %c0_i32 = arith.constant 0 : i32
    %c0_i32_0 = arith.constant 0 : i32
    %c0_i32_1 = arith.constant 0 : i32
    return %c0_i32, %c0_i32_0 : i32, i32
  }
  func.func @transform_5(%arg0: i32) -> (i32, i32) {
    %c0_i32 = arith.constant 0 : i32
    %c0_i32_0 = arith.constant 0 : i32
    %c0_i32_1 = arith.constant 0 : i32
    return %c0_i32, %c0_i32_0 : i32, i32
  }
  func.func @transform_6(%arg0: i32) -> (i32, i32) {
    %c0_i32 = arith.constant 0 : i32
    %c0_i32_0 = arith.constant 0 : i32
    %c0_i32_1 = arith.constant 0 : i32
    return %c0_i32, %c0_i32_0 : i32, i32
  }
  func.func @transform_7(%arg0: i32) -> (i32, i32) {
    %c0_i32 = arith.constant 0 : i32
    %c0_i32_0 = arith.constant 0 : i32
    return %arg0, %c0_i32 : i32, i32
  }
}

</mosaic_0001>

<bundles_post_ra>
// kernel: bottleneck_forward.1
= control target key start
LH: loop header
LB: loop body
LE: loop exit
PB: predicated region body
PF: predicated region fallthrough
CT: control target
= control target key end

     0   :  { %s8582_s24 = smov 0   ;;  %s10681_s0 = inlined_call_operand.vmem [shape: bf16[512,256], index: 0, kind: input, shape index: {}]   ;;  %s10682_s1 = inlined_call_operand.vmem [shape: bf16[256,128], index: 1, kind: input, shape index: {}]   ;;  %s10683_s2 = inlined_call_operand.vmem [shape: f32[1,128], index: 2, kind: input, shape index: {}]   ;;  %s10684_s3 = inlined_call_operand.vmem [shape: bf16[1152,128], index: 3, kind: input, shape index: {}]   ;;  %s10685_s4 = inlined_call_operand.vmem [shape: f32[1,128], index: 4, kind: input, shape index: {}]   ;;  %s10686_s5 = inlined_call_operand.vmem [shape: bf16[128,256], index: 5, kind: input, shape index: {}]   ;;  %s10687_s6 = inlined_call_operand.vmem [shape: f32[1,256], index: 6, kind: input, shape index: {}]   ;;  %s10688_s7 = inlined_call_operand.vmem [shape: bf16[512,256], index: 7, kind: output, shape index: {}]  }
   0x1 LB: > { %s7013_s25 = sadd.s32 4294967295, %s8538_s24   ;;  %p7017_p0 = scmp.ge.s32.totalorder %s8538_s24, 1  ;;  %s8538_s24 = sphi %s8582_s24, %s17_s24  }
   0x2   : > { %p239_p1 = scmp.lt.s32.totalorder %s8538_s24, 3 }
   0x4   : > { %p240_p2 = pnand %p7017_p0, %p239_p1 }
   0x6   : > { %243 = sbr.rel (%p240_p2) target bundleno = 1244 (0x4dc), region = 48 }
   0xb   : > { %s7018_s26 = sshll.u32 %s7013_s25, 5  ;;  %p7024_p4 = scmp.ne.s32.totalorder %s7013_s25, 0 }
   0xc   : > { %p274_p3 = scmp.lt.s32.totalorder %s7018_s26, 63 }
   0xd   : > { %291 = sbr.rel (%p7024_p4) target bundleno = 46 (0x2e), region = 52 }
   0xe   : > { %s10757_s26 = smov (!%p274_p3, %s7018_s26), 63 }
   0xf   : > { %s7421_s27 = sshll.u32 %s10757_s26, 3 }
  0x10   : > { %s8593_s30 = scalar_lea.vmem %s10681_s0, %s7421_s27  ;;  %s8598_s10 = scalar_lea.vmem %s10688_s7, %s7421_s27 }
  0x12   : > { %v8540_v0 = vmov 0  }
  0x13   : > { %292 = vst [vmem:[#allocation2] sm:$0xf] %v8540_v0  ;;  %293 = vst [vmem:[#allocation2 + $0x4] sm:$0xf] %v8540_v0 }
  0x14   : > { %294 = vst [vmem:[#allocation2 + $0x8] sm:$0x1] %v8540_v0  ;;  %295 = vst [vmem:[#allocation2 + $0xc] sm:$0xf] %v8540_v0 }
  0x15   : > { %296 = vst [vmem:[#allocation2 + $0x10] sm:$0xf] %v8540_v0  ;;  %297 = vst [vmem:[#allocation2 + $0x14] sm:$0x1] %v8540_v0 }
  0x16   : > { %298 = vst [vmem:[#allocation2 + $0x18] sm:$0xf] %v8540_v0  ;;  %299 = vst [vmem:[#allocation2 + $0x1c] sm:$0xf] %v8540_v0 }
  0x17   : > { %300 = vst [vmem:[#allocation2 + $0x20] sm:$0x1] %v8540_v0  ;;  %301 = vst [vmem:[#allocation2 + $0x24] sm:$0xf] %v8540_v0 }
  0x18   : > { %302 = vst [vmem:[#allocation2 + $0x28] sm:$0xf] %v8540_v0  ;;  %303 = vst [vmem:[#allocation2 + $0x2c] sm:$0x1] %v8540_v0 }
  0x19   : > { %304 = vst [vmem:[#allocation2 + $0x30] sm:$0xf] %v8540_v0  ;;  %305 = vst [vmem:[#allocation2 + $0x34] sm:$0xf] %v8540_v0 }
  0x1a   : > { %306 = vst [vmem:[#allocation2 + $0x38] sm:$0x1] %v8540_v0  ;;  %307 = vst [vmem:[#allocation2 + $0x3c] sm:$0xf] %v8540_v0 }
  0x1b   : > { %308 = vst [vmem:[#allocation2 + $0x40] sm:$0xf] %v8540_v0  ;;  %309 = vst [vmem:[#allocation2 + $0x44] sm:$0x1] %v8540_v0 }
  0x1c   : > { %310 = vst [vmem:[#allocation2 + $0x48] sm:$0xf] %v8540_v0  ;;  %311 = vst [vmem:[#allocation2 + $0x4c] sm:$0xf] %v8540_v0 }
  0x1d   : > { %312 = vst [vmem:[#allocation2 + $0x50] sm:$0x1] %v8540_v0  ;;  %313 = vst [vmem:[#allocation2 + $0x54] sm:$0xf] %v8540_v0 }
  0x1e   : > { %314 = vst [vmem:[#allocation2 + $0x58] sm:$0xf] %v8540_v0  ;;  %315 = vst [vmem:[#allocation2 + $0x5c] sm:$0x1] %v8540_v0 }
  0x1f   : > { %316 = vst [vmem:[#allocation2 + $0x60] sm:$0xf] %v8540_v0  ;;  %317 = vst [vmem:[#allocation2 + $0x64] sm:$0xf] %v8540_v0 }
  0x20   : > { %318 = vst [vmem:[#allocation2 + $0x68] sm:$0x1] %v8540_v0  ;;  %319 = vst [vmem:[#allocation2 + $0x6c] sm:$0xf] %v8540_v0 }
  0x21   : > { %320 = vst [vmem:[#allocation2 + $0x70] sm:$0xf] %v8540_v0  ;;  %321 = vst [vmem:[#allocation2 + $0x74] sm:$0x1] %v8540_v0 }
  0x22   : > { %322 = vst [vmem:[#allocation2 + $0x78] sm:$0xf] %v8540_v0  ;;  %323 = vst [vmem:[#allocation2 + $0x7c] sm:$0xf] %v8540_v0 }
  0x23   : > { %324 = vst [vmem:[#allocation2 + $0x80] sm:$0x1] %v8540_v0  ;;  %325 = vst [vmem:[#allocation2 + $0x84] sm:$0xf] %v8540_v0 }
  0x24   : > { %326 = vst [vmem:[#allocation2 + $0x88] sm:$0xf] %v8540_v0  ;;  %327 = vst [vmem:[#allocation2 + $0x8c] sm:$0x1] %v8540_v0 }
  0x25   : > { %328 = vst [vmem:[#allocation2 + $0x90] sm:$0xf] %v8540_v0  ;;  %329 = vst [vmem:[#allocation2 + $0x94] sm:$0xf] %v8540_v0 }
  0x26   : > { %330 = vst [vmem:[#allocation2 + $0x98] sm:$0x1] %v8540_v0  ;;  %331 = vst [vmem:[#allocation2 + $0x9c] sm:$0xf] %v8540_v0 }
  0x27   : > { %332 = vst [vmem:[#allocation2 + $0xa0] sm:$0xf] %v8540_v0  ;;  %333 = vst [vmem:[#allocation2 + $0xa4] sm:$0x1] %v8540_v0 }
  0x28   : > { %334 = vst [vmem:[#allocation2 + $0xa8] sm:$0xf] %v8540_v0  ;;  %335 = vst [vmem:[#allocation2 + $0xac] sm:$0xf] %v8540_v0 }
  0x29   : > { %336 = vst [vmem:[#allocation2 + $0xb0] sm:$0x1] %v8540_v0  ;;  %337 = vst [vmem:[#allocation2 + $0xb4] sm:$0xf] %v8540_v0 }
  0x2a   : > { %338 = vst [vmem:[#allocation2 + $0xb8] sm:$0xf] %v8540_v0  ;;  %339 = vst [vmem:[#allocation2 + $0xbc] sm:$0x1] %v8540_v0 }
  0x2b   : > { %340 = vst [vmem:[#allocation2 + $0xc0] sm:$0xf] %v8540_v0  ;;  %341 = vst [vmem:[#allocation2 + $0xc4] sm:$0xf] %v8540_v0 }
  0x2c   : > { %342 = vst [vmem:[#allocation2 + $0xc8] sm:$0x1] %v8540_v0  ;;  %343 = vst [vmem:[#allocation2 + $0xcc] sm:$0xf] %v8540_v0 }
  0x2d   : > { %344 = vst [vmem:[#allocation2 + $0xd0] sm:$0xf] %v8540_v0  ;;  %345 = vst [vmem:[#allocation2 + $0xd4] sm:$0x1] %v8540_v0 }
  0x2e PF: > { %v8145_v1 = vld [vmem:[%s10682_s1 + $0x78] sm:$0xff]   ;;  %v8147_v3 = vld [vmem:[%s10682_s1 + $0x70] sm:$0xff]   ;;  %v8149_v5 = vld [vmem:[%s10682_s1 + $0x68] sm:$0xff]   ;;  %vm1515_vm0 = vsmask.f32 3328  ;;  %vm2062_vm3 = vcmask 1042432  }
  0x2f   : > { %v8146_v2 = vld [vmem:[%s10682_s1 + $0x38] sm:$0xff]   ;;  %7487 = vmatprep.subr.bf16.mxu0 %v8145_v1  ;;  %v8148_v4 = vld [vmem:[%s10682_s1 + $0x30] sm:$0xff]   ;;  %v8150_v6 = vld [vmem:[%s10682_s1 + $0x28] sm:$0xff]   ;;  %vm1516_vm1 = vsmask.f32 7440  ;;  %vm2063_vm4 = vcmask 1046532  }
  0x30   : > { %7488 = vmatpush3.bf16.msra.mxu0 %v8146_v2  ;;  %v8151_v7 = vld [vmem:[%s10682_s1 + $0x60] sm:$0xff]   ;;  %v8153_v9 = vld [vmem:[%s10682_s1 + $0x58] sm:$0xff]   ;;  %v8155_v11 = vld [vmem:[%s10682_s1 + $0x50] sm:$0xff]   ;;  %vm1286_vm6 = vcmask 1043456   ;;  %vm1287_vm7 = vsmask.f32 7938 }
  0x31   : > { %7489 = vmatprep.subr.bf16.mxu0 %v8147_v3  ;;  %v8152_v8 = vld [vmem:[%s10682_s1 + $0x20] sm:$0xff]   ;;  %v8154_v10 = vld [vmem:[%s10682_s1 + $0x18] sm:$0xff]   ;;  %v347_v13 = vld [vmem:[%s8593_s30 + $0x8] sm:$0xff]  ;;  %vm962_vm9 = vsmask.f32 256  ;;  %vm1293_vm11 = vcmask 1040384  }
  0x32   : > { %v346_v12 = vld [vmem:[%s8593_s30] sm:$0xff]  ;;  %v8156_v15 = vld [vmem:[%s10682_s1 + $0x10] sm:$0xff]   ;;  %v8157_v16 = vld [vmem:[%s10682_s1 + $0x48] sm:$0xff]   ;;  %vm963_vm10 = vsmask.f32 4368 }
  0x33   : > { %v7027_v14 = vcombine.high %v346_v12, %v347_v13  ;;  %v8158_v17 = vld [vmem:[%s10682_s1 + $0x8] sm:$0xff]   ;;  %v8159_v18 = vld [vmem:[%s10682_s1 + $0x40] sm:$0xff]   ;;  %v348_v20 = vld [vmem:[%s8593_s30 + $0x10] sm:$0xff]  ;;  %v7026_v22 = vcombine.low %v346_v12, %v347_v13 }
  0x34   : > { %7490 = vmatpush3.bf16.msra.mxu0 %v8148_v4  ;;  %v8160_v19 = vld [vmem:[%s10682_s1] sm:$0xff]   ;;  %v349_v21 = vld [vmem:[%s8593_s30 + $0x18] sm:$0xff]  ;;  %v351_v25 = vld [vmem:[%s8593_s30 + $0x28] sm:$0xff] }
  0x35   : > { %7491 = vmatprep.subr.bf16.mxu0 %v8149_v5  ;;  %705 = vmatprep.mubr.bf16.mxu0 %v7027_v14  ;;  %v7029_v23 = vcombine.high %v348_v20, %v349_v21  ;;  %v350_v24 = vld [vmem:[%s8593_s30 + $0x20] sm:$0xff]  ;;  %v7028_v26 = vcombine.low %v348_v20, %v349_v21  ;;  %v352_v28 = vld [vmem:[%s8593_s30 + $0x30] sm:$0xff]  ;;  %v353_v29 = vld [vmem:[%s8593_s30 + $0x38] sm:$0xff] }
  0x36   : > { %v7031_v27 = vcombine.high %v350_v24, %v351_v25  ;;  %v7030_v30 = vcombine.low %v350_v24, %v351_v25  ;;  %v7033_v31 = vcombine.high %v352_v28, %v353_v29  ;;  %v354_v32 = vld [vmem:[%s8593_s30 + $0x40] sm:$0xff]  ;;  %v355_v33 = vld [vmem:[%s8593_s30 + $0x48] sm:$0xff]  ;;  %v7032_v34 = vcombine.low %v352_v28, %v353_v29  ;;  %v356_v36 = vld [vmem:[%s8593_s30 + $0x50] sm:$0xff] }
  0x37   : > { %v7035_v35 = vcombine.high %v354_v32, %v355_v33  ;;  %v357_v37 = vld [vmem:[%s8593_s30 + $0x58] sm:$0xff]  ;;  %v7034_v38 = vcombine.low %v354_v32, %v355_v33  ;;  %v358_v40 = vld [vmem:[%s8593_s30 + $0x60] sm:$0xff]  ;;  %v359_v41 = vld [vmem:[%s8593_s30 + $0x68] sm:$0xff] }
  0x38   : > { %7492 = vmatpush3.bf16.msra.mxu0 %v8150_v6  ;;  %v7037_v39 = vcombine.high %v356_v36, %v357_v37  ;;  %v7036_v42 = vcombine.low %v356_v36, %v357_v37  ;;  %v7039_v43 = vcombine.high %v358_v40, %v359_v41  ;;  %v360_v44 = vld [vmem:[%s8593_s30 + $0x70] sm:$0xff]  ;;  %v361_v45 = vld [vmem:[%s8593_s30 + $0x78] sm:$0xff]  ;;  %v7038_v46 = vcombine.low %v358_v40, %v359_v41  ;;  %v362_v48 = vld [vmem:[%s8593_s30 + $0x80] sm:$0xff] }
  0x39   : > { %7493 = vmatprep.subr.bf16.mxu0 %v8151_v7  ;;  %v7041_v47 = vcombine.high %v360_v44, %v361_v45  ;;  %v363_v49 = vld [vmem:[%s8593_s30 + $0x88] sm:$0xff]  ;;  %v7040_v50 = vcombine.low %v360_v44, %v361_v45  ;;  %v364_v52 = vld [vmem:[%s8593_s30 + $0x90] sm:$0xff]  ;;  %v365_v53 = vld [vmem:[%s8593_s30 + $0x98] sm:$0xff] }
  0x3a   : > { %v7043_v51 = vcombine.high %v362_v48, %v363_v49  ;;  %v7042_v54 = vcombine.low %v362_v48, %v363_v49  ;;  %v7045_v55 = vcombine.high %v364_v52, %v365_v53  ;;  %v366_v56 = vld [vmem:[%s8593_s30 + $0xa0] sm:$0xff]  ;;  %v367_v57 = vld [vmem:[%s8593_s30 + $0xa8] sm:$0xff]  ;;  %v7044_v58 = vcombine.low %v364_v52, %v365_v53  ;;  %v8193_v60 = vld [vmem:[%s10684_s3 + $0x78] sm:$0xff]  }
  0x3b   : > { %v7047_v59 = vcombine.high %v366_v56, %v367_v57  ;;  %v8194_v61 = vld [vmem:[%s10684_s3 + $0x38] sm:$0xff]   ;;  %v368_v62 = vld [vmem:[%s8593_s30 + $0xb0] sm:$0xff]  ;;  %8119 = vmatprep.subr.bf16.mxu1 %v8193_v60  ;;  %v7046_v0 = vcombine.low %v366_v56, %v367_v57  ;;  %v8197_v4 = vld [vmem:[%s10684_s3 + $0x68] sm:$0xff]  }
  0x3c   : > { %7494 = vmatpush3.bf16.msra.mxu0 %v8152_v8  ;;  %v369_v63 = vld [vmem:[%s8593_s30 + $0xb8] sm:$0xff]  ;;  %8127 = vmatpush3.bf16.msra.mxu1 %v8194_v61  ;;  %v8195_v1 = vld [vmem:[%s10684_s3 + $0x70] sm:$0xff]   ;;  %v8198_v5 = vld [vmem:[%s10684_s3 + $0x28] sm:$0xff]  }
  0x3d   : > { %7495 = vmatprep.subr.bf16.mxu0 %v8153_v9  ;;  %v7049_v2 = vcombine.high %v368_v62, %v369_v63  ;;  %v8196_v3 = vld [vmem:[%s10684_s3 + $0x30] sm:$0xff]   ;;  %8120 = vmatprep.subr.bf16.mxu1 %v8195_v1  ;;  %v370_v6 = vld [vmem:[%s8593_s30 + $0xc0] sm:$0xff]  ;;  %v371_v7 = vld [vmem:[%s8593_s30 + $0xc8] sm:$0xff]  ;;  %v7048_v8 = vcombine.low %v368_v62, %v369_v63 }
  0x3e   : > { %v8199_v9 = vld [vmem:[%s10684_s3 + $0x60] sm:$0xff]   ;;  %v373_v24 = vld [vmem:[%s8593_s30 + $0xd8] sm:$0xff]  ;;  %v1469_v25 = vld [vmem:[#allocation2 + $0x8] sm:$0x1]  ;;  %v7050_v29 = vcombine.low %v370_v6, %v371_v7 }
  0x3f   : > { %v1467_v12 = vld [vmem:[#allocation2] sm:$0xf]  ;;  %v1468_v13 = vld [vmem:[#allocation2 + $0x4] sm:$0xf]  ;;  %v1538_v28 = vshll.u32 %v1469_v25, 16  ;;  %v8204_v33 = vld [vmem:[%s10684_s3 + $0x10] sm:$0xff]  }
  0x40   : > { %7496 = vmatpush3.bf16.msra.mxu0 %v8154_v10  ;;  %8128 = vmatpush3.bf16.msra.mxu1 %v8196_v3  ;;  %v7051_v10 = vcombine.high %v370_v6, %v371_v7  ;;  %v1519_v14 = vshrl.u32 %v1467_v12, 16  ;;  %v1403_v37 = vld [vmem:[#allocation2] sm:$0xf]  ;;  %vm8712_vm2 = vmor %vm1515_vm0, %vm1516_vm1  ;;  %v8205_v40 = vld [vmem:[%s10684_s3 + $0x48] sm:$0xff]  }
  0x41   : > { %7497 = vmatprep.subr.bf16.mxu0 %v8155_v11  ;;  %8121 = vmatprep.subr.bf16.mxu1 %v8197_v4  ;;  %v8200_v11 = vld [vmem:[%s10684_s3 + $0x20] sm:$0xff]   ;;  %v1540_v36 = vrot.slane %v1538_v28, 5  ;;  %1435 = vst [vmem:[#allocation3] sm:$0xf] %v1403_v37  ;;  %v375_v45 = vld [vmem:[%s8593_s30 + $0xe8] sm:$0xff]  ;;  %v8212_v52 = vld [vmem:[%s10684_s3 + $0xf8] sm:$0xff]  }
  0x42   : > { %v1521_v20 = vrot.slane %v1519_v14, 4  ;;  %v374_v44 = vld [vmem:[%s8593_s30 + $0xe0] sm:$0xff]  ;;  %vm8739_vm5 = vmor %vm2062_vm3, %vm2063_vm4  ;;  %v8215_v6 = vld [vmem:[%s10684_s3 + $0xb0] sm:$0xff]  }
  0x43   : > { %v7055_v48 = vcombine.high %v374_v44, %v375_v45  ;;  %v8208_v49 = vld [vmem:[%s10684_s3] sm:$0xff]   ;;  %v7054_v53 = vcombine.low %v374_v44, %v375_v45  ;;  %v8219_v7 = vld [vmem:[%s10684_s3 + $0xe8] sm:$0xff]   ;;  %v8229_v14 = vld [vmem:[%s10684_s3 + $0x90] sm:$0xff]  }
  0x44   : > { %7498 = vmatpush3.bf16.msra.mxu0 %v8156_v15  ;;  %8129 = vmatpush3.bf16.msra.mxu1 %v8198_v5  ;;  %v1522_v15 = vshll.u32 %v1467_v12, 16  ;;  %v1967_v56 = vld [vmem:[#allocation2 + $0x4] sm:$0xf]  ;;  %v8227_v12 = vld [vmem:[%s10684_s3 + $0x98] sm:$0xff]   ;;  %vm8803_vm8 = vmand %vm1286_vm6, %vm1287_vm7 }
  0x45   : > { %7499 = vmatprep.subr.bf16.mxu0 %v8157_v16  ;;  %8122 = vmatprep.subr.bf16.mxu1 %v8199_v9  ;;  %v1528_v16 = vshll.u32 %v1468_v13, 16  ;;  %vm8809_vm12 = vmor %vm962_vm9, %vm963_vm10 }
  0x46   : > { %v1524_v21 = vrot.slane %v1522_v15, 5  ;;  %v8233_v15 = vld [vmem:[%s10684_s3 + $0xc8] sm:$0xff]   ;;  %vm8813_vm13 = vmand %vm1293_vm11, %vm962_vm9 }
  0x48   : > { %7500 = vmatpush3.bf16.msra.mxu0 %v8158_v17  ;;  %v1532_v17 = vshrl.u32 %v1468_v13, 16  ;;  %8130 = vmatpush3.bf16.msra.mxu1 %v8200_v11  ;;  %v8228_v13 = vld [vmem:[%s10684_s3 + $0xd0] sm:$0xff]  }
  0x49   : > { %7501 = vmatprep.subr.bf16.mxu0 %v8159_v18  ;;  %v8201_v18 = vld [vmem:[%s10684_s3 + $0x58] sm:$0xff]  }
  0x4a   : > { %8123 = vmatprep.subr.bf16.mxu1 %v8201_v18 }
  0x4c   : > { %7502 = vmatpush3.bf16.msra.mxu0 %v8160_v19  ;;  %v8202_v19 = vld [vmem:[%s10684_s3 + $0x18] sm:$0xff]  }
  0x4d   : > { %7599 = vmatprep.subr.bf16.mxu0 %v8193_v60  ;;  %8131 = vmatpush3.bf16.msra.mxu1 %v8202_v19 }
  0x4f   : > { %706 = vmatmul.mubr.bf16.vlgmr.msra.gmra.mxu0 %v7026_v22  ;;  %v1530_v22 = vrot.slane %v1528_v16, 5  ;;  %v8234_v16 = vld [vmem:[%s10684_s3 + $0x88] sm:$0xff]  }
  0x50   : > { %713 = vmatprep.mubr.bf16.mxu0 %v7029_v23  ;;  %7600 = vmatpush3.bf16.msra.mxu0 %v8194_v61  ;;  %v372_v23 = vld [vmem:[%s8593_s30 + $0xd0] sm:$0xff]  ;;  %v1968_v61 = vld [vmem:[#allocation2 + $0x8] sm:$0x1] }
  0x51   : > { %7601 = vmatprep.subr.bf16.mxu0 %v8195_v1  ;;  %v7053_v32 = vcombine.high %v372_v23, %v373_v24  ;;  %v2070_v63 = vrot.slane %v1968_v61, 5 }
  0x54   : > { %7602 = vmatpush3.bf16.msra.mxu0 %v8196_v3 }
  0x55   : > { %7603 = vmatprep.subr.bf16.mxu0 %v8197_v4  ;;  %v8213_v4 = vld [vmem:[%s10684_s3 + $0xb8] sm:$0xff]  }
  0x57   : > { %714 = vmatmul.mubr.bf16.gmra.mxu0 %v7028_v26  ;;  %v1534_v26 = vrot.slane %v1532_v17, 4  ;;  %v8238_v17 = vld [vmem:[%s10684_s3 + $0xc0] sm:$0xff]  }
  0x58   : > { %721 = vmatprep.mubr.bf16.mxu0 %v7031_v27  ;;  %7604 = vmatpush3.bf16.msra.mxu0 %v8198_v5  ;;  %v1525_v27 = vor.u32 %v1524_v21, %v1521_v20  ;;  %v8214_v5 = vld [vmem:[%s10684_s3 + $0xf0] sm:$0xff]   ;;  %v8798_v21 = vld [vmem:[%s10683_s2] ss:$0 sm:$0xff] }
  0x59   : > { %7605 = vmatprep.subr.bf16.mxu0 %v8199_v9  ;;  %v8221_v9 = vld [vmem:[%s10684_s3 + $0xe0] sm:$0xff]  }
  0x5c   : > { %7606 = vmatpush3.bf16.msra.mxu0 %v8200_v11  ;;  %v8226_v11 = vld [vmem:[%s10684_s3 + $0xd8] sm:$0xff]  }
  0x5d   : > { %7607 = vmatprep.subr.bf16.mxu0 %v8201_v18  ;;  %v8239_v18 = vld [vmem:[%s10684_s3 + $0x80] sm:$0xff]  }
  0x5f   : > { %722 = vmatmul.mubr.bf16.gmra.mxu0 %v7030_v30  ;;  %v8203_v30 = vld [vmem:[%s10684_s3 + $0x50] sm:$0xff]  }
  0x60   : > { %729 = vmatprep.mubr.bf16.mxu0 %v7033_v31  ;;  %7608 = vmatpush3.bf16.msra.mxu0 %v8202_v19  ;;  %v1535_v31 = vor.u32 %v1534_v26, %v1530_v22  ;;  %v8243_v19 = vld [vmem:[%s10684_s3 + $0x178] sm:$0xff]  }
  0x61   : > { %7609 = vmatprep.subr.bf16.mxu0 %v8203_v30  ;;  %8124 = vmatprep.subr.bf16.mxu1 %v8203_v30 }
  0x62   : > { %8132 = vmatpush3.bf16.msra.mxu1 %v8204_v33 }
  0x63   : > { %8125 = vmatprep.subr.bf16.mxu1 %v8205_v40 }
  0x64   : > { %7610 = vmatpush3.bf16.msra.mxu0 %v8204_v33 }
  0x65   : > { %7611 = vmatprep.subr.bf16.mxu0 %v8205_v40 }
  0x67   : > { %730 = vmatmul.mubr.bf16.gmra.mxu0 %v7032_v34  ;;  %v1526_v34 = vrot.slane %v1525_v27, 4 }
  0x68   : > { %737 = vmatprep.mubr.bf16.mxu0 %v7035_v35  ;;  %v1536_v35 = vrot.slane %v1535_v31, 4 }
  0x69   : > { %v1531_v41 = vsel %vm8712_vm2, %v1526_v34, %v1530_v22 }
  0x6a   : > { %1934 = vst [vmem:[#allocation3 + $0x4] sm:$0xf] %v1531_v41 }
  0x6f   : > { %738 = vmatmul.mubr.bf16.gmra.mxu0 %v7034_v38  ;;  %v1404_v38 = vld [vmem:[#allocation2 + $0x4] sm:$0xf] }
  0x70   : > { %745 = vmatprep.mubr.bf16.mxu0 %v7037_v39  ;;  %1436 = vst [vmem:[#allocation3 + $0x24] sm:$0xf] %v1404_v38 }
  0x77   : > { %746 = vmatmul.mubr.bf16.gmra.mxu0 %v7036_v42  ;;  %v1541_v42 = vsel %vm8712_vm2, %v1536_v35, %v1540_v36  ;;  %v8209_v3 = vld [vmem:[#allocation3] ss:$36 sps:$4 sm:$0xff]  }
  0x78   : > { %753 = vmatprep.mubr.bf16.mxu0 %v7039_v43  ;;  %v8206_v43 = vld [vmem:[%s10684_s3 + $0x8] sm:$0xff]   ;;  %1935 = vst [vmem:[#allocation3 + $0x28] sm:$0xf] %v1541_v42 }
  0x79   : > { %7612 = vmatpush3.bf16.msra.mxu0 %v8206_v43  ;;  %8133 = vmatpush3.bf16.msra.mxu1 %v8206_v43  ;;  %v1289_v43 = vld [vmem:[#allocation2 + $0xc] sm:$0xf] }
  0x7f   : > { %754 = vmatmul.mubr.bf16.gmra.mxu0 %v7038_v46  ;;  %v7052_v46 = vcombine.low %v372_v23, %v373_v24 }
  0x80   : > { %761 = vmatprep.mubr.bf16.mxu0 %v7041_v47  ;;  %v8207_v47 = vld [vmem:[%s10684_s3 + $0x40] sm:$0xff]  }
  0x81   : > { %7613 = vmatprep.subr.bf16.mxu0 %v8207_v47  ;;  %8126 = vmatprep.subr.bf16.mxu1 %v8207_v47 }
  0x82   : > { %7614 = vmatpush3.bf16.msra.mxu0 %v8208_v49  ;;  %8134 = vmatpush3.bf16.msra.mxu1 %v8208_v49 }
  0x83   : > { %7711 = vmatprep.subr.bf16.mxu0 %v8212_v52  ;;  %7823 = vmatprep.subr.bf16.mxu1 %v8243_v19 }
  0x87   : > { %762 = vmatmul.mubr.bf16.gmra.mxu0 %v7040_v50  ;;  %v376_v50 = vld [vmem:[%s8593_s30 + $0xf0] sm:$0xff] }
  0x88   : > { %769 = vmatprep.mubr.bf16.mxu0 %v7043_v51  ;;  %v377_v51 = vld [vmem:[%s8593_s30 + $0xf8] sm:$0xff] }
  0x89   : > { %v7057_v57 = vcombine.high %v376_v50, %v377_v51  ;;  %v7056_v1 = vcombine.low %v376_v50, %v377_v51 }
  0x8f   : > { %770 = vmatmul.mubr.bf16.gmra.mxu0 %v7042_v54 }
  0x90   : > { %777 = vmatprep.mubr.bf16.mxu0 %v7045_v55  ;;  %v1966_v55 = vld [vmem:[#allocation2] sm:$0xe] }
  0x97   : > { %778 = vmatmul.mubr.bf16.gmra.mxu0 %v7044_v58  ;;  %v7106_v58 = vrot.slane %v1966_v55, 9 }
  0x98   : > { %785 = vmatprep.mubr.bf16.mxu0 %v7047_v59  ;;  %v2067_v59 = vrot.slane %v1967_v56, 5  ;;  %v1295_v56 = vld [vmem:[#allocation2 + $0x14] sm:$0x1] }
  0x9a   : > { %v2068_v60 = vsel %vm8739_vm5, %v7106_v58, %v2067_v59  ;;  %v2069_v62 = vrot.slane %v2067_v59, 4 }
  0x9b   : > { %2209 = vst [vmem:[#allocation3 + $0x8] sm:$0xf] %v2068_v60 }
  0x9f   : > { %786 = vmatmul.mubr.bf16.gmra.mxu0 %v7046_v0  ;;  %v2071_v0 = vsel %vm8739_vm5, %v2069_v62, %v2070_v63 }
  0xa0   : > { %793 = vmatprep.mubr.bf16.mxu0 %v7049_v2  ;;  %2210 = vst [vmem:[#allocation3 + $0x2c] sm:$0xf] %v2071_v0  ;;  %v8211_v2 = vld [vmem:[#allocation3 + $0x4] ss:$36 sps:$4 sm:$0xff]  }
  0xa7   : > { %794 = vmatmul.mubr.bf16.gmra.mxu0 %v7048_v8  ;;  %v8220_v8 = vld [vmem:[%s10684_s3 + $0xa8] sm:$0xff]  }
  0xa8   : > { %801 = vmatprep.mubr.bf16.mxu0 %v7051_v10  ;;  %v8222_v10 = vld [vmem:[%s10684_s3 + $0xa0] sm:$0xff]  }
  0xaf   : > { %802 = vmatmul.mubr.bf16.gmra.mxu0 %v7050_v29 }
  0xb0   : > { %809 = vmatprep.mubr.bf16.mxu0 %v7053_v32 }
  0xb7   : > { %810 = vmatmul.mubr.bf16.gmra.mxu0 %v7052_v46 }
  0xb8   : > { %817 = vmatprep.mubr.bf16.mxu0 %v7055_v48 }
  0xbf   : > { %818 = vmatmul.mubr.bf16.gmra.mxu0 %v7054_v53 }
  0xc0   : > { %825 = vmatprep.mubr.bf16.mxu0 %v7057_v57 }
  0xc7   : > { %826 = vmatmul.mubr.bf16.gmra.mxu0 %v7056_v1 }
  0xc8   : > { %5417 = vmatprep.mubr.bf16.mxu0 %v8211_v2 }
  0xcf   : > { %5418 = vmatmul.mubr.bf16.vlgmr.msra.gmra.mxu0 %v8209_v3 }
  0xd0   : > { %7712 = vmatpush3.bf16.msra.mxu0 %v8213_v4 }
  0xd1   : > { %7713 = vmatprep.subr.bf16.mxu0 %v8214_v5 }
  0xd4   : > { %7714 = vmatpush3.bf16.msra.mxu0 %v8215_v6 }
  0xd5   : > { %7715 = vmatprep.subr.bf16.mxu0 %v8219_v7 }
  0xd8   : > { %7716 = vmatpush3.bf16.msra.mxu0 %v8220_v8 }
  0xd9   : > { %7717 = vmatprep.subr.bf16.mxu0 %v8221_v9 }
  0xdc   : > { %7718 = vmatpush3.bf16.msra.mxu0 %v8222_v10  ;;  %v1298_v10 = vld [vmem:[#allocation2 + $0x18] sm:$0xf] }
  0xdd   : > { %7719 = vmatprep.subr.bf16.mxu0 %v8226_v11 }
  0xe0   : > { %7720 = vmatpush3.bf16.msra.mxu0 %v8227_v12 }
  0xe1   : > { %7721 = vmatprep.subr.bf16.mxu0 %v8228_v13 }
  0xe4   : > { %7722 = vmatpush3.bf16.msra.mxu0 %v8229_v14 }
  0xe5   : > { %7723 = vmatprep.subr.bf16.mxu0 %v8233_v15 }
  0xe8   : > { %7724 = vmatpush3.bf16.msra.mxu0 %v8234_v16 }
  0xe9   : > { %7725 = vmatprep.subr.bf16.mxu0 %v8238_v17 }
  0xec   : > { %7726 = vmatpush3.bf16.msra.mxu0 %v8239_v18 }
 0x10f   : > { %v7503_v20 = vpop.f32.mrf.mxu0 }
 0x111   : > { %v7504_v22 = vpop.f32.mrf.mxu0 }
 0x112   : > { %v7505_v23 = vadd.f32 %v7504_v22, %v7503_v20 }
 0x113   : > { %v7506_v24 = vpop.f32.mrf.mxu0 }
 0x114   : > { %v708_v25 = vadd.f32 %v7505_v23, %v8798_v21 }
 0x115   : > { %v7507_v26 = vpop.f32.mrf.mxu0 }
 0x116   : > { %v834_v27 = vmax.f32 %v708_v25, 0.0  ;;  %v7508_v28 = vadd.f32 %v7507_v26, %v7506_v24 }
 0x117   : > { %v7509_v29 = vpop.f32.mrf.mxu0 }
 0x118   : > { %v7423_v30 = vpack.c.bf16 %v834_v27, %v834_v27  ;;  %v711_v31 = vadd.f32 %v7508_v28, %v8798_v21 }
 0x119   : > { %v7510_v32 = vpop.f32.mrf.mxu0 }
 0x11a   : > { %v966_v33 = vshrl.u32 %v7423_v30, 16  ;;  %v835_v34 = vmax.f32 %v711_v31, 0.0  ;;  %v7511_v35 = vadd.f32 %v7510_v32, %v7509_v29  ;;  %v969_v38 = vshll.u32 %v7423_v30, 16  ;;  %v1302_v29 = vld [vmem:[#allocation2 + $0x20] sm:$0x1] }
 0x11b   : > { %v7512_v36 = vpop.f32.mrf.mxu0 }
 0x11c   : > { %v968_v37 = vrot.slane %v966_v33, 7  ;;  %v7424_v40 = vpack.c.bf16 %v835_v34, %v835_v34  ;;  %v716_v41 = vadd.f32 %v7511_v35, %v8798_v21 }
 0x11d   : > { %v7513_v44 = vpop.f32.mrf.mxu0 }
 0x11e   : > { %v971_v45 = vor.u32 %v969_v38, %v968_v37  ;;  %v974_v46 = vshrl.u32 %v7424_v40, 16  ;;  %v836_v47 = vmax.f32 %v716_v41, 0.0  ;;  %v7514_v48 = vadd.f32 %v7513_v44, %v7512_v36 }
 0x11f   : > { %v7515_v49 = vpop.f32.mrf.mxu0  ;;  %v977_v53 = vshll.u32 %v7424_v40, 16  ;;  %v972_v60 = vrot.slane %v968_v37, 4 }
 0x120   : > { %v1290_v50 = vsel %vm8803_vm8, %v971_v45, %v1289_v43  ;;  %v976_v52 = vrot.slane %v974_v46, 7  ;;  %v7425_v57 = vpack.c.bf16 %v836_v47, %v836_v47  ;;  %v719_v58 = vadd.f32 %v7514_v48, %v8798_v21  ;;  %v1305_v48 = vld [vmem:[#allocation2 + $0x24] sm:$0xf] }
 0x121   : > { %1291 = vst [vmem:[#allocation2 + $0xc] sm:$0xf] %v1290_v50  ;;  %v7516_v59 = vpop.f32.mrf.mxu0 }
 0x122   : > { %v979_v61 = vor.u32 %v977_v53, %v976_v52  ;;  %v981_v62 = vrot.slane %v976_v52, 4  ;;  %v7517_v63 = vadd.f32 %v7516_v59, %v7515_v49  ;;  %v983_v0 = vshrl.u32 %v7425_v57, 16 }
 0x123   : > { %v837_v1 = vmax.f32 %v719_v58, 0.0  ;;  %v7518_v2 = vpop.f32.mrf.mxu0  ;;  %v986_v7 = vshll.u32 %v7425_v57, 16 }
 0x124   : > { %v980_v3 = vsel %vm8809_vm12, %v972_v60, %v979_v61  ;;  %v1296_v4 = vsel %vm8813_vm13, %v981_v62, %v1295_v56  ;;  %v724_v5 = vadd.f32 %v7517_v63, %v8798_v21  ;;  %v985_v6 = vrot.slane %v983_v0, 7 }
 0x125   : > { %1292 = vst [vmem:[#allocation2 + $0x10] sm:$0xf] %v980_v3  ;;  %1297 = vst [vmem:[#allocation2 + $0x14] sm:$0x1] %v1296_v4  ;;  %v7426_v8 = vpack.c.bf16 %v837_v1, %v837_v1  ;;  %v7519_v9 = vpop.f32.mrf.mxu0 }
 0x126   : > { %v838_v11 = vmax.f32 %v724_v5, 0.0  ;;  %v7520_v12 = vadd.f32 %v7519_v9, %v7518_v2  ;;  %v988_v13 = vor.u32 %v986_v7, %v985_v6  ;;  %v989_v28 = vrot.slane %v985_v6, 4  ;;  %v1309_v6 = vld [vmem:[#allocation2 + $0x2c] sm:$0x1] }
 0x127   : > { %v991_v14 = vshrl.u32 %v7426_v8, 16  ;;  %v7521_v15 = vpop.f32.mrf.mxu0  ;;  %v994_v17 = vshll.u32 %v7426_v8, 16 }
 0x128   : > { %v1470_v16 = vld [vmem:[#allocation2 + $0xc] sm:$0xf]  ;;  %v7427_v18 = vpack.c.bf16 %v838_v11, %v838_v11  ;;  %v727_v19 = vadd.f32 %v7520_v12, %v8798_v21  ;;  %v1299_v22 = vsel %vm8803_vm8, %v988_v13, %v1298_v10 }
 0x129   : > { %v1405_v20 = vld [vmem:[#allocation2 + $0xc] sm:$0xf]  ;;  %v993_v23 = vrot.slane %v991_v14, 7  ;;  %v7522_v24 = vpop.f32.mrf.mxu0  ;;  %v1543_v25 = vshrl.u32 %v1470_v16, 16  ;;  %v1546_v26 = vshll.u32 %v1470_v16, 16 }
 0x12a   : > { %1437 = vst [vmem:[#allocation3 + $0x48] sm:$0xf] %v1405_v20  ;;  %v2241_v27 = vld [vmem:[#allocation2 + $0xc] sm:$0xf]  ;;  %1300 = vst [vmem:[#allocation2 + $0x18] sm:$0xf] %v1299_v22  ;;  %v7523_v32 = vadd.f32 %v7522_v24, %v7521_v15 }
 0x12b   : > { %v1000_v30 = vshrl.u32 %v7427_v18, 16  ;;  %v839_v31 = vmax.f32 %v727_v19, 0.0  ;;  %2273 = vst [vmem:[#allocation3 + $0xc] sm:$0xf] %v2241_v27  ;;  %v996_v33 = vor.u32 %v994_v17, %v993_v23  ;;  %v998_v34 = vrot.slane %v993_v23, 4  ;;  %v7524_v35 = vpop.f32.mrf.mxu0 }
 0x12c   : > { %v1545_v36 = vrot.slane %v1543_v25, 4  ;;  %v1548_v37 = vrot.slane %v1546_v26, 5  ;;  %v1003_v40 = vshll.u32 %v7427_v18, 16  ;;  %v732_v43 = vadd.f32 %v7523_v32, %v8798_v21  ;;  %v1406_v44 = vld [vmem:[#allocation2 + $0x10] sm:$0xf] }
 0x12d   : > { %v1002_v38 = vrot.slane %v1000_v30, 7  ;;  %v7428_v41 = vpack.c.bf16 %v839_v31, %v839_v31  ;;  %v1471_v45 = vld [vmem:[#allocation2 + $0x10] sm:$0xf]  ;;  %v997_v46 = vsel %vm8809_vm12, %v989_v28, %v996_v33  ;;  %v1303_v47 = vsel %vm8813_vm13, %v998_v34, %v1302_v29  ;;  %v7525_v49 = vpop.f32.mrf.mxu0  ;;  %1438 = vst [vmem:[#allocation3 + $0x6c] sm:$0xf] %v1406_v44 }
 0x12e   : > { %v1549_v50 = vor.u32 %v1548_v37, %v1545_v36  ;;  %v1552_v52 = vshll.u32 %v1471_v45, 16  ;;  %v2242_v53 = vld [vmem:[#allocation2 + $0x10] sm:$0xf]  ;;  %1301 = vst [vmem:[#allocation2 + $0x1c] sm:$0xf] %v997_v46  ;;  %v840_v60 = vmax.f32 %v732_v43, 0.0  ;;  %v7526_v61 = vadd.f32 %v7525_v49, %v7524_v35 }
 0x12f   : > { %1304 = vst [vmem:[#allocation2 + $0x20] sm:$0x1] %v1303_v47  ;;  %v1005_v56 = vor.u32 %v1003_v40, %v1002_v38  ;;  %v1006_v57 = vrot.slane %v1002_v38, 4  ;;  %v1008_v58 = vshrl.u32 %v7428_v41, 16  ;;  %v1472_v59 = vld [vmem:[#allocation2 + $0x14] sm:$0x1]  ;;  %v7527_v62 = vpop.f32.mrf.mxu0 }
 0x130   : > { %2274 = vst [vmem:[#allocation3 + $0x30] sm:$0xf] %v2242_v53  ;;  %v1550_v63 = vrot.slane %v1549_v50, 4  ;;  %v1554_v0 = vrot.slane %v1552_v52, 5  ;;  %v1011_v3 = vshll.u32 %v7428_v41, 16  ;;  %v1556_v4 = vshrl.u32 %v1471_v45, 16 }
 0x131   : > { %v1306_v1 = vsel %vm8803_vm8, %v1005_v56, %v1305_v48  ;;  %v1010_v2 = vrot.slane %v1008_v58, 7  ;;  %v1473_v5 = vld [vmem:[#allocation2 + $0x18] sm:$0xf]  ;;  %v7429_v7 = vpack.c.bf16 %v840_v60, %v840_v60  ;;  %v735_v8 = vadd.f32 %v7526_v61, %v8798_v21  ;;  %v7528_v9 = vpop.f32.mrf.mxu0  ;;  %v1312_v33 = vld [vmem:[#allocation2 + $0x30] sm:$0xf] }
 0x132   : > { %1307 = vst [vmem:[#allocation2 + $0x24] sm:$0xf] %v1306_v1  ;;  %v1555_v10 = vsel %vm8712_vm2, %v1550_v63, %v1554_v0  ;;  %v1562_v11 = vshll.u32 %v1472_v59, 16  ;;  %v7529_v14 = vadd.f32 %v7528_v9, %v7527_v62  ;;  %v1558_v15 = vrot.slane %v1556_v4, 4  ;;  %v1407_v16 = vld [vmem:[#allocation2 + $0x18] sm:$0xf] }
 0x133   : > { %v1013_v12 = vor.u32 %v1011_v3, %v1010_v2  ;;  %v1015_v13 = vrot.slane %v1010_v2, 4  ;;  %1936 = vst [vmem:[#allocation3 + $0x4c] sm:$0xf] %v1555_v10  ;;  %v1017_v17 = vshrl.u32 %v7429_v7, 16  ;;  %v1020_v18 = vshll.u32 %v7429_v7, 16  ;;  %v7530_v20 = vpop.f32.mrf.mxu0 }
 0x134   : > { %v841_v19 = vmax.f32 %v735_v8, 0.0  ;;  %1439 = vst [vmem:[#allocation3 + $0x90] sm:$0xf] %v1407_v16  ;;  %v2243_v22 = vld [vmem:[#allocation2 + $0x18] sm:$0xf]  ;;  %v740_v25 = vadd.f32 %v7529_v14, %v8798_v21  ;;  %v1559_v26 = vor.u32 %v1558_v15, %v1554_v0  ;;  %v1564_v30 = vrot.slane %v1562_v11, 5 }
 0x135   : > { %v1014_v23 = vsel %vm8809_vm12, %v1006_v57, %v1013_v12  ;;  %v1310_v24 = vsel %vm8813_vm13, %v1015_v13, %v1309_v6  ;;  %2275 = vst [vmem:[#allocation3 + $0x54] sm:$0xf] %v2243_v22  ;;  %v1019_v27 = vrot.slane %v1017_v17, 7  ;;  %v7531_v29 = vpop.f32.mrf.mxu0  ;;  %v1408_v31 = vld [vmem:[#allocation2 + $0x1c] sm:$0xf]  ;;  %v1567_v32 = vshrl.u32 %v1473_v5, 16 }
 0x136   : > { %1308 = vst [vmem:[#allocation2 + $0x28] sm:$0xf] %v1014_v23  ;;  %1311 = vst [vmem:[#allocation2 + $0x2c] sm:$0x1] %v1310_v24  ;;  %v7430_v28 = vpack.c.bf16 %v841_v19, %v841_v19  ;;  %v842_v34 = vmax.f32 %v740_v25, 0.0  ;;  %v7532_v35 = vadd.f32 %v7531_v29, %v7530_v20  ;;  %v1560_v36 = vrot.slane %v1559_v26, 4 }
 0x137   : > { %1440 = vst [vmem:[#allocation3 + $0xb4] sm:$0xf] %v1408_v31  ;;  %v1570_v37 = vshll.u32 %v1473_v5, 16  ;;  %v1022_v38 = vor.u32 %v1020_v18, %v1019_v27  ;;  %v7533_v41 = vpop.f32.mrf.mxu0  ;;  %v1569_v52 = vrot.slane %v1567_v32, 4  ;;  %v1316_v56 = vld [vmem:[#allocation2 + $0x38] sm:$0x1] }
 0x138   : > { %v1025_v40 = vshrl.u32 %v7430_v28, 16  ;;  %v1028_v43 = vshll.u32 %v7430_v28, 16  ;;  %v7431_v44 = vpack.c.bf16 %v842_v34, %v842_v34  ;;  %v743_v45 = vadd.f32 %v7532_v35, %v8798_v21  ;;  %v8846_v1 = vld [vmem:[#allocation2 + $0x1c] sm:$0xf]  ;;  %v1475_v24 = vld [vmem:[#allocation2 + $0x20] sm:$0x1] }
 0x139   : > { %v1565_v46 = vsel %vm8712_vm2, %v1560_v36, %v1564_v30  ;;  %v3637_v47 = vld [vmem:[#allocation2 + $0x24] sm:$0xe]  ;;  %v1313_v48 = vsel %vm8803_vm8, %v1022_v38, %v1312_v33  ;;  %v7534_v50 = vpop.f32.mrf.mxu0  ;;  %v1572_v53 = vrot.slane %v1570_v37, 5  ;;  %v1023_v60 = vrot.slane %v1019_v27, 4  ;;  %v2244_v2 = vld [vmem:[#allocation2 + $0x1c] sm:$0xf] }
 0x13a   : > { %v1027_v49 = vrot.slane %v1025_v40, 7  ;;  %1937 = vst [vmem:[#allocation3 + $0x70] sm:$0xf] %v1565_v46  ;;  %1314 = vst [vmem:[#allocation2 + $0x30] sm:$0xf] %v1313_v48  ;;  %v1034_v57 = vshrl.u32 %v7431_v44, 16  ;;  %v7535_v63 = vadd.f32 %v7534_v50, %v7533_v41 }
 0x13b   : > { %v843_v58 = vmax.f32 %v743_v45, 0.0  ;;  %v1409_v59 = vld [vmem:[#allocation2 + $0x24] sm:$0xf]  ;;  %v7536_v0 = vpop.f32.mrf.mxu0  ;;  %v7139_v3 = vrot.slane %v3637_v47, 9  ;;  %v1037_v6 = vshll.u32 %v7431_v44, 16  ;;  %v1573_v13 = vor.u32 %v1572_v53, %v1569_v52 }
 0x13c   : > { %v1030_v61 = vor.u32 %v1028_v43, %v1027_v49  ;;  %v1032_v62 = vrot.slane %v1027_v49, 4  ;;  %1441 = vst [vmem:[#allocation3 + $0xd8] sm:$0xf] %v1409_v59  ;;  %v1036_v5 = vrot.slane %v1034_v57, 7  ;;  %2276 = vst [vmem:[#allocation3 + $0x78] sm:$0xf] %v2244_v2  ;;  %v748_v20 = vadd.f32 %v7535_v63, %v8798_v21 }
 0x13d   : > { %v8848_v4 = vld [vmem:[#allocation2 + $0x28] sm:$0xf]  ;;  %v7432_v7 = vpack.c.bf16 %v843_v58, %v843_v58  ;;  %v1319_v11 = vld [vmem:[#allocation2 + $0x3c] sm:$0xf]  ;;  %v7537_v12 = vpop.f32.mrf.mxu0  ;;  %v1576_v17 = vshll.u32 %v8846_v1, 16  ;;  %v1574_v34 = vrot.slane %v1573_v13, 4 }
 0x13e   : > { %v3739_v8 = vrot.slane %v8848_v4, 5  ;;  %v1031_v9 = vsel %vm8809_vm12, %v1023_v60, %v1030_v61  ;;  %v1317_v10 = vsel %vm8813_vm13, %v1032_v62, %v1316_v56  ;;  %v1410_v14 = vld [vmem:[#allocation2 + $0x28] sm:$0xf]  ;;  %v1039_v15 = vor.u32 %v1037_v6, %v1036_v5  ;;  %v8218_v28 = vld [vmem:[#allocation3 + $0x48] ss:$36 sps:$4 sm:$0xff]  }
 0x13f   : > { %1315 = vst [vmem:[#allocation2 + $0x34] sm:$0xf] %v1031_v9  ;;  %1318 = vst [vmem:[#allocation2 + $0x38] sm:$0x1] %v1317_v10  ;;  %v1042_v16 = vshrl.u32 %v7432_v7, 16  ;;  %v1045_v19 = vshll.u32 %v7432_v7, 16  ;;  %v7538_v22 = vadd.f32 %v7537_v12, %v7536_v0  ;;  %v7539_v23 = vpop.f32.mrf.mxu0 }
 0x140   : > { %1442 = vst [vmem:[#allocation3 + $0xfc] sm:$0xf] %v1410_v14  ;;  %v3740_v18 = vsel %vm8739_vm5, %v7139_v3, %v3739_v8  ;;  %v1320_v25 = vsel %vm8803_vm8, %v1039_v15, %v1319_v11  ;;  %v1040_v29 = vrot.slane %v1036_v5, 4  ;;  %v1323_v30 = vld [vmem:[#allocation2 + $0x44] sm:$0x1]  ;;  %v844_v31 = vmax.f32 %v748_v20, 0.0 }
 0x141   : > { %3876 = vst [vmem:[#allocation3 + $0x68] sm:$0xf] %v3740_v18  ;;  %v1044_v26 = vrot.slane %v1042_v16, 7  ;;  %v8216_v27 = vld [vmem:[#allocation3 + $0x4c] ss:$36 sps:$4 sm:$0xff]   ;;  %v751_v32 = vadd.f32 %v7538_v22, %v8798_v21  ;;  %v7540_v33 = vpop.f32.mrf.mxu0  ;;  %v1578_v38 = vrot.slane %v1576_v17, 5 }
 0x142   : > { %1321 = vst [vmem:[#allocation2 + $0x3c] sm:$0xf] %v1320_v25  ;;  %5425 = vmatprep.mubr.bf16.mxu0 %v8216_v27  ;;  %v7541_v37 = vadd.f32 %v7540_v33, %v7539_v23  ;;  %v1411_v40 = vld [vmem:[#allocation2 + $0x30] sm:$0xf]  ;;  %v7433_v41 = vpack.c.bf16 %v844_v31, %v844_v31  ;;  %v1580_v45 = vshrl.u32 %v8846_v1, 16  ;;  %v1586_v46 = vshll.u32 %v1475_v24, 16 }
 0x143   : > { %v1047_v35 = vor.u32 %v1045_v19, %v1044_v26  ;;  %v1049_v36 = vrot.slane %v1044_v26, 4  ;;  %v845_v43 = vmax.f32 %v751_v32, 0.0  ;;  %5426 = vmatmul.mubr.bf16.gmra.mxu0 %v8218_v28  ;;  %v7542_v44 = vpop.f32.mrf.mxu0  ;;  %1443 = vst [vmem:[#allocation3 + $0x120] sm:$0xf] %v1411_v40  ;;  %v2245_v47 = vld [vmem:[#allocation2 + $0x24] sm:$0xf]  ;;  %v1579_v52 = vsel %vm8712_vm2, %v1574_v34, %v1578_v38 }
 0x144   : > { %v756_v50 = vadd.f32 %v7541_v37, %v8798_v21  ;;  %v2246_v53 = vld [vmem:[#allocation2 + $0x28] sm:$0xf]  ;;  %2277 = vst [vmem:[#allocation3 + $0x9c] sm:$0xf] %v2245_v47  ;;  %v8872_v56 = vld [vmem:[#allocation2 + $0x24] sm:$0xf] }
 0x145   : > { %v1048_v48 = vsel %vm8809_vm12, %v1040_v29, %v1047_v35  ;;  %v1324_v49 = vsel %vm8813_vm13, %v1049_v36, %v1323_v30  ;;  %v1051_v57 = vshrl.u32 %v7433_v41, 16  ;;  %v7434_v58 = vpack.c.bf16 %v845_v43, %v845_v43  ;;  %v7543_v59 = vpop.f32.mrf.mxu0  ;;  %1938 = vst [vmem:[#allocation3 + $0x94] sm:$0xf] %v1579_v52  ;;  %2278 = vst [vmem:[#allocation3 + $0xc0] sm:$0xf] %v2246_v53 }
 0x146   : > { %1322 = vst [vmem:[#allocation2 + $0x40] sm:$0xf] %v1048_v48  ;;  %1325 = vst [vmem:[#allocation2 + $0x44] sm:$0x1] %v1324_v49  ;;  %v1582_v60 = vrot.slane %v1580_v45, 4  ;;  %v1054_v62 = vshll.u32 %v7433_v41, 16  ;;  %v7544_v0 = vadd.f32 %v7543_v59, %v7542_v44 }
 0x147   : > { %v1412_v61 = vld [vmem:[#allocation2 + $0x34] sm:$0xf]  ;;  %v846_v63 = vmax.f32 %v756_v50, 0.0  ;;  %v1053_v1 = vrot.slane %v1051_v57, 7  ;;  %v1059_v2 = vshrl.u32 %v7434_v58, 16  ;;  %v7545_v3 = vpop.f32.mrf.mxu0  ;;  %v1588_v6 = vrot.slane %v1586_v46, 5 }
 0x148   : > { %1444 = vst [vmem:[#allocation3 + $0x144] sm:$0xf] %v1412_v61  ;;  %v1583_v5 = vor.u32 %v1582_v60, %v1578_v38  ;;  %v1326_v7 = vld [vmem:[#allocation2 + $0x48] sm:$0xf]  ;;  %v1062_v9 = vshll.u32 %v7434_v58, 16  ;;  %v759_v12 = vadd.f32 %v7544_v0, %v8798_v21  ;;  %v1591_v13 = vshrl.u32 %v8872_v56, 16 }
 0x149   : > { %v1330_v10 = vld [vmem:[#allocation2 + $0x50] sm:$0x1]  ;;  %v7435_v11 = vpack.c.bf16 %v846_v63, %v846_v63  ;;  %v1056_v14 = vor.u32 %v1054_v62, %v1053_v1  ;;  %v1057_v15 = vrot.slane %v1053_v1, 4  ;;  %v1061_v16 = vrot.slane %v1059_v2, 7  ;;  %v7546_v18 = vpop.f32.mrf.mxu0  ;;  %v1477_v19 = vld [vmem:[#allocation2 + $0x28] sm:$0xf] }
 0x14a   : > { %v1584_v17 = vrot.slane %v1583_v5, 4  ;;  %v847_v23 = vmax.f32 %v759_v12, 0.0  ;;  %v7547_v24 = vadd.f32 %v7546_v18, %v7545_v3  ;;  %v1413_v25 = vld [vmem:[#allocation2 + $0x3c] sm:$0xf]  ;;  %v2247_v31 = vld [vmem:[#allocation2 + $0x30] sm:$0xf] }
 0x14b   : > { %v1068_v20 = vshrl.u32 %v7435_v11, 16  ;;  %v1071_v22 = vshll.u32 %v7435_v11, 16  ;;  %v1327_v26 = vsel %vm8803_vm8, %v1056_v14, %v1326_v7  ;;  %v1064_v27 = vor.u32 %v1062_v9, %v1061_v16  ;;  %v7548_v30 = vpop.f32.mrf.mxu0  ;;  %1445 = vst [vmem:[#allocation3 + $0x168] sm:$0xf] %v1413_v25  ;;  %2279 = vst [vmem:[#allocation3 + $0xe4] sm:$0xf] %v2247_v31 }
 0x14c   : > { %v1066_v28 = vrot.slane %v1061_v16, 4  ;;  %v1589_v29 = vsel %vm8712_vm2, %v1584_v17, %v1588_v6  ;;  %1328 = vst [vmem:[#allocation2 + $0x48] sm:$0xf] %v1327_v26  ;;  %v7436_v33 = vpack.c.bf16 %v847_v23, %v847_v23  ;;  %v764_v34 = vadd.f32 %v7547_v24, %v8798_v21  ;;  %v1333_v40 = vld [vmem:[#allocation2 + $0x54] sm:$0xf] }
 0x14d   : > { %v1070_v32 = vrot.slane %v1068_v20, 7  ;;  %1939 = vst [vmem:[#allocation3 + $0xb8] sm:$0xf] %v1589_v29  ;;  %v1593_v35 = vrot.slane %v1591_v13, 4  ;;  %v1414_v36 = vld [vmem:[#allocation2 + $0x40] sm:$0xf]  ;;  %v1065_v37 = vsel %vm8809_vm12, %v1057_v15, %v1064_v27  ;;  %v7549_v41 = vpop.f32.mrf.mxu0 }
 0x14e   : > { %v1331_v38 = vsel %vm8813_vm13, %v1066_v28, %v1330_v10  ;;  %v1478_v43 = vld [vmem:[#allocation2 + $0x2c] sm:$0x1]  ;;  %v1594_v44 = vshll.u32 %v8872_v56, 16  ;;  %v1600_v45 = vshll.u32 %v1477_v19, 16  ;;  %1446 = vst [vmem:[#allocation3 + $0x18c] sm:$0xf] %v1414_v36  ;;  %v7550_v52 = vadd.f32 %v7549_v41, %v7548_v30 }
 0x14f   : > { %1329 = vst [vmem:[#allocation2 + $0x4c] sm:$0xf] %v1065_v37  ;;  %1332 = vst [vmem:[#allocation2 + $0x50] sm:$0x1] %v1331_v38  ;;  %v1073_v46 = vor.u32 %v1071_v22, %v1070_v32  ;;  %v1076_v47 = vshrl.u32 %v7436_v33, 16  ;;  %v1079_v49 = vshll.u32 %v7436_v33, 16  ;;  %v7551_v53 = vpop.f32.mrf.mxu0 }
 0x150   : > { %v2248_v48 = vld [vmem:[#allocation2 + $0x34] sm:$0xf]  ;;  %v848_v50 = vmax.f32 %v764_v34, 0.0  ;;  %v1596_v57 = vrot.slane %v1594_v44, 5  ;;  %v1604_v60 = vshrl.u32 %v1477_v19, 16  ;;  %v1610_v61 = vshll.u32 %v1478_v43, 16 }
 0x151   : > { %2280 = vst [vmem:[#allocation3 + $0x108] sm:$0xf] %v2248_v48  ;;  %v1334_v58 = vsel %vm8803_vm8, %v1073_v46, %v1333_v40  ;;  %v1078_v59 = vrot.slane %v1076_v47, 7  ;;  %v8888_v56 = vld [vmem:[#allocation2 + $0x30] sm:$0xf]  ;;  %v767_v0 = vadd.f32 %v7550_v52, %v8798_v21  ;;  %v1602_v2 = vrot.slane %v1600_v45, 5  ;;  %v7552_v3 = vpop.f32.mrf.mxu0 }
 0x152   : > { %1335 = vst [vmem:[#allocation2 + $0x54] sm:$0xf] %v1334_v58  ;;  %v1337_v62 = vld [vmem:[#allocation2 + $0x5c] sm:$0x1]  ;;  %v7437_v63 = vpack.c.bf16 %v848_v50, %v848_v50  ;;  %v1597_v1 = vor.u32 %v1596_v57, %v1593_v35  ;;  %v1074_v6 = vrot.slane %v1070_v32, 4  ;;  %v1606_v10 = vrot.slane %v1604_v60, 4 }
 0x153   : > { %v2249_v5 = vld [vmem:[#allocation2 + $0x3c] sm:$0xf]  ;;  %v1081_v7 = vor.u32 %v1079_v49, %v1078_v59  ;;  %v1083_v9 = vrot.slane %v1078_v59, 4  ;;  %v2250_v11 = vld [vmem:[#allocation2 + $0x40] sm:$0xf]  ;;  %v7553_v12 = vadd.f32 %v7552_v3, %v7551_v53  ;;  %v7554_v13 = vpop.f32.mrf.mxu0  ;;  %v1615_v14 = vshrl.u32 %v8888_v56, 16 }
 0x154   : > { %2281 = vst [vmem:[#allocation3 + $0x12c] sm:$0xf] %v2249_v5  ;;  %2282 = vst [vmem:[#allocation3 + $0x150] sm:$0xf] %v2250_v11  ;;  %v8223_v17 = vld [vmem:[#allocation3 + $0x94] ss:$36 sps:$4 sm:$0xff]   ;;  %v1607_v25 = vor.u32 %v1606_v10, %v1602_v2 }
 0x155   : > { %v1082_v15 = vsel %vm8809_vm12, %v1074_v6, %v1081_v7  ;;  %v1338_v16 = vsel %vm8813_vm13, %v1083_v9, %v1337_v62  ;;  %v1085_v18 = vshrl.u32 %v7437_v63, 16  ;;  %v1612_v19 = vrot.slane %v1610_v61, 5  ;;  %v8896_v20 = vld [vmem:[#allocation2 + $0xc] sm:$0xe]  ;;  %v7555_v27 = vpop.f32.mrf.mxu0  ;;  %v1415_v28 = vld [vmem:[#allocation2 + $0x48] sm:$0xf]  ;;  %5433 = vmatprep.mubr.bf16.mxu0 %v8223_v17 }
 0x156   : > { %1336 = vst [vmem:[#allocation2 + $0x58] sm:$0xf] %v1082_v15  ;;  %1339 = vst [vmem:[#allocation2 + $0x5c] sm:$0x1] %v1338_v16  ;;  %v8225_v22 = vld [vmem:[#allocation3 + $0x90] ss:$36 sps:$4 sm:$0xff]   ;;  %v772_v26 = vadd.f32 %v7553_v12, %v8798_v21  ;;  %v7556_v31 = vadd.f32 %v7555_v27, %v7554_v13 }
 0x157   : > { %v849_v23 = vmax.f32 %v767_v0, 0.0  ;;  %v1598_v24 = vrot.slane %v1597_v1, 4  ;;  %v1087_v29 = vrot.slane %v1085_v18, 7  ;;  %v1088_v30 = vshll.u32 %v7437_v63, 16  ;;  %v1416_v33 = vld [vmem:[#allocation2 + $0x4c] sm:$0xf]  ;;  %5434 = vmatmul.mubr.bf16.gmra.mxu0 %v8225_v22  ;;  %v8902_v40 = vpop.f32.mrf.mxu0 }
 0x158   : > { %v1618_v32 = vshll.u32 %v8888_v56, 16  ;;  %1447 = vst [vmem:[#allocation3 + $0x1b0] sm:$0xf] %v1415_v28  ;;  %v1340_v34 = vld [vmem:[#allocation2 + $0x60] sm:$0xf]  ;;  %v1608_v37 = vrot.slane %v1607_v25, 4  ;;  %v775_v43 = vadd.f32 %v7556_v31, %v8798_v21 }
 0x159   : > { %v7438_v35 = vpack.c.bf16 %v849_v23, %v849_v23  ;;  %v1603_v36 = vsel %vm8712_vm2, %v1598_v24, %v1602_v2  ;;  %v850_v38 = vmax.f32 %v772_v26, 0.0  ;;  %1448 = vst [vmem:[#allocation3 + $0x1d4] sm:$0xf] %v1416_v33  ;;  %v1090_v41 = vor.u32 %v1088_v30, %v1087_v29  ;;  %v1480_v44 = vld [vmem:[#allocation2 + $0x34] sm:$0xf]  ;;  %v7558_v50 = vpop.f32.mrf.mxu0 }
 0x15a   : > { %1940 = vst [vmem:[#allocation3 + $0xdc] sm:$0xf] %v1603_v36  ;;  %v1617_v45 = vrot.slane %v1615_v14, 4  ;;  %v1091_v46 = vrot.slane %v1087_v29, 4  ;;  %v1613_v48 = vsel %vm8712_vm2, %v1608_v37, %v1612_v19  ;;  %v1481_v49 = vld [vmem:[#allocation2 + $0x38] sm:$0x1] }
 0x15b   : > { %v1093_v47 = vshrl.u32 %v7438_v35, 16  ;;  %v7107_v52 = vrot.slane %v8896_v20, 9  ;;  %v1341_v53 = vsel %vm8803_vm8, %v1090_v41, %v1340_v34  ;;  %1941 = vst [vmem:[#allocation3 + $0x100] sm:$0xf] %v1613_v48  ;;  %v7439_v57 = vpack.c.bf16 %v850_v38, %v850_v38  ;;  %v1417_v60 = vld [vmem:[#allocation2 + $0x54] sm:$0xf]  ;;  %v7560_v0 = vpop.f32.mrf.mxu0 }
 0x15c   : > { %v851_v58 = vmax.f32 %v775_v43, 0.0  ;;  %v1620_v59 = vrot.slane %v1618_v32, 5  ;;  %1342 = vst [vmem:[#allocation2 + $0x60] sm:$0xf] %v1341_v53  ;;  %v1096_v56 = vshll.u32 %v7438_v35, 16  ;;  %v1624_v62 = vshll.u32 %v1480_v44, 16 }
 0x15d   : > { %v1095_v61 = vrot.slane %v1093_v47, 7  ;;  %v1628_v63 = vshrl.u32 %v1480_v44, 16  ;;  %1449 = vst [vmem:[#allocation3 + $0x1f8] sm:$0xf] %v1417_v60  ;;  %v1344_v1 = vld [vmem:[#allocation2 + $0x68] sm:$0x1]  ;;  %v7561_v14 = vpop.f32.mrf.mxu0  ;;  %v7559_v41 = vadd.f32 %v7558_v50, %v8902_v40 }
 0x15e   : > { %v1102_v2 = vshrl.u32 %v7439_v57, 16  ;;  %v7440_v3 = vpack.c.bf16 %v851_v58, %v851_v58  ;;  %v1621_v5 = vor.u32 %v1620_v59, %v1617_v45  ;;  %v1634_v6 = vshll.u32 %v1481_v49, 16  ;;  %v1418_v7 = vld [vmem:[#allocation2 + $0x58] sm:$0xf]  ;;  %v1347_v11 = vld [vmem:[#allocation2 + $0x6c] sm:$0xf] }
 0x15f   : > { %v1098_v9 = vor.u32 %v1096_v56, %v1095_v61  ;;  %v1100_v10 = vrot.slane %v1095_v61, 4  ;;  %v1626_v12 = vrot.slane %v1624_v62, 5  ;;  %v1630_v13 = vrot.slane %v1628_v63, 4  ;;  %1450 = vst [vmem:[#allocation3 + $0x21c] sm:$0xf] %v1418_v7  ;;  %v7563_v26 = vpop.f32.mrf.mxu0 }
 0x160   : > { %v1104_v15 = vrot.slane %v1102_v2, 7  ;;  %v1105_v16 = vshll.u32 %v7439_v57, 16  ;;  %v1110_v17 = vshrl.u32 %v7440_v3, 16  ;;  %v1622_v18 = vrot.slane %v1621_v5, 4  ;;  %v1970_v19 = vld [vmem:[#allocation2 + $0x10] sm:$0xf] }
 0x161   : > { %v1099_v22 = vsel %vm8809_vm12, %v1091_v46, %v1098_v9  ;;  %v1345_v23 = vsel %vm8813_vm13, %v1100_v10, %v1344_v1  ;;  %v1113_v24 = vshll.u32 %v7440_v3, 16  ;;  %v1631_v25 = vor.u32 %v1630_v13, %v1626_v12  ;;  %v2251_v27 = vld [vmem:[#allocation2 + $0x48] sm:$0xf]  ;;  %v2252_v28 = vld [vmem:[#allocation2 + $0x4c] sm:$0xf]  ;;  %v7564_v44 = vpop.f32.mrf.mxu0 }
 0x162   : > { %v8914_v29 = vld [vmem:[#allocation2 + $0x3c] sm:$0xf]  ;;  %1343 = vst [vmem:[#allocation2 + $0x64] sm:$0xf] %v1099_v22  ;;  %1346 = vst [vmem:[#allocation2 + $0x68] sm:$0x1] %v1345_v23  ;;  %v1107_v30 = vor.u32 %v1105_v16, %v1104_v15  ;;  %v1627_v33 = vsel %vm8712_vm2, %v1622_v18, %v1626_v12  ;;  %v7562_v43 = vadd.f32 %v7561_v14, %v7560_v0 }
 0x163   : > { %v1112_v31 = vrot.slane %v1110_v17, 7  ;;  %v1351_v32 = vld [vmem:[#allocation2 + $0x74] sm:$0x1]  ;;  %v1636_v34 = vrot.slane %v1634_v6, 5  ;;  %2283 = vst [vmem:[#allocation3 + $0x174] sm:$0xf] %v2251_v27  ;;  %v7565_v53 = vadd.f32 %v7564_v44, %v7563_v26  ;;  %v780_v59 = vadd.f32 %v7559_v41, %v8798_v21  ;;  %v7566_v50 = vpop.f32.mrf.mxu0 }
 0x164   : > { %v1971_v35 = vld [vmem:[#allocation2 + $0x14] sm:$0x1]  ;;  %2284 = vst [vmem:[#allocation3 + $0x198] sm:$0xf] %v2252_v28  ;;  %v1632_v38 = vrot.slane %v1631_v25, 4  ;;  %v1108_v45 = vrot.slane %v1104_v15, 4  ;;  %v1348_v46 = vsel %vm8803_vm8, %v1107_v30, %v1347_v11  ;;  %v783_v63 = vadd.f32 %v7562_v43, %v8798_v21 }
 0x165   : > { %v8230_v36 = vld [vmem:[#allocation3 + $0xdc] ss:$36 sps:$4 sm:$0xff]   ;;  %1942 = vst [vmem:[#allocation3 + $0x124] sm:$0xf] %v1627_v33  ;;  %v8237_v47 = vld [vmem:[#allocation3 + $0xc] ss:$36 sps:$4 sm:$0xff]   ;;  %v1115_v48 = vor.u32 %v1113_v24, %v1112_v31  ;;  %v7567_v9 = vpop.f32.mrf.mxu0  ;;  %v788_v23 = vadd.f32 %v7565_v53, %v8798_v21 }
 0x166   : > { %v8232_v37 = vld [vmem:[#allocation3 + $0xd8] ss:$36 sps:$4 sm:$0xff]   ;;  %v1483_v49 = vld [vmem:[#allocation2 + $0x40] sm:$0xf]  ;;  %5441 = vmatprep.mubr.bf16.mxu0 %v8230_v36  ;;  %1349 = vst [vmem:[#allocation2 + $0x6c] sm:$0xf] %v1348_v46  ;;  %v1637_v58 = vsel %vm8712_vm2, %v1632_v38, %v1636_v34  ;;  %v7568_v44 = vadd.f32 %v7567_v9, %v7566_v50 }
 0x167   : > { %v1117_v57 = vrot.slane %v1112_v31, 4  ;;  %v2074_v60 = vrot.slane %v1970_v19, 5  ;;  %v1484_v40 = vld [vmem:[#allocation2 + $0x44] sm:$0x1]  ;;  %v1419_v61 = vld [vmem:[#allocation2 + $0x60] sm:$0xf]  ;;  %5442 = vmatmul.mubr.bf16.gmra.mxu0 %v8232_v37  ;;  %v1116_v56 = vsel %vm8809_vm12, %v1108_v45, %v1115_v48  ;;  %v7569_v17 = vpop.f32.mrf.mxu0 }
 0x168   : > { %1943 = vst [vmem:[#allocation3 + $0x148] sm:$0xf] %v1637_v58  ;;  %v2077_v62 = vrot.slane %v1971_v35, 5  ;;  %v1639_v0 = vshrl.u32 %v8914_v29, 16  ;;  %1451 = vst [vmem:[#allocation3 + $0x240] sm:$0xf] %v1419_v61  ;;  %5578 = vmatprep.mubr.bf16.mxu0 %v8237_v47 }
 0x169   : > { %v2253_v1 = vld [vmem:[#allocation2 + $0x54] sm:$0xf]  ;;  %v2254_v2 = vld [vmem:[#allocation2 + $0x58] sm:$0xf]  ;;  %1350 = vst [vmem:[#allocation2 + $0x70] sm:$0xf] %v1116_v56  ;;  %v1352_v3 = vsel %vm8813_vm13, %v1117_v57, %v1351_v32  ;;  %v2075_v6 = vsel %vm8739_vm5, %v7107_v52, %v2074_v60  ;;  %v7570_v28 = vpop.f32.mrf.mxu0 }
 0x16a   : > { %v852_v5 = vmax.f32 %v780_v59, 0.0  ;;  %v2076_v7 = vrot.slane %v2074_v60, 4  ;;  %2285 = vst [vmem:[#allocation3 + $0x1bc] sm:$0xf] %v2253_v1  ;;  %2286 = vst [vmem:[#allocation3 + $0x1e0] sm:$0xf] %v2254_v2  ;;  %v8953_v45 = vadd.f32 %v7570_v28, %v7569_v17 }
 0x16b   : > { %1353 = vst [vmem:[#allocation2 + $0x74] sm:$0x1] %v1352_v3  ;;  %2211 = vst [vmem:[#allocation3 + $0x50] sm:$0xf] %v2075_v6  ;;  %v853_v10 = vmax.f32 %v783_v63, 0.0  ;;  %v1641_v11 = vrot.slane %v1639_v0, 4  ;;  %v8955_v46 = vpop.f32.mrf.mxu0 }
 0x16c   : > { %v1642_v12 = vshll.u32 %v8914_v29, 16  ;;  %v1648_v13 = vshll.u32 %v1483_v49, 16  ;;  %v7441_v14 = vpack.c.bf16 %v852_v5, %v852_v5  ;;  %v2078_v15 = vsel %vm8739_vm5, %v2076_v7, %v2077_v62  ;;  %v1420_v18 = vld [vmem:[#allocation2 + $0x64] sm:$0xf]  ;;  %v8331_v24 = vld [vmem:[%s10684_s3 + $0x1f8] sm:$0xff]   ;;  %v8253_v43 = vld [vmem:[%s10684_s3 + $0x170] sm:$0xff]  }
 0x16d   : > { %v1652_v16 = vshrl.u32 %v1483_v49, 16  ;;  %v1658_v20 = vshll.u32 %v1484_v40, 16  ;;  %2212 = vst [vmem:[#allocation3 + $0x74] sm:$0xf] %v2078_v15  ;;  %v8937_v52 = vpack.c.bf16 %v853_v10, %v853_v10  ;;  %1452 = vst [vmem:[#allocation3 + $0x264] sm:$0xf] %v1420_v18  ;;  %7935 = vmatprep.subr.bf16.mxu0 %v8331_v24  ;;  %v8960_v56 = vpop.f32.mrf.mxu0 }
 0x16e   : > { %v1644_v19 = vrot.slane %v1642_v12, 5  ;;  %v1650_v22 = vrot.slane %v1648_v13, 5  ;;  %v1119_v25 = vshrl.u32 %v7441_v14, 16  ;;  %v8943_v27 = vld [vmem:[#allocation2 + $0x18] sm:$0xe]  ;;  %v1122_v31 = vshll.u32 %v7441_v14, 16 }
 0x16f   : > { %v1654_v26 = vrot.slane %v1652_v16, 4  ;;  %v2255_v29 = vld [vmem:[#allocation2 + $0x60] sm:$0xf]  ;;  %v1354_v32 = vld [vmem:[#allocation2 + $0x78] sm:$0xf]  ;;  %v1660_v21 = vrot.slane %v1658_v20, 5  ;;  %v8978_v13 = vpop.f32.mrf.mxu0 }
 0x170   : > { %v8235_v30 = vld [vmem:[#allocation3 + $0x8] ss:$36 sps:$4 sm:$0xff]   ;;  %v8244_v33 = vld [vmem:[%s10684_s3 + $0x138] sm:$0xff]   ;;  %v1645_v34 = vor.u32 %v1644_v19, %v1641_v11  ;;  %2287 = vst [vmem:[#allocation3 + $0x204] sm:$0xf] %v2255_v29  ;;  %v1121_v37 = vrot.slane %v1119_v25, 7 }
 0x171   : > { %v1973_v35 = vld [vmem:[#allocation2 + $0x1c] sm:$0xf]  ;;  %v1655_v38 = vor.u32 %v1654_v26, %v1650_v22  ;;  %v8948_v41 = vld [vmem:[#allocation2 + $0x20] sm:$0x1]  ;;  %5579 = vmatmul.mubr.bf16.vlgmr.msra.gmra.mxu0 %v8235_v30  ;;  %v1127_v48 = vshrl.u32 %v8937_v52, 16  ;;  %v1130_v49 = vshll.u32 %v8937_v52, 16  ;;  %v7576_v25 = vpop.f32.mrf.mxu0 }
 0x172   : > { %v8240_v36 = vld [vmem:[#allocation3 + $0x120] ss:$36 sps:$4 sm:$0xff]   ;;  %v1646_v53 = vrot.slane %v1645_v34, 4  ;;  %v854_v57 = vmax.f32 %v788_v23, 0.0  ;;  %v1124_v58 = vor.u32 %v1122_v31, %v1121_v37  ;;  %v1125_v59 = vrot.slane %v1121_v37, 4  ;;  %v8254_v12 = vld [vmem:[%s10684_s3 + $0x130] sm:$0xff]  }
 0x173   : > { %v8242_v47 = vld [vmem:[#allocation3 + $0x124] ss:$36 sps:$4 sm:$0xff]   ;;  %v1656_v40 = vrot.slane %v1655_v38, 4  ;;  %v7108_v61 = vrot.slane %v8943_v27, 9  ;;  %v1421_v50 = vld [vmem:[#allocation2 + $0x6c] sm:$0xf]  ;;  %v7578_v37 = vpop.f32.mrf.mxu0 }
 0x174   : > { %v1358_v60 = vld [vmem:[#allocation2 + $0x80] sm:$0x1]  ;;  %v1485_v62 = vld [vmem:[#allocation2 + $0x48] sm:$0xf]  ;;  %5449 = vmatprep.mubr.bf16.mxu1 %v8242_v47  ;;  %v1129_v63 = vrot.slane %v1127_v48, 7  ;;  %v1651_v0 = vsel %vm8712_vm2, %v1646_v53, %v1650_v22  ;;  %v7443_v1 = vpack.c.bf16 %v854_v57, %v854_v57  ;;  %v2081_v2 = vrot.slane %v1973_v35, 5 }
 0x175   : > { %v1422_v3 = vld [vmem:[#allocation2 + $0x70] sm:$0xf]  ;;  %1453 = vst [vmem:[#allocation3 + $0x288] sm:$0xf] %v1421_v50  ;;  %v1355_v5 = vsel %vm8803_vm8, %v1124_v58, %v1354_v32  ;;  %5450 = vmatmul.mubr.bf16.vlgmr.msra.gmra.mxu1 %v8240_v36  ;;  %v1661_v7 = vsel %vm8712_vm2, %v1656_v40, %v1660_v21  ;;  %1944 = vst [vmem:[#allocation3 + $0x16c] sm:$0xf] %v1651_v0  ;;  %v7579_v58 = vpop.f32.mrf.mxu0 }
 0x176   : > { %v8245_v6 = vld [vmem:[#allocation3 + $0x54] ss:$36 sps:$4 sm:$0xff]   ;;  %v2084_v9 = vrot.slane %v8948_v41, 5  ;;  %v8972_v10 = vld [vmem:[%s10683_s2] ss:$0 sm:$0xff]  ;;  %7824 = vmatpush3.bf16.msra.mxu1 %v8244_v33  ;;  %v1132_v14 = vor.u32 %v1130_v49, %v1129_v63  ;;  %v1134_v15 = vrot.slane %v1129_v63, 4  ;;  %v2082_v52 = vsel %vm8739_vm5, %v7108_v61, %v2081_v2 }
 0x177   : > { %v791_v11 = vadd.f32 %v8972_v10, %v7568_v44  ;;  %1454 = vst [vmem:[#allocation3 + $0x2ac] sm:$0xf] %v1422_v3  ;;  %1356 = vst [vmem:[#allocation2 + $0x78] sm:$0xf] %v1355_v5  ;;  %v1136_v16 = vshrl.u32 %v7443_v1, 16  ;;  %v1139_v20 = vshll.u32 %v7443_v1, 16  ;;  %5586 = vmatprep.mubr.bf16.mxu0 %v8245_v6  ;;  %7825 = vmatprep.subr.bf16.mxu1 %v8253_v43 }
 0x178   : > { %1945 = vst [vmem:[#allocation3 + $0x190] sm:$0xf] %v1661_v7  ;;  %v1486_v17 = vld [vmem:[#allocation2 + $0x4c] sm:$0xf]  ;;  %v8332_v18 = vld [vmem:[%s10684_s3 + $0x1b8] sm:$0xff]   ;;  %v2083_v19 = vrot.slane %v2081_v2, 4  ;;  %v1133_v27 = vsel %vm8809_vm12, %v1125_v59, %v1132_v14  ;;  %v1359_v28 = vsel %vm8813_vm13, %v1134_v15, %v1358_v60  ;;  %v7574_v7 = vadd.f32 %v8960_v56, %v8955_v46 }
 0x179   : > { %v855_v22 = vmax.f32 %v791_v11, 0.0  ;;  %v1663_v23 = vshrl.u32 %v1485_v62, 16  ;;  %v8263_v24 = vld [vmem:[%s10684_s3 + $0x168] sm:$0xff]   ;;  %v2256_v26 = vld [vmem:[#allocation2 + $0x64] sm:$0xf]  ;;  %v8992_v29 = vrot.slane %v1136_v16, 7  ;;  %7936 = vmatpush3.bf16.msra.mxu0 %v8332_v18  ;;  %v7577_v16 = vadd.f32 %v7576_v25, %v8978_v13 }
 0x17a   : > { %v8250_v30 = vld [vmem:[#allocation3 + $0x50] ss:$36 sps:$4 sm:$0xff]   ;;  %2213 = vst [vmem:[#allocation3 + $0x98] sm:$0xf] %v2082_v52  ;;  %v1487_v31 = vld [vmem:[#allocation2 + $0x50] sm:$0x1]  ;;  %v2085_v34 = vsel %vm8739_vm5, %v2083_v19, %v2084_v9  ;;  %7826 = vmatpush3.bf16.msra.mxu1 %v8254_v12  ;;  %v7581_v9 = vpop.f32.mrf.mxu0 }
 0x17b   : > { %v1666_v32 = vshll.u32 %v1485_v62, 16  ;;  %2288 = vst [vmem:[#allocation3 + $0x228] sm:$0xf] %v2256_v26  ;;  %1357 = vst [vmem:[#allocation2 + $0x7c] sm:$0xf] %v1133_v27  ;;  %v7444_v21 = vpack.c.bf16 %v855_v22, %v855_v22  ;;  %v1665_v35 = vrot.slane %v1663_v23, 4  ;;  %v1141_v38 = vor.u32 %v1139_v20, %v8992_v29  ;;  %5587 = vmatmul.mubr.bf16.gmra.mxu0 %v8250_v30 }
 0x17c   : > { %1360 = vst [vmem:[#allocation2 + $0x80] sm:$0x1] %v1359_v28  ;;  %v1361_v33 = vld [vmem:[#allocation2 + $0x84] sm:$0xf]  ;;  %v1672_v36 = vshll.u32 %v1486_v17, 16  ;;  %v1676_v43 = vshrl.u32 %v1486_v17, 16  ;;  %7827 = vmatprep.subr.bf16.mxu1 %v8263_v24  ;;  %v796_v62 = vadd.f32 %v8972_v10, %v8953_v45  ;;  %v7580_v20 = vadd.f32 %v7579_v58, %v7578_v37  ;;  %v7582_v22 = vpop.f32.mrf.mxu0 }
 0x17d   : > { %2214 = vst [vmem:[#allocation3 + $0xbc] sm:$0xf] %v2085_v34  ;;  %v1668_v41 = vrot.slane %v1666_v32, 5  ;;  %v8266_v44 = vld [vmem:[%s10684_s3 + $0x128] sm:$0xff]   ;;  %v8339_v48 = vld [vmem:[%s10684_s3 + $0x1f0] sm:$0xff]   ;;  %v1144_v49 = vshrl.u32 %v7444_v21, 16  ;;  %v1362_v40 = vsel %vm8803_vm8, %v1141_v38, %v1361_v33  ;;  %v799_v32 = vadd.f32 %v8972_v10, %v7574_v7 }
 0x17e   : > { %v2257_v47 = vld [vmem:[#allocation2 + $0x6c] sm:$0xf]  ;;  %v1674_v53 = vrot.slane %v1672_v36, 5  ;;  %v1682_v57 = vshll.u32 %v1487_v31, 16  ;;  %v8275_v59 = vld [vmem:[%s10684_s3 + $0x160] sm:$0xff]   ;;  %v1678_v50 = vrot.slane %v1676_v43, 4  ;;  %7937 = vmatprep.subr.bf16.mxu0 %v8339_v48  ;;  %7828 = vmatpush3.bf16.msra.mxu1 %v8266_v44  ;;  %v7584_v33 = vpop.f32.mrf.mxu0 }
 0x17f   : > { %v2258_v60 = vld [vmem:[#allocation2 + $0x70] sm:$0xf]  ;;  %2289 = vst [vmem:[#allocation3 + $0x24c] sm:$0xf] %v2257_v47  ;;  %v1669_v61 = vor.u32 %v1668_v41, %v1665_v35  ;;  %v1975_v63 = vld [vmem:[#allocation2 + $0x24] sm:$0xe]  ;;  %7829 = vmatprep.subr.bf16.mxu1 %v8275_v59 }
 0x180   : > { %v8276_v0 = vld [vmem:[%s10684_s3 + $0x120] sm:$0xff]   ;;  %2290 = vst [vmem:[#allocation3 + $0x270] sm:$0xf] %v2258_v60  ;;  %v1142_v1 = vrot.slane %v8992_v29, 4  ;;  %1363 = vst [vmem:[#allocation2 + $0x84] sm:$0xf] %v1362_v40  ;;  %v1679_v15 = vor.u32 %v1678_v50, %v1674_v53  ;;  %v7585_v58 = vpop.f32.mrf.mxu0  ;;  %v804_v60 = vadd.f32 %v8972_v10, %v7577_v16  ;;  %v9050_v40 = vadd.f32 %v8972_v10, %v7580_v20 }
 0x181   : > { %v1147_v2 = vshll.u32 %v7444_v21, 16  ;;  %v1365_v3 = vld [vmem:[#allocation2 + $0x8c] sm:$0x1]  ;;  %v1976_v5 = vld [vmem:[#allocation2 + $0x28] sm:$0xf]  ;;  %v8285_v45 = vld [vmem:[%s10684_s3 + $0x158] sm:$0xff]   ;;  %v9052_v50 = vadd.f32 %v7585_v58, %v7584_v33 }
 0x182   : > { %v9014_v6 = vld [vmem:[#allocation2 + $0x2c] sm:$0x1]  ;;  %v8247_v11 = vld [vmem:[#allocation3 + $0x16c] ss:$36 sps:$4 sm:$0xff]   ;;  %v1146_v14 = vrot.slane %v1144_v49, 7  ;;  %v1670_v17 = vrot.slane %v1669_v61, 4  ;;  %7830 = vmatpush3.bf16.msra.mxu1 %v8276_v0  ;;  %v7583_v61 = vadd.f32 %v7582_v22, %v7581_v9 }
 0x183   : > { %v8249_v12 = vld [vmem:[#allocation3 + $0x168] ss:$36 sps:$4 sm:$0xff]   ;;  %v1684_v18 = vrot.slane %v1682_v57, 5  ;;  %v856_v52 = vmax.f32 %v796_v62, 0.0  ;;  %v7109_v19 = vrot.slane %v1975_v63, 9  ;;  %v8340_v46 = vld [vmem:[%s10684_s3 + $0x1b0] sm:$0xff]   ;;  %5457 = vmatprep.mubr.bf16.mxu1 %v8247_v11  ;;  %7831 = vmatprep.subr.bf16.mxu1 %v8285_v45 }
 0x184   : > { %v9025_v56 = vld [vmem:[#allocation2 + $0x54] sm:$0xf]  ;;  %v1149_v23 = vor.u32 %v1147_v2, %v1146_v14  ;;  %v1151_v24 = vrot.slane %v1146_v14, 4  ;;  %v1680_v26 = vrot.slane %v1679_v15, 4  ;;  %v2088_v27 = vrot.slane %v1976_v5, 5  ;;  %v8288_v25 = vld [vmem:[%s10684_s3 + $0x118] sm:$0xff]   ;;  %5458 = vmatmul.mubr.bf16.gmra.mxu1 %v8249_v12  ;;  %7938 = vmatpush3.bf16.msra.mxu0 %v8340_v46  ;;  %v9064_v5 = vpop.f32.mrf.mxu0 }
 0x185   : > { %v1423_v13 = vld [vmem:[#allocation2 + $0x78] sm:$0xf]  ;;  %v1675_v29 = vsel %vm8712_vm2, %v1670_v17, %v1674_v53  ;;  %v7445_v30 = vpack.c.bf16 %v856_v52, %v856_v52  ;;  %v2091_v31 = vrot.slane %v9014_v6, 5  ;;  %v8298_v34 = vld [vmem:[%s10684_s3 + $0x150] sm:$0xff]   ;;  %v8342_v21 = vld [vmem:[%s10684_s3 + $0x1e8] sm:$0xff]   ;;  %v857_v53 = vmax.f32 %v799_v32, 0.0 }
 0x186   : > { %v8251_v28 = vld [vmem:[#allocation3 + $0x9c] ss:$36 sps:$4 sm:$0xff]   ;;  %1455 = vst [vmem:[#allocation3 + $0x2d0] sm:$0xf] %v1423_v13  ;;  %v1150_v35 = vsel %vm8809_vm12, %v1142_v1, %v1149_v23  ;;  %v1366_v36 = vsel %vm8813_vm13, %v1151_v24, %v1365_v3  ;;  %v1685_v37 = vsel %vm8712_vm2, %v1680_v26, %v1684_v18  ;;  %1946 = vst [vmem:[#allocation3 + $0x1b4] sm:$0xf] %v1675_v29  ;;  %7939 = vmatprep.subr.bf16.mxu0 %v8342_v21  ;;  %v9074_v52 = vpop.f32.mrf.mxu0 }
 0x187   : > { %v8258_v38 = vld [vmem:[#allocation3 + $0x98] ss:$36 sps:$4 sm:$0xff]   ;;  %v2089_v41 = vsel %vm8739_vm5, %v7109_v19, %v2088_v27  ;;  %v1489_v43 = vld [vmem:[#allocation2 + $0x58] sm:$0xf]  ;;  %v1424_v44 = vld [vmem:[#allocation2 + $0x7c] sm:$0xf]  ;;  %5594 = vmatprep.mubr.bf16.mxu0 %v8251_v28  ;;  %v7446_v1 = vpack.c.bf16 %v857_v53, %v857_v53  ;;  %7832 = vmatpush3.bf16.msra.mxu1 %v8288_v25 }
 0x188   : > { %1364 = vst [vmem:[#allocation2 + $0x88] sm:$0xf] %v1150_v35  ;;  %1367 = vst [vmem:[#allocation2 + $0x8c] sm:$0x1] %v1366_v36  ;;  %v1153_v47 = vshrl.u32 %v7445_v30, 16  ;;  %v1156_v48 = vshll.u32 %v7445_v30, 16  ;;  %5595 = vmatmul.mubr.bf16.gmra.mxu0 %v8258_v38  ;;  %7833 = vmatprep.subr.bf16.mxu1 %v8298_v34  ;;  %v9083_v30 = vpop.f32.mrf.mxu0  ;;  %v9095_v38 = vadd.f32 %v8972_v10, %v7583_v61 }
 0x189   : > { %1947 = vst [vmem:[#allocation3 + $0x1d8] sm:$0xf] %v1685_v37  ;;  %v2090_v49 = vrot.slane %v2088_v27, 4  ;;  %2215 = vst [vmem:[#allocation3 + $0xe0] sm:$0xf] %v2089_v41  ;;  %v8299_v62 = vld [vmem:[%s10684_s3 + $0x110] sm:$0xff]  }
 0x18a   : > { %v1490_v57 = vld [vmem:[#allocation2 + $0x5c] sm:$0x1]  ;;  %1456 = vst [vmem:[#allocation3 + $0x2f4] sm:$0xf] %v1424_v44  ;;  %v1368_v59 = vld [vmem:[#allocation2 + $0x90] sm:$0xf] }
 0x18b   : > { %v9057_v63 = vrot.slane %v1153_v47, 7  ;;  %v2092_v0 = vsel %vm8739_vm5, %v2090_v49, %v2091_v31  ;;  %v1687_v2 = vshrl.u32 %v9025_v56, 16  ;;  %v9062_v3 = vld [vmem:[#allocation2 + $0x30] sm:$0xe]  ;;  %v1425_v6 = vld [vmem:[#allocation2 + $0x84] sm:$0xf]  ;;  %7834 = vmatpush3.bf16.msra.mxu1 %v8299_v62  ;;  %v7591_v49 = vpop.f32.mrf.mxu0 }
 0x18c   : > { %v8308_v7 = vld [vmem:[%s10684_s3 + $0x148] sm:$0xff]   ;;  %2216 = vst [vmem:[#allocation3 + $0x104] sm:$0xf] %v2092_v0  ;;  %v1690_v9 = vshll.u32 %v9025_v56, 16  ;;  %v1696_v45 = vshll.u32 %v1489_v43, 16  ;;  %v1700_v11 = vshrl.u32 %v1489_v43, 16 }
 0x18d   : > { %v1706_v12 = vshll.u32 %v1490_v57, 16  ;;  %v9070_v14 = vld [vmem:[#allocation2 + $0x34] sm:$0xf]  ;;  %1457 = vst [vmem:[#allocation3 + $0x318] sm:$0xf] %v1425_v6  ;;  %v1158_v16 = vor.u32 %v1156_v48, %v9057_v63  ;;  %v1159_v20 = vrot.slane %v9057_v63, 4  ;;  %7835 = vmatprep.subr.bf16.mxu1 %v8308_v7  ;;  %v9111_v6 = vpop.f32.mrf.mxu0 }
 0x18e   : > { %v2259_v15 = vld [vmem:[#allocation2 + $0x78] sm:$0xf]  ;;  %v1161_v17 = vshrl.u32 %v7446_v1, 16  ;;  %v1164_v18 = vshll.u32 %v7446_v1, 16  ;;  %v2260_v19 = vld [vmem:[#allocation2 + $0x7c] sm:$0xf] }
 0x18f   : > { %2291 = vst [vmem:[#allocation3 + $0x294] sm:$0xf] %v2259_v15  ;;  %v8348_v22 = vld [vmem:[%s10684_s3 + $0x1a8] sm:$0xff]   ;;  %v1372_v46 = vld [vmem:[#allocation2 + $0x98] sm:$0x1]  ;;  %v1689_v56 = vrot.slane %v1687_v2, 4  ;;  %v1369_v13 = vsel %vm8803_vm8, %v1158_v16, %v1368_v59 }
 0x190   : > { %v1692_v23 = vrot.slane %v1690_v9, 5  ;;  %v1698_v24 = vrot.slane %v1696_v45, 5  ;;  %v1702_v26 = vrot.slane %v1700_v11, 4  ;;  %v9079_v27 = vld [vmem:[#allocation2 + $0x38] sm:$0x1]  ;;  %v1163_v25 = vrot.slane %v1161_v17, 7  ;;  %7940 = vmatpush3.bf16.msra.mxu0 %v8348_v22 }
 0x191   : > { %2292 = vst [vmem:[#allocation3 + $0x2b8] sm:$0xf] %v2260_v19  ;;  %v1708_v28 = vrot.slane %v1706_v12, 5  ;;  %v858_v29 = vmax.f32 %v804_v60, 0.0  ;;  %v8310_v31 = vld [vmem:[%s10684_s3 + $0x108] sm:$0xff]   ;;  %v8320_v32 = vld [vmem:[%s10684_s3 + $0x140] sm:$0xff]  }
 0x192   : > { %v9091_v33 = vld [vmem:[#allocation2 + $0x60] sm:$0xf]  ;;  %v8255_v34 = vld [vmem:[#allocation3 + $0x1b4] ss:$36 sps:$4 sm:$0xff]   ;;  %1370 = vst [vmem:[#allocation2 + $0x90] sm:$0xf] %v1369_v13  ;;  %v1693_v35 = vor.u32 %v1692_v23, %v1689_v56  ;;  %v1703_v36 = vor.u32 %v1702_v26, %v1698_v24  ;;  %v1166_v41 = vor.u32 %v1164_v18, %v1163_v25  ;;  %7836 = vmatpush3.bf16.msra.mxu1 %v8310_v31 }
 0x193   : > { %v8257_v21 = vld [vmem:[#allocation3 + $0x1b0] ss:$36 sps:$4 sm:$0xff]   ;;  %v7110_v37 = vrot.slane %v9062_v3, 9  ;;  %v1168_v43 = vrot.slane %v1163_v25, 4  ;;  %v7447_v44 = vpack.c.bf16 %v858_v29, %v858_v29  ;;  %v2095_v47 = vrot.slane %v9070_v14, 5  ;;  %v8349_v57 = vld [vmem:[%s10684_s3 + $0x1e0] sm:$0xff]   ;;  %5465 = vmatprep.mubr.bf16.mxu1 %v8255_v34  ;;  %7837 = vmatprep.subr.bf16.mxu1 %v8320_v32 }
 0x194   : > { %v9098_v48 = vld [vmem:[#allocation2 + $0x64] sm:$0xf]  ;;  %v1426_v53 = vld [vmem:[#allocation2 + $0x88] sm:$0xf]  ;;  %v1694_v58 = vrot.slane %v1693_v35, 4  ;;  %v1704_v59 = vrot.slane %v1703_v36, 4  ;;  %5466 = vmatmul.mubr.bf16.gmra.mxu1 %v8257_v21  ;;  %v1167_v0 = vsel %vm8809_vm12, %v1159_v20, %v1166_v41  ;;  %7941 = vmatprep.subr.bf16.mxu0 %v8349_v57  ;;  %v9149_v31 = vadd.f32 %v8972_v10, %v9052_v50 }
 0x195   : > { %v2098_v60 = vrot.slane %v9079_v27, 5  ;;  %v859_v61 = vmax.f32 %v9050_v40, 0.0  ;;  %v9105_v62 = vld [vmem:[#allocation2 + $0x68] sm:$0x1]  ;;  %1458 = vst [vmem:[#allocation3 + $0x33c] sm:$0xf] %v1426_v53  ;;  %v1373_v1 = vsel %vm8813_vm13, %v1168_v43, %v1372_v46  ;;  %v2096_v12 = vsel %vm8739_vm5, %v7110_v37, %v2095_v47  ;;  %v9142_v27 = vpop.f32.mrf.mxu0 }
 0x196   : > { %v8259_v63 = vld [vmem:[#allocation3 + $0xe4] ss:$36 sps:$4 sm:$0xff]   ;;  %v1170_v2 = vshrl.u32 %v7447_v44, 16  ;;  %v1173_v3 = vshll.u32 %v7447_v44, 16  ;;  %1371 = vst [vmem:[#allocation2 + $0x94] sm:$0xf] %v1167_v0  ;;  %v1699_v7 = vsel %vm8712_vm2, %v1694_v58, %v1698_v24  ;;  %v1709_v9 = vsel %vm8712_vm2, %v1704_v59, %v1708_v28 }
 0x197   : > { %v8350_v40 = vld [vmem:[%s10684_s3 + $0x1a0] sm:$0xff]   ;;  %1374 = vst [vmem:[#allocation2 + $0x98] sm:$0x1] %v1373_v1  ;;  %v1375_v45 = vld [vmem:[#allocation2 + $0x9c] sm:$0xf]  ;;  %v2097_v14 = vrot.slane %v2095_v47, 4  ;;  %5602 = vmatprep.mubr.bf16.mxu0 %v8259_v63  ;;  %v7448_v20 = vpack.c.bf16 %v859_v61, %v859_v61  ;;  %v9153_v32 = vadd.f32 %v9074_v52, %v9064_v5  ;;  %v7596_v58 = vpop.f32.mrf.mxu0 }
 0x198   : > { %v8265_v11 = vld [vmem:[#allocation3 + $0xe0] ss:$36 sps:$4 sm:$0xff]   ;;  %v8321_v15 = vld [vmem:[%s10684_s3 + $0x100] sm:$0xff]   ;;  %1948 = vst [vmem:[#allocation3 + $0x1fc] sm:$0xf] %v1699_v7  ;;  %v9125_v16 = vrot.slane %v1170_v2, 7  ;;  %7942 = vmatpush3.bf16.msra.mxu0 %v8350_v40 }
 0x199   : > { %1949 = vst [vmem:[#allocation3 + $0x220] sm:$0xf] %v1709_v9  ;;  %2217 = vst [vmem:[#allocation3 + $0x128] sm:$0xf] %v2096_v12  ;;  %v1711_v17 = vshrl.u32 %v9091_v33, 16  ;;  %v1714_v18 = vshll.u32 %v9091_v33, 16  ;;  %5603 = vmatmul.mubr.bf16.gmra.mxu0 %v8265_v11  ;;  %v2099_v56 = vsel %vm8739_vm5, %v2097_v14, %v2098_v60  ;;  %v9156_v33 = vadd.f32 %v7591_v49, %v9083_v30 }
 0x19a   : > { %v9129_v19 = vld [vmem:[#allocation2 + $0x3c] sm:$0xe]  ;;  %v1720_v23 = vshll.u32 %v9098_v48, 16  ;;  %v1724_v24 = vshrl.u32 %v9098_v48, 16  ;;  %v1730_v26 = vshll.u32 %v9105_v62, 16  ;;  %v1175_v25 = vor.u32 %v1173_v3, %v9125_v16  ;;  %7838 = vmatpush3.bf16.msra.mxu1 %v8321_v15  ;;  %v8360_v44 = vld [vmem:[%s10684_s3 + $0x1d0] sm:$0xff]  }
 0x19b   : > { %v8333_v22 = vld [vmem:[%s10684_s3 + $0x238] sm:$0xff]   ;;  %v2261_v13 = vld [vmem:[#allocation2 + $0x84] sm:$0xf]  ;;  %2218 = vst [vmem:[#allocation3 + $0x14c] sm:$0xf] %v2099_v56  ;;  %v1176_v21 = vrot.slane %v9125_v16, 4 }
 0x19c   : > { %v8353_v46 = vld [vmem:[%s10684_s3 + $0x1d8] sm:$0xff]   ;;  %v1982_v28 = vld [vmem:[#allocation2 + $0x40] sm:$0xf]  ;;  %v9145_v29 = vld [vmem:[#allocation2 + $0x44] sm:$0x1]  ;;  %v1178_v35 = vshrl.u32 %v7448_v20, 16  ;;  %v1376_v5 = vsel %vm8803_vm8, %v1175_v25, %v1375_v45  ;;  %8071 = vmatprep.subr.bf16.mxu1 %v8333_v22 }
 0x19d   : > { %2293 = vst [vmem:[#allocation3 + $0x2dc] sm:$0xf] %v2261_v13  ;;  %v8359_v34 = vld [vmem:[%s10684_s3 + $0x198] sm:$0xff]   ;;  %v1181_v36 = vshll.u32 %v7448_v20, 16  ;;  %v1713_v37 = vrot.slane %v1711_v17, 4  ;;  %7943 = vmatprep.subr.bf16.mxu0 %v8353_v46  ;;  %v1716_v52 = vrot.slane %v1714_v18, 5 }
 0x19e   : > { %v1427_v50 = vld [vmem:[#allocation2 + $0x90] sm:$0xf]  ;;  %v1722_v30 = vrot.slane %v1720_v23, 5  ;;  %v1726_v41 = vrot.slane %v1724_v24, 4  ;;  %v2262_v43 = vld [vmem:[#allocation2 + $0x88] sm:$0xf]  ;;  %7944 = vmatpush3.bf16.msra.mxu0 %v8359_v34 }
 0x19f   : > { %1459 = vst [vmem:[#allocation3 + $0x360] sm:$0xf] %v1427_v50  ;;  %1377 = vst [vmem:[#allocation2 + $0x9c] sm:$0xf] %v1376_v5  ;;  %v1180_v47 = vrot.slane %v1178_v35, 7  ;;  %v1732_v49 = vrot.slane %v1730_v26, 5  ;;  %v1717_v60 = vor.u32 %v1716_v52, %v1713_v37  ;;  %7945 = vmatprep.subr.bf16.mxu0 %v8360_v44  ;;  %v7595_v37 = vadd.f32 %v9142_v27, %v9111_v6 }
 0x1a0   : > { %v1379_v48 = vld [vmem:[#allocation2 + $0xa4] sm:$0x1]  ;;  %v860_v53 = vmax.f32 %v9095_v38, 0.0  ;;  %v7111_v57 = vrot.slane %v9129_v19, 9  ;;  %2294 = vst [vmem:[#allocation3 + $0x300] sm:$0xf] %v2262_v43  ;;  %v1727_v61 = vor.u32 %v1726_v41, %v1722_v30  ;;  %v7597_v19 = vpop.f32.mrf.mxu0 }
 0x1a1   : > { %v1494_v59 = vld [vmem:[#allocation2 + $0x6c] sm:$0xf]  ;;  %v2102_v62 = vrot.slane %v1982_v28, 5  ;;  %v2105_v63 = vrot.slane %v9145_v29, 5  ;;  %v9170_v0 = vld [vmem:[#allocation2 + $0x70] sm:$0xf]  ;;  %v1183_v3 = vor.u32 %v1181_v36, %v1180_v47  ;;  %v9193_v36 = vadd.f32 %v8972_v10, %v9156_v33 }
 0x1a2   : > { %v1428_v1 = vld [vmem:[#allocation2 + $0x94] sm:$0xf]  ;;  %v1185_v40 = vrot.slane %v1180_v47, 4  ;;  %v7449_v7 = vpack.c.bf16 %v860_v53, %v860_v53  ;;  %v861_v38 = vmax.f32 %v9149_v31, 0.0  ;;  %v1718_v45 = vrot.slane %v1717_v60, 4  ;;  %v8363_v44 = vld [vmem:[%s10684_s3 + $0x1c8] sm:$0xff]  }
 0x1a3   : > { %v8261_v2 = vld [vmem:[#allocation3 + $0x1fc] ss:$36 sps:$4 sm:$0xff]   ;;  %1460 = vst [vmem:[#allocation3 + $0x384] sm:$0xf] %v1428_v1  ;;  %v1728_v11 = vrot.slane %v1727_v61, 4  ;;  %v2103_v12 = vsel %vm8739_vm5, %v7111_v57, %v2102_v62  ;;  %v2104_v14 = vrot.slane %v2102_v62, 4  ;;  %v1184_v16 = vsel %vm8809_vm12, %v1176_v21, %v1183_v3 }
 0x1a4   : > { %v8264_v9 = vld [vmem:[#allocation3 + $0x1f8] ss:$36 sps:$4 sm:$0xff]   ;;  %5473 = vmatprep.mubr.bf16.mxu1 %v8261_v2  ;;  %v8267_v15 = vld [vmem:[#allocation3 + $0x12c] ss:$36 sps:$4 sm:$0xff]   ;;  %v1380_v20 = vsel %vm8813_vm13, %v1185_v40, %v1379_v48  ;;  %v1187_v17 = vshrl.u32 %v7449_v7, 16  ;;  %v1190_v18 = vshll.u32 %v7449_v7, 16  ;;  %v1723_v46 = vsel %vm8712_vm2, %v1718_v45, %v1722_v30 }
 0x1a5   : > { %2219 = vst [vmem:[#allocation3 + $0x170] sm:$0xf] %v2103_v12  ;;  %v8361_v22 = vld [vmem:[%s10684_s3 + $0x190] sm:$0xff]   ;;  %5474 = vmatmul.mubr.bf16.gmra.mxu1 %v8264_v9  ;;  %1378 = vst [vmem:[#allocation2 + $0xa0] sm:$0xf] %v1184_v16  ;;  %v1733_v56 = vsel %vm8712_vm2, %v1728_v11, %v1732_v49  ;;  %v2106_v24 = vsel %vm8739_vm5, %v2104_v14, %v2105_v63  ;;  %v7450_v26 = vpack.c.bf16 %v861_v38, %v861_v38  ;;  %v8366_v61 = vld [vmem:[%s10684_s3 + $0x188] sm:$0xff]  }
 0x1a6   : > { %1381 = vst [vmem:[#allocation2 + $0xa4] sm:$0x1] %v1380_v20  ;;  %v8272_v23 = vld [vmem:[#allocation3 + $0x128] ss:$36 sps:$4 sm:$0xff]   ;;  %5610 = vmatprep.mubr.bf16.mxu0 %v8267_v15  ;;  %1950 = vst [vmem:[#allocation3 + $0x244] sm:$0xf] %v1723_v46  ;;  %7946 = vmatpush3.bf16.msra.mxu0 %v8361_v22  ;;  %v820_v21 = vadd.f32 %v8972_v10, %v9153_v32  ;;  %v9197_v50 = vadd.f32 %v7597_v19, %v7596_v58 }
 0x1a7   : > { %1951 = vst [vmem:[#allocation3 + $0x268] sm:$0xf] %v1733_v56  ;;  %v1189_v13 = vrot.slane %v1187_v17, 7  ;;  %2220 = vst [vmem:[#allocation3 + $0x194] sm:$0xf] %v2106_v24  ;;  %v1735_v25 = vshrl.u32 %v1494_v59, 16  ;;  %5611 = vmatmul.mubr.bf16.gmra.mxu0 %v8272_v23  ;;  %7947 = vmatprep.subr.bf16.mxu0 %v8363_v44  ;;  %v828_v56 = vadd.f32 %v8972_v10, %v7595_v37 }
 0x1a8   : > { %v1738_v28 = vshll.u32 %v1494_v59, 16  ;;  %v1744_v29 = vshll.u32 %v9170_v0, 16  ;;  %v1382_v31 = vld [vmem:[#allocation2 + $0xa8] sm:$0xf]  ;;  %v1496_v34 = vld [vmem:[#allocation2 + $0x74] sm:$0x1] }
 0x1a9   : > { %v1984_v35 = vld [vmem:[#allocation2 + $0x48] sm:$0xe]  ;;  %v1192_v5 = vor.u32 %v1190_v18, %v1189_v13  ;;  %v1193_v52 = vrot.slane %v1189_v13, 4  ;;  %v1195_v30 = vshrl.u32 %v7450_v26, 16  ;;  %v1198_v41 = vshll.u32 %v7450_v26, 16 }
 0x1aa   : > { %v1985_v43 = vld [vmem:[#allocation2 + $0x4c] sm:$0xf]  ;;  %v1386_v32 = vld [vmem:[#allocation2 + $0xb0] sm:$0x1]  ;;  %v1737_v47 = vrot.slane %v1735_v25, 4  ;;  %v1740_v48 = vrot.slane %v1738_v28, 5  ;;  %7948 = vmatpush3.bf16.msra.mxu0 %v8366_v61 }
 0x1ab   : > { %v1746_v49 = vrot.slane %v1744_v29, 5  ;;  %v1748_v33 = vshrl.u32 %v9170_v0, 16  ;;  %v1429_v53 = vld [vmem:[#allocation2 + $0x9c] sm:$0xf]  ;;  %v1383_v6 = vsel %vm8803_vm8, %v1192_v5, %v1382_v31  ;;  %v1197_v27 = vrot.slane %v1195_v30, 7  ;;  %v8370_v28 = vld [vmem:[%s10684_s3 + $0x1c0] sm:$0xff]  }
 0x1ac   : > { %v1754_v57 = vshll.u32 %v1496_v34, 16  ;;  %v862_v58 = vmax.f32 %v820_v21, 0.0  ;;  %v1986_v59 = vld [vmem:[#allocation2 + $0x50] sm:$0x1]  ;;  %1461 = vst [vmem:[#allocation3 + $0x3a8] sm:$0xf] %v1429_v53  ;;  %v1741_v63 = vor.u32 %v1740_v48, %v1737_v47  ;;  %7949 = vmatprep.subr.bf16.mxu0 %v8370_v28  ;;  %v831_v48 = vadd.f32 %v8972_v10, %v9197_v50 }
 0x1ad   : > { %v2263_v60 = vld [vmem:[#allocation2 + $0x90] sm:$0xf]  ;;  %v9208_v62 = vld [vmem:[#allocation2 + $0x78] sm:$0xf]  ;;  %1384 = vst [vmem:[#allocation2 + $0xa8] sm:$0xf] %v1383_v6  ;;  %v1200_v40 = vor.u32 %v1198_v41, %v1197_v27 }
 0x1ae   : > { %v1750_v0 = vrot.slane %v1748_v33, 4  ;;  %v7112_v1 = vrot.slane %v1984_v35, 9  ;;  %v2109_v2 = vrot.slane %v1985_v43, 5  ;;  %v2264_v3 = vld [vmem:[#allocation2 + $0x94] sm:$0xf]  ;;  %v1202_v7 = vrot.slane %v1197_v27, 4 }
 0x1af   : > { %2295 = vst [vmem:[#allocation3 + $0x324] sm:$0xf] %v2263_v60  ;;  %v1756_v38 = vrot.slane %v1754_v57, 5  ;;  %v7451_v9 = vpack.c.bf16 %v862_v58, %v862_v58  ;;  %v1498_v45 = vld [vmem:[#allocation2 + $0x7c] sm:$0xf]  ;;  %v1742_v14 = vrot.slane %v1741_v63, 4  ;;  %v1201_v19 = vsel %vm8809_vm12, %v1193_v52, %v1200_v40 }
 0x1b0   : > { %v1430_v11 = vld [vmem:[#allocation2 + $0xa0] sm:$0xf]  ;;  %2296 = vst [vmem:[#allocation3 + $0x348] sm:$0xf] %v2264_v3  ;;  %v1751_v15 = vor.u32 %v1750_v0, %v1746_v49  ;;  %v2110_v16 = vsel %vm8739_vm5, %v7112_v1, %v2109_v2  ;;  %v2111_v20 = vrot.slane %v2109_v2, 4  ;;  %v1387_v22 = vsel %vm8813_vm13, %v1202_v7, %v1386_v32 }
 0x1b1   : > { %v8269_v12 = vld [vmem:[#allocation3 + $0x244] ss:$36 sps:$4 sm:$0xff]   ;;  %1462 = vst [vmem:[#allocation3 + $0x3cc] sm:$0xf] %v1430_v11  ;;  %v8273_v18 = vld [vmem:[#allocation3 + $0x174] ss:$36 sps:$4 sm:$0xff]   ;;  %v1747_v23 = vsel %vm8712_vm2, %v1742_v14, %v1746_v49 }
 0x1b2   : > { %v8271_v17 = vld [vmem:[#allocation3 + $0x240] ss:$36 sps:$4 sm:$0xff]   ;;  %v1204_v46 = vshrl.u32 %v7451_v9, 16  ;;  %2221 = vst [vmem:[#allocation3 + $0x1b8] sm:$0xf] %v2110_v16  ;;  %5481 = vmatprep.mubr.bf16.mxu1 %v8269_v12  ;;  %v1752_v24 = vrot.slane %v1751_v15, 4  ;;  %5618 = vmatprep.mubr.bf16.mxu0 %v8273_v18 }
 0x1b3   : > { %1385 = vst [vmem:[#allocation2 + $0xac] sm:$0xf] %v1201_v19  ;;  %1388 = vst [vmem:[#allocation2 + $0xb0] sm:$0x1] %v1387_v22  ;;  %v1207_v26 = vshll.u32 %v7451_v9, 16  ;;  %v2112_v25 = vrot.slane %v1986_v59, 5  ;;  %5482 = vmatmul.mubr.bf16.gmra.mxu1 %v8271_v17 }
 0x1b4   : > { %v8280_v13 = vld [vmem:[#allocation3 + $0x170] ss:$36 sps:$4 sm:$0xff]   ;;  %1952 = vst [vmem:[#allocation3 + $0x28c] sm:$0xf] %v1747_v23  ;;  %v9222_v29 = vrot.slane %v1204_v46, 7  ;;  %v863_v31 = vmax.f32 %v9193_v36, 0.0  ;;  %v1757_v35 = vsel %vm8712_vm2, %v1752_v24, %v1756_v38 }
 0x1b5   : > { %v1759_v34 = vshrl.u32 %v9208_v62, 16  ;;  %v1762_v21 = vshll.u32 %v9208_v62, 16  ;;  %v1389_v37 = vld [vmem:[#allocation2 + $0xb4] sm:$0xf]  ;;  %5619 = vmatmul.mubr.bf16.gmra.mxu0 %v8280_v13  ;;  %v2113_v5 = vsel %vm8739_vm5, %v2111_v20, %v2112_v25  ;;  %v1768_v52 = vshll.u32 %v1498_v45, 16  ;;  %v8371_v61 = vld [vmem:[%s10684_s3 + $0x180] sm:$0xff]  }
 0x1b6   : > { %v1772_v30 = vshrl.u32 %v1498_v45, 16  ;;  %v1987_v41 = vld [vmem:[#allocation2 + $0x54] sm:$0xe]  ;;  %1953 = vst [vmem:[#allocation3 + $0x2b0] sm:$0xf] %v1757_v35  ;;  %v1209_v43 = vor.u32 %v1207_v26, %v9222_v29  ;;  %v7452_v36 = vpack.c.bf16 %v863_v31, %v863_v31  ;;  %v1210_v49 = vrot.slane %v9222_v29, 4  ;;  %7950 = vmatpush3.bf16.msra.mxu0 %v8371_v61 }
 0x1b7   : > { %2222 = vst [vmem:[#allocation3 + $0x1dc] sm:$0xf] %v2113_v5  ;;  %v1499_v44 = vld [vmem:[#allocation2 + $0x80] sm:$0x1]  ;;  %v1988_v32 = vld [vmem:[#allocation2 + $0x58] sm:$0xf] }
 0x1b8   : > { %v9232_v47 = vld [vmem:[#allocation2 + $0x5c] sm:$0x1]  ;;  %v1761_v33 = vrot.slane %v1759_v34, 4  ;;  %v1764_v53 = vrot.slane %v1762_v21, 5  ;;  %v1770_v6 = vrot.slane %v1768_v52, 5  ;;  %v1390_v57 = vsel %vm8803_vm8, %v1209_v43, %v1389_v37 }
 0x1b9   : > { %v1431_v27 = vld [vmem:[#allocation2 + $0xa8] sm:$0xf]  ;;  %v1212_v58 = vshrl.u32 %v7452_v36, 16  ;;  %v1215_v59 = vshll.u32 %v7452_v36, 16  ;;  %v1774_v60 = vrot.slane %v1772_v30, 4  ;;  %v1778_v10 = vshll.u32 %v1499_v44, 16 }
 0x1ba   : > { %1463 = vst [vmem:[#allocation3 + $0x3f0] sm:$0xf] %v1431_v27  ;;  %1391 = vst [vmem:[#allocation2 + $0xb4] sm:$0xf] %v1390_v57  ;;  %v1765_v62 = vor.u32 %v1764_v53, %v1761_v33  ;;  %v864_v50 = vmax.f32 %v828_v56, 0.0  ;;  %v7113_v63 = vrot.slane %v1987_v41, 9 }
 0x1bb   : > { %v2265_v0 = vld [vmem:[#allocation2 + $0x9c] sm:$0xf]  ;;  %v1214_v1 = vrot.slane %v1212_v58, 7  ;;  %v1775_v2 = vor.u32 %v1774_v60, %v1770_v6  ;;  %v2116_v3 = vrot.slane %v1988_v32, 5  ;;  %v2119_v40 = vrot.slane %v9232_v47, 5 }
 0x1bc   : > { %v1432_v7 = vld [vmem:[#allocation2 + $0xac] sm:$0xf]  ;;  %2297 = vst [vmem:[#allocation3 + $0x36c] sm:$0xf] %v2265_v0  ;;  %v1393_v38 = vld [vmem:[#allocation2 + $0xbc] sm:$0x1]  ;;  %v7453_v11 = vpack.c.bf16 %v864_v50, %v864_v50 }
 0x1bd   : > { %v1766_v9 = vrot.slane %v1765_v62, 4  ;;  %v1780_v45 = vrot.slane %v1778_v10, 5  ;;  %v865_v12 = vmax.f32 %v831_v48, 0.0  ;;  %1464 = vst [vmem:[#allocation3 + $0x414] sm:$0xf] %v1432_v7  ;;  %v1217_v14 = vor.u32 %v1215_v59, %v1214_v1 }
 0x1be   : > { %v1219_v15 = vrot.slane %v1214_v1, 4  ;;  %v1776_v16 = vrot.slane %v1775_v2, 4  ;;  %v2117_v20 = vsel %vm8739_vm5, %v7113_v63, %v2116_v3  ;;  %v2266_v17 = vld [vmem:[#allocation2 + $0xa0] sm:$0xf]  ;;  %v1500_v18 = vld [vmem:[#allocation2 + $0x84] sm:$0xf] }
 0x1bf   : > { %v8277_v19 = vld [vmem:[#allocation3 + $0x28c] ss:$36 sps:$4 sm:$0xff]   ;;  %v1771_v46 = vsel %vm8712_vm2, %v1766_v9, %v1770_v6  ;;  %v1221_v56 = vshrl.u32 %v7453_v11, 16  ;;  %2223 = vst [vmem:[#allocation3 + $0x200] sm:$0xf] %v2117_v20  ;;  %v7454_v23 = vpack.c.bf16 %v865_v12, %v865_v12  ;;  %v1218_v26 = vsel %vm8809_vm12, %v1210_v49, %v1217_v14 }
 0x1c0   : > { %v8279_v22 = vld [vmem:[#allocation3 + $0x288] ss:$36 sps:$4 sm:$0xff]   ;;  %2298 = vst [vmem:[#allocation3 + $0x390] sm:$0xf] %v2266_v17  ;;  %v8281_v24 = vld [vmem:[#allocation3 + $0x1bc] ss:$36 sps:$4 sm:$0xff]   ;;  %v1394_v13 = vsel %vm8813_vm13, %v1219_v15, %v1393_v38  ;;  %v1781_v25 = vsel %vm8712_vm2, %v1776_v16, %v1780_v45  ;;  %5489 = vmatprep.mubr.bf16.mxu1 %v8277_v19 }
 0x1c1   : > { %1954 = vst [vmem:[#allocation3 + $0x2d4] sm:$0xf] %v1771_v46  ;;  %v1224_v28 = vshll.u32 %v7453_v11, 16  ;;  %v1396_v29 = vld [vmem:[#allocation2 + $0xc0] sm:$0xf]  ;;  %v1223_v34 = vrot.slane %v1221_v56, 7  ;;  %5490 = vmatmul.mubr.bf16.gmra.mxu1 %v8279_v22  ;;  %5626 = vmatprep.mubr.bf16.mxu0 %v8281_v24 }
 0x1c2   : > { %v1501_v31 = vld [vmem:[#allocation2 + $0x88] sm:$0xf]  ;;  %1392 = vst [vmem:[#allocation2 + $0xb8] sm:$0xf] %v1218_v26  ;;  %1395 = vst [vmem:[#allocation2 + $0xbc] sm:$0x1] %v1394_v13 }
 0x1c3   : > { %1955 = vst [vmem:[#allocation3 + $0x2f8] sm:$0xf] %v1781_v25  ;;  %v8287_v21 = vld [vmem:[#allocation3 + $0x1b8] ss:$36 sps:$4 sm:$0xff]   ;;  %v2118_v35 = vrot.slane %v2116_v3, 4  ;;  %v1229_v37 = vshrl.u32 %v7454_v23, 16  ;;  %v1226_v43 = vor.u32 %v1224_v28, %v1223_v34 }
 0x1c4   : > { %v1232_v5 = vshll.u32 %v7454_v23, 16  ;;  %v1400_v52 = vld [vmem:[#allocation2 + $0xc8] sm:$0x1]  ;;  %v1502_v30 = vld [vmem:[#allocation2 + $0x8c] sm:$0x1]  ;;  %v1227_v36 = vrot.slane %v1223_v34, 4  ;;  %5627 = vmatmul.mubr.bf16.gmra.mxu0 %v8287_v21 }
 0x1c5   : > { %v1990_v41 = vld [vmem:[#allocation2 + $0x60] sm:$0xe]  ;;  %v2120_v44 = vsel %vm8739_vm5, %v2118_v35, %v2119_v40  ;;  %v1231_v32 = vrot.slane %v1229_v37, 7  ;;  %v1991_v47 = vld [vmem:[#allocation2 + $0x64] sm:$0xf]  ;;  %v1783_v49 = vshrl.u32 %v1500_v18, 16  ;;  %v1397_v58 = vsel %vm8803_vm8, %v1226_v43, %v1396_v29 }
 0x1c6   : > { %v1433_v48 = vld [vmem:[#allocation2 + $0xb4] sm:$0xf]  ;;  %2224 = vst [vmem:[#allocation3 + $0x224] sm:$0xf] %v2120_v44  ;;  %v1786_v33 = vshll.u32 %v1500_v18, 16  ;;  %v1792_v53 = vshll.u32 %v1501_v31, 16 }
 0x1c7   : > { %v1796_v6 = vshrl.u32 %v1501_v31, 16  ;;  %v1992_v27 = vld [vmem:[#allocation2 + $0x68] sm:$0x1]  ;;  %1465 = vst [vmem:[#allocation3 + $0x438] sm:$0xf] %v1433_v48  ;;  %v1234_v59 = vor.u32 %v1232_v5, %v1231_v32  ;;  %v1236_v60 = vrot.slane %v1231_v32, 4  ;;  %v7615_v32 = vpop.f32.mrf.mxu0 }
 0x1c8   : > { %v1503_v57 = vld [vmem:[#allocation2 + $0x90] sm:$0xf]  ;;  %v1802_v61 = vshll.u32 %v1502_v30, 16  ;;  %v1504_v62 = vld [vmem:[#allocation2 + $0x94] sm:$0xf]  ;;  %v1785_v10 = vrot.slane %v1783_v49, 4 }
 0x1c9   : > { %1398 = vst [vmem:[#allocation2 + $0xc0] sm:$0xf] %v1397_v58  ;;  %v1788_v50 = vrot.slane %v1786_v33, 5  ;;  %v1794_v63 = vrot.slane %v1792_v53, 5  ;;  %v1798_v0 = vrot.slane %v1796_v6, 4  ;;  %v1235_v1 = vsel %vm8809_vm12, %v1227_v36, %v1234_v59 }
 0x1ca   : > { %v1401_v2 = vsel %vm8813_vm13, %v1236_v60, %v1400_v52  ;;  %v1804_v3 = vrot.slane %v1802_v61, 5  ;;  %v7114_v40 = vrot.slane %v1990_v41, 9  ;;  %v8283_v7 = vld [vmem:[#allocation3 + $0x2d4] ss:$36 sps:$4 sm:$0xff]   ;;  %1399 = vst [vmem:[#allocation2 + $0xc4] sm:$0xf] %v1235_v1 }
 0x1cb   : > { %v8286_v42 = vld [vmem:[#allocation3 + $0x2d0] ss:$36 sps:$4 sm:$0xff]   ;;  %1402 = vst [vmem:[#allocation2 + $0xc8] sm:$0x1] %v1401_v2  ;;  %v1789_v38 = vor.u32 %v1788_v50, %v1785_v10  ;;  %v1799_v9 = vor.u32 %v1798_v0, %v1794_v63  ;;  %v2123_v45 = vrot.slane %v1991_v47, 5  ;;  %v2126_v11 = vrot.slane %v1992_v27, 5  ;;  %5497 = vmatprep.mubr.bf16.mxu1 %v8283_v7 }
 0x1cc   : > { %v1807_v12 = vshrl.u32 %v1503_v57, 16  ;;  %v1810_v14 = vshll.u32 %v1503_v57, 16  ;;  %v1816_v15 = vshll.u32 %v1504_v62, 16  ;;  %v1993_v16 = vld [vmem:[#allocation2 + $0x6c] sm:$0xe]  ;;  %5498 = vmatmul.mubr.bf16.gmra.mxu1 %v8286_v42  ;;  %v1820_v31 = vshrl.u32 %v1504_v62, 16  ;;  %v7616_v42 = vpop.f32.mrf.mxu0 }
 0x1cd   : > { %v1434_v20 = vld [vmem:[#allocation2 + $0xb8] sm:$0xf]  ;;  %v1790_v51 = vrot.slane %v1789_v38, 4  ;;  %v1800_v17 = vrot.slane %v1799_v9, 4  ;;  %v2124_v55 = vsel %vm8739_vm5, %v7114_v40, %v2123_v45  ;;  %v2125_v18 = vrot.slane %v2123_v45, 4 }
 0x1ce   : > { %v1994_v19 = vld [vmem:[#allocation2 + $0x70] sm:$0xf]  ;;  %1466 = vst [vmem:[#allocation3 + $0x45c] sm:$0xf] %v1434_v20  ;;  %v8289_v22 = vld [vmem:[#allocation3 + $0x204] ss:$36 sps:$4 sm:$0xff]  }
 0x1cf   : > { %2225 = vst [vmem:[#allocation3 + $0x248] sm:$0xf] %v2124_v55  ;;  %v1505_v46 = vld [vmem:[#allocation2 + $0x98] sm:$0x1]  ;;  %v1809_v56 = vrot.slane %v1807_v12, 4  ;;  %v1795_v24 = vsel %vm8712_vm2, %v1790_v51, %v1794_v63  ;;  %v1805_v26 = vsel %vm8712_vm2, %v1800_v17, %v1804_v3  ;;  %v2127_v25 = vsel %vm8739_vm5, %v2125_v18, %v2126_v11  ;;  %5634 = vmatprep.mubr.bf16.mxu0 %v8289_v22 }
 0x1d0   : > { %v1506_v23 = vld [vmem:[#allocation2 + $0x9c] sm:$0xf]  ;;  %v1812_v28 = vrot.slane %v1810_v14, 5  ;;  %1956 = vst [vmem:[#allocation3 + $0x31c] sm:$0xf] %v1795_v24  ;;  %v1818_v29 = vrot.slane %v1816_v15, 5  ;;  %v9275_v11 = vadd.f32 %v7616_v42, %v7615_v32 }
 0x1d1   : > { %v8294_v13 = vld [vmem:[#allocation3 + $0x200] ss:$36 sps:$4 sm:$0xff]   ;;  %1957 = vst [vmem:[#allocation3 + $0x340] sm:$0xf] %v1805_v26  ;;  %2226 = vst [vmem:[#allocation3 + $0x26c] sm:$0xf] %v2127_v25 }
 0x1d2   : > { %v1995_v34 = vld [vmem:[#allocation2 + $0x74] sm:$0x1]  ;;  %5635 = vmatmul.mubr.bf16.gmra.mxu0 %v8294_v13  ;;  %v1813_v21 = vor.u32 %v1812_v28, %v1809_v56  ;;  %v7115_v35 = vrot.slane %v1993_v16, 9  ;;  %v2130_v37 = vrot.slane %v1994_v19, 5  ;;  %v1507_v5 = vld [vmem:[#allocation2 + $0xa0] sm:$0xf] }
 0x1d3   : > { %v1508_v52 = vld [vmem:[#allocation2 + $0xa4] sm:$0x1]  ;;  %v1822_v30 = vrot.slane %v1820_v31, 4  ;;  %v1826_v41 = vshll.u32 %v1505_v46, 16  ;;  %v1831_v43 = vshrl.u32 %v1506_v23, 16  ;;  %v1834_v36 = vshll.u32 %v1506_v23, 16 }
 0x1d4   : > { %v2267_v44 = vld [vmem:[#allocation2 + $0xa8] sm:$0xf]  ;;  %v1814_v47 = vrot.slane %v1813_v21, 4  ;;  %v2131_v48 = vsel %vm8739_vm5, %v7115_v35, %v2130_v37  ;;  %v2132_v49 = vrot.slane %v2130_v37, 4  ;;  %v2133_v33 = vrot.slane %v1995_v34, 5 }
 0x1d5   : > { %v1996_v53 = vld [vmem:[#allocation2 + $0x78] sm:$0xe]  ;;  %v2268_v6 = vld [vmem:[#allocation2 + $0xac] sm:$0xf]  ;;  %2299 = vst [vmem:[#allocation3 + $0x3b4] sm:$0xf] %v2267_v44  ;;  %v1823_v27 = vor.u32 %v1822_v30, %v1818_v29 }
 0x1d6   : > { %2227 = vst [vmem:[#allocation3 + $0x290] sm:$0xf] %v2131_v48  ;;  %v1833_v57 = vrot.slane %v1831_v43, 4  ;;  %v1836_v58 = vrot.slane %v1834_v36, 5  ;;  %v1840_v59 = vshll.u32 %v1507_v5, 16  ;;  %v1819_v10 = vsel %vm8712_vm2, %v1814_v47, %v1818_v29 }
 0x1d7   : > { %v1997_v60 = vld [vmem:[#allocation2 + $0x7c] sm:$0xf]  ;;  %v1998_v61 = vld [vmem:[#allocation2 + $0x80] sm:$0x1]  ;;  %2300 = vst [vmem:[#allocation3 + $0x3d8] sm:$0xf] %v2268_v6  ;;  %v2134_v50 = vsel %vm8739_vm5, %v2132_v49, %v2133_v33 }
 0x1d8   : > { %v1509_v62 = vld [vmem:[#allocation2 + $0xa8] sm:$0xf]  ;;  %v1844_v63 = vshrl.u32 %v1507_v5, 16  ;;  %v1850_v0 = vshll.u32 %v1508_v52, 16  ;;  %v1824_v1 = vrot.slane %v1823_v27, 4  ;;  %v1828_v2 = vrot.slane %v1826_v41, 5 }
 0x1d9   : > { %1958 = vst [vmem:[#allocation3 + $0x364] sm:$0xf] %v1819_v10  ;;  %2228 = vst [vmem:[#allocation3 + $0x2b4] sm:$0xf] %v2134_v50  ;;  %v1837_v3 = vor.u32 %v1836_v58, %v1833_v57  ;;  %v1842_v40 = vrot.slane %v1840_v59, 5  ;;  %v7116_v20 = vrot.slane %v1996_v53, 9 }
 0x1da   : > { %v1510_v7 = vld [vmem:[#allocation2 + $0xac] sm:$0xf]  ;;  %v8291_v38 = vld [vmem:[#allocation3 + $0x31c] ss:$36 sps:$4 sm:$0xff]   ;;  %v1846_v9 = vrot.slane %v1844_v63, 4  ;;  %v1829_v14 = vsel %vm8712_vm2, %v1824_v1, %v1828_v2  ;;  %v1852_v16 = vrot.slane %v1850_v0, 5 }
 0x1db   : > { %v1511_v45 = vld [vmem:[#allocation2 + $0xb0] sm:$0x1]  ;;  %v1838_v15 = vrot.slane %v1837_v3, 4  ;;  %v1999_v51 = vld [vmem:[#allocation2 + $0x84] sm:$0xe]  ;;  %5505 = vmatprep.mubr.bf16.mxu1 %v8291_v38  ;;  %v2137_v19 = vrot.slane %v1997_v60, 5 }
 0x1dc   : > { %v8293_v12 = vld [vmem:[#allocation3 + $0x318] ss:$36 sps:$4 sm:$0xff]   ;;  %v2000_v17 = vld [vmem:[#allocation2 + $0x88] sm:$0xf]  ;;  %1959 = vst [vmem:[#allocation3 + $0x388] sm:$0xf] %v1829_v14  ;;  %v1847_v18 = vor.u32 %v1846_v9, %v1842_v40 }
 0x1dd   : > { %v8297_v55 = vld [vmem:[#allocation3 + $0x24c] ss:$36 sps:$4 sm:$0xff]   ;;  %v2140_v22 = vrot.slane %v1998_v61, 5  ;;  %v1855_v46 = vshrl.u32 %v1509_v62, 16  ;;  %5506 = vmatmul.mubr.bf16.gmra.mxu1 %v8293_v12  ;;  %v1843_v23 = vsel %vm8712_vm2, %v1838_v15, %v1842_v40  ;;  %v1858_v24 = vshll.u32 %v1509_v62, 16 }
 0x1de   : > { %v8295_v56 = vld [vmem:[#allocation3 + $0x248] ss:$36 sps:$4 sm:$0xff]   ;;  %v1864_v26 = vshll.u32 %v1510_v7, 16  ;;  %v1868_v13 = vshrl.u32 %v1510_v7, 16  ;;  %5642 = vmatprep.mubr.bf16.mxu0 %v8297_v55  ;;  %v1848_v25 = vrot.slane %v1847_v18, 4  ;;  %v2138_v28 = vsel %vm8739_vm5, %v7116_v20, %v2137_v19 }
 0x1df   : > { %1960 = vst [vmem:[#allocation3 + $0x3ac] sm:$0xf] %v1843_v23  ;;  %v2139_v29 = vrot.slane %v2137_v19, 4  ;;  %v1857_v31 = vrot.slane %v1855_v46, 4  ;;  %v2001_v34 = vld [vmem:[#allocation2 + $0x8c] sm:$0x1]  ;;  %5643 = vmatmul.mubr.bf16.gmra.mxu0 %v8295_v56 }
 0x1e0   : > { %v1512_v21 = vld [vmem:[#allocation2 + $0xb4] sm:$0xf]  ;;  %2229 = vst [vmem:[#allocation3 + $0x2d8] sm:$0xf] %v2138_v28  ;;  %v1860_v35 = vrot.slane %v1858_v24, 5  ;;  %v1866_v37 = vrot.slane %v1864_v26, 5  ;;  %v1853_v30 = vsel %vm8712_vm2, %v1848_v25, %v1852_v16 }
 0x1e1   : > { %v1870_v5 = vrot.slane %v1868_v13, 4  ;;  %v1874_v52 = vshll.u32 %v1511_v45, 16  ;;  %v2141_v41 = vsel %vm8739_vm5, %v2139_v29, %v2140_v22  ;;  %v7117_v43 = vrot.slane %v1999_v51, 9  ;;  %v8305_v44 = vld [vmem:[#allocation3 + $0x294] ss:$36 sps:$4 sm:$0xff]  }
 0x1e2   : > { %v2144_v36 = vrot.slane %v2000_v17, 5  ;;  %1961 = vst [vmem:[#allocation3 + $0x3d0] sm:$0xf] %v1853_v30  ;;  %2230 = vst [vmem:[#allocation3 + $0x2fc] sm:$0xf] %v2141_v41  ;;  %v1861_v32 = vor.u32 %v1860_v35, %v1857_v31  ;;  %v2147_v49 = vrot.slane %v2001_v34, 5  ;;  %5650 = vmatprep.mubr.bf16.mxu0 %v8305_v44 }
 0x1e3   : > { %v1871_v47 = vor.u32 %v1870_v5, %v1866_v37  ;;  %v1876_v48 = vrot.slane %v1874_v52, 5  ;;  %v1513_v33 = vld [vmem:[#allocation2 + $0xb8] sm:$0xf]  ;;  %v2002_v53 = vld [vmem:[#allocation2 + $0x90] sm:$0xe]  ;;  %v1879_v59 = vshrl.u32 %v1512_v21, 16 }
 0x1e4   : > { %v2003_v6 = vld [vmem:[#allocation2 + $0x94] sm:$0xf]  ;;  %v2145_v27 = vsel %vm8739_vm5, %v7117_v43, %v2144_v36  ;;  %v2146_v57 = vrot.slane %v2144_v36, 4  ;;  %v1514_v58 = vld [vmem:[#allocation2 + $0xbc] sm:$0x1]  ;;  %v1882_v60 = vshll.u32 %v1512_v21, 16 }
 0x1e5   : > { %v8300_v61 = vld [vmem:[#allocation3 + $0x364] ss:$36 sps:$4 sm:$0xff]   ;;  %v8303_v10 = vld [vmem:[#allocation3 + $0x290] ss:$36 sps:$4 sm:$0xff]   ;;  %v1862_v50 = vrot.slane %v1861_v32, 4  ;;  %v1872_v63 = vrot.slane %v1871_v47, 4 }
 0x1e6   : > { %v8302_v62 = vld [vmem:[#allocation3 + $0x360] ss:$36 sps:$4 sm:$0xff]   ;;  %2231 = vst [vmem:[#allocation3 + $0x320] sm:$0xf] %v2145_v27  ;;  %v2148_v0 = vsel %vm8739_vm5, %v2146_v57, %v2147_v49  ;;  %v1881_v1 = vrot.slane %v1879_v59, 4  ;;  %v1884_v2 = vrot.slane %v1882_v60, 5  ;;  %5513 = vmatprep.mubr.bf16.mxu1 %v8300_v61 }
 0x1e7   : > { %v2269_v3 = vld [vmem:[#allocation2 + $0xb4] sm:$0xf]  ;;  %v1867_v40 = vsel %vm8712_vm2, %v1862_v50, %v1866_v37  ;;  %2232 = vst [vmem:[#allocation3 + $0x344] sm:$0xf] %v2148_v0  ;;  %v1888_v7 = vshll.u32 %v1513_v33, 16  ;;  %v1892_v42 = vshrl.u32 %v1513_v33, 16  ;;  %5514 = vmatmul.mubr.bf16.gmra.mxu1 %v8302_v62  ;;  %v1877_v45 = vsel %vm8712_vm2, %v1872_v63, %v1876_v48  ;;  %5651 = vmatmul.mubr.bf16.gmra.mxu0 %v8303_v10 }
 0x1e8   : > { %v1898_v38 = vshll.u32 %v1514_v58, 16  ;;  %v2270_v9 = vld [vmem:[#allocation2 + $0xb8] sm:$0xf]  ;;  %2301 = vst [vmem:[#allocation3 + $0x3fc] sm:$0xf] %v2269_v3  ;;  %v1885_v12 = vor.u32 %v1884_v2, %v1881_v1  ;;  %v7118_v15 = vrot.slane %v2002_v53, 9 }
 0x1e9   : > { %1962 = vst [vmem:[#allocation3 + $0x3f4] sm:$0xf] %v1867_v40  ;;  %v2004_v14 = vld [vmem:[#allocation2 + $0x98] sm:$0x1]  ;;  %v2151_v16 = vrot.slane %v2003_v6, 5  ;;  %v1890_v51 = vrot.slane %v1888_v7, 5 }
 0x1ea   : > { %2302 = vst [vmem:[#allocation3 + $0x420] sm:$0xf] %v2270_v9  ;;  %v2305_v20 = vld [vmem:[#allocation2 + $0xc] sm:$0xf]  ;;  %1963 = vst [vmem:[#allocation3 + $0x418] sm:$0xf] %v1877_v45 }
 0x1eb   : > { %v1894_v17 = vrot.slane %v1892_v42, 4  ;;  %v2306_v55 = vld [vmem:[#allocation2 + $0x10] sm:$0xf]  ;;  %v8306_v18 = vld [vmem:[#allocation3 + $0x3ac] ss:$36 sps:$4 sm:$0xff]   ;;  %v1886_v19 = vrot.slane %v1885_v12, 4  ;;  %v2152_v22 = vsel %vm8739_vm5, %v7118_v15, %v2151_v16 }
 0x1ec   : > { %v2307_v46 = vld [vmem:[#allocation2 + $0x14] sm:$0x1]  ;;  %v1900_v24 = vrot.slane %v1898_v38, 5  ;;  %v2153_v26 = vrot.slane %v2151_v16, 4  ;;  %v2154_v13 = vrot.slane %v2004_v14, 5  ;;  %5521 = vmatprep.mubr.bf16.mxu1 %v8306_v18  ;;  %v2354_v29 = vshrl.u32 %v2305_v20, 16 }
 0x1ed   : > { %v8313_v56 = vld [vmem:[#allocation3 + $0x2dc] ss:$36 sps:$4 sm:$0xff]   ;;  %v1895_v23 = vor.u32 %v1894_v17, %v1890_v51  ;;  %2233 = vst [vmem:[#allocation3 + $0x368] sm:$0xf] %v2152_v22  ;;  %v8309_v25 = vld [vmem:[#allocation3 + $0x3a8] ss:$36 sps:$4 sm:$0xff]   ;;  %v1891_v28 = vsel %vm8712_vm2, %v1886_v19, %v1890_v51 }
 0x1ee   : > { %v2357_v31 = vshll.u32 %v2305_v20, 16  ;;  %v2363_v34 = vshll.u32 %v2306_v55, 16  ;;  %v2801_v21 = vld [vmem:[#allocation2 + $0xc] sm:$0xe]  ;;  %v2802_v35 = vld [vmem:[#allocation2 + $0x10] sm:$0xf]  ;;  %5658 = vmatprep.mubr.bf16.mxu0 %v8313_v56  ;;  %v2155_v5 = vsel %vm8739_vm5, %v2153_v26, %v2154_v13 }
 0x1ef   : > { %v1896_v37 = vrot.slane %v1895_v23, 4  ;;  %1964 = vst [vmem:[#allocation3 + $0x43c] sm:$0xf] %v1891_v28  ;;  %v2367_v52 = vshrl.u32 %v2306_v55, 16  ;;  %v2373_v30 = vshll.u32 %v2307_v46, 16  ;;  %v2356_v36 = vrot.slane %v2354_v29, 4  ;;  %5522 = vmatmul.mubr.bf16.gmra.mxu1 %v8309_v25 }
 0x1f0   : > { %v2803_v41 = vld [vmem:[#allocation2 + $0x14] sm:$0x1]  ;;  %v2005_v43 = vld [vmem:[#allocation2 + $0x9c] sm:$0xe]  ;;  %2234 = vst [vmem:[#allocation3 + $0x38c] sm:$0xf] %v2155_v5 }
 0x1f1   : > { %v2006_v44 = vld [vmem:[#allocation2 + $0xa0] sm:$0xf]  ;;  %v2007_v32 = vld [vmem:[#allocation2 + $0xa4] sm:$0x1]  ;;  %v8311_v47 = vld [vmem:[#allocation3 + $0x2d8] ss:$36 sps:$4 sm:$0xff]   ;;  %v1901_v48 = vsel %vm8712_vm2, %v1896_v37, %v1900_v24 }
 0x1f2   : > { %v2359_v49 = vrot.slane %v2357_v31, 5  ;;  %v2365_v33 = vrot.slane %v2363_v34, 5  ;;  %v2369_v53 = vrot.slane %v2367_v52, 4  ;;  %v8314_v6 = vld [vmem:[#allocation3 + $0x3f4] ss:$36 sps:$4 sm:$0xff]   ;;  %v2375_v57 = vrot.slane %v2373_v30, 5  ;;  %5659 = vmatmul.mubr.bf16.gmra.mxu0 %v8311_v47 }
 0x1f3   : > { %v8319_v27 = vld [vmem:[#allocation3 + $0x324] ss:$36 sps:$4 sm:$0xff]   ;;  %1965 = vst [vmem:[#allocation3 + $0x460] sm:$0xf] %v1901_v48  ;;  %v2308_v58 = vld [vmem:[#allocation2 + $0x18] sm:$0xf]  ;;  %5529 = vmatprep.mubr.bf16.mxu1 %v8314_v6 }
 0x1f4   : > { %v2360_v59 = vor.u32 %v2359_v49, %v2356_v36  ;;  %v2370_v60 = vor.u32 %v2369_v53, %v2365_v33  ;;  %v7122_v61 = vrot.slane %v2801_v21, 9  ;;  %v2899_v62 = vrot.slane %v2802_v35, 5  ;;  %v2309_v10 = vld [vmem:[#allocation2 + $0x1c] sm:$0xf]  ;;  %5666 = vmatprep.mubr.bf16.mxu0 %v8319_v27  ;;  %v8316_v2 = vld [vmem:[#allocation3 + $0x3f0] ss:$36 sps:$4 sm:$0xff]  }
 0x1f5   : > { %v2902_v50 = vrot.slane %v2803_v41, 5  ;;  %v7119_v63 = vrot.slane %v2005_v43, 9  ;;  %v2158_v0 = vrot.slane %v2006_v44, 5  ;;  %v2161_v1 = vrot.slane %v2007_v32, 5  ;;  %v2310_v38 = vld [vmem:[#allocation2 + $0x20] sm:$0x1] }
 0x1f6   : > { %v2361_v3 = vrot.slane %v2360_v59, 4  ;;  %v2371_v40 = vrot.slane %v2370_v60, 4  ;;  %v2900_v7 = vsel %vm8739_vm5, %v7122_v61, %v2899_v62  ;;  %v2901_v42 = vrot.slane %v2899_v62, 4  ;;  %v2804_v9 = vld [vmem:[#allocation2 + $0x18] sm:$0xe] }
 0x1f7   : > { %3041 = vst [vmem:[#allocation3 + $0x14] sm:$0xf] %v2900_v7  ;;  %v2159_v45 = vsel %vm8739_vm5, %v7119_v63, %v2158_v0  ;;  %v2160_v12 = vrot.slane %v2158_v0, 4  ;;  %v2378_v14 = vshrl.u32 %v2308_v58, 16  ;;  %v2381_v15 = vshll.u32 %v2308_v58, 16  ;;  %5530 = vmatmul.mubr.bf16.gmra.mxu1 %v8316_v2 }
 0x1f8   : > { %v2805_v16 = vld [vmem:[#allocation2 + $0x1c] sm:$0xf]  ;;  %v9307_v20 = vld [vmem:[#allocation2 + $0x20] sm:$0x1]  ;;  %v2008_v51 = vld [vmem:[#allocation2 + $0xa8] sm:$0xe]  ;;  %v2366_v55 = vsel %vm8712_vm2, %v2361_v3, %v2365_v33  ;;  %v2376_v18 = vsel %vm8712_vm2, %v2371_v40, %v2375_v57  ;;  %v2903_v19 = vsel %vm8739_vm5, %v2901_v42, %v2902_v50 }
 0x1f9   : > { %v2271_v17 = vld [vmem:[#allocation2 + $0xc0] sm:$0xf]  ;;  %2235 = vst [vmem:[#allocation3 + $0x3b0] sm:$0xf] %v2159_v45  ;;  %v2387_v22 = vshll.u32 %v2309_v10, 16  ;;  %v2162_v23 = vsel %vm8739_vm5, %v2160_v12, %v2161_v1  ;;  %v2380_v24 = vrot.slane %v2378_v14, 4 }
 0x1fa   : > { %v2009_v46 = vld [vmem:[#allocation2 + $0xac] sm:$0xf]  ;;  %v2010_v56 = vld [vmem:[#allocation2 + $0xb0] sm:$0x1]  ;;  %2303 = vst [vmem:[#allocation3 + $0x444] sm:$0xf] %v2271_v17 }
 0x1fb   : > { %2769 = vst [vmem:[#allocation3 + $0x10] sm:$0xf] %v2366_v55  ;;  %2770 = vst [vmem:[#allocation3 + $0x34] sm:$0xf] %v2376_v18  ;;  %v2383_v26 = vrot.slane %v2381_v15, 5  ;;  %v2391_v13 = vshrl.u32 %v2309_v10, 16 }
 0x1fc   : > { %3042 = vst [vmem:[#allocation3 + $0x38] sm:$0xf] %v2903_v19  ;;  %v2272_v25 = vld [vmem:[#allocation2 + $0xc4] sm:$0xf]  ;;  %v8317_v29 = vld [vmem:[#allocation3 + $0x320] ss:$36 sps:$4 sm:$0xff]  }
 0x1fd   : > { %v2311_v28 = vld [vmem:[#allocation2 + $0x24] sm:$0xf]  ;;  %v8322_v31 = vld [vmem:[#allocation3 + $0x43c] ss:$36 sps:$4 sm:$0xff]   ;;  %2236 = vst [vmem:[#allocation3 + $0x3d4] sm:$0xf] %v2162_v23  ;;  %v2384_v35 = vor.u32 %v2383_v26, %v2380_v24  ;;  %5667 = vmatmul.mubr.bf16.gmra.mxu0 %v8317_v29 }
 0x1fe   : > { %v2389_v34 = vrot.slane %v2387_v22, 5  ;;  %2304 = vst [vmem:[#allocation3 + $0x468] sm:$0xf] %v2272_v25  ;;  %v8327_v21 = vld [vmem:[#allocation3 + $0x36c] ss:$36 sps:$4 sm:$0xff]   ;;  %v2393_v37 = vrot.slane %v2391_v13, 4  ;;  %5537 = vmatprep.mubr.bf16.mxu1 %v8322_v31 }
 0x1ff   : > { %v2397_v5 = vshll.u32 %v2310_v38, 16  ;;  %v7123_v52 = vrot.slane %v2804_v9, 9  ;;  %v2906_v30 = vrot.slane %v2805_v16, 5  ;;  %v2909_v41 = vrot.slane %v9307_v20, 5  ;;  %v2312_v44 = vld [vmem:[#allocation2 + $0x28] sm:$0xf]  ;;  %5674 = vmatprep.mubr.bf16.mxu0 %v8327_v21 }
 0x200   : > { %v7120_v43 = vrot.slane %v2008_v51, 9  ;;  %v2165_v36 = vrot.slane %v2009_v46, 5  ;;  %v2385_v32 = vrot.slane %v2384_v35, 4  ;;  %v2394_v47 = vor.u32 %v2393_v37, %v2389_v34  ;;  %v2313_v33 = vld [vmem:[#allocation2 + $0x2c] sm:$0x1] }
 0x201   : > { %v2399_v48 = vrot.slane %v2397_v5, 5  ;;  %v2168_v49 = vrot.slane %v2010_v56, 5  ;;  %v2907_v53 = vsel %vm8739_vm5, %v7123_v52, %v2906_v30  ;;  %v2908_v6 = vrot.slane %v2906_v30, 4  ;;  %v2807_v58 = vld [vmem:[#allocation2 + $0x24] sm:$0xe] }
 0x202   : > { %v2166_v27 = vsel %vm8739_vm5, %v7120_v43, %v2165_v36  ;;  %v2167_v57 = vrot.slane %v2165_v36, 4  ;;  %v2808_v59 = vld [vmem:[#allocation2 + $0x28] sm:$0xf]  ;;  %v2809_v60 = vld [vmem:[#allocation2 + $0x2c] sm:$0x1]  ;;  %v2390_v10 = vsel %vm8712_vm2, %v2385_v32, %v2389_v34  ;;  %v2395_v50 = vrot.slane %v2394_v47, 4 }
 0x203   : > { %v2011_v61 = vld [vmem:[#allocation2 + $0xb4] sm:$0xe]  ;;  %3043 = vst [vmem:[#allocation3 + $0x5c] sm:$0xf] %v2907_v53  ;;  %2237 = vst [vmem:[#allocation3 + $0x3f8] sm:$0xf] %v2166_v27  ;;  %v2910_v2 = vsel %vm8739_vm5, %v2908_v6, %v2909_v41 }
 0x204   : > { %v8324_v62 = vld [vmem:[#allocation3 + $0x438] ss:$36 sps:$4 sm:$0xff]   ;;  %v2402_v63 = vshrl.u32 %v2311_v28, 16  ;;  %v2405_v0 = vshll.u32 %v2311_v28, 16  ;;  %2771 = vst [vmem:[#allocation3 + $0x58] sm:$0xf] %v2390_v10  ;;  %v2169_v3 = vsel %vm8739_vm5, %v2167_v57, %v2168_v49  ;;  %v2400_v9 = vsel %vm8712_vm2, %v2395_v50, %v2399_v48 }
 0x205   : > { %v9324_v1 = vld [vmem:[#allocation2 + $0x30] sm:$0xf]  ;;  %v2411_v40 = vshll.u32 %v2312_v44, 16  ;;  %v2415_v7 = vshrl.u32 %v2312_v44, 16  ;;  %v2012_v42 = vld [vmem:[#allocation2 + $0xb8] sm:$0xf]  ;;  %5538 = vmatmul.mubr.bf16.gmra.mxu1 %v8324_v62 }
 0x206   : > { %v8325_v38 = vld [vmem:[#allocation3 + $0x368] ss:$36 sps:$4 sm:$0xff]   ;;  %3044 = vst [vmem:[#allocation3 + $0x80] sm:$0xf] %v2910_v2  ;;  %2238 = vst [vmem:[#allocation3 + $0x41c] sm:$0xf] %v2169_v3 }
 0x207   : > { %v2404_v45 = vrot.slane %v2402_v63, 4  ;;  %v2013_v12 = vld [vmem:[#allocation2 + $0xbc] sm:$0x1]  ;;  %v8330_v14 = vld [vmem:[#allocation3 + $0x14] ss:$36 sps:$4 sm:$0xff]   ;;  %v2407_v15 = vrot.slane %v2405_v0, 5  ;;  %5675 = vmatmul.mubr.bf16.gmra.mxu0 %v8325_v38 }
 0x208   : > { %2772 = vst [vmem:[#allocation3 + $0x7c] sm:$0xf] %v2400_v9  ;;  %v2413_v16 = vrot.slane %v2411_v40, 5  ;;  %v2417_v20 = vrot.slane %v2415_v7, 4  ;;  %v2421_v51 = vshll.u32 %v2313_v33, 16  ;;  %v7124_v55 = vrot.slane %v2807_v58, 9  ;;  %5739 = vmatprep.mubr.bf16.mxu1 %v8330_v14 }
 0x209   : > { %v8336_v17 = vld [vmem:[#allocation3 + $0x3b4] ss:$36 sps:$4 sm:$0xff]   ;;  %v2913_v18 = vrot.slane %v2808_v59, 5  ;;  %v2916_v19 = vrot.slane %v2809_v60, 5  ;;  %v7121_v22 = vrot.slane %v2011_v61, 9  ;;  %v2408_v46 = vor.u32 %v2407_v15, %v2404_v45 }
 0x20a   : > { %v2418_v56 = vor.u32 %v2417_v20, %v2413_v16  ;;  %v2423_v23 = vrot.slane %v2421_v51, 5  ;;  %v2172_v24 = vrot.slane %v2012_v42, 5  ;;  %v2315_v26 = vld [vmem:[#allocation2 + $0x34] sm:$0xf]  ;;  %5682 = vmatprep.mubr.bf16.mxu0 %v8336_v17  ;;  %v2175_v28 = vrot.slane %v2013_v12, 5  ;;  %v8498_v42 = vld [vmem:[%s10684_s3 + $0x238] sm:$0xff]  }
 0x20b   : > { %v2914_v13 = vsel %vm8739_vm5, %v7124_v55, %v2913_v18  ;;  %v2915_v25 = vrot.slane %v2913_v18, 4  ;;  %v2316_v29 = vld [vmem:[#allocation2 + $0x38] sm:$0x1]  ;;  %v2426_v31 = vshrl.u32 %v9324_v1, 16  ;;  %v2810_v34 = vld [vmem:[#allocation2 + $0x30] sm:$0xe] }
 0x20c   : > { %v2317_v21 = vld [vmem:[#allocation2 + $0x3c] sm:$0xf]  ;;  %v2409_v35 = vrot.slane %v2408_v46, 4  ;;  %v2419_v37 = vrot.slane %v2418_v56, 4  ;;  %3045 = vst [vmem:[#allocation3 + $0xa4] sm:$0xf] %v2914_v13  ;;  %v2173_v5 = vsel %vm8739_vm5, %v7121_v22, %v2172_v24 }
 0x20d   : > { %v2174_v52 = vrot.slane %v2172_v24, 4  ;;  %v2811_v30 = vld [vmem:[#allocation2 + $0x34] sm:$0xf]  ;;  %v3074_v41 = vld [vmem:[#allocation2 + $0x18] sm:$0xf]  ;;  %v2917_v43 = vsel %vm8739_vm5, %v2915_v25, %v2916_v19  ;;  %v2428_v44 = vrot.slane %v2426_v31, 4 }
 0x20e   : > { %v8351_v36 = vld [vmem:[%s10684_s3 + $0x230] sm:$0xff]   ;;  %2239 = vst [vmem:[#allocation3 + $0x440] sm:$0xf] %v2173_v5  ;;  %v2429_v32 = vshll.u32 %v9324_v1, 16  ;;  %v2435_v47 = vshll.u32 %v2315_v26, 16  ;;  %v2414_v49 = vsel %vm8712_vm2, %v2409_v35, %v2413_v16  ;;  %v2424_v33 = vsel %vm8712_vm2, %v2419_v37, %v2423_v23  ;;  %v8372_v55 = vld [vmem:[%s10684_s3 + $0x228] sm:$0xff]  }
 0x20f   : > { %v3075_v48 = vld [vmem:[#allocation2 + $0x1c] sm:$0xf]  ;;  %3106 = vst [vmem:[#allocation3 + $0x18] sm:$0xf] %v3074_v41  ;;  %3046 = vst [vmem:[#allocation3 + $0xc8] sm:$0xf] %v2917_v43  ;;  %v2176_v53 = vsel %vm8739_vm5, %v2174_v52, %v2175_v28 }
 0x210   : > { %v2439_v6 = vshrl.u32 %v2315_v26, 16  ;;  %v2812_v27 = vld [vmem:[#allocation2 + $0x38] sm:$0x1]  ;;  %v2318_v57 = vld [vmem:[#allocation2 + $0x40] sm:$0xf]  ;;  %v2431_v60 = vrot.slane %v2429_v32, 5 }
 0x211   : > { %3107 = vst [vmem:[#allocation3 + $0x3c] sm:$0xf] %v3075_v48  ;;  %v8328_v58 = vld [vmem:[#allocation3 + $0x10] ss:$36 sps:$4 sm:$0xff]   ;;  %2773 = vst [vmem:[#allocation3 + $0xa0] sm:$0xf] %v2414_v49 }
 0x212   : > { %v8334_v59 = vld [vmem:[#allocation3 + $0x3b0] ss:$36 sps:$4 sm:$0xff]   ;;  %2774 = vst [vmem:[#allocation3 + $0xc4] sm:$0xf] %v2424_v33  ;;  %2240 = vst [vmem:[#allocation3 + $0x464] sm:$0xf] %v2176_v53  ;;  %5740 = vmatmul.mubr.bf16.vlgmr.msra.gmra.mxu1 %v8328_v58  ;;  %v2432_v1 = vor.u32 %v2431_v60, %v2428_v44 }
 0x213   : > { %v8337_v61 = vld [vmem:[#allocation3 + $0x5c] ss:$36 sps:$4 sm:$0xff]   ;;  %v2437_v62 = vrot.slane %v2435_v47, 5  ;;  %v2441_v10 = vrot.slane %v2439_v6, 4  ;;  %v2445_v50 = vshll.u32 %v2316_v29, 16  ;;  %v7125_v63 = vrot.slane %v2810_v34, 9  ;;  %8072 = vmatpush3.bf16.msra.mxu1 %v8498_v42  ;;  %5683 = vmatmul.mubr.bf16.gmra.mxu0 %v8334_v59 }
 0x214   : > { %v2319_v0 = vld [vmem:[#allocation2 + $0x44] sm:$0x1]  ;;  %v2920_v2 = vrot.slane %v2811_v30, 5  ;;  %v2923_v3 = vrot.slane %v2812_v27, 5  ;;  %v2450_v40 = vshrl.u32 %v2317_v21, 16  ;;  %5747 = vmatprep.mubr.bf16.mxu1 %v8337_v61  ;;  %v2453_v12 = vshll.u32 %v2317_v21, 16  ;;  %8073 = vmatprep.subr.bf16.mxu1 %v8351_v36 }
 0x215   : > { %v2813_v7 = vld [vmem:[#allocation2 + $0x3c] sm:$0xe]  ;;  %v8345_v38 = vld [vmem:[#allocation3 + $0x3fc] ss:$36 sps:$4 sm:$0xff]   ;;  %v2442_v9 = vor.u32 %v2441_v10, %v2437_v62  ;;  %v2447_v45 = vrot.slane %v2445_v50, 5  ;;  %v2459_v14 = vshll.u32 %v2318_v57, 16 }
 0x216   : > { %v2433_v15 = vrot.slane %v2432_v1, 4  ;;  %v2921_v16 = vsel %vm8739_vm5, %v7125_v63, %v2920_v2  ;;  %v2922_v20 = vrot.slane %v2920_v2, 4  ;;  %v2452_v51 = vrot.slane %v2450_v40, 4  ;;  %v2814_v17 = vld [vmem:[#allocation2 + $0x40] sm:$0xf]  ;;  %5690 = vmatprep.mubr.bf16.mxu0 %v8345_v38  ;;  %v8398_v2 = vld [vmem:[%s10684_s3 + $0x218] sm:$0xff]  }
 0x217   : > { %v3138_v18 = vld [vmem:[#allocation2 + $0x18] sm:$0xf]  ;;  %v2443_v19 = vrot.slane %v2442_v9, 4  ;;  %3047 = vst [vmem:[#allocation3 + $0xec] sm:$0xf] %v2921_v16  ;;  %v2455_v22 = vrot.slane %v2453_v12, 5  ;;  %8074 = vmatpush3.bf16.msra.mxu1 %v8351_v36 }
 0x218   : > { %v2461_v46 = vrot.slane %v2459_v14, 5  ;;  %v2463_v56 = vshrl.u32 %v2318_v57, 16  ;;  %v2438_v23 = vsel %vm8712_vm2, %v2433_v15, %v2437_v62  ;;  %v2924_v24 = vsel %vm8739_vm5, %v2922_v20, %v2923_v3  ;;  %v2815_v13 = vld [vmem:[#allocation2 + $0x44] sm:$0x1]  ;;  %v3139_v35 = vld [vmem:[#allocation2 + $0x1c] sm:$0xf]  ;;  %8075 = vmatprep.subr.bf16.mxu1 %v8372_v55 }
 0x219   : > { %v2469_v26 = vshll.u32 %v2319_v0, 16  ;;  %v7126_v25 = vrot.slane %v2813_v7, 9  ;;  %v9364_v28 = vld [vmem:[%s10684_s3 + $0x220] sm:$0xff]   ;;  %v2448_v29 = vsel %vm8712_vm2, %v2443_v19, %v2447_v45  ;;  %2775 = vst [vmem:[#allocation3 + $0xe8] sm:$0xf] %v2438_v23  ;;  %v2456_v31 = vor.u32 %v2455_v22, %v2452_v51 }
 0x21a   : > { %3048 = vst [vmem:[#allocation3 + $0x110] sm:$0xf] %v2924_v24  ;;  %v2465_v34 = vrot.slane %v2463_v56, 4  ;;  %v2927_v21 = vrot.slane %v2814_v17, 5  ;;  %v2320_v37 = vld [vmem:[#allocation2 + $0x48] sm:$0xf] }
 0x21b   : > { %v8341_v5 = vld [vmem:[#allocation3 + $0x58] ss:$36 sps:$4 sm:$0xff]   ;;  %2776 = vst [vmem:[#allocation3 + $0x10c] sm:$0xf] %v2448_v29  ;;  %v2471_v30 = vrot.slane %v2469_v26, 5  ;;  %v2457_v32 = vrot.slane %v2456_v31, 4  ;;  %8076 = vmatpush3.bf16.msra.mxu1 %v8372_v55 }
 0x21c   : > { %v8343_v52 = vld [vmem:[#allocation3 + $0x3f8] ss:$36 sps:$4 sm:$0xff]   ;;  %v3140_v41 = vld [vmem:[#allocation2 + $0x20] sm:$0x1]  ;;  %v2466_v36 = vor.u32 %v2465_v34, %v2461_v46  ;;  %v2928_v47 = vsel %vm8739_vm5, %v7126_v25, %v2927_v21  ;;  %v2929_v48 = vrot.slane %v2927_v21, 4  ;;  %5748 = vmatmul.mubr.bf16.gmra.mxu1 %v8341_v5  ;;  %v2930_v33 = vrot.slane %v2815_v13, 5  ;;  %8077 = vmatprep.subr.bf16.mxu1 %v9364_v28 }
 0x21d   : > { %v8346_v43 = vld [vmem:[#allocation3 + $0xa4] ss:$36 sps:$4 sm:$0xff]   ;;  %v2321_v49 = vld [vmem:[#allocation2 + $0x4c] sm:$0xf]  ;;  %3049 = vst [vmem:[#allocation3 + $0x134] sm:$0xf] %v2928_v47  ;;  %v2462_v58 = vsel %vm8712_vm2, %v2457_v32, %v2461_v46  ;;  %5691 = vmatmul.mubr.bf16.gmra.mxu0 %v8343_v52 }
 0x21e   : > { %v8356_v44 = vld [vmem:[#allocation3 + $0x444] ss:$36 sps:$4 sm:$0xff]   ;;  %v3187_v53 = vshrl.u32 %v3138_v18, 16  ;;  %v3190_v6 = vshll.u32 %v3138_v18, 16  ;;  %v3196_v27 = vshll.u32 %v3139_v35, 16  ;;  %5755 = vmatprep.mubr.bf16.mxu1 %v8346_v43  ;;  %v2467_v59 = vrot.slane %v2466_v36, 4 }
 0x21f   : > { %v3076_v57 = vld [vmem:[#allocation2 + $0x24] sm:$0xf]  ;;  %v3200_v60 = vshrl.u32 %v3139_v35, 16  ;;  %v3206_v61 = vshll.u32 %v3140_v41, 16  ;;  %v3077_v62 = vld [vmem:[#allocation2 + $0x28] sm:$0xf]  ;;  %v2931_v10 = vsel %vm8739_vm5, %v2929_v48, %v2930_v33  ;;  %5698 = vmatprep.mubr.bf16.mxu0 %v8356_v44  ;;  %8078 = vmatpush3.bf16.msra.mxu1 %v9364_v28 }
 0x220   : > { %3108 = vst [vmem:[#allocation3 + $0x60] sm:$0xf] %v3076_v57  ;;  %2777 = vst [vmem:[#allocation3 + $0x130] sm:$0xf] %v2462_v58  ;;  %v3189_v50 = vrot.slane %v3187_v53, 4  ;;  %v3192_v63 = vrot.slane %v3190_v6, 5  ;;  %v2472_v3 = vsel %vm8712_vm2, %v2467_v59, %v2471_v30  ;;  %8079 = vmatprep.subr.bf16.mxu1 %v8398_v2 }
 0x221   : > { %v3198_v0 = vrot.slane %v3196_v27, 5  ;;  %v2322_v1 = vld [vmem:[#allocation2 + $0x50] sm:$0x1]  ;;  %3109 = vst [vmem:[#allocation3 + $0x84] sm:$0xf] %v3077_v62  ;;  %v3202_v40 = vrot.slane %v3200_v60, 4 }
 0x222   : > { %3050 = vst [vmem:[#allocation3 + $0x158] sm:$0xf] %v2931_v10  ;;  %v2474_v7 = vshrl.u32 %v2320_v37, 16  ;;  %v2816_v42 = vld [vmem:[#allocation2 + $0x48] sm:$0xe]  ;;  %v3193_v45 = vor.u32 %v3192_v63, %v3189_v50  ;;  %v2477_v12 = vshll.u32 %v2320_v37, 16 }
 0x223   : > { %v2817_v38 = vld [vmem:[#allocation2 + $0x4c] sm:$0xf]  ;;  %v8352_v9 = vld [vmem:[#allocation3 + $0xa0] ss:$36 sps:$4 sm:$0xff]   ;;  %2778 = vst [vmem:[#allocation3 + $0x154] sm:$0xf] %v2472_v3  ;;  %v3203_v20 = vor.u32 %v3202_v40, %v3198_v0  ;;  %8080 = vmatpush3.bf16.msra.mxu1 %v8398_v2 }
 0x224   : > { %v2483_v14 = vshll.u32 %v2321_v49, 16  ;;  %v2487_v15 = vshrl.u32 %v2321_v49, 16  ;;  %v3141_v16 = vld [vmem:[#allocation2 + $0x24] sm:$0xf]  ;;  %v3208_v51 = vrot.slane %v3206_v61, 5  ;;  %v2476_v17 = vrot.slane %v2474_v7, 4  ;;  %5756 = vmatmul.mubr.bf16.gmra.mxu1 %v8352_v9  ;;  %v9410_v9 = vpop.f32.mrf.mxu0 }
 0x225   : > { %v2818_v55 = vld [vmem:[#allocation2 + $0x50] sm:$0x1]  ;;  %v8354_v19 = vld [vmem:[#allocation3 + $0x440] ss:$36 sps:$4 sm:$0xff]   ;;  %v3194_v22 = vrot.slane %v3193_v45, 4  ;;  %v2479_v46 = vrot.slane %v2477_v12, 5 }
 0x226   : > { %v8411_v18 = vld [vmem:[%s10684_s3 + $0x210] sm:$0xff]   ;;  %v2485_v56 = vrot.slane %v2483_v14, 5  ;;  %v2489_v23 = vrot.slane %v2487_v15, 4  ;;  %v8357_v24 = vld [vmem:[#allocation3 + $0xec] ss:$36 sps:$4 sm:$0xff]   ;;  %v3204_v26 = vrot.slane %v3203_v20, 4  ;;  %5699 = vmatmul.mubr.bf16.gmra.mxu0 %v8354_v19 }
 0x227   : > { %v2493_v13 = vshll.u32 %v2322_v1, 16  ;;  %v7127_v25 = vrot.slane %v2816_v42, 9  ;;  %v2934_v29 = vrot.slane %v2817_v38, 5  ;;  %v9384_v31 = vld [vmem:[#allocation2 + $0x54] sm:$0xf]  ;;  %v3199_v28 = vsel %vm8712_vm2, %v3194_v22, %v3198_v0  ;;  %5763 = vmatprep.mubr.bf16.mxu1 %v8357_v24  ;;  %v8424_v32 = vld [vmem:[%s10684_s3 + $0x208] sm:$0xff]   ;;  %8081 = vmatprep.subr.bf16.mxu1 %v8411_v18 }
 0x228   : > { %v2480_v34 = vor.u32 %v2479_v46, %v2476_v17  ;;  %v2490_v21 = vor.u32 %v2489_v23, %v2485_v56  ;;  %v2937_v35 = vrot.slane %v2818_v55, 5  ;;  %v3142_v37 = vld [vmem:[#allocation2 + $0x28] sm:$0xf]  ;;  %v9388_v5 = vld [vmem:[#allocation2 + $0x2c] sm:$0x1]  ;;  %v3209_v52 = vsel %vm8712_vm2, %v3204_v26, %v3208_v51  ;;  %8082 = vmatpush3.bf16.msra.mxu1 %v8411_v18  ;;  %v8437_v45 = vld [vmem:[%s10684_s3 + $0x200] sm:$0xff]  }
 0x229   : > { %3602 = vst [vmem:[#allocation3 + $0x1c] sm:$0xf] %v3199_v28  ;;  %v2495_v30 = vrot.slane %v2493_v13, 5  ;;  %v2935_v41 = vsel %vm8739_vm5, %v7127_v25, %v2934_v29  ;;  %v2936_v43 = vrot.slane %v2934_v29, 4  ;;  %v3078_v44 = vld [vmem:[#allocation2 + $0x30] sm:$0xf]  ;;  %8083 = vmatprep.subr.bf16.mxu1 %v8424_v32 }
 0x22a   : > { %3603 = vst [vmem:[#allocation3 + $0x40] sm:$0xf] %v3209_v52  ;;  %v2481_v36 = vrot.slane %v2480_v34, 4  ;;  %v2491_v47 = vrot.slane %v2490_v21, 4  ;;  %3051 = vst [vmem:[#allocation3 + $0x17c] sm:$0xf] %v2935_v41  ;;  %v9421_v34 = vpop.f32.mrf.mxu0 }
 0x22b   : > { %v3211_v48 = vshrl.u32 %v3141_v16, 16  ;;  %v3214_v49 = vshll.u32 %v3141_v16, 16  ;;  %v3079_v33 = vld [vmem:[#allocation2 + $0x34] sm:$0xf]  ;;  %3110 = vst [vmem:[#allocation3 + $0xa8] sm:$0xf] %v3078_v44  ;;  %v2938_v6 = vsel %vm8739_vm5, %v2936_v43, %v2937_v35 }
 0x22c   : > { %v3741_v53 = vrot.slane %v3739_v8, 4  ;;  %v3220_v27 = vshll.u32 %v3142_v37, 16  ;;  %v2324_v57 = vld [vmem:[#allocation2 + $0x58] sm:$0xf]  ;;  %3111 = vst [vmem:[#allocation3 + $0xcc] sm:$0xf] %v3079_v33  ;;  %v2486_v59 = vsel %vm8712_vm2, %v2481_v36, %v2485_v56  ;;  %v2496_v60 = vsel %vm8712_vm2, %v2491_v47, %v2495_v30  ;;  %8084 = vmatpush3.bf16.msra.mxu1 %v8424_v32 }
 0x22d   : > { %v3639_v58 = vld [vmem:[#allocation2 + $0x2c] sm:$0x1]  ;;  %3052 = vst [vmem:[#allocation3 + $0x1a0] sm:$0xf] %v2938_v6  ;;  %v3213_v61 = vrot.slane %v3211_v48, 4  ;;  %v3216_v62 = vrot.slane %v3214_v49, 5  ;;  %8085 = vmatprep.subr.bf16.mxu1 %v8437_v45 }
 0x22e   : > { %v2325_v10 = vld [vmem:[#allocation2 + $0x5c] sm:$0x1]  ;;  %v8362_v50 = vld [vmem:[#allocation3 + $0xe8] ss:$36 sps:$4 sm:$0xff]   ;;  %2779 = vst [vmem:[#allocation3 + $0x178] sm:$0xf] %v2486_v59 }
 0x22f   : > { %2780 = vst [vmem:[#allocation3 + $0x19c] sm:$0xf] %v2496_v60  ;;  %v3222_v4 = vrot.slane %v3220_v27, 5  ;;  %v3224_v8 = vshrl.u32 %v3142_v37, 16  ;;  %v3230_v63 = vshll.u32 %v9388_v5, 16  ;;  %v2498_v0 = vshrl.u32 %v9384_v31, 16  ;;  %5764 = vmatmul.mubr.bf16.gmra.mxu1 %v8362_v50 }
 0x230   : > { %v9407_v1 = vld [vmem:[#allocation2 + $0x30] sm:$0xf]  ;;  %v3217_v2 = vor.u32 %v3216_v62, %v3213_v61  ;;  %v2501_v3 = vshll.u32 %v9384_v31, 16  ;;  %v2507_v40 = vshll.u32 %v2324_v57, 16  ;;  %v2511_v7 = vshrl.u32 %v2324_v57, 16  ;;  %8086 = vmatpush3.bf16.msra.mxu1 %v8437_v45  ;;  %v7621_v61 = vpop.f32.mrf.mxu0 }
 0x231   : > { %v2819_v42 = vld [vmem:[#allocation2 + $0x54] sm:$0xe]  ;;  %v2820_v38 = vld [vmem:[#allocation2 + $0x58] sm:$0xf]  ;;  %v3742_v12 = vrot.slane %v3639_v58, 5  ;;  %v3226_v15 = vrot.slane %v3224_v8, 4 }
 0x232   : > { %v8364_v14 = vld [vmem:[#allocation3 + $0x134] ss:$36 sps:$4 sm:$0xff]   ;;  %v2500_v16 = vrot.slane %v2498_v0, 4  ;;  %v2517_v20 = vshll.u32 %v2325_v10, 16  ;;  %v2821_v51 = vld [vmem:[#allocation2 + $0x5c] sm:$0x1] }
 0x233   : > { %v3218_v17 = vrot.slane %v3217_v2, 4  ;;  %v2503_v55 = vrot.slane %v2501_v3, 5  ;;  %v2509_v18 = vrot.slane %v2507_v40, 5  ;;  %v2513_v19 = vrot.slane %v2511_v7, 4  ;;  %5771 = vmatprep.mubr.bf16.mxu1 %v8364_v14  ;;  %v8369_v22 = vld [vmem:[#allocation3 + $0x1c] ss:$36 sps:$4 sm:$0xff]  }
 0x234   : > { %v3227_v46 = vor.u32 %v3226_v15, %v3222_v4  ;;  %v3145_v56 = vld [vmem:[#allocation2 + $0x34] sm:$0xf]  ;;  %v3743_v23 = vsel %vm8739_vm5, %v3741_v53, %v3742_v12  ;;  %v2326_v24 = vld [vmem:[#allocation2 + $0x60] sm:$0xf]  ;;  %v3232_v25 = vrot.slane %v3230_v63, 5  ;;  %5900 = vmatprep.mubr.bf16.mxu0 %v8369_v22  ;;  %v7128_v35 = vrot.slane %v2819_v42, 9 }
 0x235   : > { %v8367_v26 = vld [vmem:[#allocation3 + $0x18] ss:$36 sps:$4 sm:$0xff]   ;;  %v3223_v13 = vsel %vm8712_vm2, %v3218_v17, %v3222_v4  ;;  %v2504_v29 = vor.u32 %v2503_v55, %v2500_v16  ;;  %v2514_v31 = vor.u32 %v2513_v19, %v2509_v18  ;;  %v9419_v28 = vld [vmem:[#allocation2 + $0x38] sm:$0x1]  ;;  %3877 = vst [vmem:[#allocation3 + $0x8c] sm:$0xf] %v3743_v23  ;;  %v7622_v16 = vpop.f32.mrf.mxu0 }
 0x236   : > { %v3228_v21 = vrot.slane %v3227_v46, 4  ;;  %3604 = vst [vmem:[#allocation3 + $0x64] sm:$0xf] %v3223_v13  ;;  %v2941_v37 = vrot.slane %v2820_v38, 5  ;;  %v3235_v5 = vshrl.u32 %v9407_v1, 16  ;;  %5901 = vmatmul.mubr.bf16.vlgmr.msra.gmra.mxu0 %v8367_v26  ;;  %v2519_v44 = vrot.slane %v2517_v20, 5 }
 0x237   : > { %v3080_v52 = vld [vmem:[#allocation2 + $0x3c] sm:$0xf]  ;;  %v8373_v30 = vld [vmem:[#allocation3 + $0x130] ss:$36 sps:$4 sm:$0xff]   ;;  %v2505_v41 = vrot.slane %v2504_v29, 4  ;;  %v2515_v43 = vrot.slane %v2514_v31, 4 }
 0x238   : > { %v2944_v32 = vrot.slane %v2821_v51, 5  ;;  %3112 = vst [vmem:[#allocation3 + $0xf0] sm:$0xf] %v3080_v52  ;;  %v3233_v36 = vsel %vm8712_vm2, %v3228_v21, %v3232_v25  ;;  %v2942_v47 = vsel %vm8739_vm5, %v7128_v35, %v2941_v37  ;;  %v2943_v48 = vrot.slane %v2941_v37, 4  ;;  %v2327_v33 = vld [vmem:[#allocation2 + $0x64] sm:$0xf]  ;;  %5772 = vmatmul.mubr.bf16.gmra.mxu1 %v8373_v30 }
 0x239   : > { %v3237_v49 = vrot.slane %v3235_v5, 4  ;;  %v3081_v53 = vld [vmem:[#allocation2 + $0x40] sm:$0xf]  ;;  %3605 = vst [vmem:[#allocation3 + $0x88] sm:$0xf] %v3233_v36  ;;  %v2510_v6 = vsel %vm8712_vm2, %v2505_v41, %v2509_v18  ;;  %v2520_v27 = vsel %vm8712_vm2, %v2515_v43, %v2519_v44  ;;  %v3238_v57 = vshll.u32 %v9407_v1, 16 }
 0x23a   : > { %3053 = vst [vmem:[#allocation3 + $0x1c4] sm:$0xf] %v2942_v47  ;;  %v3244_v58 = vshll.u32 %v3145_v56, 16  ;;  %v2328_v59 = vld [vmem:[#allocation2 + $0x68] sm:$0x1]  ;;  %v2945_v10 = vsel %vm8739_vm5, %v2943_v48, %v2944_v32  ;;  %v3248_v50 = vshrl.u32 %v3145_v56, 16  ;;  %v9438_v37 = vadd.f32 %v7622_v16, %v7621_v61  ;;  %v9444_v48 = vpop.f32.mrf.mxu0 }
 0x23b   : > { %v2822_v60 = vld [vmem:[#allocation2 + $0x60] sm:$0xe]  ;;  %3113 = vst [vmem:[#allocation3 + $0x114] sm:$0xf] %v3081_v53  ;;  %v8374_v62 = vld [vmem:[#allocation3 + $0x17c] ss:$36 sps:$4 sm:$0xff]  }
 0x23c   : > { %2781 = vst [vmem:[#allocation3 + $0x1c0] sm:$0xf] %v2510_v6  ;;  %2782 = vst [vmem:[#allocation3 + $0x1e4] sm:$0xf] %v2520_v27  ;;  %v3254_v4 = vshll.u32 %v9419_v28, 16  ;;  %v2522_v8 = vshrl.u32 %v2326_v24, 16  ;;  %5779 = vmatprep.mubr.bf16.mxu1 %v8374_v62 }
 0x23d   : > { %3054 = vst [vmem:[#allocation3 + $0x1e8] sm:$0xf] %v2945_v10  ;;  %v3240_v63 = vrot.slane %v3238_v57, 5  ;;  %v3246_v0 = vrot.slane %v3244_v58, 5  ;;  %v2525_v1 = vshll.u32 %v2326_v24, 16  ;;  %v2531_v2 = vshll.u32 %v2327_v33, 16 }
 0x23e   : > { %v2823_v3 = vld [vmem:[#allocation2 + $0x64] sm:$0xf]  ;;  %v3250_v40 = vrot.slane %v3248_v50, 4  ;;  %v2524_v7 = vrot.slane %v2522_v8, 4  ;;  %v2535_v42 = vshrl.u32 %v2327_v33, 16  ;;  %v2541_v15 = vshll.u32 %v2328_v59, 16 }
 0x23f   : > { %v2824_v38 = vld [vmem:[#allocation2 + $0x68] sm:$0x1]  ;;  %v3241_v45 = vor.u32 %v3240_v63, %v3237_v49  ;;  %v2527_v12 = vrot.slane %v2525_v1, 5  ;;  %v2533_v14 = vrot.slane %v2531_v2, 5  ;;  %v3147_v20 = vld [vmem:[#allocation2 + $0x3c] sm:$0xf] }
 0x240   : > { %v3251_v51 = vor.u32 %v3250_v40, %v3246_v0  ;;  %v2537_v17 = vrot.slane %v2535_v42, 4  ;;  %v7129_v55 = vrot.slane %v2822_v60, 9  ;;  %v2948_v18 = vrot.slane %v2823_v3, 5  ;;  %v8379_v19 = vld [vmem:[#allocation3 + $0x178] ss:$36 sps:$4 sm:$0xff]   ;;  %v9452_v3 = vpop.f32.mrf.mxu0 }
 0x241   : > { %v3242_v22 = vrot.slane %v3241_v45, 4  ;;  %v3256_v46 = vrot.slane %v3254_v4, 5  ;;  %v2528_v56 = vor.u32 %v2527_v12, %v2524_v7  ;;  %v2951_v23 = vrot.slane %v2824_v38, 5  ;;  %v3148_v24 = vld [vmem:[#allocation2 + $0x40] sm:$0xf]  ;;  %5780 = vmatmul.mubr.bf16.gmra.mxu1 %v8379_v19 }
 0x242   : > { %v3082_v26 = vld [vmem:[#allocation2 + $0x48] sm:$0xf]  ;;  %v2329_v13 = vld [vmem:[#allocation2 + $0x6c] sm:$0xf]  ;;  %v8376_v25 = vld [vmem:[#allocation3 + $0x60] ss:$36 sps:$4 sm:$0xff]   ;;  %v2538_v28 = vor.u32 %v2537_v17, %v2533_v14  ;;  %v2949_v21 = vsel %vm8739_vm5, %v7129_v55, %v2948_v18 }
 0x243   : > { %v8378_v29 = vld [vmem:[#allocation3 + $0x64] ss:$36 sps:$4 sm:$0xff]   ;;  %v3252_v31 = vrot.slane %v3251_v51, 4  ;;  %v2330_v35 = vld [vmem:[#allocation2 + $0x70] sm:$0xf]  ;;  %v3247_v5 = vsel %vm8712_vm2, %v3242_v22, %v3246_v0  ;;  %v2529_v52 = vrot.slane %v2528_v56, 4 }
 0x244   : > { %3114 = vst [vmem:[#allocation3 + $0x138] sm:$0xf] %v3082_v26  ;;  %v2950_v30 = vrot.slane %v2948_v18, 4  ;;  %3055 = vst [vmem:[#allocation3 + $0x20c] sm:$0xf] %v2949_v21  ;;  %v3259_v41 = vshrl.u32 %v3147_v20, 16  ;;  %5908 = vmatprep.mubr.bf16.mxu0 %v8378_v29 }
 0x245   : > { %v3083_v43 = vld [vmem:[#allocation2 + $0x4c] sm:$0xf]  ;;  %v8380_v44 = vld [vmem:[#allocation3 + $0x1c4] ss:$36 sps:$4 sm:$0xff]   ;;  %v3257_v32 = vsel %vm8712_vm2, %v3252_v31, %v3256_v46  ;;  %3606 = vst [vmem:[#allocation3 + $0xac] sm:$0xf] %v3247_v5  ;;  %5909 = vmatmul.mubr.bf16.gmra.mxu0 %v8376_v25  ;;  %v2534_v49 = vsel %vm8712_vm2, %v2529_v52, %v2533_v14 }
 0x246   : > { %v2539_v36 = vrot.slane %v2538_v28, 4  ;;  %v2543_v47 = vrot.slane %v2541_v15, 5  ;;  %3115 = vst [vmem:[#allocation3 + $0x15c] sm:$0xf] %v3083_v43  ;;  %3607 = vst [vmem:[#allocation3 + $0xd0] sm:$0xf] %v3257_v32  ;;  %v2952_v33 = vsel %vm8739_vm5, %v2950_v30, %v2951_v23  ;;  %5787 = vmatprep.mubr.bf16.mxu1 %v8380_v44 }
 0x247   : > { %v3149_v53 = vld [vmem:[#allocation2 + $0x44] sm:$0x1]  ;;  %v3261_v6 = vrot.slane %v3259_v41, 4  ;;  %v3262_v27 = vshll.u32 %v3147_v20, 16  ;;  %2783 = vst [vmem:[#allocation3 + $0x208] sm:$0xf] %v2534_v49 }
 0x248   : > { %v2544_v57 = vsel %vm8712_vm2, %v2539_v36, %v2543_v47  ;;  %3056 = vst [vmem:[#allocation3 + $0x230] sm:$0xf] %v2952_v33  ;;  %v3268_v58 = vshll.u32 %v3148_v24, 16  ;;  %v3272_v59 = vshrl.u32 %v3148_v24, 16  ;;  %v2331_v60 = vld [vmem:[#allocation2 + $0x74] sm:$0x1] }
 0x249   : > { %2784 = vst [vmem:[#allocation3 + $0x22c] sm:$0xf] %v2544_v57  ;;  %v3264_v61 = vrot.slane %v3262_v27, 5  ;;  %v2546_v62 = vshrl.u32 %v2329_v13, 16  ;;  %v2549_v10 = vshll.u32 %v2329_v13, 16  ;;  %v2555_v50 = vshll.u32 %v2330_v35, 16  ;;  %v9454_v13 = vpop.f32.mrf.mxu0 }
 0x24a   : > { %v2825_v4 = vld [vmem:[#allocation2 + $0x6c] sm:$0xe]  ;;  %v3270_v8 = vrot.slane %v3268_v58, 5  ;;  %v3274_v63 = vrot.slane %v3272_v59, 4  ;;  %v3278_v0 = vshll.u32 %v3149_v53, 16  ;;  %v2559_v1 = vshrl.u32 %v2330_v35, 16 }
 0x24b   : > { %v2826_v2 = vld [vmem:[#allocation2 + $0x70] sm:$0xf]  ;;  %v3265_v40 = vor.u32 %v3264_v61, %v3261_v6  ;;  %v2548_v7 = vrot.slane %v2546_v62, 4  ;;  %v2551_v42 = vrot.slane %v2549_v10, 5  ;;  %v2557_v38 = vrot.slane %v2555_v50, 5  ;;  %v9462_v43 = vpop.f32.mrf.mxu0 }
 0x24c   : > { %v3150_v45 = vld [vmem:[#allocation2 + $0x48] sm:$0xf]  ;;  %v8386_v12 = vld [vmem:[#allocation3 + $0x1c0] ss:$36 sps:$4 sm:$0xff]   ;;  %v3275_v14 = vor.u32 %v3274_v63, %v3270_v8  ;;  %v2561_v15 = vrot.slane %v2559_v1, 4  ;;  %v2565_v16 = vshll.u32 %v2331_v60, 16 }
 0x24d   : > { %v2827_v20 = vld [vmem:[#allocation2 + $0x74] sm:$0x1]  ;;  %v3266_v51 = vrot.slane %v3265_v40, 4  ;;  %v2552_v17 = vor.u32 %v2551_v42, %v2548_v7  ;;  %v7130_v55 = vrot.slane %v2825_v4, 9  ;;  %v2955_v18 = vrot.slane %v2826_v2, 5  ;;  %5788 = vmatmul.mubr.bf16.gmra.mxu1 %v8386_v12  ;;  %v9470_v10 = vpop.f32.mrf.mxu0 }
 0x24e   : > { %v3151_v19 = vld [vmem:[#allocation2 + $0x4c] sm:$0xf]  ;;  %v3084_v22 = vld [vmem:[#allocation2 + $0x54] sm:$0xf]  ;;  %v2332_v46 = vld [vmem:[#allocation2 + $0x78] sm:$0xf]  ;;  %v2562_v26 = vor.u32 %v2561_v15, %v2557_v38 }
 0x24f   : > { %v8384_v56 = vld [vmem:[#allocation3 + $0xac] ss:$36 sps:$4 sm:$0xff]   ;;  %v3276_v23 = vrot.slane %v3275_v14, 4  ;;  %v3280_v24 = vrot.slane %v3278_v0, 5  ;;  %3116 = vst [vmem:[#allocation3 + $0x180] sm:$0xf] %v3084_v22  ;;  %v3271_v29 = vsel %vm8712_vm2, %v3266_v51, %v3270_v8  ;;  %v2956_v28 = vsel %vm8739_vm5, %v7130_v55, %v2955_v18 }
 0x250   : > { %v8382_v25 = vld [vmem:[#allocation3 + $0xa8] ss:$36 sps:$4 sm:$0xff]   ;;  %v2553_v31 = vrot.slane %v2552_v17, 4  ;;  %v3085_v21 = vld [vmem:[#allocation2 + $0x58] sm:$0xf]  ;;  %5916 = vmatprep.mubr.bf16.mxu0 %v8384_v56  ;;  %v2563_v52 = vrot.slane %v2562_v26, 4 }
 0x251   : > { %v8387_v35 = vld [vmem:[#allocation3 + $0x20c] ss:$36 sps:$4 sm:$0xff]   ;;  %v3281_v5 = vsel %vm8712_vm2, %v3276_v23, %v3280_v24  ;;  %3608 = vst [vmem:[#allocation3 + $0xf4] sm:$0xf] %v3271_v29  ;;  %v2567_v30 = vrot.slane %v2565_v16, 5  ;;  %v2958_v41 = vrot.slane %v2827_v20, 5  ;;  %5917 = vmatmul.mubr.bf16.gmra.mxu0 %v8382_v25 }
 0x252   : > { %3057 = vst [vmem:[#allocation3 + $0x254] sm:$0xf] %v2956_v28  ;;  %3117 = vst [vmem:[#allocation3 + $0x1a4] sm:$0xf] %v3085_v21  ;;  %v2558_v44 = vsel %vm8712_vm2, %v2553_v31, %v2557_v38  ;;  %v2957_v32 = vrot.slane %v2955_v18, 4  ;;  %v3283_v47 = vshrl.u32 %v3150_v45, 16  ;;  %5795 = vmatprep.mubr.bf16.mxu1 %v8387_v35  ;;  %v9472_v18 = vpop.f32.mrf.mxu0 }
 0x253   : > { %3609 = vst [vmem:[#allocation3 + $0x118] sm:$0xf] %v3281_v5  ;;  %v3152_v36 = vld [vmem:[#allocation2 + $0x50] sm:$0x1]  ;;  %v3286_v49 = vshll.u32 %v3150_v45, 16  ;;  %v2568_v33 = vsel %vm8712_vm2, %v2563_v52, %v2567_v30  ;;  %v3292_v53 = vshll.u32 %v3151_v19, 16 }
 0x254   : > { %2785 = vst [vmem:[#allocation3 + $0x250] sm:$0xf] %v2558_v44  ;;  %v3296_v6 = vshrl.u32 %v3151_v19, 16  ;;  %v2333_v27 = vld [vmem:[#allocation2 + $0x7c] sm:$0xf]  ;;  %v2959_v58 = vsel %vm8739_vm5, %v2957_v32, %v2958_v41  ;;  %v3285_v59 = vrot.slane %v3283_v47, 4  ;;  %v9484_v47 = vpop.f32.mrf.mxu0 }
 0x255   : > { %v2334_v57 = vld [vmem:[#allocation2 + $0x80] sm:$0x1]  ;;  %2786 = vst [vmem:[#allocation3 + $0x274] sm:$0xf] %v2568_v33  ;;  %v3288_v60 = vrot.slane %v3286_v49, 5  ;;  %v2570_v61 = vshrl.u32 %v2332_v46, 16 }
 0x256   : > { %v2828_v62 = vld [vmem:[#allocation2 + $0x78] sm:$0xe]  ;;  %3058 = vst [vmem:[#allocation3 + $0x278] sm:$0xf] %v2959_v58  ;;  %v3294_v50 = vrot.slane %v3292_v53, 5  ;;  %v3298_v4 = vrot.slane %v3296_v6, 4 }
 0x257   : > { %v3302_v8 = vshll.u32 %v3152_v36, 16  ;;  %v2573_v63 = vshll.u32 %v2332_v46, 16  ;;  %v2829_v0 = vld [vmem:[#allocation2 + $0x7c] sm:$0xf]  ;;  %v8392_v1 = vld [vmem:[#allocation3 + $0x208] ss:$36 sps:$4 sm:$0xff]   ;;  %v3289_v2 = vor.u32 %v3288_v60, %v3285_v59  ;;  %v9482_v36 = vadd.f32 %v9462_v43, %v9454_v13 }
 0x258   : > { %v2572_v40 = vrot.slane %v2570_v61, 4  ;;  %v2579_v7 = vshll.u32 %v2333_v27, 16  ;;  %v2583_v42 = vshrl.u32 %v2333_v27, 16  ;;  %v3299_v38 = vor.u32 %v3298_v4, %v3294_v50  ;;  %v2830_v14 = vld [vmem:[#allocation2 + $0x80] sm:$0x1]  ;;  %5796 = vmatmul.mubr.bf16.gmra.mxu1 %v8392_v1  ;;  %v9492_v61 = vpop.f32.mrf.mxu0 }
 0x259   : > { %v2575_v45 = vrot.slane %v2573_v63, 5  ;;  %v2589_v12 = vshll.u32 %v2334_v57, 16  ;;  %v7131_v15 = vrot.slane %v2828_v62, 9  ;;  %v3153_v16 = vld [vmem:[#allocation2 + $0x54] sm:$0xf]  ;;  %v3290_v20 = vrot.slane %v3289_v2, 4 }
 0x25a   : > { %v2581_v51 = vrot.slane %v2579_v7, 5  ;;  %v2585_v17 = vrot.slane %v2583_v42, 4  ;;  %v2962_v55 = vrot.slane %v2829_v0, 5  ;;  %v8391_v19 = vld [vmem:[#allocation3 + $0xf4] ss:$36 sps:$4 sm:$0xff]   ;;  %v3300_v22 = vrot.slane %v3299_v38, 4  ;;  %v9496_v42 = vpop.f32.mrf.mxu0 }
 0x25b   : > { %v3304_v46 = vrot.slane %v3302_v8, 5  ;;  %v2576_v56 = vor.u32 %v2575_v45, %v2572_v40  ;;  %v3154_v23 = vld [vmem:[#allocation2 + $0x58] sm:$0xf]  ;;  %v2335_v24 = vld [vmem:[#allocation2 + $0x84] sm:$0xf]  ;;  %v3295_v25 = vsel %vm8712_vm2, %v3290_v20, %v3294_v50  ;;  %5924 = vmatprep.mubr.bf16.mxu0 %v8391_v19  ;;  %v2965_v52 = vrot.slane %v2830_v14, 5 }
 0x25c   : > { %v8389_v26 = vld [vmem:[#allocation3 + $0xf0] ss:$36 sps:$4 sm:$0xff]   ;;  %v2586_v29 = vor.u32 %v2585_v17, %v2581_v51  ;;  %v2963_v31 = vsel %vm8739_vm5, %v7131_v15, %v2962_v55  ;;  %v3155_v28 = vld [vmem:[#allocation2 + $0x5c] sm:$0x1]  ;;  %3610 = vst [vmem:[#allocation3 + $0x13c] sm:$0xf] %v3295_v25  ;;  %v9500_v20 = vadd.f32 %v9421_v34, %v9410_v9  ;;  %v9504_v19 = vadd.f32 %v9452_v3, %v9444_v48 }
 0x25d   : > { %v3305_v21 = vsel %vm8712_vm2, %v3300_v22, %v3304_v46  ;;  %v2577_v35 = vrot.slane %v2576_v56, 4  ;;  %v2964_v5 = vrot.slane %v2962_v55, 4  ;;  %3059 = vst [vmem:[#allocation3 + $0x29c] sm:$0xf] %v2963_v31  ;;  %v3086_v30 = vld [vmem:[#allocation2 + $0x60] sm:$0xf]  ;;  %5925 = vmatmul.mubr.bf16.gmra.mxu0 %v8389_v26  ;;  %v9506_v22 = vpop.f32.mrf.mxu0 }
 0x25e   : > { %v8393_v41 = vld [vmem:[#allocation3 + $0x254] ss:$36 sps:$4 sm:$0xff]   ;;  %3611 = vst [vmem:[#allocation3 + $0x160] sm:$0xf] %v3305_v21  ;;  %v2587_v44 = vrot.slane %v2586_v29, 4  ;;  %v2591_v32 = vrot.slane %v2589_v12, 5 }
 0x25f   : > { %3118 = vst [vmem:[#allocation3 + $0x1c8] sm:$0xf] %v3086_v30  ;;  %v2582_v49 = vsel %vm8712_vm2, %v2577_v35, %v2581_v51  ;;  %v2966_v33 = vsel %vm8739_vm5, %v2964_v5, %v2965_v52  ;;  %v3307_v53 = vshrl.u32 %v3153_v16, 16  ;;  %v3310_v6 = vshll.u32 %v3153_v16, 16  ;;  %v2336_v27 = vld [vmem:[#allocation2 + $0x88] sm:$0xf]  ;;  %5803 = vmatprep.mubr.bf16.mxu1 %v8393_v41  ;;  %v9508_v21 = vpop.f32.mrf.mxu0 }
 0x260   : > { %v3087_v57 = vld [vmem:[#allocation2 + $0x64] sm:$0xf]  ;;  %v8399_v58 = vld [vmem:[#allocation3 + $0x250] ss:$36 sps:$4 sm:$0xff]   ;;  %v2592_v59 = vsel %vm8712_vm2, %v2587_v44, %v2591_v32  ;;  %2787 = vst [vmem:[#allocation3 + $0x298] sm:$0xf] %v2582_v49 }
 0x261   : > { %3060 = vst [vmem:[#allocation3 + $0x2c0] sm:$0xf] %v2966_v33  ;;  %v3316_v13 = vshll.u32 %v3154_v23, 16  ;;  %v3320_v43 = vshrl.u32 %v3154_v23, 16  ;;  %v3326_v60 = vshll.u32 %v3155_v28, 16  ;;  %v3309_v62 = vrot.slane %v3307_v53, 4  ;;  %5804 = vmatmul.mubr.bf16.gmra.mxu1 %v8399_v58 }
 0x262   : > { %3119 = vst [vmem:[#allocation3 + $0x1ec] sm:$0xf] %v3087_v57  ;;  %2788 = vst [vmem:[#allocation3 + $0x2bc] sm:$0xf] %v2592_v59  ;;  %v3312_v50 = vrot.slane %v3310_v6, 5  ;;  %v2594_v8 = vshrl.u32 %v2335_v24, 16 }
 0x263   : > { %v2337_v4 = vld [vmem:[#allocation2 + $0x8c] sm:$0x1]  ;;  %v2597_v63 = vshll.u32 %v2335_v24, 16  ;;  %v9494_v0 = vld [vmem:[#allocation2 + $0x60] sm:$0xf]  ;;  %v3318_v1 = vrot.slane %v3316_v13, 5 }
 0x264   : > { %v3322_v2 = vrot.slane %v3320_v43, 4  ;;  %v2603_v40 = vshll.u32 %v2336_v27, 16  ;;  %v2831_v7 = vld [vmem:[#allocation2 + $0x84] sm:$0xe]  ;;  %v3313_v38 = vor.u32 %v3312_v50, %v3309_v62  ;;  %v2596_v45 = vrot.slane %v2594_v8, 4 }
 0x265   : > { %v2599_v12 = vrot.slane %v2597_v63, 5  ;;  %v2607_v14 = vshrl.u32 %v2336_v27, 16  ;;  %v2832_v15 = vld [vmem:[#allocation2 + $0x88] sm:$0xf]  ;;  %v2833_v17 = vld [vmem:[#allocation2 + $0x8c] sm:$0x1]  ;;  %v9519_v27 = vpop.f32.mrf.mxu0 }
 0x266   : > { %v3323_v16 = vor.u32 %v3322_v2, %v3318_v1  ;;  %v2605_v51 = vrot.slane %v2603_v40, 5  ;;  %v3157_v55 = vld [vmem:[#allocation2 + $0x64] sm:$0xf]  ;;  %v8397_v46 = vld [vmem:[#allocation3 + $0x13c] ss:$36 sps:$4 sm:$0xff]   ;;  %v3314_v56 = vrot.slane %v3313_v38, 4 }
 0x267   : > { %v3328_v23 = vrot.slane %v3326_v60, 5  ;;  %v2600_v24 = vor.u32 %v2599_v12, %v2596_v45  ;;  %v2613_v26 = vshll.u32 %v2337_v4, 16  ;;  %v2338_v25 = vld [vmem:[#allocation2 + $0x90] sm:$0xf]  ;;  %v2609_v28 = vrot.slane %v2607_v14, 4  ;;  %5932 = vmatprep.mubr.bf16.mxu0 %v8397_v46  ;;  %v9524_v60 = vpop.f32.mrf.mxu1  ;;  %v9528_v63 = vpop.f32.mrf.mxu0 }
 0x268   : > { %v8395_v29 = vld [vmem:[#allocation3 + $0x138] ss:$36 sps:$4 sm:$0xff]   ;;  %v3324_v31 = vrot.slane %v3323_v16, 4  ;;  %v7132_v9 = vrot.slane %v2831_v7, 9  ;;  %v2969_v34 = vrot.slane %v2832_v15, 5  ;;  %v3319_v48 = vsel %vm8712_vm2, %v3314_v56, %v3318_v1 }
 0x269   : > { %v2601_v3 = vrot.slane %v2600_v24, 4  ;;  %v2972_v35 = vrot.slane %v2833_v17, 5  ;;  %v9512_v5 = vld [vmem:[#allocation2 + $0x68] sm:$0x1]  ;;  %v3331_v52 = vshrl.u32 %v9494_v0, 16  ;;  %5933 = vmatmul.mubr.bf16.gmra.mxu0 %v8395_v29  ;;  %v2610_v33 = vor.u32 %v2609_v28, %v2605_v51  ;;  %v9535_v45 = vpop.f32.mrf.mxu1  ;;  %v9540_v17 = vpop.f32.mrf.mxu0 }
 0x26a   : > { %v2339_v30 = vld [vmem:[#allocation2 + $0x94] sm:$0xf]  ;;  %v3088_v41 = vld [vmem:[#allocation2 + $0x6c] sm:$0xf]  ;;  %v3329_v32 = vsel %vm8712_vm2, %v3324_v31, %v3328_v23  ;;  %3612 = vst [vmem:[#allocation3 + $0x184] sm:$0xf] %v3319_v48  ;;  %v2970_v53 = vsel %vm8739_vm5, %v7132_v9, %v2969_v34 }
 0x26b   : > { %v8400_v44 = vld [vmem:[#allocation3 + $0x29c] ss:$36 sps:$4 sm:$0xff]   ;;  %v2971_v6 = vrot.slane %v2969_v34, 4  ;;  %3120 = vst [vmem:[#allocation3 + $0x210] sm:$0xf] %v3088_v41  ;;  %v2606_v57 = vsel %vm8712_vm2, %v2601_v3, %v2605_v51  ;;  %v3333_v58 = vrot.slane %v3331_v52, 4  ;;  %v9548_v48 = vpop.f32.mrf.mxu0 }
 0x26c   : > { %v8405_v49 = vld [vmem:[#allocation3 + $0x298] ss:$36 sps:$4 sm:$0xff]   ;;  %3613 = vst [vmem:[#allocation3 + $0x1a8] sm:$0xf] %v3329_v32  ;;  %3061 = vst [vmem:[#allocation3 + $0x2e4] sm:$0xf] %v2970_v53  ;;  %5811 = vmatprep.mubr.bf16.mxu1 %v8400_v44 }
 0x26d   : > { %v3334_v59 = vshll.u32 %v9494_v0, 16  ;;  %v3340_v13 = vshll.u32 %v3157_v55, 16  ;;  %v3089_v43 = vld [vmem:[#allocation2 + $0x70] sm:$0xf]  ;;  %v2611_v62 = vrot.slane %v2610_v33, 4  ;;  %v2615_v50 = vrot.slane %v2613_v26, 5  ;;  %5812 = vmatmul.mubr.bf16.gmra.mxu1 %v8405_v49  ;;  %v9542_v26 = vpop.f32.mrf.mxu1 }
 0x26e   : > { %2789 = vst [vmem:[#allocation3 + $0x2e0] sm:$0xf] %v2606_v57  ;;  %v2973_v4 = vsel %vm8739_vm5, %v2971_v6, %v2972_v35  ;;  %v3344_v8 = vshrl.u32 %v3157_v55, 16  ;;  %3121 = vst [vmem:[#allocation3 + $0x234] sm:$0xf] %v3089_v43  ;;  %v2618_v7 = vshrl.u32 %v2338_v25, 16  ;;  %v9552_v33 = vadd.f32 %v9492_v61, %v9484_v47 }
 0x26f   : > { %v9533_v1 = vld [vmem:[%s10685_s4] ss:$0 sm:$0xff]  ;;  %3062 = vst [vmem:[#allocation3 + $0x308] sm:$0xf] %v2973_v4  ;;  %v3336_v0 = vrot.slane %v3334_v59, 5  ;;  %v3342_v2 = vrot.slane %v3340_v13, 5  ;;  %v2616_v12 = vsel %vm8712_vm2, %v2611_v62, %v2615_v50  ;;  %v9560_v62 = vpop.f32.mrf.mxu1 }
 0x270   : > { %v2340_v40 = vld [vmem:[#allocation2 + $0x98] sm:$0x1]  ;;  %v2621_v38 = vshll.u32 %v2338_v25, 16  ;;  %v3346_v14 = vrot.slane %v3344_v8, 4  ;;  %v3350_v15 = vshll.u32 %v9512_v5, 16  ;;  %v2627_v16 = vshll.u32 %v2339_v30, 16 }
 0x271   : > { %v2835_v51 = vld [vmem:[#allocation2 + $0x94] sm:$0xf]  ;;  %2790 = vst [vmem:[#allocation3 + $0x304] sm:$0xf] %v2616_v12  ;;  %v3337_v55 = vor.u32 %v3336_v0, %v3333_v58  ;;  %v2620_v46 = vrot.slane %v2618_v7, 4  ;;  %v2631_v23 = vshrl.u32 %v2339_v30, 16  ;;  %v9546_v29 = vadd.f32 %v9275_v11, %v9533_v1  ;;  %v9554_v11 = vpop.f32.mrf.mxu0 }
 0x272   : > { %v2623_v56 = vrot.slane %v2621_v38, 5  ;;  %v2834_v24 = vld [vmem:[#allocation2 + $0x90] sm:$0xe]  ;;  %v3159_v25 = vld [vmem:[#allocation2 + $0x6c] sm:$0xf]  ;;  %v3347_v31 = vor.u32 %v3346_v14, %v3342_v2  ;;  %v2629_v28 = vrot.slane %v2627_v16, 5 }
 0x273   : > { %v2637_v9 = vshll.u32 %v2340_v40, 16  ;;  %v2836_v34 = vld [vmem:[#allocation2 + $0x98] sm:$0x1]  ;;  %v3338_v3 = vrot.slane %v3337_v55, 4  ;;  %v2633_v5 = vrot.slane %v2631_v23, 4  ;;  %v2976_v52 = vrot.slane %v2835_v51, 5 }
 0x274   : > { %v2624_v35 = vor.u32 %v2623_v56, %v2620_v46  ;;  %v3160_v41 = vld [vmem:[#allocation2 + $0x70] sm:$0xf]  ;;  %v8404_v30 = vld [vmem:[#allocation3 + $0x184] ss:$36 sps:$4 sm:$0xff]   ;;  %v3348_v44 = vrot.slane %v3347_v31, 4  ;;  %v3352_v32 = vrot.slane %v3350_v15, 5  ;;  %v9572_v15 = vadd.f32 %v9500_v20, %v9533_v1 }
 0x275   : > { %v7133_v49 = vrot.slane %v2834_v24, 9  ;;  %v2341_v53 = vld [vmem:[#allocation2 + $0x9c] sm:$0xf]  ;;  %v3343_v57 = vsel %vm8712_vm2, %v3338_v3, %v3342_v2  ;;  %v2634_v59 = vor.u32 %v2633_v5, %v2629_v28  ;;  %v2639_v13 = vrot.slane %v2637_v9, 5  ;;  %v9558_v43 = vld [vmem:[#allocation2 + $0x74] sm:$0x1]  ;;  %5940 = vmatprep.mubr.bf16.mxu0 %v8404_v30  ;;  %v9566_v2 = vpop.f32.mrf.mxu0  ;;  %v9584_v9 = vpop.f32.mrf.mxu1 }
 0x276   : > { %v8402_v6 = vld [vmem:[#allocation3 + $0x180] ss:$36 sps:$4 sm:$0xff]   ;;  %v2625_v58 = vrot.slane %v2624_v35, 4  ;;  %v3353_v50 = vsel %vm8712_vm2, %v3348_v44, %v3352_v32  ;;  %3614 = vst [vmem:[#allocation3 + $0x1cc] sm:$0xf] %v3343_v57  ;;  %v2978_v61 = vrot.slane %v2976_v52, 4  ;;  %v9576_v51 = vadd.f32 %v9438_v37, %v9533_v1 }
 0x277   : > { %v2977_v47 = vsel %vm8739_vm5, %v7133_v49, %v2976_v52  ;;  %v2979_v4 = vrot.slane %v2836_v34, 5  ;;  %v3090_v8 = vld [vmem:[#allocation2 + $0x78] sm:$0xf]  ;;  %v3091_v0 = vld [vmem:[#allocation2 + $0x7c] sm:$0xf]  ;;  %5941 = vmatmul.mubr.bf16.gmra.mxu0 %v8402_v6  ;;  %v2635_v7 = vrot.slane %v2634_v59, 4  ;;  %v9580_v23 = vpop.f32.mrf.mxu0  ;;  %v9589_v6 = vpop.f32.mrf.mxu1 }
 0x278   : > { %3615 = vst [vmem:[#allocation3 + $0x1f0] sm:$0xf] %v3353_v50  ;;  %v2630_v40 = vsel %vm8712_vm2, %v2625_v58, %v2629_v28  ;;  %3063 = vst [vmem:[#allocation3 + $0x32c] sm:$0xf] %v2977_v47  ;;  %v3355_v38 = vshrl.u32 %v3159_v25, 16  ;;  %v3358_v12 = vshll.u32 %v3159_v25, 16 }
 0x279   : > { %v2342_v14 = vld [vmem:[#allocation2 + $0xa0] sm:$0xf]  ;;  %3122 = vst [vmem:[#allocation3 + $0x258] sm:$0xf] %v3090_v8  ;;  %3123 = vst [vmem:[#allocation3 + $0x27c] sm:$0xf] %v3091_v0  ;;  %v2980_v55 = vsel %vm8739_vm5, %v2978_v61, %v2979_v4  ;;  %v2640_v25 = vsel %vm8712_vm2, %v2635_v7, %v2639_v13  ;;  %v9597_v8 = vpop.f32.mrf.mxu1 }
 0x27a   : > { %v8406_v16 = vld [vmem:[#allocation3 + $0x2e4] ss:$36 sps:$4 sm:$0xff]   ;;  %2791 = vst [vmem:[#allocation3 + $0x328] sm:$0xf] %v2630_v40  ;;  %v3364_v46 = vshll.u32 %v3160_v41, 16  ;;  %v3357_v20 = vrot.slane %v3355_v38, 4 }
 0x27b   : > { %v2343_v56 = vld [vmem:[#allocation2 + $0xa4] sm:$0x1]  ;;  %v8412_v24 = vld [vmem:[#allocation3 + $0x2e0] ss:$36 sps:$4 sm:$0xff]   ;;  %3064 = vst [vmem:[#allocation3 + $0x350] sm:$0xf] %v2980_v55  ;;  %5819 = vmatprep.mubr.bf16.mxu1 %v8406_v16 }
 0x27c   : > { %v3360_v31 = vrot.slane %v3358_v12, 5  ;;  %v3368_v28 = vshrl.u32 %v3160_v41, 16  ;;  %2792 = vst [vmem:[#allocation3 + $0x34c] sm:$0xf] %v2640_v25  ;;  %v3366_v37 = vrot.slane %v3364_v46, 5  ;;  %v3374_v34 = vshll.u32 %v9558_v43, 16  ;;  %5820 = vmatmul.mubr.bf16.gmra.mxu1 %v8412_v24  ;;  %v9595_v43 = vpop.f32.mrf.mxu0 }
 0x27d   : > { %v2642_v3 = vshrl.u32 %v2341_v53, 16  ;;  %v2645_v35 = vshll.u32 %v2341_v53, 16  ;;  %v9587_v5 = vld [vmem:[#allocation2 + $0x78] sm:$0xf]  ;;  %v2651_v44 = vshll.u32 %v2342_v14, 16  ;;  %v2655_v32 = vshrl.u32 %v2342_v14, 16 }
 0x27e   : > { %v3361_v52 = vor.u32 %v3360_v31, %v3357_v20  ;;  %v3370_v30 = vrot.slane %v3368_v28, 4  ;;  %v2837_v49 = vld [vmem:[#allocation2 + $0x9c] sm:$0xe]  ;;  %v9593_v41 = vadd.f32 %v9504_v19, %v9533_v1  ;;  %v2661_v59 = vshll.u32 %v2343_v56, 16  ;;  %v2838_v13 = vld [vmem:[#allocation2 + $0xa0] sm:$0xf]  ;;  %v9605_v14 = vpop.f32.mrf.mxu0 }
 0x27f   : > { %v2644_v57 = vrot.slane %v2642_v3, 4  ;;  %v2647_v58 = vrot.slane %v2645_v35, 5  ;;  %v2653_v47 = vrot.slane %v2651_v44, 5  ;;  %v2657_v61 = vrot.slane %v2655_v32, 4  ;;  %v2839_v4 = vld [vmem:[#allocation2 + $0xa4] sm:$0x1]  ;;  %v9617_v44 = vpop.f32.mrf.mxu1 }
 0x280   : > { %v3362_v53 = vrot.slane %v3361_v52, 4  ;;  %v3371_v50 = vor.u32 %v3370_v30, %v3366_v37  ;;  %v8410_v0 = vld [vmem:[#allocation3 + $0x1cc] ss:$36 sps:$4 sm:$0xff]   ;;  %v3376_v40 = vrot.slane %v3374_v34, 5  ;;  %v3163_v38 = vld [vmem:[#allocation2 + $0x7c] sm:$0xf]  ;;  %v9601_v19 = vadd.f32 %v9535_v45, %v9524_v60 }
 0x281   : > { %v2648_v7 = vor.u32 %v2647_v58, %v2644_v57  ;;  %v7729_v12 = vadd.f32 %v9519_v27, %v9508_v21  ;;  %v2344_v16 = vld [vmem:[#allocation2 + $0xa8] sm:$0xf]  ;;  %v8408_v55 = vld [vmem:[#allocation3 + $0x1c8] ss:$36 sps:$4 sm:$0xff]   ;;  %v2658_v24 = vor.u32 %v2657_v61, %v2653_v47  ;;  %v2663_v25 = vrot.slane %v2661_v59, 5  ;;  %5948 = vmatprep.mubr.bf16.mxu0 %v8410_v0  ;;  %v9610_v27 = vpop.f32.mrf.mxu0 }
 0x282   : > { %v3367_v46 = vsel %vm8712_vm2, %v3362_v53, %v3366_v37  ;;  %v3372_v56 = vrot.slane %v3371_v50, 4  ;;  %v3164_v20 = vld [vmem:[#allocation2 + $0x80] sm:$0x1]  ;;  %v7134_v28 = vrot.slane %v2837_v49, 9  ;;  %v2983_v60 = vrot.slane %v2838_v13, 5  ;;  %5949 = vmatmul.mubr.bf16.gmra.mxu0 %v8408_v55 }
 0x283   : > { %3616 = vst [vmem:[#allocation3 + $0x214] sm:$0xf] %v3367_v46  ;;  %v2649_v31 = vrot.slane %v2648_v7, 4  ;;  %v3379_v45 = vshrl.u32 %v9587_v5, 16  ;;  %v2345_v34 = vld [vmem:[#allocation2 + $0xac] sm:$0xf]  ;;  %v9615_v30 = vadd.f32 %v7729_v12, %v9546_v29  ;;  %v9630_v55 = vpop.f32.mrf.mxu0 }
 0x284   : > { %v3092_v21 = vld [vmem:[#allocation2 + $0x84] sm:$0xf]  ;;  %v3377_v37 = vsel %vm8712_vm2, %v3372_v56, %v3376_v40  ;;  %v2659_v35 = vrot.slane %v2658_v24, 4  ;;  %v2986_v52 = vrot.slane %v2839_v4, 5  ;;  %v2984_v57 = vsel %vm8739_vm5, %v7134_v28, %v2983_v60  ;;  %v3093_v13 = vld [vmem:[#allocation2 + $0x88] sm:$0xf] }
 0x285   : > { %v8413_v3 = vld [vmem:[#allocation3 + $0x32c] ss:$36 sps:$4 sm:$0xff]   ;;  %3124 = vst [vmem:[#allocation3 + $0x2a0] sm:$0xf] %v3092_v21  ;;  %3617 = vst [vmem:[#allocation3 + $0x238] sm:$0xf] %v3377_v37  ;;  %v2654_v49 = vsel %vm8712_vm2, %v2649_v31, %v2653_v47 }
 0x286   : > { %v8418_v32 = vld [vmem:[#allocation3 + $0x328] ss:$36 sps:$4 sm:$0xff]   ;;  %v2985_v58 = vrot.slane %v2983_v60, 4  ;;  %v3381_v59 = vrot.slane %v3379_v45, 4  ;;  %5827 = vmatprep.mubr.bf16.mxu1 %v8413_v3  ;;  %v2664_v53 = vsel %vm8712_vm2, %v2659_v35, %v2663_v25  ;;  %2793 = vst [vmem:[#allocation3 + $0x370] sm:$0xf] %v2654_v49  ;;  %v9632_v25 = vpop.f32.mrf.mxu1 }
 0x287   : > { %3065 = vst [vmem:[#allocation3 + $0x374] sm:$0xf] %v2984_v57  ;;  %v3382_v29 = vshll.u32 %v9587_v5, 16  ;;  %v3388_v50 = vshll.u32 %v3163_v38, 16  ;;  %v3392_v61 = vshrl.u32 %v3163_v38, 16  ;;  %5828 = vmatmul.mubr.bf16.gmra.mxu1 %v8418_v32  ;;  %v3398_v0 = vshll.u32 %v3164_v20, 16 }
 0x288   : > { %v9626_v4 = vld [vmem:[#allocation2 + $0xb0] sm:$0x1]  ;;  %3125 = vst [vmem:[#allocation3 + $0x2c4] sm:$0xf] %v3093_v13  ;;  %2794 = vst [vmem:[#allocation3 + $0x394] sm:$0xf] %v2664_v53  ;;  %v2987_v47 = vsel %vm8739_vm5, %v2985_v58, %v2986_v52  ;;  %v9635_v35 = vpop.f32.mrf.mxu1  ;;  %v9637_v53 = vpop.f32.mrf.mxu0 }
 0x289   : > { %v2666_v40 = vshrl.u32 %v2344_v16, 16  ;;  %v2669_v7 = vshll.u32 %v2344_v16, 16  ;;  %v2840_v12 = vld [vmem:[#allocation2 + $0xa8] sm:$0xe]  ;;  %3066 = vst [vmem:[#allocation3 + $0x398] sm:$0xf] %v2987_v47  ;;  %v9651_v47 = vadd.f32 %v9589_v6, %v9584_v9 }
 0x28a   : > { %v3384_v46 = vrot.slane %v3382_v29, 5  ;;  %v3390_v56 = vrot.slane %v3388_v50, 5  ;;  %v3394_v5 = vrot.slane %v3392_v61, 4  ;;  %v2675_v24 = vshll.u32 %v2345_v34, 16  ;;  %v2841_v38 = vld [vmem:[#allocation2 + $0xac] sm:$0xf] }
 0x28b   : > { %v3400_v31 = vrot.slane %v3398_v0, 5  ;;  %v2668_v28 = vrot.slane %v2666_v40, 4  ;;  %v2671_v60 = vrot.slane %v2669_v7, 5  ;;  %v2679_v45 = vshrl.u32 %v2345_v34, 16  ;;  %v2842_v37 = vld [vmem:[#allocation2 + $0xb0] sm:$0x1]  ;;  %v9653_v0 = vpop.f32.mrf.mxu1 }
 0x28c   : > { %v3385_v21 = vor.u32 %v3384_v46, %v3381_v59  ;;  %v3395_v3 = vor.u32 %v3394_v5, %v3390_v56  ;;  %v2677_v20 = vrot.slane %v2675_v24, 5  ;;  %v2685_v16 = vshll.u32 %v9626_v4, 16  ;;  %v3165_v52 = vld [vmem:[#allocation2 + $0x84] sm:$0xf]  ;;  %v3166_v13 = vld [vmem:[#allocation2 + $0x88] sm:$0xf]  ;;  %v9657_v24 = vpop.f32.mrf.mxu0 }
 0x28d   : > { %v2672_v32 = vor.u32 %v2671_v60, %v2668_v28  ;;  %v2681_v49 = vrot.slane %v2679_v45, 4  ;;  %v7135_v57 = vrot.slane %v2840_v12, 9  ;;  %v2990_v58 = vrot.slane %v2841_v38, 5  ;;  %v8415_v29 = vld [vmem:[#allocation3 + $0x210] ss:$36 sps:$4 sm:$0xff]  }
 0x28e   : > { %v8417_v50 = vld [vmem:[#allocation3 + $0x214] ss:$36 sps:$4 sm:$0xff]   ;;  %v9641_v34 = vadd.f32 %v9482_v36, %v9533_v1  ;;  %v3386_v59 = vrot.slane %v3385_v21, 4  ;;  %v9647_v4 = vadd.f32 %v9560_v62, %v9542_v26  ;;  %v2347_v40 = vld [vmem:[#allocation2 + $0xb4] sm:$0xf]  ;;  %v3396_v7 = vrot.slane %v3395_v3, 4 }
 0x28f   : > { %v9643_v61 = vld [vmem:[#allocation2 + $0x8c] sm:$0x1]  ;;  %v2673_v12 = vrot.slane %v2672_v32, 4  ;;  %v2682_v46 = vor.u32 %v2681_v49, %v2677_v20  ;;  %v7732_v36 = vadd.f32 %v9540_v17, %v9528_v63  ;;  %v3094_v5 = vld [vmem:[#allocation2 + $0x90] sm:$0xf]  ;;  %5956 = vmatprep.mubr.bf16.mxu0 %v8417_v50  ;;  %v2991_v62 = vsel %vm8739_vm5, %v7135_v57, %v2990_v58 }
 0x290   : > { %v3391_v26 = vsel %vm8712_vm2, %v3386_v59, %v3390_v56  ;;  %v2992_v9 = vrot.slane %v2990_v58, 4  ;;  %v2993_v6 = vrot.slane %v2842_v37, 5  ;;  %v2348_v38 = vld [vmem:[#allocation2 + $0xb8] sm:$0xf]  ;;  %v3095_v28 = vld [vmem:[#allocation2 + $0x94] sm:$0xf]  ;;  %5957 = vmatmul.mubr.bf16.gmra.mxu0 %v8415_v29  ;;  %v3401_v63 = vsel %vm8712_vm2, %v3396_v7, %v3400_v31  ;;  %v9667_v56 = vpop.f32.mrf.mxu0  ;;  %v9671_v31 = vpop.f32.mrf.mxu1 }
 0x291   : > { %3126 = vst [vmem:[#allocation3 + $0x2e8] sm:$0xf] %v3094_v5  ;;  %v8419_v60 = vld [vmem:[#allocation3 + $0x374] ss:$36 sps:$4 sm:$0xff]   ;;  %3618 = vst [vmem:[#allocation3 + $0x25c] sm:$0xf] %v3391_v26  ;;  %v2678_v17 = vsel %vm8712_vm2, %v2673_v12, %v2677_v20  ;;  %v9677_v29 = vadd.f32 %v7732_v36, %v9572_v15  ;;  %v9683_v26 = vadd.f32 %v9472_v18, %v9470_v10 }
 0x292   : > { %v2683_v45 = vrot.slane %v2682_v46, 4  ;;  %v2687_v21 = vrot.slane %v2685_v16, 5  ;;  %3067 = vst [vmem:[#allocation3 + $0x3bc] sm:$0xf] %v2991_v62  ;;  %3127 = vst [vmem:[#allocation3 + $0x30c] sm:$0xf] %v3095_v28  ;;  %v2994_v37 = vsel %vm8739_vm5, %v2992_v9, %v2993_v6  ;;  %5835 = vmatprep.mubr.bf16.mxu1 %v8419_v60  ;;  %v9679_v5 = vpop.f32.mrf.mxu0  ;;  %v9685_v60 = vpop.f32.mrf.mxu1 }
 0x293   : > { %3619 = vst [vmem:[#allocation3 + $0x280] sm:$0xf] %v3401_v63  ;;  %v8425_v3 = vld [vmem:[#allocation3 + $0x370] ss:$36 sps:$4 sm:$0xff]   ;;  %2795 = vst [vmem:[#allocation3 + $0x3b8] sm:$0xf] %v2678_v17 }
 0x294   : > { %v3403_v32 = vshrl.u32 %v3165_v52, 16  ;;  %v3406_v49 = vshll.u32 %v3165_v52, 16  ;;  %v3412_v57 = vshll.u32 %v3166_v13, 16  ;;  %v2688_v20 = vsel %vm8712_vm2, %v2683_v45, %v2687_v21  ;;  %3068 = vst [vmem:[#allocation3 + $0x3e0] sm:$0xf] %v2994_v37  ;;  %5836 = vmatmul.mubr.bf16.gmra.mxu1 %v8425_v3 }
 0x295   : > { %v3416_v16 = vshrl.u32 %v3166_v13, 16  ;;  %v3422_v58 = vshll.u32 %v9643_v61, 16  ;;  %v2349_v50 = vld [vmem:[#allocation2 + $0xbc] sm:$0x1]  ;;  %2796 = vst [vmem:[#allocation3 + $0x3dc] sm:$0xf] %v2688_v20 }
 0x296   : > { %v3405_v59 = vrot.slane %v3403_v32, 4  ;;  %v3408_v7 = vrot.slane %v3406_v49, 5  ;;  %v3414_v52 = vrot.slane %v3412_v57, 5  ;;  %v2690_v12 = vshrl.u32 %v2347_v40, 16  ;;  %v2843_v46 = vld [vmem:[#allocation2 + $0xb4] sm:$0xe] }
 0x297   : > { %v3418_v13 = vrot.slane %v3416_v16, 4  ;;  %v2693_v62 = vshll.u32 %v2347_v40, 16  ;;  %v2699_v61 = vshll.u32 %v2348_v38, 16  ;;  %v2844_v9 = vld [vmem:[#allocation2 + $0xb8] sm:$0xf]  ;;  %v2703_v6 = vshrl.u32 %v2348_v38, 16  ;;  %v9687_v16 = vpop.f32.mrf.mxu1  ;;  %v9689_v38 = vpop.f32.mrf.mxu0 }
 0x298   : > { %v3409_v15 = vor.u32 %v3408_v7, %v3405_v59  ;;  %v2692_v36 = vrot.slane %v2690_v12, 4  ;;  %v2709_v28 = vshll.u32 %v2349_v50, 16  ;;  %v3168_v63 = vld [vmem:[#allocation2 + $0x90] sm:$0xf]  ;;  %v3424_v45 = vrot.slane %v3422_v58, 5 }
 0x299   : > { %v3419_v17 = vor.u32 %v3418_v13, %v3414_v52  ;;  %v2695_v21 = vrot.slane %v2693_v62, 5  ;;  %v2701_v3 = vrot.slane %v2699_v61, 5  ;;  %v2845_v37 = vld [vmem:[#allocation2 + $0xbc] sm:$0x1]  ;;  %v2705_v10 = vrot.slane %v2703_v6, 4  ;;  %v9697_v6 = vpop.f32.mrf.mxu1 }
 0x29a   : > { %v3096_v32 = vld [vmem:[#allocation2 + $0x9c] sm:$0xf]  ;;  %v3410_v49 = vrot.slane %v3409_v15, 4  ;;  %v7136_v18 = vrot.slane %v2843_v46, 9  ;;  %v2997_v57 = vrot.slane %v2844_v9, 5  ;;  %v2711_v12 = vrot.slane %v2709_v28, 5 }
 0x29b   : > { %v3169_v40 = vld [vmem:[#allocation2 + $0x94] sm:$0xf]  ;;  %v3170_v20 = vld [vmem:[#allocation2 + $0x98] sm:$0x1]  ;;  %3128 = vst [vmem:[#allocation3 + $0x330] sm:$0xf] %v3096_v32  ;;  %v2696_v7 = vor.u32 %v2695_v21, %v2692_v36  ;;  %v7735_v58 = vadd.f32 %v9554_v11, %v9548_v48  ;;  %v2706_v46 = vor.u32 %v2705_v10, %v2701_v3  ;;  %v9699_v32 = vpop.f32.mrf.mxu0  ;;  %v9708_v28 = vadd.f32 %v9617_v44, %v9597_v8  ;;  %v9714_v44 = vpop.f32.mrf.mxu1 }
 0x29c   : > { %v8423_v50 = vld [vmem:[#allocation3 + $0x25c] ss:$36 sps:$4 sm:$0xff]   ;;  %v3420_v59 = vrot.slane %v3419_v17, 4  ;;  %v3415_v62 = vsel %vm8712_vm2, %v3410_v49, %v3414_v52  ;;  %v2998_v61 = vsel %vm8739_vm5, %v7136_v18, %v2997_v57  ;;  %v2999_v9 = vrot.slane %v2997_v57, 4  ;;  %v3097_v15 = vld [vmem:[#allocation2 + $0xa0] sm:$0xf] }
 0x29d   : > { %v8421_v13 = vld [vmem:[#allocation3 + $0x258] ss:$36 sps:$4 sm:$0xff]   ;;  %v2350_v17 = vld [vmem:[#allocation2 + $0xc0] sm:$0xf]  ;;  %5964 = vmatprep.mubr.bf16.mxu0 %v8423_v50  ;;  %3620 = vst [vmem:[#allocation3 + $0x2a4] sm:$0xf] %v3415_v62  ;;  %v9704_v52 = vadd.f32 %v7735_v58, %v9576_v51 }
 0x29e   : > { %v8426_v36 = vld [vmem:[#allocation3 + $0x3bc] ss:$36 sps:$4 sm:$0xff]   ;;  %v3425_v48 = vsel %vm8712_vm2, %v3420_v59, %v3424_v45  ;;  %v2697_v11 = vrot.slane %v2696_v7, 4  ;;  %3069 = vst [vmem:[#allocation3 + $0x404] sm:$0xf] %v2998_v61  ;;  %5965 = vmatmul.mubr.bf16.gmra.mxu0 %v8421_v13  ;;  %v2707_v49 = vrot.slane %v2706_v46, 4  ;;  %v9710_v45 = vpop.f32.mrf.mxu0 }
 0x29f   : > { %3129 = vst [vmem:[#allocation3 + $0x354] sm:$0xf] %v3097_v15  ;;  %3621 = vst [vmem:[#allocation3 + $0x2c8] sm:$0xf] %v3425_v48  ;;  %v8431_v21 = vld [vmem:[#allocation3 + $0x3b8] ss:$36 sps:$4 sm:$0xff]   ;;  %5843 = vmatprep.mubr.bf16.mxu1 %v8426_v36 }
 0x2a0   : > { %v3000_v10 = vrot.slane %v2845_v37, 5  ;;  %v3427_v18 = vshrl.u32 %v3168_v63, 16  ;;  %v3430_v57 = vshll.u32 %v3168_v63, 16  ;;  %v2351_v50 = vld [vmem:[#allocation2 + $0xc4] sm:$0xf]  ;;  %v2702_v51 = vsel %vm8712_vm2, %v2697_v11, %v2701_v3  ;;  %5844 = vmatmul.mubr.bf16.gmra.mxu1 %v8431_v21  ;;  %v9720_v3 = vpop.f32.mrf.mxu0 }
 0x2a1   : > { %v3436_v59 = vshll.u32 %v3169_v40, 16  ;;  %v3440_v7 = vshrl.u32 %v3169_v40, 16  ;;  %v3446_v58 = vshll.u32 %v3170_v20, 16  ;;  %v3098_v8 = vld [vmem:[#allocation2 + $0xa8] sm:$0xf]  ;;  %v2712_v13 = vsel %vm8712_vm2, %v2707_v49, %v2711_v12 }
 0x2a2   : > { %2797 = vst [vmem:[#allocation3 + $0x400] sm:$0xf] %v2702_v51  ;;  %v3001_v63 = vsel %vm8739_vm5, %v2999_v9, %v3000_v10  ;;  %v3429_v37 = vrot.slane %v3427_v18, 4  ;;  %v3432_v62 = vrot.slane %v3430_v57, 5  ;;  %v2352_v46 = vld [vmem:[#allocation2 + $0xc8] sm:$0x1]  ;;  %v9724_v40 = vadd.f32 %v9683_v26, %v9533_v1  ;;  %v9728_v26 = vpop.f32.mrf.mxu1 }
 0x2a3   : > { %v3099_v61 = vld [vmem:[#allocation2 + $0xac] sm:$0xf]  ;;  %3130 = vst [vmem:[#allocation3 + $0x378] sm:$0xf] %v3098_v8  ;;  %2798 = vst [vmem:[#allocation3 + $0x424] sm:$0xf] %v2712_v13  ;;  %v7738_v9 = vadd.f32 %v9580_v23, %v9566_v2  ;;  %v9735_v2 = vpop.f32.mrf.mxu0 }
 0x2a4   : > { %3070 = vst [vmem:[#allocation3 + $0x428] sm:$0xf] %v3001_v63  ;;  %v3438_v20 = vrot.slane %v3436_v59, 5  ;;  %v3442_v15 = vrot.slane %v3440_v7, 4  ;;  %v3448_v12 = vrot.slane %v3446_v58, 5  ;;  %v3433_v36 = vor.u32 %v3432_v62, %v3429_v37 }
 0x2a5   : > { %3131 = vst [vmem:[#allocation3 + $0x39c] sm:$0xf] %v3099_v61  ;;  %v2714_v48 = vshrl.u32 %v2350_v17, 16  ;;  %v2717_v11 = vshll.u32 %v2350_v17, 16  ;;  %v2846_v21 = vld [vmem:[#allocation2 + $0xc0] sm:$0xe]  ;;  %v9733_v7 = vadd.f32 %v7738_v9, %v9593_v41  ;;  %v7741_v62 = vadd.f32 %v9605_v14, %v9595_v43  ;;  %v9747_v41 = vpop.f32.mrf.mxu1 }
 0x2a6   : > { %v3443_v49 = vor.u32 %v3442_v15, %v3438_v20  ;;  %v2723_v10 = vshll.u32 %v2351_v50, 16  ;;  %v2727_v18 = vshrl.u32 %v2351_v50, 16  ;;  %v2733_v57 = vshll.u32 %v2352_v46, 16  ;;  %v2847_v51 = vld [vmem:[#allocation2 + $0xc4] sm:$0xf] }
 0x2a7   : > { %v9730_v8 = vld [vmem:[#allocation2 + $0x9c] sm:$0xf]  ;;  %v3434_v59 = vrot.slane %v3433_v36, 4  ;;  %v2716_v58 = vrot.slane %v2714_v48, 4  ;;  %v2719_v13 = vrot.slane %v2717_v11, 5  ;;  %v9739_v50 = vadd.f32 %v9635_v35, %v9632_v25 }
 0x2a8   : > { %v2848_v63 = vld [vmem:[#allocation2 + $0xc8] sm:$0x1]  ;;  %v8430_v23 = vld [vmem:[#allocation3 + $0x2a4] ss:$36 sps:$4 sm:$0xff]   ;;  %v3444_v17 = vrot.slane %v3443_v49, 4  ;;  %v9745_v46 = vadd.f32 %v9671_v31, %v9653_v0  ;;  %v2725_v9 = vrot.slane %v2723_v10, 5  ;;  %v9751_v49 = vpop.f32.mrf.mxu0  ;;  %v9755_v31 = vpop.f32.mrf.mxu1 }
 0x2a9   : > { %v3172_v37 = vld [vmem:[#allocation2 + $0xa0] sm:$0xf]  ;;  %v8428_v61 = vld [vmem:[#allocation3 + $0x2a0] ss:$36 sps:$4 sm:$0xff]   ;;  %v3439_v15 = vsel %vm8712_vm2, %v3434_v59, %v3438_v20  ;;  %v2720_v36 = vor.u32 %v2719_v13, %v2716_v58  ;;  %v2729_v48 = vrot.slane %v2727_v18, 4  ;;  %5972 = vmatprep.mubr.bf16.mxu0 %v8430_v23  ;;  %v2735_v14 = vrot.slane %v2733_v57, 5 }
 0x2aa   : > { %v3173_v11 = vld [vmem:[#allocation2 + $0xa4] sm:$0x1]  ;;  %v3449_v43 = vsel %vm8712_vm2, %v3444_v17, %v3448_v12  ;;  %3622 = vst [vmem:[#allocation3 + $0x2ec] sm:$0xf] %v3439_v15  ;;  %v7137_v25 = vrot.slane %v2846_v21, 9  ;;  %v3004_v35 = vrot.slane %v2847_v51, 5  ;;  %v9759_v20 = vadd.f32 %v9506_v22, %v9496_v42  ;;  %5973 = vmatmul.mubr.bf16.gmra.mxu0 %v8428_v61  ;;  %v9764_v12 = vpop.f32.mrf.mxu0 }
 0x2ab   : > { %v3100_v0 = vld [vmem:[#allocation2 + $0xb4] sm:$0xf]  ;;  %v8432_v10 = vld [vmem:[#allocation3 + $0x404] ss:$36 sps:$4 sm:$0xff]   ;;  %3623 = vst [vmem:[#allocation3 + $0x310] sm:$0xf] %v3449_v43  ;;  %v2730_v58 = vor.u32 %v2729_v48, %v2725_v9  ;;  %v9762_v13 = vadd.f32 %v7741_v62, %v9641_v34 }
 0x2ac   : > { %v8438_v18 = vld [vmem:[#allocation3 + $0x400] ss:$36 sps:$4 sm:$0xff]   ;;  %v2721_v59 = vrot.slane %v2720_v36, 4  ;;  %3132 = vst [vmem:[#allocation3 + $0x3c0] sm:$0xf] %v3100_v0  ;;  %v3005_v21 = vsel %vm8739_vm5, %v7137_v25, %v3004_v35  ;;  %v3006_v57 = vrot.slane %v3004_v35, 4  ;;  %5851 = vmatprep.mubr.bf16.mxu1 %v8432_v10  ;;  %v9774_v25 = vpop.f32.mrf.mxu1 }
 0x2ad   : > { %v3007_v51 = vrot.slane %v2848_v63, 5  ;;  %v3451_v42 = vshrl.u32 %v9730_v8, 16  ;;  %v3101_v22 = vld [vmem:[#allocation2 + $0xb8] sm:$0xf]  ;;  %v3174_v23 = vld [vmem:[#allocation2 + $0xa8] sm:$0xf]  ;;  %5852 = vmatmul.mubr.bf16.gmra.mxu1 %v8438_v18  ;;  %v9782_v18 = vpop.f32.mrf.mxu0 }
 0x2ae   : > { %v2726_v17 = vsel %vm8712_vm2, %v2721_v59, %v2725_v9  ;;  %v2731_v61 = vrot.slane %v2730_v58, 4  ;;  %3071 = vst [vmem:[#allocation3 + $0x44c] sm:$0xf] %v3005_v21  ;;  %v3454_v34 = vshll.u32 %v9730_v8, 16  ;;  %v3460_v62 = vshll.u32 %v3172_v37, 16 }
 0x2af   : > { %3133 = vst [vmem:[#allocation3 + $0x3e4] sm:$0xf] %v3101_v22  ;;  %2799 = vst [vmem:[#allocation3 + $0x448] sm:$0xf] %v2726_v17  ;;  %v3008_v15 = vsel %vm8739_vm5, %v3006_v57, %v3007_v51  ;;  %v3453_v63 = vrot.slane %v3451_v42, 4  ;;  %v3464_v36 = vshrl.u32 %v3172_v37, 16  ;;  %v9778_v9 = vadd.f32 %v9552_v33, %v9533_v1 }
 0x2b0   : > { %v3470_v48 = vshll.u32 %v3173_v11, 16  ;;  %v3175_v43 = vld [vmem:[#allocation2 + $0xac] sm:$0xf]  ;;  %v2736_v8 = vsel %vm8712_vm2, %v2731_v61, %v2735_v14  ;;  %3072 = vst [vmem:[#allocation3 + $0x470] sm:$0xf] %v3008_v15  ;;  %v3456_v35 = vrot.slane %v3454_v34, 5  ;;  %v7744_v11 = vadd.f32 %v9630_v55, %v9610_v27 }
 0x2b1   : > { %v3462_v0 = vrot.slane %v3460_v62, 5  ;;  %v3176_v10 = vld [vmem:[#allocation2 + $0xb0] sm:$0x1]  ;;  %2800 = vst [vmem:[#allocation3 + $0x46c] sm:$0xf] %v2736_v8  ;;  %v3466_v59 = vrot.slane %v3464_v36, 4  ;;  %v9791_v15 = vadd.f32 %v9687_v16, %v9685_v60  ;;  %v9793_v36 = vpop.f32.mrf.mxu1  ;;  %v5447_v60 = vadd.f32 %v9759_v20, %v9533_v1 }
 0x2b2   : > { %v3472_v37 = vrot.slane %v3470_v48, 5  ;;  %v3475_v58 = vshrl.u32 %v3174_v23, 16  ;;  %v3634_v21 = vld [vmem:[#allocation2 + $0x18] sm:$0xe]  ;;  %v3457_v57 = vor.u32 %v3456_v35, %v3453_v63  ;;  %v3478_v33 = vshll.u32 %v3174_v23, 16 }
 0x2b3   : > { %v3484_v51 = vshll.u32 %v3175_v43, 16  ;;  %v3488_v42 = vshrl.u32 %v3175_v43, 16  ;;  %v3635_v22 = vld [vmem:[#allocation2 + $0x1c] sm:$0xf]  ;;  %v8436_v14 = vld [vmem:[#allocation3 + $0x2ec] ss:$36 sps:$4 sm:$0xff]   ;;  %v3467_v17 = vor.u32 %v3466_v59, %v3462_v0  ;;  %v9787_v61 = vadd.f32 %v7744_v11, %v9724_v40  ;;  %v9795_v43 = vpop.f32.mrf.mxu0 }
 0x2b4   : > { %v3477_v34 = vrot.slane %v3475_v58, 4  ;;  %v3636_v62 = vld [vmem:[#allocation2 + $0x20] sm:$0x1]  ;;  %v3458_v55 = vrot.slane %v3457_v57, 4  ;;  %v3480_v63 = vrot.slane %v3478_v33, 5  ;;  %5980 = vmatprep.mubr.bf16.mxu0 %v8436_v14  ;;  %v3494_v35 = vshll.u32 %v3176_v10, 16  ;;  %v9797_v58 = vpop.f32.mrf.mxu1 }
 0x2b5   : > { %10701 = vst [vmem:[#allocation4_spill] sm:$0xff] %v9787_v61  ;;  %v8434_v27 = vld [vmem:[#allocation3 + $0x2e8] ss:$36 sps:$4 sm:$0xff]   ;;  %v3486_v23 = vrot.slane %v3484_v51, 5  ;;  %v3490_v48 = vrot.slane %v3488_v42, 4  ;;  %v3468_v8 = vrot.slane %v3467_v17, 4  ;;  %v9803_v42 = vpop.f32.mrf.mxu0 }
 0x2b6   : > { %v7138_v40 = vrot.slane %v3634_v21, 9  ;;  %v3732_v59 = vrot.slane %v3635_v22, 5  ;;  %v3102_v11 = vld [vmem:[#allocation2 + $0xc0] sm:$0xf]  ;;  %v3177_v61 = vld [vmem:[#allocation2 + $0xb4] sm:$0xf]  ;;  %5981 = vmatmul.mubr.bf16.gmra.mxu0 %v8434_v27  ;;  %v3463_v16 = vsel %vm8712_vm2, %v3458_v55, %v3462_v0  ;;  %v3481_v57 = vor.u32 %v3480_v63, %v3477_v34  ;;  %v9809_v17 = vpop.f32.mrf.mxu1 }
 0x2b7   : > { %v3491_v33 = vor.u32 %v3490_v48, %v3486_v23  ;;  %v3103_v51 = vld [vmem:[#allocation2 + $0xc4] sm:$0xf]  ;;  %3134 = vst [vmem:[#allocation3 + $0x408] sm:$0xf] %v3102_v11  ;;  %v3473_v10 = vsel %vm8712_vm2, %v3468_v8, %v3472_v37  ;;  %3624 = vst [vmem:[#allocation3 + $0x334] sm:$0xf] %v3463_v16  ;;  %v7747_v55 = vadd.f32 %v9657_v24, %v9637_v53  ;;  %v9817_v63 = vpop.f32.mrf.mxu0 }
 0x2b8   : > { %v3733_v21 = vsel %vm8739_vm5, %v7138_v40, %v3732_v59  ;;  %v3734_v22 = vrot.slane %v3732_v59, 4  ;;  %v3735_v14 = vrot.slane %v3636_v62, 5  ;;  %v3178_v20 = vld [vmem:[#allocation2 + $0xb8] sm:$0xf]  ;;  %3135 = vst [vmem:[#allocation3 + $0x42c] sm:$0xf] %v3103_v51  ;;  %v9815_v37 = vadd.f32 %v9714_v44, %v9697_v6  ;;  %v9823_v11 = vpop.f32.mrf.mxu1 }
 0x2b9   : > { %v8439_v0 = vld [vmem:[#allocation3 + $0x44c] ss:$36 sps:$4 sm:$0xff]   ;;  %3625 = vst [vmem:[#allocation3 + $0x358] sm:$0xf] %v3473_v10  ;;  %v3482_v34 = vrot.slane %v3481_v57, 4  ;;  %v3496_v27 = vrot.slane %v3494_v35, 5  ;;  %v7750_v40 = vadd.f32 %v9679_v5, %v9667_v56  ;;  %v5452_v53 = vadd.f32 %v9601_v19, %v9533_v1  ;;  %v9836_v10 = vpop.f32.mrf.mxu0 }
 0x2ba   : > { %3874 = vst [vmem:[#allocation3 + $0x20] sm:$0xf] %v3733_v21  ;;  %v8444_v48 = vld [vmem:[#allocation3 + $0x448] ss:$36 sps:$4 sm:$0xff]   ;;  %v3492_v62 = vrot.slane %v3491_v33, 4  ;;  %v3736_v8 = vsel %vm8739_vm5, %v3734_v22, %v3735_v14  ;;  %v3499_v35 = vshrl.u32 %v3177_v61, 16  ;;  %5859 = vmatprep.mubr.bf16.mxu1 %v8439_v0  ;;  %v9830_v6 = vadd.f32 %v7747_v55, %v9778_v9  ;;  %v9840_v0 = vpop.f32.mrf.mxu1 }
 0x2bb   : > { %v3179_v59 = vld [vmem:[#allocation2 + $0xbc] sm:$0x1]  ;;  %v3487_v24 = vsel %vm8712_vm2, %v3482_v34, %v3486_v23  ;;  %3875 = vst [vmem:[#allocation3 + $0x44] sm:$0xf] %v3736_v8  ;;  %v3502_v44 = vshll.u32 %v3177_v61, 16  ;;  %5860 = vmatmul.mubr.bf16.gmra.mxu1 %v8444_v48  ;;  %v9834_v5 = vadd.f32 %v7750_v40, %v5447_v60  ;;  %v3508_v19 = vshll.u32 %v3178_v20, 16 }
 0x2bc   : > { %v3640_v16 = vld [vmem:[#allocation2 + $0x30] sm:$0xe]  ;;  %v3641_v57 = vld [vmem:[#allocation2 + $0x34] sm:$0xf]  ;;  %v3497_v56 = vsel %vm8712_vm2, %v3492_v62, %v3496_v27  ;;  %3626 = vst [vmem:[#allocation3 + $0x37c] sm:$0xf] %v3487_v24  ;;  %v5455_v9 = vadd.f32 %v9647_v4, %v9533_v1  ;;  %v9844_v55 = vadd.f32 %v9747_v41, %v9728_v26  ;;  %v7753_v4 = vadd.f32 %v9699_v32, %v9689_v38 }
 0x2bd   : > { %v3501_v33 = vrot.slane %v3499_v35, 4  ;;  %v3642_v51 = vld [vmem:[#allocation2 + $0x38] sm:$0x1]  ;;  %v3643_v23 = vld [vmem:[#allocation2 + $0x3c] sm:$0xe]  ;;  %v3504_v61 = vrot.slane %v3502_v44, 5 }
 0x2be   : > { %3627 = vst [vmem:[#allocation3 + $0x3a0] sm:$0xf] %v3497_v56  ;;  %v3512_v21 = vshrl.u32 %v3178_v20, 16  ;;  %v3518_v22 = vshll.u32 %v3179_v59, 16  ;;  %v3644_v14 = vld [vmem:[#allocation2 + $0x40] sm:$0xf]  ;;  %v9850_v20 = vpop.f32.mrf.mxu1  ;;  %v9858_v56 = vpop.f32.mrf.mxu0 }
 0x2bf   : > { %v3510_v34 = vrot.slane %v3508_v19, 5  ;;  %v7140_v27 = vrot.slane %v3640_v16, 9  ;;  %v3746_v60 = vrot.slane %v3641_v57, 5  ;;  %v9846_v48 = vld [vmem:[#allocation2 + $0x44] sm:$0x1]  ;;  %v3505_v8 = vor.u32 %v3504_v61, %v3501_v33 }
 0x2c0   : > { %v3104_v62 = vld [vmem:[#allocation2 + $0xcc] sm:$0xf]  ;;  %v3514_v40 = vrot.slane %v3512_v21, 4  ;;  %v3749_v1 = vrot.slane %v3642_v51, 5  ;;  %v3105_v59 = vld [vmem:[#allocation2 + $0xd0] sm:$0xf]  ;;  %v9856_v16 = vadd.f32 %v9774_v25, %v9755_v31  ;;  %v9860_v51 = vadd.f32 %v7753_v4, %v5452_v53 }
 0x2c1   : > { %3136 = vst [vmem:[#allocation3 + $0x450] sm:$0xf] %v3104_v62  ;;  %v3180_v35 = vld [vmem:[#allocation2 + $0xc0] sm:$0xf]  ;;  %v8443_v24 = vld [vmem:[#allocation3 + $0x334] ss:$36 sps:$4 sm:$0xff]   ;;  %v3747_v26 = vsel %vm8739_vm5, %v7140_v27, %v3746_v60  ;;  %v7756_v61 = vadd.f32 %v9720_v3, %v9710_v45  ;;  %v9877_v45 = vpop.f32.mrf.mxu0 }
 0x2c2   : > { %v3520_v44 = vrot.slane %v3518_v22, 5  ;;  %v3748_v41 = vrot.slane %v3746_v60, 4  ;;  %v3181_v57 = vld [vmem:[#allocation2 + $0xc4] sm:$0xf]  ;;  %3137 = vst [vmem:[#allocation3 + $0x474] sm:$0xf] %v3105_v59  ;;  %v3515_v19 = vor.u32 %v3514_v40, %v3510_v34  ;;  %v9866_v22 = vpop.f32.mrf.mxu1  ;;  %5988 = vmatprep.mubr.bf16.mxu0 %v8443_v24  ;;  %v9888_v24 = vadd.f32 %v9797_v58, %v9793_v36 }
 0x2c3   : > { %v8441_v38 = vld [vmem:[#allocation3 + $0x330] ss:$36 sps:$4 sm:$0xff]   ;;  %v8449_v32 = vld [vmem:[#allocation3 + $0x68] ss:$36 sps:$4 sm:$0xff]   ;;  %v3506_v33 = vrot.slane %v3505_v8, 4  ;;  %v7141_v60 = vrot.slane %v3643_v23, 9  ;;  %v9881_v40 = vadd.f32 %v7756_v61, %v5455_v9  ;;  %v9892_v9 = vpop.f32.mrf.mxu0 }
 0x2c4   : > { %3878 = vst [vmem:[#allocation3 + $0xb0] sm:$0xf] %v3747_v26  ;;  %v9864_v21 = vld [vmem:[#allocation2 + $0xc8] sm:$0x1]  ;;  %v9871_v31 = vld [vmem:[%s10685_s4] ss:$0 sm:$0xff]  ;;  %v3750_v53 = vsel %vm8739_vm5, %v3748_v41, %v3749_v1  ;;  %5989 = vmatmul.mubr.bf16.gmra.mxu0 %v8441_v38 }
 0x2c5   : > { %v5460_v25 = vadd.f32 %v9871_v31, %v9651_v47  ;;  %v8448_v27 = vld [vmem:[#allocation3 + $0x20] ss:$36 sps:$4 sm:$0xff]   ;;  %v3753_v62 = vrot.slane %v3644_v14, 5  ;;  %v3511_v3 = vsel %vm8712_vm2, %v3506_v33, %v3510_v34  ;;  %v3516_v8 = vrot.slane %v3515_v19, 4  ;;  %3879 = vst [vmem:[#allocation3 + $0xd4] sm:$0xf] %v3750_v53  ;;  %v9896_v19 = vpop.f32.mrf.mxu1 }
 0x2c6   : > { %v3756_v4 = vrot.slane %v9846_v48, 5  ;;  %v3646_v47 = vld [vmem:[#allocation2 + $0x48] sm:$0xe]  ;;  %v8447_v59 = vld [vmem:[#allocation3 + $0x37c] ss:$36 sps:$4 sm:$0xff]   ;;  %8087 = vmatprep.mubr.bf16.mxu1 %v8448_v27  ;;  %v7759_v34 = vadd.f32 %v9751_v49, %v9735_v2  ;;  %v3523_v26 = vshrl.u32 %v3180_v35, 16 }
 0x2c7   : > { %3628 = vst [vmem:[#allocation3 + $0x3c4] sm:$0xf] %v3511_v3  ;;  %v3754_v23 = vsel %vm8739_vm5, %v7141_v60, %v3753_v62  ;;  %v3755_v14 = vrot.slane %v3753_v62, 4  ;;  %v3647_v1 = vld [vmem:[#allocation2 + $0x4c] sm:$0xf]  ;;  %8088 = vmatmul.mubr.bf16.vlgmr.msra.gmra.mxu1 %v8449_v32  ;;  %v3521_v48 = vsel %vm8712_vm2, %v3516_v8, %v3520_v44  ;;  %v3526_v41 = vshll.u32 %v3180_v35, 16  ;;  %5996 = vmatprep.mubr.bf16.mxu0 %v8447_v59  ;;  %v9901_v60 = vpop.f32.mrf.mxu0 }
 0x2c8   : > { %3880 = vst [vmem:[#allocation3 + $0xf8] sm:$0xf] %v3754_v23  ;;  %v3532_v38 = vshll.u32 %v3181_v57, 16  ;;  %v3648_v33 = vld [vmem:[#allocation2 + $0x50] sm:$0x1]  ;;  %v3536_v2 = vshrl.u32 %v3181_v57, 16  ;;  %v5463_v62 = vadd.f32 %v9871_v31, %v9708_v28  ;;  %v5468_v3 = vadd.f32 %v9871_v31, %v9739_v50 }
 0x2c9   : > { %v3649_v61 = vld [vmem:[#allocation2 + $0x54] sm:$0xe]  ;;  %3629 = vst [vmem:[#allocation3 + $0x3e8] sm:$0xf] %v3521_v48  ;;  %v3757_v36 = vsel %vm8739_vm5, %v3755_v14, %v3756_v4  ;;  %v3542_v49 = vshll.u32 %v9864_v21, 16  ;;  %v7142_v58 = vrot.slane %v3646_v47, 9  ;;  %v9909_v14 = vadd.f32 %v7759_v34, %v5460_v25 }
 0x2ca   : > { %3881 = vst [vmem:[#allocation3 + $0x11c] sm:$0xf] %v3757_v36  ;;  %v3525_v32 = vrot.slane %v3523_v26, 4  ;;  %v3528_v44 = vrot.slane %v3526_v41, 5  ;;  %v3534_v27 = vrot.slane %v3532_v38, 5  ;;  %v3760_v53 = vrot.slane %v3647_v1, 5  ;;  %v9911_v26 = vpop.f32.mrf.mxu1 }
 0x2cb   : > { %v3650_v35 = vld [vmem:[#allocation2 + $0x58] sm:$0xf]  ;;  %v3538_v8 = vrot.slane %v3536_v2, 4  ;;  %v3763_v4 = vrot.slane %v3648_v33, 5  ;;  %v3651_v57 = vld [vmem:[#allocation2 + $0x5c] sm:$0x1]  ;;  %v9915_v50 = vadd.f32 %v9823_v11, %v9809_v17  ;;  %v7762_v33 = vadd.f32 %v9782_v18, %v9764_v12 }
 0x2cc   : > { %v8445_v59 = vld [vmem:[#allocation3 + $0x378] ss:$36 sps:$4 sm:$0xff]   ;;  %v3529_v21 = vor.u32 %v3528_v44, %v3525_v32  ;;  %v3761_v47 = vsel %vm8739_vm5, %v7142_v58, %v3760_v53  ;;  %v3762_v23 = vrot.slane %v3760_v53, 4  ;;  %v3652_v1 = vld [vmem:[#allocation2 + $0x60] sm:$0xe]  ;;  %v3544_v38 = vrot.slane %v3542_v49, 5  ;;  %v7682_v32 = vpop.f32.mrf.mxu1  ;;  %v9921_v44 = vpop.f32.mrf.mxu0 }
 0x2cd   : > { %v3653_v48 = vld [vmem:[#allocation2 + $0x64] sm:$0xf]  ;;  %v8453_v41 = vld [vmem:[#allocation3 + $0xb0] ss:$36 sps:$4 sm:$0xff]   ;;  %v3539_v28 = vor.u32 %v3538_v8, %v3534_v27  ;;  %3882 = vst [vmem:[#allocation3 + $0x140] sm:$0xf] %v3761_v47  ;;  %5997 = vmatmul.mubr.bf16.gmra.mxu0 %v8445_v59  ;;  %v5471_v49 = vadd.f32 %v9871_v31, %v9745_v46  ;;  %v9925_v11 = vadd.f32 %v7762_v33, %v5463_v62 }
 0x2ce   : > { %v3530_v36 = vrot.slane %v3529_v21, 4  ;;  %v3764_v25 = vsel %vm8739_vm5, %v3762_v23, %v3763_v4  ;;  %v7143_v34 = vrot.slane %v3649_v61, 9  ;;  %v3767_v2 = vrot.slane %v3650_v35, 5  ;;  %v3654_v58 = vld [vmem:[#allocation2 + $0x68] sm:$0x1]  ;;  %8091 = vmatprep.mubr.bf16.mxu1 %v8453_v41  ;;  %v9935_v59 = vpop.f32.mrf.mxu1  ;;  %v9937_v21 = vpop.f32.mrf.mxu0 }
 0x2cf   : > { %v3540_v17 = vrot.slane %v3539_v28, 4  ;;  %3883 = vst [vmem:[#allocation3 + $0x164] sm:$0xf] %v3764_v25  ;;  %v3770_v12 = vrot.slane %v3651_v57, 5  ;;  %v3183_v18 = vld [vmem:[#allocation2 + $0xcc] sm:$0xf]  ;;  %v9933_v4 = vadd.f32 %v9850_v20, %v9840_v0  ;;  %v7765_v23 = vadd.f32 %v9803_v42, %v9795_v43 }
 0x2d0   : > { %v8452_v53 = vld [vmem:[#allocation3 + $0x3c4] ss:$36 sps:$4 sm:$0xff]   ;;  %v3535_v8 = vsel %vm8712_vm2, %v3530_v36, %v3534_v27  ;;  %v3768_v61 = vsel %vm8739_vm5, %v7143_v34, %v3767_v2  ;;  %v3769_v35 = vrot.slane %v3767_v2, 4  ;;  %v3184_v46 = vld [vmem:[#allocation2 + $0xd0] sm:$0xf]  ;;  %v7144_v27 = vrot.slane %v3652_v1, 9  ;;  %v9951_v1 = vpop.f32.mrf.mxu1 }
 0x2d1   : > { %v8454_v62 = vld [vmem:[#allocation3 + $0xf8] ss:$36 sps:$4 sm:$0xff]   ;;  %v3545_v57 = vsel %vm8712_vm2, %v3540_v17, %v3544_v38  ;;  %3630 = vst [vmem:[#allocation3 + $0x40c] sm:$0xf] %v3535_v8  ;;  %3884 = vst [vmem:[#allocation3 + $0x188] sm:$0xf] %v3768_v61  ;;  %6004 = vmatprep.mubr.bf16.mxu0 %v8452_v53  ;;  %v9947_v28 = vadd.f32 %v9896_v19, %v9866_v22  ;;  %v7768_v38 = vadd.f32 %v9836_v10, %v9817_v63 }
 0x2d2   : > { %v3774_v47 = vrot.slane %v3653_v48, 5  ;;  %v3655_v41 = vld [vmem:[#allocation2 + $0x6c] sm:$0xe]  ;;  %3631 = vst [vmem:[#allocation3 + $0x430] sm:$0xf] %v3545_v57  ;;  %v3771_v0 = vsel %vm8739_vm5, %v3769_v35, %v3770_v12  ;;  %v3777_v20 = vrot.slane %v3654_v58, 5  ;;  %v9953_v48 = vpop.f32.mrf.mxu0  ;;  %8092 = vmatmul.mubr.bf16.gmra.mxu1 %v8454_v62  ;;  %v9957_v36 = vadd.f32 %v7765_v23, %v5468_v3  ;;  %v9967_v62 = vpop.f32.mrf.mxu1 }
 0x2d3   : > { %v3185_v33 = vld [vmem:[#allocation2 + $0xd4] sm:$0x1]  ;;  %3885 = vst [vmem:[#allocation3 + $0x1ac] sm:$0xf] %v3771_v0  ;;  %v3547_v25 = vshrl.u32 %v3183_v18, 16  ;;  %v5476_v19 = vadd.f32 %v9871_v31, %v9791_v15  ;;  %v9961_v10 = vadd.f32 %v7768_v38, %v5471_v49  ;;  %v3550_v2 = vshll.u32 %v3183_v18, 16 }
 0x2d4   : > { %v3775_v43 = vsel %vm8739_vm5, %v7144_v27, %v3774_v47  ;;  %v3776_v42 = vrot.slane %v3774_v47, 4  ;;  %v3656_v34 = vld [vmem:[#allocation2 + $0x70] sm:$0xf]  ;;  %v3658_v22 = vld [vmem:[#allocation2 + $0x78] sm:$0xe]  ;;  %v3556_v58 = vshll.u32 %v3184_v46, 16  ;;  %v9963_v12 = vpop.f32.mrf.mxu0  ;;  %v9970_v18 = vadd.f32 %v7682_v32, %v9911_v26 }
 0x2d5   : > { %v8450_v63 = vld [vmem:[#allocation3 + $0x3c0] ss:$36 sps:$4 sm:$0xff]   ;;  %3886 = vst [vmem:[#allocation3 + $0x1d0] sm:$0xf] %v3775_v43  ;;  %10702 = vst [vmem:[#allocation5_spill] sm:$0xff] %v9961_v10  ;;  %v3549_v3 = vrot.slane %v3547_v25, 4  ;;  %v7771_v47 = vadd.f32 %v9877_v45, %v9858_v56 }
 0x2d6   : > { %v3657_v17 = vld [vmem:[#allocation2 + $0x74] sm:$0x1]  ;;  %v3778_v53 = vsel %vm8739_vm5, %v3776_v42, %v3777_v20  ;;  %v3560_v8 = vshrl.u32 %v3184_v46, 16  ;;  %v3566_v61 = vshll.u32 %v3185_v33, 16  ;;  %v3659_v35 = vld [vmem:[#allocation2 + $0x7c] sm:$0xf]  ;;  %6005 = vmatmul.mubr.bf16.gmra.mxu0 %v8450_v63  ;;  %v9974_v23 = vpop.f32.mrf.mxu0  ;;  %v5479_v46 = vadd.f32 %v9871_v31, %v9815_v37  ;;  %v7688_v42 = vpop.f32.mrf.mxu1 }
 0x2d7   : > { %v8458_v15 = vld [vmem:[#allocation3 + $0x140] ss:$36 sps:$4 sm:$0xff]   ;;  %3887 = vst [vmem:[#allocation3 + $0x1f4] sm:$0xf] %v3778_v53  ;;  %v3552_v57 = vrot.slane %v3550_v2, 5  ;;  %v3558_v49 = vrot.slane %v3556_v58, 5 }
 0x2d8   : > { %v3660_v27 = vld [vmem:[#allocation2 + $0x80] sm:$0x1]  ;;  %v3661_v0 = vld [vmem:[#allocation2 + $0x84] sm:$0xe]  ;;  %v3562_v20 = vrot.slane %v3560_v8, 4  ;;  %v7145_v38 = vrot.slane %v3655_v41, 9  ;;  %8095 = vmatprep.mubr.bf16.mxu1 %v8458_v15  ;;  %v9978_v32 = vpop.f32.mrf.mxu0  ;;  %v9982_v8 = vpop.f32.mrf.mxu1 }
 0x2d9   : > { %v3781_v33 = vrot.slane %v3656_v34, 5  ;;  %v3662_v43 = vld [vmem:[#allocation2 + $0x88] sm:$0xf]  ;;  %v3553_v25 = vor.u32 %v3552_v57, %v3549_v3  ;;  %v3568_v63 = vrot.slane %v3566_v61, 5  ;;  %v7146_v2 = vrot.slane %v3658_v22, 9 }
 0x2da   : > { %v3788_v26 = vrot.slane %v3659_v35, 5  ;;  %v8457_v58 = vld [vmem:[#allocation3 + $0x40c] ss:$36 sps:$4 sm:$0xff]   ;;  %v3563_v56 = vor.u32 %v3562_v20, %v3558_v49  ;;  %v3784_v10 = vrot.slane %v3657_v17, 5  ;;  %v3663_v37 = vld [vmem:[#allocation2 + $0x8c] sm:$0x1]  ;;  %v9986_v61 = vadd.f32 %v7771_v47, %v5476_v19  ;;  %v9988_v35 = vpop.f32.mrf.mxu0 }
 0x2db   : > { %v3782_v45 = vsel %vm8739_vm5, %v7145_v38, %v3781_v33  ;;  %v3783_v53 = vrot.slane %v3781_v33, 4  ;;  %v8459_v41 = vld [vmem:[#allocation3 + $0x188] ss:$36 sps:$4 sm:$0xff]   ;;  %v3554_v34 = vrot.slane %v3553_v25, 4  ;;  %6012 = vmatprep.mubr.bf16.mxu0 %v8457_v58  ;;  %v3791_v17 = vrot.slane %v3660_v27, 5  ;;  %v9996_v33 = vpop.f32.mrf.mxu1 }
 0x2dc   : > { %3888 = vst [vmem:[#allocation3 + $0x218] sm:$0xf] %v3782_v45  ;;  %v3789_v3 = vsel %vm8739_vm5, %v7146_v2, %v3788_v26  ;;  %v3790_v22 = vrot.slane %v3788_v26, 4  ;;  %v3564_v15 = vrot.slane %v3563_v56, 4  ;;  %v9994_v20 = vadd.f32 %v9951_v1, %v9935_v59  ;;  %v3664_v38 = vld [vmem:[#allocation2 + $0x90] sm:$0xe]  ;;  %8096 = vmatmul.mubr.bf16.gmra.mxu1 %v8459_v41  ;;  %v10002_v26 = vpop.f32.mrf.mxu0 }
 0x2dd   : > { %v3785_v57 = vsel %vm8739_vm5, %v3783_v53, %v3784_v10  ;;  %3890 = vst [vmem:[#allocation3 + $0x260] sm:$0xf] %v3789_v3  ;;  %v8455_v25 = vld [vmem:[#allocation3 + $0x408] ss:$36 sps:$4 sm:$0xff]   ;;  %v3559_v19 = vsel %vm8712_vm2, %v3554_v34, %v3558_v49  ;;  %v7774_v47 = vadd.f32 %v9901_v60, %v9892_v9  ;;  %v7147_v2 = vrot.slane %v3661_v0, 9  ;;  %v7693_v45 = vpop.f32.mrf.mxu1 }
 0x2de   : > { %3889 = vst [vmem:[#allocation3 + $0x23c] sm:$0xf] %v3785_v57  ;;  %v3795_v10 = vrot.slane %v3662_v43, 5  ;;  %v3665_v27 = vld [vmem:[#allocation2 + $0x94] sm:$0xf]  ;;  %v5484_v59 = vadd.f32 %v9871_v31, %v9844_v55  ;;  %v3569_v58 = vsel %vm8712_vm2, %v3564_v15, %v3568_v63  ;;  %v3792_v49 = vsel %vm8739_vm5, %v3790_v22, %v3791_v17  ;;  %6013 = vmatmul.mubr.bf16.gmra.mxu0 %v8455_v25  ;;  %v10014_v39 = vpop.f32.mrf.mxu0 }
 0x2df   : > { %v8460_v1 = vld [vmem:[#allocation3 + $0x1d0] ss:$36 sps:$4 sm:$0xff]   ;;  %3632 = vst [vmem:[#allocation3 + $0x454] sm:$0xf] %v3559_v19  ;;  %v3666_v56 = vld [vmem:[#allocation2 + $0x98] sm:$0x1]  ;;  %v10010_v9 = vadd.f32 %v7774_v47, %v5479_v46  ;;  %v10017_v34 = vadd.f32 %v7688_v42, %v9967_v62  ;;  %v7777_v3 = vadd.f32 %v9937_v21, %v9921_v44  ;;  %v7694_v15 = vpop.f32.mrf.mxu1  ;;  %v5487_v57 = vadd.f32 %v9871_v31, %v9856_v16 }
 0x2e0   : > { %v3667_v53 = vld [vmem:[#allocation2 + $0x9c] sm:$0xe]  ;;  %3633 = vst [vmem:[#allocation3 + $0x478] sm:$0xf] %v3569_v58  ;;  %3891 = vst [vmem:[#allocation3 + $0x284] sm:$0xf] %v3792_v49  ;;  %v3796_v60 = vsel %vm8739_vm5, %v7147_v2, %v3795_v10  ;;  %8099 = vmatprep.mubr.bf16.mxu1 %v8460_v1  ;;  %v7788_v62 = vpop.f32.mrf.mxu0 }
 0x2e1   : > { %v3797_v55 = vrot.slane %v3795_v10, 4  ;;  %v3798_v0 = vrot.slane %v3663_v37, 5  ;;  %v3668_v43 = vld [vmem:[#allocation2 + $0xa0] sm:$0xf]  ;;  %3892 = vst [vmem:[#allocation3 + $0x2a8] sm:$0xf] %v3796_v60  ;;  %v10029_v42 = vadd.f32 %v7777_v3, %v5484_v59  ;;  %v10031_v2 = vpop.f32.mrf.mxu1 }
 0x2e2   : > { %v7148_v63 = vrot.slane %v3664_v38, 9  ;;  %v3802_v41 = vrot.slane %v3665_v27, 5  ;;  %v3669_v46 = vld [vmem:[#allocation2 + $0xa4] sm:$0x1]  ;;  %v3670_v22 = vld [vmem:[#allocation2 + $0xa8] sm:$0xe]  ;;  %v7780_v38 = vadd.f32 %v9963_v12, %v9953_v48  ;;  %v5492_v48 = vadd.f32 %v9871_v31, %v9888_v24  ;;  %v10042_v59 = vpop.f32.mrf.mxu0 }
 0x2e3   : > { %v3799_v37 = vsel %vm8739_vm5, %v3797_v55, %v3798_v0  ;;  %v3805_v17 = vrot.slane %v3666_v56, 5  ;;  %v3671_v25 = vld [vmem:[#allocation2 + $0xac] sm:$0xf]  ;;  %v3672_v19 = vld [vmem:[#allocation2 + $0xb0] sm:$0x1]  ;;  %v7149_v47 = vrot.slane %v3667_v53, 9  ;;  %v10049_v0 = vadd.f32 %v7694_v15, %v7693_v45  ;;  %v10051_v24 = vpop.f32.mrf.mxu1 }
 0x2e4   : > { %3893 = vst [vmem:[#allocation3 + $0x2cc] sm:$0xf] %v3799_v37  ;;  %v3803_v44 = vsel %vm8739_vm5, %v7148_v63, %v3802_v41  ;;  %v3804_v21 = vrot.slane %v3802_v41, 4  ;;  %v8473_v16 = vld [vmem:[%s10686_s5 + $0x70] ss:$8 sps:$4 sm:$0xff]   ;;  %v10040_v12 = vadd.f32 %v7780_v38, %v5487_v57  ;;  %v3809_v27 = vrot.slane %v3668_v43, 5  ;;  %v7791_v45 = vpop.f32.mrf.mxu0 }
 0x2e5   : > { %v10036_v10 = vld [vmem:[#allocation2 + $0xb4] sm:$0xe]  ;;  %3894 = vst [vmem:[#allocation3 + $0x2f0] sm:$0xf] %v3803_v44  ;;  %v3812_v1 = vrot.slane %v3669_v46, 5  ;;  %v7150_v60 = vrot.slane %v3670_v22, 9  ;;  %v7783_v57 = vadd.f32 %v9978_v32, %v9974_v23  ;;  %v5500_v38 = vadd.f32 %v9871_v31, %v9933_v4  ;;  %v7699_v44 = vpop.f32.mrf.mxu1 }
 0x2e6   : > { %v3674_v58 = vld [vmem:[#allocation2 + $0xb8] sm:$0xf]  ;;  %v8475_v49 = vld [vmem:[%s10686_s5 + $0x74] ss:$8 sps:$4 sm:$0xff]   ;;  %v3806_v53 = vsel %vm8739_vm5, %v3804_v21, %v3805_v17  ;;  %v3816_v55 = vrot.slane %v3671_v25, 5  ;;  %v3810_v41 = vsel %vm8739_vm5, %v7149_v47, %v3809_v27  ;;  %v3811_v3 = vrot.slane %v3809_v27, 4 }
 0x2e7   : > { %v8464_v56 = vld [vmem:[#allocation3 + $0x218] ss:$36 sps:$4 sm:$0xff]   ;;  %v10053_v63 = vld [vmem:[#allocation2 + $0xbc] sm:$0x1]  ;;  %v10055_v43 = vld [vmem:[#allocation2 + $0xc0] sm:$0xe]  ;;  %6346 = vmatprep.subr.bf16.mxu1 %v8475_v49  ;;  %v5495_v17 = vadd.f32 %v9871_v31, %v9915_v50  ;;  %v10076_v50 = vadd.f32 %v7783_v57, %v5492_v48  ;;  %v7786_v4 = vadd.f32 %v10002_v26, %v9988_v35  ;;  %v7789_v49 = vadd.f32 %v7788_v62, %v10014_v39 }
 0x2e8   : > { %3895 = vst [vmem:[#allocation3 + $0x314] sm:$0xf] %v3806_v53  ;;  %v3819_v46 = vrot.slane %v3672_v19, 5  ;;  %v3677_v37 = vld [vmem:[#allocation2 + $0xc4] sm:$0xf]  ;;  %8100 = vmatmul.mubr.bf16.gmra.mxu1 %v8464_v56  ;;  %v3817_v23 = vsel %vm8739_vm5, %v7150_v60, %v3816_v55  ;;  %v3818_v32 = vrot.slane %v3816_v55, 4  ;;  %v3813_v27 = vsel %vm8739_vm5, %v3811_v3, %v3812_v1  ;;  %v7793_v56 = vpop.f32.mrf.mxu0 }
 0x2e9   : > { %v10061_v22 = vld [vmem:[#allocation2 + $0xc8] sm:$0x1]  ;;  %v8463_v19 = vld [vmem:[#allocation3 + $0x454] ss:$36 sps:$4 sm:$0xff]   ;;  %3896 = vst [vmem:[#allocation3 + $0x338] sm:$0xf] %v3810_v41  ;;  %6347 = vmatpush1.bf16.msra.mxu1 %v8473_v16  ;;  %v5503_v60 = vadd.f32 %v9871_v31, %v9947_v28  ;;  %v7700_v41 = vpop.f32.mrf.mxu1  ;;  %v10089_v26 = vadd.f32 %v7786_v4, %v5495_v17 }
 0x2ea   : > { %v8476_v15 = vld [vmem:[%s10686_s5 + $0x60] ss:$8 sps:$4 sm:$0xff]   ;;  %v10072_v21 = vld [vmem:[#allocation2 + $0xcc] sm:$0xe]  ;;  %v8465_v47 = vld [vmem:[#allocation3 + $0x260] ss:$36 sps:$4 sm:$0xff]   ;;  %6020 = vmatprep.mubr.bf16.mxu0 %v8463_v19  ;;  %v3820_v55 = vsel %vm8739_vm5, %v3818_v32, %v3819_v46  ;;  %v10093_v62 = vadd.f32 %v7700_v41, %v7699_v44  ;;  %v7794_v16 = vpop.f32.mrf.mxu0  ;;  %v10105_v19 = vadd.f32 %v7789_v49, %v5500_v38 }
 0x2eb   : > { %v8461_v25 = vld [vmem:[#allocation3 + $0x450] ss:$36 sps:$4 sm:$0xff]   ;;  %3898 = vst [vmem:[#allocation3 + $0x380] sm:$0xf] %v3817_v23  ;;  %v3680_v53 = vld [vmem:[#allocation2 + $0xd0] sm:$0xf]  ;;  %8103 = vmatprep.mubr.bf16.mxu1 %v8465_v47  ;;  %v10101_v17 = vpop.f32.mrf.mxu1  ;;  %v7792_v23 = vadd.f32 %v7791_v45, %v10042_v59  ;;  %v5511_v59 = vadd.f32 %v9871_v31, %v9994_v20 }
 0x2ec   : > { %3897 = vst [vmem:[#allocation3 + $0x35c] sm:$0xf] %v3813_v27  ;;  %v7151_v1 = vrot.slane %v10036_v10, 9  ;;  %v3823_v48 = vrot.slane %v3674_v58, 5  ;;  %v3681_v3 = vld [vmem:[#allocation2 + $0xd4] sm:$0x1]  ;;  %6021 = vmatmul.mubr.bf16.gmra.mxu0 %v8461_v25  ;;  %v7796_v44 = vpop.f32.mrf.mxu0 }
 0x2ed   : > { %v8478_v35 = vld [vmem:[%s10686_s5 + $0x64] ss:$8 sps:$4 sm:$0xff]   ;;  %3899 = vst [vmem:[#allocation3 + $0x3a4] sm:$0xf] %v3820_v55  ;;  %v3826_v28 = vrot.slane %v10053_v63, 5  ;;  %v7152_v39 = vrot.slane %v10055_v43, 9  ;;  %v5508_v63 = vadd.f32 %v9871_v31, %v9970_v18  ;;  %v10116_v38 = vpop.f32.mrf.mxu1  ;;  %v10120_v45 = vadd.f32 %v7792_v23, %v5503_v60 }
 0x2ee   : > { %v8479_v10 = vld [vmem:[%s10686_s5 + $0x50] ss:$8 sps:$4 sm:$0xff]   ;;  %v3824_v58 = vsel %vm8739_vm5, %v7151_v1, %v3823_v48  ;;  %v3825_v46 = vrot.slane %v3823_v48, 4  ;;  %v3830_v57 = vrot.slane %v3677_v37, 5  ;;  %v3833_v25 = vrot.slane %v10061_v22, 5  ;;  %6348 = vmatprep.subr.bf16.mxu1 %v8478_v35  ;;  %v7797_v49 = vpop.f32.mrf.mxu0 }
 0x2ef   : > { %v8466_v43 = vld [vmem:[#allocation3 + $0x2a8] ss:$36 sps:$4 sm:$0xff]   ;;  %3900 = vst [vmem:[#allocation3 + $0x3c8] sm:$0xf] %v3824_v58  ;;  %v7153_v32 = vrot.slane %v10072_v21, 9  ;;  %6349 = vmatpush1.bf16.msra.mxu1 %v8476_v15  ;;  %v3837_v4 = vrot.slane %v3680_v53, 5  ;;  %v7795_v21 = vadd.f32 %v7794_v16, %v7793_v56  ;;  %v7705_v53 = vpop.f32.mrf.mxu1  ;;  %v7798_v41 = vadd.f32 %v7797_v49, %v7796_v44 }
 0x2f0   : > { %v8481_v37 = vld [vmem:[%s10686_s5 + $0x54] ss:$8 sps:$4 sm:$0xff]   ;;  %v8467_v22 = vld [vmem:[#allocation3 + $0x2f0] ss:$36 sps:$4 sm:$0xff]   ;;  %v3827_v47 = vsel %vm8739_vm5, %v3825_v46, %v3826_v28  ;;  %v3831_v18 = vsel %vm8739_vm5, %v7152_v39, %v3830_v57  ;;  %v3832_v27 = vrot.slane %v3830_v57, 4  ;;  %v3840_v15 = vrot.slane %v3681_v3, 5  ;;  %8104 = vmatmul.mubr.bf16.gmra.mxu1 %v8466_v43  ;;  %v7799_v60 = vpop.f32.mrf.mxu0 }
 0x2f1   : > { %3901 = vst [vmem:[#allocation3 + $0x3ec] sm:$0xf] %v3827_v47  ;;  %3902 = vst [vmem:[#allocation3 + $0x410] sm:$0xf] %v3831_v18  ;;  %6350 = vmatprep.subr.bf16.mxu1 %v8481_v37  ;;  %v8484_v55 = vld [vmem:[%s10686_s5 + $0x44] ss:$8 sps:$4 sm:$0xff]   ;;  %v3838_v20 = vsel %vm8739_vm5, %v7153_v32, %v3837_v4  ;;  %8107 = vmatprep.mubr.bf16.mxu1 %v8467_v22  ;;  %v10129_v56 = vadd.f32 %v7795_v21, %v5508_v63  ;;  %v7706_v28 = vpop.f32.mrf.mxu1 }
 0x2f2   : > { %v3834_v1 = vsel %vm8739_vm5, %v3832_v27, %v3833_v25  ;;  %v3839_v48 = vrot.slane %v3837_v4, 4  ;;  %3904 = vst [vmem:[#allocation3 + $0x458] sm:$0xf] %v3838_v20  ;;  %v8482_v3 = vld [vmem:[%s10686_s5 + $0x40] ss:$8 sps:$4 sm:$0xff]   ;;  %v10136_v39 = vadd.f32 %v7798_v41, %v5511_v59  ;;  %v10138_v16 = vadd.f32 %v7706_v28, %v7705_v53  ;;  %v7800_v58 = vpop.f32.mrf.mxu0 }
 0x2f3   : > { %3903 = vst [vmem:[#allocation3 + $0x434] sm:$0xf] %v3834_v1  ;;  %6351 = vmatpush1.bf16.msra.mxu1 %v8479_v10  ;;  %v5516_v46 = vadd.f32 %v9871_v31, %v10017_v34  ;;  %v7692_v10 = vadd.f32 %v9996_v33, %v9982_v8  ;;  %v10144_v57 = vpop.f32.mrf.mxu1  ;;  %v7801_v25 = vadd.f32 %v7800_v58, %v7799_v60  ;;  %v8468_v54 = vld [vmem:[#allocation3 + $0x338] ss:$36 sps:$4 sm:$0xff]  }
 0x2f4   : > { %v3841_v35 = vsel %vm8739_vm5, %v3839_v48, %v3840_v15  ;;  %6352 = vmatprep.subr.bf16.mxu1 %v8484_v55  ;;  %v7802_v63 = vpop.f32.mrf.mxu0  ;;  %v8469_v32 = vld [vmem:[#allocation3 + $0x380] ss:$36 sps:$4 sm:$0xff]   ;;  %v5524_v21 = vadd.f32 %v9871_v31, %v10049_v0  ;;  %v7698_v49 = vadd.f32 %v10051_v24, %v10031_v2  ;;  %v8490_v24 = vld [vmem:[%s10686_s5 + $0x24] ss:$8 sps:$4 sm:$0xff]  }
 0x2f5   : > { %3905 = vst [vmem:[#allocation3 + $0x47c] sm:$0xf] %v3841_v35  ;;  %v10146_v43 = vpop.f32.mrf.mxu1  ;;  %v10148_v23 = vadd.f32 %v7801_v25, %v5516_v46  ;;  %v8485_v37 = vld [vmem:[%s10686_s5 + $0x30] ss:$8 sps:$4 sm:$0xff]   ;;  %v8487_v8 = vld [vmem:[%s10686_s5 + $0x34] ss:$8 sps:$4 sm:$0xff]   ;;  %v5519_v33 = vadd.f32 %v9871_v31, %v7692_v10 }
 0x2f6   : > { %v7803_v44 = vpop.f32.mrf.mxu0  ;;  %v5527_v58 = vadd.f32 %v9871_v31, %v7698_v49 }
 0x2f7   : > { %6353 = vmatpush1.bf16.msra.mxu1 %v8482_v3  ;;  %v7839_v34 = vpop.f32.mrf.mxu1  ;;  %v7804_v22 = vadd.f32 %v7803_v44, %v7802_v63 }
 0x2f8   : > { %8108 = vmatmul.mubr.bf16.gmra.mxu1 %v8468_v54  ;;  %6354 = vmatprep.subr.bf16.mxu1 %v8487_v8  ;;  %v7805_v27 = vpop.f32.mrf.mxu0  ;;  %v8470_v53 = vld [vmem:[#allocation3 + $0x3c8] ss:$36 sps:$4 sm:$0xff]  }
 0x2f9   : > { %8111 = vmatprep.mubr.bf16.mxu1 %v8469_v32  ;;  %v7840_v47 = vpop.f32.mrf.mxu1  ;;  %v10157_v18 = vadd.f32 %v7804_v22, %v5519_v33 }
 0x2fa   : > { %v7841_v4 = vadd.f32 %v7840_v47, %v7839_v34  ;;  %v7806_v15 = vpop.f32.mrf.mxu0  ;;  %v8471_v41 = vld [vmem:[#allocation3 + $0x410] ss:$36 sps:$4 sm:$0xff]  }
 0x2fb   : > { %6355 = vmatpush1.bf16.msra.mxu1 %v8485_v37  ;;  %v7842_v59 = vpop.f32.mrf.mxu1  ;;  %v7807_v1 = vadd.f32 %v7806_v15, %v7805_v27  ;;  %v7704_v37 = vadd.f32 %v10116_v38, %v10101_v17 }
 0x2fc   : > { %v10164_v55 = vadd.f32 %v7841_v4, %v9615_v30  ;;  %v7808_v48 = vpop.f32.mrf.mxu0  ;;  %v8488_v30 = vld [vmem:[%s10686_s5 + $0x20] ss:$8 sps:$4 sm:$0xff]   ;;  %6356 = vmatprep.subr.bf16.mxu1 %v8490_v24  ;;  %v8472_v54 = vld [vmem:[#allocation3 + $0x458] ss:$36 sps:$4 sm:$0xff]  }
 0x2fd   : > { %v7843_v20 = vpop.f32.mrf.mxu1  ;;  %v10166_v3 = vadd.f32 %v7807_v1, %v5524_v21  ;;  %v5535_v15 = vadd.f32 %v9871_v31, %v7704_v37  ;;  %v8494_v37 = vld [vmem:[%s10686_s5] ss:$8 sps:$4 sm:$0xff]  }
 0x2fe   : > { %v7844_v60 = vadd.f32 %v7843_v20, %v7842_v59  ;;  %v7809_v28 = vpop.f32.mrf.mxu0  ;;  %v5540_v20 = vadd.f32 %v9871_v31, %v10138_v16 }
 0x2ff   : > { %v7845_v35 = vpop.f32.mrf.mxu1  ;;  %v7810_v2 = vadd.f32 %v7809_v28, %v7808_v48  ;;  %6357 = vmatpush1.bf16.msra.mxu1 %v8488_v30  ;;  %v7710_v48 = vadd.f32 %v10146_v43, %v10144_v57  ;;  %v10703_v43 = vld [vmem:[#allocation4_spill] sm:$0xff] }
 0x300   : > { %8112 = vmatmul.mubr.bf16.gmra.mxu1 %v8470_v53  ;;  %v10170_v0 = vadd.f32 %v7844_v60, %v9677_v29  ;;  %v7811_v10 = vpop.f32.mrf.mxu0  ;;  %v5532_v29 = vadd.f32 %v9871_v31, %v10093_v62 }
 0x301   : > { %8115 = vmatprep.mubr.bf16.mxu1 %v8471_v41  ;;  %v7846_v46 = vpop.f32.mrf.mxu1  ;;  %v10178_v63 = vadd.f32 %v7810_v2, %v5527_v58 }
 0x302   : > { %v7847_v25 = vadd.f32 %v7846_v46, %v7845_v35  ;;  %v7812_v44 = vpop.f32.mrf.mxu0  ;;  %v8493_v35 = vld [vmem:[%s10686_s5 + $0x14] ss:$8 sps:$4 sm:$0xff]  }
 0x303   : > { %v7848_v32 = vpop.f32.mrf.mxu1  ;;  %v7813_v33 = vadd.f32 %v7812_v44, %v7811_v10  ;;  %6358 = vmatprep.subr.bf16.mxu1 %v8493_v35 }
 0x304   : > { %v10185_v8 = vadd.f32 %v7847_v25, %v9704_v52  ;;  %v7814_v22 = vpop.f32.mrf.mxu0 }
 0x305   : > { %v7849_v34 = vpop.f32.mrf.mxu1  ;;  %v10187_v27 = vadd.f32 %v7813_v33, %v5532_v29 }
 0x306   : > { %v7850_v47 = vadd.f32 %v7849_v34, %v7848_v32  ;;  %v7815_v59 = vpop.f32.mrf.mxu0 }
 0x307   : > { %v7851_v4 = vpop.f32.mrf.mxu1  ;;  %v7816_v62 = vadd.f32 %v7815_v59, %v7814_v22 }
 0x308   : > { %8116 = vmatmul.mubr.bf16.gmra.mxu1 %v8472_v54  ;;  %v10191_v21 = vadd.f32 %v7850_v47, %v9733_v7  ;;  %v7817_v17 = vpop.f32.mrf.mxu0  ;;  %v8491_v7 = vld [vmem:[%s10686_s5 + $0x10] ss:$8 sps:$4 sm:$0xff]  }
 0x309   : > { %v7852_v49 = vpop.f32.mrf.mxu1  ;;  %v10193_v52 = vadd.f32 %v7816_v62, %v5535_v15  ;;  %6359 = vmatpush1.bf16.msra.mxu1 %v8491_v7 }
 0x30a   : > { %v7853_v38 = vadd.f32 %v7852_v49, %v7851_v4  ;;  %v7818_v53 = vpop.f32.mrf.mxu0 }
 0x30b   : > { %v7854_v1 = vpop.f32.mrf.mxu1  ;;  %v7819_v60 = vadd.f32 %v7818_v53, %v7817_v17 }
 0x30c   : > { %v10200_v41 = vadd.f32 %v7853_v38, %v9762_v13  ;;  %v7820_v58 = vpop.f32.mrf.mxu0  ;;  %v5543_v13 = vadd.f32 %v9871_v31, %v7710_v48  ;;  %v8496_v31 = vld [vmem:[%s10686_s5 + $0x4] ss:$8 sps:$4 sm:$0xff]   ;;  %v10689_v48 = vmov 0  }
 0x30d   : > { %v7855_v28 = vpop.f32.mrf.mxu1  ;;  %v10208_v30 = vadd.f32 %v7819_v60, %v5540_v20  ;;  %6360 = vmatprep.subr.bf16.mxu1 %v8496_v31  ;;  %6378 = vmatprep.mubr.bf16.mxu1 %v10689_v48 }
 0x30e   : > { %v7856_v2 = vadd.f32 %v7855_v28, %v7854_v1  ;;  %v7821_v57 = vpop.f32.mrf.mxu0  ;;  %6361 = vmatpush1.bf16.msra.mxu1 %v8494_v37 }
 0x30f   : > { %v7857_v16 = vpop.f32.mrf.mxu1  ;;  %v7822_v46 = vadd.f32 %v7821_v57, %v7820_v58 }
 0x310   : > { %v10212_v24 = vadd.f32 %v7856_v2, %v10703_v43  ;;  %v10216_v44 = vpop.f32.mrf.mxu0 }
 0x311   : > { %v7858_v10 = vpop.f32.mrf.mxu1  ;;  %v10214_v54 = vadd.f32 %v7822_v46, %v5543_v13 }
 0x312   : > { %v7859_v25 = vadd.f32 %v7858_v10, %v7857_v16  ;;  %v10227_v34 = vpop.f32.mrf.mxu0 }
 0x313   : > { %v7860_v32 = vpop.f32.mrf.mxu1 }
 0x314   : > { %v10219_v29 = vadd.f32 %v7859_v25, %v9830_v6  ;;  %v10229_v4 = vpop.f32.mrf.mxu0 }
 0x315   : > { %v7861_v33 = vpop.f32.mrf.mxu1 }
 0x316   : > { %v7862_v22 = vadd.f32 %v7861_v33, %v7860_v32  ;;  %v10234_v49 = vpop.f32.mrf.mxu0 }
 0x317   : > { %v7863_v47 = vpop.f32.mrf.mxu1 }
 0x318   : > { %v10232_v6 = vadd.f32 %v7862_v22, %v9834_v5  ;;  %v10239_v20 = vpop.f32.mrf.mxu0 }
 0x319   : > { %v7864_v59 = vpop.f32.mrf.mxu1 }
 0x31a   : > { %v7865_v15 = vadd.f32 %v7864_v59, %v7863_v47  ;;  %v10245_v7 = vpop.f32.mrf.mxu0  ;;  %v10705_v59 = vld [vmem:[#allocation5_spill] sm:$0xff] }
 0x31b   : > { %v7866_v62 = vpop.f32.mrf.mxu1 }
 0x31c   : > { %v10237_v17 = vadd.f32 %v7865_v15, %v9860_v51  ;;  %v10247_v58 = vpop.f32.mrf.mxu0 }
 0x31d   : > { %v7867_v38 = vpop.f32.mrf.mxu1 }
 0x31e   : > { %v7868_v1 = vadd.f32 %v7867_v38, %v7866_v62  ;;  %v10252_v16 = vpop.f32.mrf.mxu0 }
 0x31f   : > { %v7869_v53 = vpop.f32.mrf.mxu1 }
 0x320   : > { %v10243_v60 = vadd.f32 %v7868_v1, %v9881_v40  ;;  %v10257_v40 = vpop.f32.mrf.mxu0 }
 0x321   : > { %v7870_v5 = vpop.f32.mrf.mxu1 }
 0x322   : > { %v7871_v35 = vadd.f32 %v7870_v5, %v7869_v53  ;;  %v10259_v25 = vpop.f32.mrf.mxu0 }
 0x323   : > { %v7872_v28 = vpop.f32.mrf.mxu1 }
 0x324   : > { %v10250_v51 = vadd.f32 %v7871_v35, %v9909_v14  ;;  %v10264_v14 = vpop.f32.mrf.mxu0 }
 0x325   : > { %v7873_v2 = vpop.f32.mrf.mxu1 }
 0x326   : > { %v7874_v57 = vadd.f32 %v7873_v2, %v7872_v28  ;;  %v10266_v22 = vpop.f32.mrf.mxu0 }
 0x327   : > { %v7875_v13 = vpop.f32.mrf.mxu1 }
 0x328   : > { %v10255_v43 = vadd.f32 %v7874_v57, %v9925_v11  ;;  %v10271_v38 = vpop.f32.mrf.mxu0 }
 0x329   : > { %v7876_v46 = vpop.f32.mrf.mxu1 }
 0x32a   : > { %v7877_v10 = vadd.f32 %v7876_v46, %v7875_v13 }
 0x32b   : > { %v7878_v32 = vpop.f32.mrf.mxu1 }
 0x32c   : > { %v10262_v37 = vadd.f32 %v7877_v10, %v9957_v36  ;;  %v10276_v36 = vpop.f32.mrf.mxu0 }
 0x32d   : > { %v7879_v31 = vpop.f32.mrf.mxu1 }
 0x32e   : > { %10704 = vst [vmem:[#allocation4_spill] sm:$0xff] %v10262_v37  ;;  %v7880_v33 = vadd.f32 %v7879_v31, %v7878_v32  ;;  %v10278_v28 = vpop.f32.mrf.mxu0 }
 0x32f   : > { %v7881_v47 = vpop.f32.mrf.mxu1 }
 0x330   : > { %v10269_v11 = vadd.f32 %v7880_v33, %v10705_v59  ;;  %v10283_v13 = vpop.f32.mrf.mxu0 }
 0x331   : > { %v7882_v15 = vpop.f32.mrf.mxu1 }
 0x332   : > { %10706 = vst [vmem:[#allocation5_spill] sm:$0xff] %v10269_v11  ;;  %v7883_v62 = vadd.f32 %v7882_v15, %v7881_v47 }
 0x333   : > { %v7884_v1 = vpop.f32.mrf.mxu1 }
 0x334   : > { %v10274_v53 = vadd.f32 %v7883_v62, %v9986_v61  ;;  %v10288_v61 = vpop.f32.mrf.mxu0 }
 0x335   : > { %v7885_v5 = vpop.f32.mrf.mxu1 }
 0x336   : > { %10707 = vst [vmem:[#allocation6_spill] sm:$0xff] %v10274_v53  ;;  %v7886_v35 = vadd.f32 %v7885_v5, %v7884_v1  ;;  %v10290_v59 = vpop.f32.mrf.mxu0 }
 0x337   : > { %v7887_v2 = vpop.f32.mrf.mxu1 }
 0x338   : > { %v10281_v57 = vadd.f32 %v7886_v35, %v10010_v9  ;;  %v10295_v9 = vpop.f32.mrf.mxu0 }
 0x339   : > { %v7888_v46 = vpop.f32.mrf.mxu1 }
 0x33a   : > { %10708 = vst [vmem:[#allocation7_spill] sm:$0xff] %v10281_v57  ;;  %v7889_v10 = vadd.f32 %v7888_v46, %v7887_v2  ;;  %v10297_v35 = vpop.f32.mrf.mxu0 }
 0x33b   : > { %v7890_v32 = vpop.f32.mrf.mxu1 }
 0x33c   : > { %v10286_v31 = vadd.f32 %v7889_v10, %v10029_v42  ;;  %v10302_v48 = vpop.f32.mrf.mxu0 }
 0x33d   : > { %v7891_v33 = vpop.f32.mrf.mxu1 }
 0x33e   : > { %10709 = vst [vmem:[#allocation8_spill] sm:$0xff] %v10286_v31  ;;  %v7892_v47 = vadd.f32 %v7891_v33, %v7890_v32 }
 0x33f   : > { %v7893_v62 = vpop.f32.mrf.mxu1 }
 0x340   : > { %v10293_v15 = vadd.f32 %v7892_v47, %v10040_v12  ;;  %v10307_v12 = vpop.f32.mrf.mxu0 }
 0x341   : > { %v7894_v1 = vpop.f32.mrf.mxu1 }
 0x342   : > { %10710 = vst [vmem:[#allocation9_spill] sm:$0xff] %v10293_v15  ;;  %v7895_v5 = vadd.f32 %v7894_v1, %v7893_v62  ;;  %v10309_v33 = vpop.f32.mrf.mxu0 }
 0x343   : > { %v7896_v2 = vpop.f32.mrf.mxu1 }
 0x344   : > { %v10300_v42 = vadd.f32 %v7895_v5, %v10076_v50  ;;  %v10311_v15 = vpop.f32.mrf.mxu0 }
 0x345   : > { %v7897_v46 = vpop.f32.mrf.mxu1 }
 0x346   : > { %10711 = vst [vmem:[#allocation10_spill] sm:$0xff] %v10300_v42  ;;  %v7898_v10 = vadd.f32 %v7897_v46, %v7896_v2  ;;  %v10316_v5 = vpop.f32.mrf.mxu0 }
 0x347   : > { %v7899_v47 = vpop.f32.mrf.mxu1 }
 0x348   : > { %v10305_v32 = vadd.f32 %v7898_v10, %v10089_v26  ;;  %v10318_v42 = vpop.f32.mrf.mxu0 }
 0x349   : > { %v7900_v62 = vpop.f32.mrf.mxu1 }
 0x34a   : > { %10712 = vst [vmem:[#allocation11_spill] sm:$0xff] %v10305_v32  ;;  %v7901_v1 = vadd.f32 %v7900_v62, %v7899_v47  ;;  %v10323_v32 = vpop.f32.mrf.mxu0 }
 0x34b   : > { %v7902_v31 = vpop.f32.mrf.mxu1  ;;  %10715 = vst [vmem:[#allocation14_spill] sm:$0xff] %v10323_v32 }
 0x34c   : > { %v10314_v50 = vadd.f32 %v7901_v1, %v10105_v19  ;;  %v10325_v37 = vpop.f32.mrf.mxu0 }
 0x34d   : > { %v7903_v2 = vpop.f32.mrf.mxu1  ;;  %10716 = vst [vmem:[#allocation15_spill] sm:$0xff] %v10325_v37 }
 0x34e   : > { %10713 = vst [vmem:[#allocation12_spill] sm:$0xff] %v10314_v50  ;;  %v7904_v46 = vadd.f32 %v7903_v2, %v7902_v31 }
 0x34f   : > { %v7905_v10 = vpop.f32.mrf.mxu1 }
 0x350   : > { %v10321_v26 = vadd.f32 %v7904_v46, %v10120_v45  ;;  %v10330_v50 = vpop.f32.mrf.mxu0 }
 0x351   : > { %v7906_v11 = vpop.f32.mrf.mxu1 }
 0x352   : > { %10714 = vst [vmem:[#allocation13_spill] sm:$0xff] %v10321_v26  ;;  %v7907_v57 = vadd.f32 %v7906_v11, %v7905_v10  ;;  %v10335_v45 = vpop.f32.mrf.mxu0 }
 0x353   : > { %v7908_v47 = vpop.f32.mrf.mxu1 }
 0x354   : > { %v10328_v19 = vadd.f32 %v7907_v57, %v10129_v56  ;;  %v10337_v46 = vpop.f32.mrf.mxu0 }
 0x355   : > { %v7909_v62 = vpop.f32.mrf.mxu1 }
 0x356   : > { %10717 = vst [vmem:[#allocation16_spill] sm:$0xff] %v10328_v19  ;;  %v7910_v1 = vadd.f32 %v7909_v62, %v7908_v47  ;;  %v10339_v10 = vpop.f32.mrf.mxu0 }
 0x357   : > { %v7911_v2 = vpop.f32.mrf.mxu1 }
 0x358   : > { %v10333_v31 = vadd.f32 %v7910_v1, %v10136_v39 }
 0x359   : > { %v7912_v26 = vpop.f32.mrf.mxu1 }
 0x35a   : > { %10718 = vst [vmem:[#allocation17_spill] sm:$0xff] %v10333_v31  ;;  %v7913_v11 = vadd.f32 %v7912_v26, %v7911_v2 }
 0x35b   : > { %v7914_v53 = vpop.f32.mrf.mxu1 }
 0x35c   : > { %v10342_v56 = vadd.f32 %v7913_v11, %v10148_v23 }
 0x35d   : > { %v7915_v57 = vpop.f32.mrf.mxu1 }
 0x35e   : > { %10719 = vst [vmem:[#allocation18_spill] sm:$0xff] %v10342_v56  ;;  %v7916_v47 = vadd.f32 %v7915_v57, %v7914_v53  ;;  %v10344_v62 = vpop.f32.mrf.mxu0 }
 0x360   : > { %v10347_v39 = vadd.f32 %v7916_v47, %v10157_v18  ;;  %v10349_v1 = vpop.f32.mrf.mxu0  ;;  %v7917_v31 = vpop.f32.mrf.mxu1 }
 0x361   : > { %10721 = vst [vmem:[#allocation20_spill] sm:$0xff] %v10349_v1 }
 0x362   : > { %10720 = vst [vmem:[#allocation19_spill] sm:$0xff] %v10347_v39  ;;  %v10351_v19 = vpop.f32.mrf.mxu0  ;;  %v7918_v37 = vpop.f32.mrf.mxu1 }
 0x363   : > { %10722 = vst [vmem:[#allocation21_spill] sm:$0xff] %v10351_v19  ;;  %v7919_v26 = vadd.f32 %v7918_v37, %v7917_v31 }
 0x364   : > { %v10353_v2 = vpop.f32.mrf.mxu0  ;;  %v7920_v32 = vpop.f32.mrf.mxu1 }
 0x365   : > { %10723 = vst [vmem:[#allocation22_spill] sm:$0xff] %v10353_v2  ;;  %v10356_v23 = vadd.f32 %v7919_v26, %v10166_v3 }
 0x366   : > { %v7921_v11 = vpop.f32.mrf.mxu1 }
 0x367   : > { %10724 = vst [vmem:[#allocation23_spill] sm:$0xff] %v10356_v23  ;;  %v7922_v53 = vadd.f32 %v7921_v11, %v7920_v32 }
 0x369   : > { %v10361_v18 = vadd.f32 %v7922_v53, %v10178_v63 }
 0x36a   : > { %v10358_v57 = vpop.f32.mrf.mxu0 }
 0x36b   : > { %10725 = vst [vmem:[#allocation24_spill] sm:$0xff] %v10361_v18 }
 0x36c   : > { %v10363_v47 = vpop.f32.mrf.mxu0 }
 0x36d   : > { %v7923_v39 = vpop.f32.mrf.mxu1 }
 0x36e   : > { %v10365_v56 = vpop.f32.mrf.mxu0 }
 0x36f   : > { %10726 = vst [vmem:[#allocation25_spill] sm:$0xff] %v10365_v56  ;;  %v7924_v19 = vpop.f32.mrf.mxu1 }
 0x370   : > { %v10367_v37 = vpop.f32.mrf.mxu0  ;;  %v7925_v31 = vadd.f32 %v7924_v19, %v7923_v39 }
 0x371   : > { %v7926_v2 = vpop.f32.mrf.mxu1 }
 0x372   : > { %v10370_v3 = vadd.f32 %v7925_v31, %v10187_v27  ;;  %v7959_v31 = vadd.f32 %v10245_v7, %v10239_v20 }
 0x373   : > { %v7927_v26 = vpop.f32.mrf.mxu1 }
 0x374   : > { %10727 = vst [vmem:[#allocation26_spill] sm:$0xff] %v10370_v3  ;;  %v7928_v11 = vadd.f32 %v7927_v26, %v7926_v2  ;;  %v5911_v20 = vadd.f32 %v7959_v31, %v10185_v8 }
 0x376   : > { %v10372_v32 = vpop.f32.mrf.mxu0  ;;  %v10377_v63 = vadd.f32 %v7928_v11, %v10193_v52  ;;  %v7953_v52 = vadd.f32 %v10227_v34, %v10216_v44  ;;  %v7962_v11 = vadd.f32 %v10252_v16, %v10247_v58 }
 0x378   : > { %v10374_v23 = vpop.f32.mrf.mxu0  ;;  %10728 = vst [vmem:[#allocation27_spill] sm:$0xff] %v10377_v63  ;;  %v5903_v44 = vadd.f32 %v7953_v52, %v10164_v55  ;;  %v5914_v34 = vadd.f32 %v7962_v11, %v10191_v21  ;;  %v7965_v11 = vadd.f32 %v10259_v25, %v10257_v40 }
 0x37a   : > { %v10379_v53 = vpop.f32.mrf.mxu0  ;;  %v5919_v40 = vadd.f32 %v7965_v11, %v10200_v41  ;;  %v7977_v41 = vadd.f32 %v10290_v59, %v10288_v61 }
 0x37b   : > { %v7929_v18 = vpop.f32.mrf.mxu1 }
 0x37c   : > { %v10381_v1 = vpop.f32.mrf.mxu0  ;;  %v5935_v59 = vadd.f32 %v7977_v41, %v10237_v17  ;;  %v7998_v17 = vadd.f32 %v10339_v10, %v10337_v46  ;;  %v10735_v10 = vld [vmem:[#allocation7_spill] sm:$0xff] }
 0x37d   : > { %v7930_v56 = vpop.f32.mrf.mxu1 }
 0x37e   : > { %v7931_v19 = vadd.f32 %v7930_v56, %v7929_v18  ;;  %v7956_v18 = vadd.f32 %v10234_v49, %v10229_v4 }
 0x37f   : > { %v7932_v39 = vpop.f32.mrf.mxu1 }
 0x380   : > { %v10384_v27 = vadd.f32 %v7931_v19, %v10208_v30 }
 0x381   : > { %v7933_v2 = vpop.f32.mrf.mxu1 }
 0x382   : > { %v7934_v3 = vadd.f32 %v7933_v2, %v7932_v39 }
 0x384   : > { %v10388_v26 = vpop.f32.mrf.mxu0  ;;  %v10397_v56 = vadd.f32 %v7934_v3, %v10214_v54  ;;  %v5906_v3 = vadd.f32 %v7956_v18, %v10170_v0  ;;  %v7974_v0 = vadd.f32 %v10283_v13, %v10278_v28  ;;  %v10730_v28 = vmov 0  }
 0x386   : > { %v10394_v63 = vpop.f32.mrf.mxu0  ;;  %10729 = vst [vmem:[#allocation28_spill] sm:$0xff] %v10397_v56  ;;  %v5930_v25 = vadd.f32 %v7974_v0, %v10232_v6  ;;  %v7986_v6 = vadd.f32 %v10311_v15, %v10309_v33 }
 0x387   : > { %v8089_v30 = vpop.f32.mrf.mxu1 }
 0x388   : > { %v10402_v7 = vpop.f32.mrf.mxu0  ;;  %v6072_v39 = vadd.f32 %v8089_v30, %v5911_v20  ;;  %v7971_v30 = vadd.f32 %v10276_v36, %v10271_v38  ;;  %v5946_v15 = vadd.f32 %v7986_v6, %v10255_v43  ;;  %v8007_v6 = vadd.f32 %v10363_v47, %v10358_v57 }
 0x389   : > { %v6063_v19 = vpop.f32.mrf.mxu1 }
 0x38a   : > { %v10406_v58 = vpop.f32.mrf.mxu0  ;;  %v6064_v2 = vadd.f32 %v6063_v19, %v5903_v44  ;;  %v6192_v49 = vmax.f32 %v6072_v39, 0.0  ;;  %v7968_v44 = vadd.f32 %v10266_v22, %v10264_v14  ;;  %v5927_v38 = vadd.f32 %v7971_v30, %v10219_v29 }
 0x38b   : > { %v8090_v16 = vpop.f32.mrf.mxu1  ;;  %v7983_v22 = vadd.f32 %v10307_v12, %v10302_v48 }
 0x38c   : > { %v6075_v54 = vadd.f32 %v8090_v16, %v5914_v34  ;;  %v6190_v55 = vmax.f32 %v6064_v2, 0.0  ;;  %v5922_v14 = vadd.f32 %v7968_v44, %v10212_v24  ;;  %v7980_v24 = vadd.f32 %v10297_v35, %v10295_v9 }
 0x38d   : > { %v10409_v56 = vpop.f32.mrf.mxu0  ;;  %v6066_v4 = vpop.f32.mrf.mxu1  ;;  %v5943_v12 = vadd.f32 %v7983_v22, %v10250_v51  ;;  %v7995_v51 = vadd.f32 %v10335_v45, %v10330_v50  ;;  %v10732_v50 = vld [vmem:[#allocation15_spill] sm:$0xff] }
 0x38e   : > { %v6193_v8 = vmax.f32 %v6075_v54, 0.0  ;;  %v6067_v31 = vadd.f32 %v6066_v4, %v5906_v3  ;;  %v5938_v9 = vadd.f32 %v7980_v24, %v10243_v60 }
 0x38f   : > { %v10413_v20 = vpop.f32.mrf.mxu0 }
 0x390   : > { %v6223_v21 = vpack.c.bf16 %v6193_v8, %v6192_v49  ;;  %v6191_v52 = vmax.f32 %v6067_v31, 0.0 }
 0x391   : > { %v10419_v18 = vpop.f32.mrf.mxu0 }
 0x392   : > { %v6222_v19 = vpack.c.bf16 %v6191_v52, %v6190_v55  ;;  %v8093_v39 = vpop.f32.mrf.mxu1 }
 0x393   : > { %v10423_v34 = vpop.f32.mrf.mxu0  ;;  %v6088_v2 = vadd.f32 %v8093_v39, %v5927_v38 }
 0x394   : > { %v6079_v36 = vpop.f32.mrf.mxu1  ;;  %6379 = vmatmul.mubr.bf16.vlgmr.msra.gmra.mxu1 %v6222_v19 }
 0x395   : > { %6388 = vmatprep.mubr.bf16.mxu1 %v10730_v28  ;;  %v6080_v54 = vadd.f32 %v6079_v36, %v5919_v40  ;;  %v6196_v49 = vmax.f32 %v6088_v2, 0.0  ;;  %v7989_v40 = vadd.f32 %v10318_v42, %v10316_v5 }
 0x396   : > { %v10426_v16 = vpop.f32.mrf.mxu0  ;;  %v8094_v13 = vpop.f32.mrf.mxu1 }
 0x397   : > { %v6091_v3 = vadd.f32 %v8094_v13, %v5930_v25  ;;  %v6194_v30 = vmax.f32 %v6080_v54, 0.0 }
 0x398   : > { %v10434_v29 = vpop.f32.mrf.mxu0  ;;  %v6082_v4 = vpop.f32.mrf.mxu1 }
 0x399   : > { %v6197_v8 = vmax.f32 %v6091_v3, 0.0  ;;  %v6083_v31 = vadd.f32 %v6082_v4, %v5922_v14  ;;  %v10731_v3 = vld [vmem:[#allocation14_spill] sm:$0xff] }
 0x39a   : > { %v10442_v48 = vpop.f32.mrf.mxu0  ;;  %v7992_v45 = vadd.f32 %v10732_v50, %v10731_v3  ;;  %v10733_v14 = vld [vmem:[#allocation6_spill] sm:$0xff] }
 0x39b   : > { %v6225_v55 = vpack.c.bf16 %v6197_v8, %v6196_v49  ;;  %v6195_v52 = vmax.f32 %v6083_v31, 0.0  ;;  %v5959_v22 = vadd.f32 %v7995_v51, %v10733_v14  ;;  %v10734_v49 = vld [vmem:[#allocation4_spill] sm:$0xff]  ;;  %v5962_v8 = vadd.f32 %v7998_v17, %v10735_v10 }
 0x39c   : > { %v8097_v11 = vpop.f32.mrf.mxu1  ;;  %6389 = vmatmul.mubr.bf16.gmra.mxu1 %v6223_v21  ;;  %v10448_v39 = vpop.f32.mrf.mxu0  ;;  %v5951_v46 = vadd.f32 %v7989_v40, %v10734_v49  ;;  %v8013_v49 = vadd.f32 %v10374_v23, %v10372_v32  ;;  %v8022_v10 = vadd.f32 %v10406_v58, %v10402_v7  ;;  %v10746_v58 = vld [vmem:[#allocation12_spill] sm:$0xff] }
 0x39d   : > { %v6224_v0 = vpack.c.bf16 %v6195_v52, %v6194_v30  ;;  %6398 = vmatprep.mubr.bf16.mxu1 %v10730_v28  ;;  %v6104_v61 = vadd.f32 %v8097_v11, %v5943_v12  ;;  %v10736_v11 = vld [vmem:[#allocation5_spill] sm:$0xff]  ;;  %v10737_v12 = vld [vmem:[#allocation20_spill] sm:$0xff] }
 0x39e   : > { %v6095_v19 = vpop.f32.mrf.mxu1  ;;  %v10457_v43 = vpop.f32.mrf.mxu0  ;;  %v5954_v24 = vadd.f32 %v7992_v45, %v10736_v11 }
 0x39f   : > { %v6096_v44 = vadd.f32 %v6095_v19, %v5935_v59  ;;  %v6200_v21 = vmax.f32 %v6104_v61, 0.0  ;;  %v10738_v61 = vld [vmem:[#allocation25_spill] sm:$0xff] }
 0x3a0   : > { %v8098_v33 = vpop.f32.mrf.mxu1  ;;  %v10467_v31 = vpop.f32.mrf.mxu0  ;;  %v8010_v59 = vadd.f32 %v10367_v37, %v10738_v61  ;;  %v10747_v61 = vld [vmem:[#allocation17_spill] sm:$0xff] }
 0x3a1   : > { %v6107_v38 = vadd.f32 %v8098_v33, %v5946_v15  ;;  %v6198_v25 = vmax.f32 %v6096_v44, 0.0 }
 0x3a2   : > { %v6098_v35 = vpop.f32.mrf.mxu1 }
 0x3a3   : > { %v6201_v36 = vmax.f32 %v6107_v38, 0.0  ;;  %v6099_v2 = vadd.f32 %v6098_v35, %v5938_v9  ;;  %v10739_v38 = vld [vmem:[#allocation21_spill] sm:$0xff]  ;;  %v10740_v9 = vld [vmem:[#allocation22_spill] sm:$0xff]  ;;  %v10478_v35 = vpop.f32.mrf.mxu0 }
 0x3a4   : > { %6399 = vmatmul.mubr.bf16.gmra.mxu1 %v6224_v0  ;;  %v8001_v0 = vadd.f32 %v10737_v12, %v10344_v62  ;;  %v8004_v51 = vadd.f32 %v10740_v9, %v10739_v38  ;;  %v10745_v12 = vld [vmem:[#allocation16_spill] sm:$0xff]  ;;  %v8025_v9 = vadd.f32 %v10413_v20, %v10409_v56 }
 0x3a5   : > { %v10459_v13 = vpack.c.bf16 %v6201_v36, %v6200_v21  ;;  %v6199_v54 = vmax.f32 %v6099_v2, 0.0  ;;  %6408 = vmatprep.mubr.bf16.mxu1 %v10730_v28  ;;  %v10741_v2 = vld [vmem:[#allocation10_spill] sm:$0xff]  ;;  %v10488_v50 = vpop.f32.mrf.mxu0 }
 0x3a6   : > { %v5975_v62 = vadd.f32 %v8007_v6, %v10741_v2 }
 0x3a7   : > { %v6226_v4 = vpack.c.bf16 %v6199_v54, %v6198_v25  ;;  %v10742_v25 = vld [vmem:[#allocation8_spill] sm:$0xff] }
 0x3a8   : > { %v8101_v60 = vpop.f32.mrf.mxu1  ;;  %v5967_v54 = vadd.f32 %v8001_v0, %v10742_v25 }
 0x3a9   : > { %v6120_v5 = vadd.f32 %v8101_v60, %v5959_v22  ;;  %v10743_v60 = vld [vmem:[#allocation11_spill] sm:$0xff] }
 0x3aa   : > { %v6111_v42 = vpop.f32.mrf.mxu1  ;;  %v5978_v3 = vadd.f32 %v8010_v59, %v10743_v60  ;;  %v5994_v59 = vadd.f32 %v8022_v10, %v10747_v61 }
 0x3ab   : > { %v6112_v30 = vadd.f32 %v6111_v42, %v5951_v46  ;;  %v6204_v15 = vmax.f32 %v6120_v5, 0.0  ;;  %v10744_v42 = vld [vmem:[#allocation9_spill] sm:$0xff] }
 0x3ac   : > { %v8102_v41 = vpop.f32.mrf.mxu1  ;;  %6409 = vmatmul.mubr.bf16.gmra.mxu1 %v6225_v55  ;;  %v8019_v55 = vadd.f32 %v10394_v63, %v10388_v26  ;;  %v5970_v5 = vadd.f32 %v8004_v51, %v10744_v42 }
 0x3ad   : > { %v6123_v52 = vadd.f32 %v8102_v41, %v5962_v8  ;;  %v6202_v47 = vmax.f32 %v6112_v30, 0.0  ;;  %6418 = vmatprep.mubr.bf16.mxu1 %v10730_v28  ;;  %v8016_v30 = vadd.f32 %v10381_v1, %v10379_v53 }
 0x3ae   : > { %v6114_v19 = vpop.f32.mrf.mxu1  ;;  %v5991_v0 = vadd.f32 %v8019_v55, %v10745_v12 }
 0x3af   : > { %v6205_v33 = vmax.f32 %v6123_v52, 0.0  ;;  %v6115_v44 = vadd.f32 %v6114_v19, %v5954_v24  ;;  %v8041_v52 = vpop.f32.mrf.mxu0  ;;  %v5983_v19 = vadd.f32 %v8013_v49, %v10746_v58  ;;  %v8037_v49 = vadd.f32 %v10467_v31, %v10457_v43  ;;  %v10754_v58 = vld [vmem:[#allocation28_spill] sm:$0xff] }
 0x3b0   : > { %v8105_v57 = vpop.f32.mrf.mxu1 }
 0x3b1   : > { %v10480_v21 = vpack.c.bf16 %v6205_v33, %v6204_v15  ;;  %v6203_v36 = vmax.f32 %v6115_v44, 0.0  ;;  %v6136_v17 = vadd.f32 %v8105_v57, %v5975_v62  ;;  %v8042_v1 = vpop.f32.mrf.mxu0  ;;  %v10748_v44 = vld [vmem:[#allocation13_spill] sm:$0xff]  ;;  %v8034_v57 = vadd.f32 %v10448_v39, %v10442_v48  ;;  %v10750_v39 = vld [vmem:[#allocation18_spill] sm:$0xff] }
 0x3b2   : > { %v6127_v40 = vpop.f32.mrf.mxu1  ;;  %v5986_v38 = vadd.f32 %v8016_v30, %v10748_v44  ;;  %v8028_v62 = vadd.f32 %v10423_v34, %v10419_v18  ;;  %v8043_v34 = vadd.f32 %v8042_v1, %v8041_v52  ;;  %v8040_v30 = vadd.f32 %v10488_v50, %v10478_v35  ;;  %v10755_v50 = vld [vmem:[#allocation27_spill] sm:$0xff] }
 0x3b3   : > { %v10484_v37 = vpack.c.bf16 %v6203_v36, %v6202_v47  ;;  %v6128_v14 = vadd.f32 %v6127_v40, %v5967_v54  ;;  %v6208_v8 = vmax.f32 %v6136_v17, 0.0  ;;  %v8044_v40 = vpop.f32.mrf.mxu0  ;;  %v10749_v54 = vld [vmem:[#allocation23_spill] sm:$0xff] }
 0x3b4   : > { %v8106_v45 = vpop.f32.mrf.mxu1  ;;  %6419 = vmatmul.mubr.bf16.gmra.mxu1 %v6226_v4  ;;  %v8031_v4 = vadd.f32 %v10434_v29, %v10426_v16  ;;  %v6023_v12 = vadd.f32 %v8043_v34, %v10384_v27  ;;  %v6018_v1 = vadd.f32 %v8040_v30, %v10755_v50 }
 0x3b5   : > { %v6139_v22 = vadd.f32 %v8106_v45, %v5978_v3  ;;  %v6206_v63 = vmax.f32 %v6128_v14, 0.0  ;;  %6428 = vmatprep.mubr.bf16.mxu1 %v10730_v28  ;;  %v5999_v3 = vadd.f32 %v8025_v9, %v10750_v39  ;;  %v10751_v45 = vld [vmem:[#allocation24_spill] sm:$0xff]  ;;  %v8045_v14 = vpop.f32.mrf.mxu0  ;;  %v6254_v9 = vld [vmem:[%s10687_s6] sm:$0x3] }
 0x3b6   : > { %v6130_v46 = vpop.f32.mrf.mxu1  ;;  %v6007_v60 = vadd.f32 %v8031_v4, %v10749_v54  ;;  %v6010_v55 = vadd.f32 %v8034_v57, %v10751_v45  ;;  %v8046_v10 = vadd.f32 %v8045_v14, %v8044_v40 }
 0x3b7   : > { %v6209_v41 = vmax.f32 %v6139_v22, 0.0  ;;  %v6131_v6 = vadd.f32 %v6130_v46, %v5970_v5 }
 0x3b8   : > { %v8109_v11 = vpop.f32.mrf.mxu1 }
 0x3b9   : > { %v10499_v26 = vpack.c.bf16 %v6209_v41, %v6208_v8  ;;  %v6207_v24 = vmax.f32 %v6131_v6, 0.0  ;;  %v6152_v7 = vadd.f32 %v8109_v11, %v5991_v0 }
 0x3ba   : > { %v6143_v23 = vpop.f32.mrf.mxu1 }
 0x3bb   : > { %v10503_v32 = vpack.c.bf16 %v6207_v24, %v6206_v63  ;;  %v6144_v15 = vadd.f32 %v6143_v23, %v5983_v19  ;;  %v6212_v47 = vmax.f32 %v6152_v7, 0.0  ;;  %v10753_v23 = vld [vmem:[#allocation26_spill] sm:$0xff]  ;;  %v6026_v19 = vadd.f32 %v8046_v10, %v10754_v58  ;;  %v8503_v10 = vld [vmem:[%s8593_s30 + $0x18] sm:$0xff] }
 0x3bc   : > { %v8110_v53 = vpop.f32.mrf.mxu1  ;;  %6429 = vmatmul.mubr.bf16.gmra.mxu1 %v10459_v13  ;;  %v10752_v13 = vld [vmem:[#allocation19_spill] sm:$0xff]  ;;  %v6015_v7 = vadd.f32 %v8037_v49, %v10753_v23 }
 0x3bd   : > { %v6155_v33 = vadd.f32 %v8110_v53, %v5994_v59  ;;  %v6210_v16 = vmax.f32 %v6144_v15, 0.0  ;;  %6438 = vmatprep.mubr.bf16.mxu1 %v10730_v28  ;;  %v6002_v5 = vadd.f32 %v8028_v62, %v10752_v13 }
 0x3be   : > { %v6146_v51 = vpop.f32.mrf.mxu1 }
 0x3bf   : > { %v6213_v36 = vmax.f32 %v6155_v33, 0.0  ;;  %v6147_v2 = vadd.f32 %v6146_v51, %v5986_v38 }
 0x3c0   : > { %v8113_v17 = vpop.f32.mrf.mxu1 }
 0x3c1   : > { %v6233_v29 = vpack.c.bf16 %v6213_v36, %v6212_v47  ;;  %v6211_v25 = vmax.f32 %v6147_v2, 0.0  ;;  %v6168_v48 = vadd.f32 %v8113_v17, %v6007_v60  ;;  %v8500_v47 = vld [vmem:[%s8593_s30] sm:$0xff] }
 0x3c2   : > { %v6159_v56 = vpop.f32.mrf.mxu1  ;;  %v6539_v36 = vunpack.c.l.bf16 %v8500_v47  ;;  %v6540_v40 = vunpack.c.h.bf16 %v8500_v47 }
 0x3c3   : > { %v6232_v20 = vpack.c.bf16 %v6211_v25, %v6210_v16  ;;  %v6160_v22 = vadd.f32 %v6159_v56, %v5999_v3  ;;  %v6216_v8 = vmax.f32 %v6168_v48, 0.0  ;;  %v8501_v25 = vld [vmem:[%s8593_s30 + $0x8] sm:$0xff]  ;;  %v8502_v3 = vld [vmem:[%s8593_s30 + $0x10] sm:$0xff] }
 0x3c4   : > { %v8114_v18 = vpop.f32.mrf.mxu1  ;;  %6439 = vmatmul.mubr.bf16.gmra.mxu1 %v10484_v37  ;;  %v6541_v54 = vunpack.c.l.bf16 %v8501_v25  ;;  %v6542_v48 = vunpack.c.h.bf16 %v8501_v25  ;;  %v6543_v45 = vunpack.c.l.bf16 %v8502_v3  ;;  %v6544_v49 = vunpack.c.h.bf16 %v8502_v3 }
 0x3c5   : > { %v6171_v42 = vadd.f32 %v8114_v18, %v6010_v55  ;;  %v6214_v63 = vmax.f32 %v6160_v22, 0.0  ;;  %6448 = vmatprep.mubr.bf16.mxu1 %v10730_v28 }
 0x3c6   : > { %v6162_v46 = vpop.f32.mrf.mxu1 }
 0x3c7   : > { %v6217_v41 = vmax.f32 %v6171_v42, 0.0  ;;  %v6163_v6 = vadd.f32 %v6162_v46, %v6002_v5 }
 0x3c8   : > { %v8117_v11 = vpop.f32.mrf.mxu1 }
 0x3c9   : > { %v6235_v52 = vpack.c.bf16 %v6217_v41, %v6216_v8  ;;  %v6215_v24 = vmax.f32 %v6163_v6, 0.0  ;;  %v6184_v31 = vadd.f32 %v8117_v11, %v6023_v12  ;;  %v6545_v8 = vunpack.c.l.bf16 %v8503_v10 }
 0x3ca   : > { %v6175_v0 = vpop.f32.mrf.mxu1 }
 0x3cb   : > { %v6234_v43 = vpack.c.bf16 %v6215_v24, %v6214_v63  ;;  %v6176_v59 = vadd.f32 %v6175_v0, %v6015_v7  ;;  %v6220_v53 = vmax.f32 %v6184_v31, 0.0  ;;  %v6546_v0 = vunpack.c.h.bf16 %v8503_v10  ;;  %v8504_v31 = vld [vmem:[%s8593_s30 + $0x20] sm:$0xff] }
 0x3cc   : > { %v8118_v61 = vpop.f32.mrf.mxu1  ;;  %6449 = vmatmul.mubr.bf16.gmra.mxu1 %v10480_v21  ;;  %v6256_v21 = vlaneseq  ;;  %v6547_v23 = vunpack.c.l.bf16 %v8504_v31 }
 0x3cd   : > { %v6187_v35 = vadd.f32 %v8118_v61, %v6026_v19  ;;  %v6218_v27 = vmax.f32 %v6176_v59, 0.0  ;;  %6458 = vmatprep.mubr.bf16.mxu1 %v10730_v28 }
 0x3ce   : > { %v6178_v37 = vpop.f32.mrf.mxu1 }
 0x3cf   : > { %v6221_v4 = vmax.f32 %v6187_v35, 0.0  ;;  %v6179_v15 = vadd.f32 %v6178_v37, %v6018_v1  ;;  %v6548_v37 = vunpack.c.h.bf16 %v8504_v31 }
 0x3d1   : > { %v6237_v33 = vpack.c.bf16 %v6221_v4, %v6220_v53  ;;  %v6219_v44 = vmax.f32 %v6179_v15, 0.0  ;;  %v8505_v4 = vld [vmem:[%s8593_s30 + $0x28] sm:$0xff] }
 0x3d2   : > { %v6549_v15 = vunpack.c.l.bf16 %v8505_v4 }
 0x3d3   : > { %v6236_v38 = vpack.c.bf16 %v6219_v44, %v6218_v27 }
 0x3d4   : > { %6459 = vmatmul.mubr.bf16.gmra.mxu1 %v10503_v32 }
 0x3d5   : > { %6468 = vmatprep.mubr.bf16.mxu1 %v10730_v28 }
 0x3dc   : > { %6469 = vmatmul.mubr.bf16.gmra.mxu1 %v10499_v26  ;;  %v6257_v26 = vshrl.u32 %v6256_v21, 7 }
 0x3dd   : > { %6478 = vmatprep.mubr.bf16.mxu1 %v10730_v28 }
 0x3de   : > { %v6258_v32 = vsub.s32 0, %v6257_v26  ;;  %v6262_v51 = vsub.s32 1, %v6257_v26 }
 0x3e0   : > { %v10546_v57 = vrot.slane %v6254_v9, %v6258_v32  ;;  %v10549_v2 = vrot.slane %v6254_v9, %v6262_v51  ;;  %v6550_v51 = vunpack.c.h.bf16 %v8505_v4 }
 0x3e4   : > { %6479 = vmatmul.mubr.bf16.gmra.mxu1 %v6232_v20 }
 0x3e5   : > { %6488 = vmatprep.mubr.bf16.mxu1 %v10730_v28 }
 0x3ec   : > { %6489 = vmatmul.mubr.bf16.gmra.mxu1 %v6233_v29 }
 0x3ed   : > { %6498 = vmatprep.mubr.bf16.mxu1 %v10730_v28 }
 0x3f4   : > { %6499 = vmatmul.mubr.bf16.gmra.mxu1 %v6234_v43 }
 0x3f5   : > { %6508 = vmatprep.mubr.bf16.mxu1 %v10730_v28 }
 0x3fc   : > { %6509 = vmatmul.mubr.bf16.gmra.mxu1 %v6235_v52 }
 0x3fd   : > { %6518 = vmatprep.mubr.bf16.mxu1 %v10730_v28 }
 0x404   : > { %6519 = vmatmul.mubr.bf16.gmra.mxu1 %v6236_v38 }
 0x405   : > { %6528 = vmatprep.mubr.bf16.mxu1 %v10730_v28 }
 0x40c   : > { %6529 = vmatmul.mubr.bf16.gmra.mxu1 %v6237_v33 }
 0x454   : > { %v6380_v62 = vpop.f32.mrf.mxu1 }
 0x455   : > { %v6381_v28 = vadd.f32 %v6380_v62, %v10546_v57 }
 0x456   : > { %v6382_v17 = vpop.f32.mrf.mxu1 }
 0x457   : > { %v6603_v16 = vadd.f32 %v6539_v36, %v6381_v28  ;;  %v6383_v29 = vadd.f32 %v6382_v17, %v10549_v2  ;;  %v8506_v36 = vld [vmem:[%s8593_s30 + $0x30] sm:$0xff] }
 0x458   : > { %v6384_v60 = vpop.f32.mrf.mxu1  ;;  %v6551_v62 = vunpack.c.l.bf16 %v8506_v36 }
 0x459   : > { %v6604_v56 = vadd.f32 %v6540_v40, %v6383_v29  ;;  %v6385_v20 = vadd.f32 %v6384_v60, %v10546_v57  ;;  %v6667_v55 = vmax.f32 %v6603_v16, 0.0 }
 0x45a   : > { %v6386_v39 = vpop.f32.mrf.mxu1 }
 0x45b   : > { %v6668_v14 = vmax.f32 %v6604_v56, 0.0  ;;  %v6605_v18 = vadd.f32 %v6541_v54, %v6385_v20  ;;  %v6387_v34 = vadd.f32 %v6386_v39, %v10549_v2  ;;  %v6552_v56 = vunpack.c.h.bf16 %v8506_v36 }
 0x45c   : > { %v6390_v22 = vpop.f32.mrf.mxu1 }
 0x45d   : > { %v7455_v42 = vpack.c.bf16 %v6668_v14, %v6667_v55  ;;  %v6606_v13 = vadd.f32 %v6542_v48, %v6387_v34  ;;  %v6391_v5 = vadd.f32 %v6390_v22, %v10546_v57  ;;  %v6669_v41 = vmax.f32 %v6605_v18, 0.0  ;;  %v8507_v48 = vld [vmem:[%s8593_s30 + $0x38] sm:$0xff] }
 0x45e   : > { %v6392_v46 = vpop.f32.mrf.mxu1  ;;  %v6553_v39 = vunpack.c.l.bf16 %v8507_v48 }
 0x45f   : > { %6923 = vst [vmem:[%s8598_s10] sm:$0xff] %v7455_v42  ;;  %v6670_v6 = vmax.f32 %v6606_v13, 0.0  ;;  %v6607_v30 = vadd.f32 %v6543_v45, %v6391_v5  ;;  %v6393_v11 = vadd.f32 %v6392_v46, %v10549_v2  ;;  %v6554_v13 = vunpack.c.h.bf16 %v8507_v48 }
 0x460   : > { %v6394_v63 = vpop.f32.mrf.mxu1 }
 0x461   : > { %v7456_v52 = vpack.c.bf16 %v6670_v6, %v6669_v41  ;;  %v6608_v24 = vadd.f32 %v6544_v49, %v6393_v11  ;;  %v6395_v12 = vadd.f32 %v6394_v63, %v10546_v57  ;;  %v6671_v7 = vmax.f32 %v6607_v30, 0.0  ;;  %v8508_v49 = vld [vmem:[%s8593_s30 + $0x40] sm:$0xff] }
 0x462   : > { %v6396_v43 = vpop.f32.mrf.mxu1  ;;  %v6555_v46 = vunpack.c.l.bf16 %v8508_v49 }
 0x463   : > { %6924 = vst [vmem:[%s8598_s10 + $0x8] sm:$0xff] %v7456_v52  ;;  %v6672_v58 = vmax.f32 %v6608_v24, 0.0  ;;  %v6609_v19 = vadd.f32 %v6545_v8, %v6395_v12  ;;  %v6397_v61 = vadd.f32 %v6396_v43, %v10549_v2  ;;  %v6556_v24 = vunpack.c.h.bf16 %v8508_v49 }
 0x464   : > { %v6400_v59 = vpop.f32.mrf.mxu1 }
 0x465   : > { %v7457_v35 = vpack.c.bf16 %v6672_v58, %v6671_v7  ;;  %v6610_v50 = vadd.f32 %v6546_v0, %v6397_v61  ;;  %v6401_v1 = vadd.f32 %v6400_v59, %v10546_v57  ;;  %v6673_v27 = vmax.f32 %v6609_v19, 0.0  ;;  %v8509_v0 = vld [vmem:[%s8593_s30 + $0x48] sm:$0xff] }
 0x466   : > { %v6402_v53 = vpop.f32.mrf.mxu1  ;;  %v6557_v43 = vunpack.c.l.bf16 %v8509_v0 }
 0x467   : > { %6925 = vst [vmem:[%s8598_s10 + $0x10] sm:$0xff] %v7457_v35  ;;  %v6674_v33 = vmax.f32 %v6610_v50, 0.0  ;;  %v6611_v44 = vadd.f32 %v6547_v23, %v6401_v1  ;;  %v6403_v38 = vadd.f32 %v6402_v53, %v10549_v2  ;;  %v6558_v50 = vunpack.c.h.bf16 %v8509_v0 }
 0x468   : > { %v6404_v21 = vpop.f32.mrf.mxu1 }
 0x469   : > { %v7458_v26 = vpack.c.bf16 %v6674_v33, %v6673_v27  ;;  %v6612_v32 = vadd.f32 %v6548_v37, %v6403_v38  ;;  %v6405_v9 = vadd.f32 %v6404_v21, %v10546_v57  ;;  %v6675_v28 = vmax.f32 %v6611_v44, 0.0  ;;  %v8510_v37 = vld [vmem:[%s8593_s30 + $0x50] sm:$0xff] }
 0x46a   : > { %v6406_v47 = vpop.f32.mrf.mxu1  ;;  %v6559_v53 = vunpack.c.l.bf16 %v8510_v37 }
 0x46b   : > { %6926 = vst [vmem:[%s8598_s10 + $0x18] sm:$0xff] %v7458_v26  ;;  %v6676_v40 = vmax.f32 %v6612_v32, 0.0  ;;  %v6613_v17 = vadd.f32 %v6549_v15, %v6405_v9  ;;  %v6407_v16 = vadd.f32 %v6406_v47, %v10549_v2  ;;  %v6560_v32 = vunpack.c.h.bf16 %v8510_v37 }
 0x46c   : > { %v6410_v29 = vpop.f32.mrf.mxu1 }
 0x46d   : > { %v7459_v25 = vpack.c.bf16 %v6676_v40, %v6675_v28  ;;  %v6614_v54 = vadd.f32 %v6550_v51, %v6407_v16  ;;  %v6411_v60 = vadd.f32 %v6410_v29, %v10546_v57  ;;  %v6677_v3 = vmax.f32 %v6613_v17, 0.0  ;;  %v8511_v51 = vld [vmem:[%s8593_s30 + $0x58] sm:$0xff] }
 0x46e   : > { %v6412_v20 = vpop.f32.mrf.mxu1  ;;  %v6561_v47 = vunpack.c.l.bf16 %v8511_v51 }
 0x46f   : > { %6927 = vst [vmem:[%s8598_s10 + $0x20] sm:$0xff] %v7459_v25  ;;  %v6678_v45 = vmax.f32 %v6614_v54, 0.0  ;;  %v6615_v55 = vadd.f32 %v6551_v62, %v6411_v60  ;;  %v6413_v14 = vadd.f32 %v6412_v20, %v10549_v2  ;;  %v6562_v54 = vunpack.c.h.bf16 %v8511_v51 }
 0x470   : > { %v6414_v18 = vpop.f32.mrf.mxu1 }
 0x471   : > { %v7460_v34 = vpack.c.bf16 %v6678_v45, %v6677_v3  ;;  %v6616_v22 = vadd.f32 %v6552_v56, %v6413_v14  ;;  %v6415_v42 = vadd.f32 %v6414_v18, %v10546_v57  ;;  %v6679_v10 = vmax.f32 %v6615_v55, 0.0  ;;  %v8512_v56 = vld [vmem:[%s8593_s30 + $0x60] sm:$0xff] }
 0x472   : > { %v6416_v5 = vpop.f32.mrf.mxu1  ;;  %v6563_v20 = vunpack.c.l.bf16 %v8512_v56 }
 0x473   : > { %6928 = vst [vmem:[%s8598_s10 + $0x28] sm:$0xff] %v7460_v34  ;;  %v6680_v8 = vmax.f32 %v6616_v22, 0.0  ;;  %v6617_v41 = vadd.f32 %v6553_v39, %v6415_v42  ;;  %v6417_v6 = vadd.f32 %v6416_v5, %v10549_v2  ;;  %v6564_v22 = vunpack.c.h.bf16 %v8512_v56 }
 0x474   : > { %v6420_v30 = vpop.f32.mrf.mxu1 }
 0x475   : > { %v7461_v11 = vpack.c.bf16 %v6680_v8, %v6679_v10  ;;  %v6618_v63 = vadd.f32 %v6554_v13, %v6417_v6  ;;  %v6421_v52 = vadd.f32 %v6420_v30, %v10546_v57  ;;  %v6681_v31 = vmax.f32 %v6617_v41, 0.0  ;;  %v8513_v13 = vld [vmem:[%s8593_s30 + $0x68] sm:$0xff] }
 0x476   : > { %v6422_v12 = vpop.f32.mrf.mxu1  ;;  %v6565_v5 = vunpack.c.l.bf16 %v8513_v13 }
 0x477   : > { %6929 = vst [vmem:[%s8598_s10 + $0x30] sm:$0xff] %v7461_v11  ;;  %v6682_v23 = vmax.f32 %v6618_v63, 0.0  ;;  %v6619_v7 = vadd.f32 %v6555_v46, %v6421_v52  ;;  %v6423_v58 = vadd.f32 %v6422_v12, %v10549_v2  ;;  %v6566_v63 = vunpack.c.h.bf16 %v8513_v13 }
 0x478   : > { %v6424_v19 = vpop.f32.mrf.mxu1 }
 0x479   : > { %v7462_v61 = vpack.c.bf16 %v6682_v23, %v6681_v31  ;;  %v6620_v59 = vadd.f32 %v6556_v24, %v6423_v58  ;;  %v6425_v35 = vadd.f32 %v6424_v19, %v10546_v57  ;;  %v6683_v4 = vmax.f32 %v6619_v7, 0.0  ;;  %v8514_v24 = vld [vmem:[%s8593_s30 + $0x70] sm:$0xff] }
 0x47a   : > { %v6426_v1 = vpop.f32.mrf.mxu1  ;;  %v6567_v12 = vunpack.c.l.bf16 %v8514_v24 }
 0x47b   : > { %6930 = vst [vmem:[%s8598_s10 + $0x38] sm:$0xff] %v7462_v61  ;;  %v6684_v15 = vmax.f32 %v6620_v59, 0.0  ;;  %v6621_v27 = vadd.f32 %v6557_v43, %v6425_v35  ;;  %v6427_v33 = vadd.f32 %v6426_v1, %v10549_v2  ;;  %v6568_v59 = vunpack.c.h.bf16 %v8514_v24 }
 0x47c   : > { %v6430_v44 = vpop.f32.mrf.mxu1 }
 0x47d   : > { %v7463_v38 = vpack.c.bf16 %v6684_v15, %v6683_v4  ;;  %v6622_v21 = vadd.f32 %v6558_v50, %v6427_v33  ;;  %v6431_v26 = vadd.f32 %v6430_v44, %v10546_v57  ;;  %v6685_v36 = vmax.f32 %v6621_v27, 0.0  ;;  %v8515_v50 = vld [vmem:[%s8593_s30 + $0x78] sm:$0xff] }
 0x47e   : > { %v6432_v9 = vpop.f32.mrf.mxu1  ;;  %v6569_v1 = vunpack.c.l.bf16 %v8515_v50 }
 0x47f   : > { %6931 = vst [vmem:[%s8598_s10 + $0x40] sm:$0xff] %v7463_v38  ;;  %v6686_v62 = vmax.f32 %v6622_v21, 0.0  ;;  %v6623_v28 = vadd.f32 %v6559_v53, %v6431_v26  ;;  %v6433_v40 = vadd.f32 %v6432_v9, %v10549_v2  ;;  %v6570_v21 = vunpack.c.h.bf16 %v8515_v50 }
 0x480   : > { %v6434_v17 = vpop.f32.mrf.mxu1 }
 0x481   : > { %v7464_v16 = vpack.c.bf16 %v6686_v62, %v6685_v36  ;;  %v6624_v29 = vadd.f32 %v6560_v32, %v6433_v40  ;;  %v6435_v25 = vadd.f32 %v6434_v17, %v10546_v57  ;;  %v6687_v48 = vmax.f32 %v6623_v28, 0.0  ;;  %v8516_v32 = vld [vmem:[%s8593_s30 + $0x80] sm:$0xff] }
 0x482   : > { %v6436_v60 = vpop.f32.mrf.mxu1  ;;  %v6571_v9 = vunpack.c.l.bf16 %v8516_v32 }
 0x483   : > { %6932 = vst [vmem:[%s8598_s10 + $0x48] sm:$0xff] %v7464_v16  ;;  %v6688_v39 = vmax.f32 %v6624_v29, 0.0  ;;  %v6625_v3 = vadd.f32 %v6561_v47, %v6435_v25  ;;  %v6437_v45 = vadd.f32 %v6436_v60, %v10549_v2  ;;  %v6572_v29 = vunpack.c.h.bf16 %v8516_v32 }
 0x484   : > { %v6440_v55 = vpop.f32.mrf.mxu1 }
 0x485   : > { %v7465_v14 = vpack.c.bf16 %v6688_v39, %v6687_v48  ;;  %v6626_v18 = vadd.f32 %v6562_v54, %v6437_v45  ;;  %v6441_v34 = vadd.f32 %v6440_v55, %v10546_v57  ;;  %v6689_v49 = vmax.f32 %v6625_v3, 0.0  ;;  %v8517_v54 = vld [vmem:[%s8593_s30 + $0x88] sm:$0xff] }
 0x486   : > { %v6442_v42 = vpop.f32.mrf.mxu1  ;;  %v6573_v60 = vunpack.c.l.bf16 %v8517_v54 }
 0x487   : > { %6933 = vst [vmem:[%s8598_s10 + $0x50] sm:$0xff] %v7465_v14  ;;  %v6690_v46 = vmax.f32 %v6626_v18, 0.0  ;;  %v6627_v10 = vadd.f32 %v6563_v20, %v6441_v34  ;;  %v6443_v8 = vadd.f32 %v6442_v42, %v10549_v2  ;;  %v6574_v18 = vunpack.c.h.bf16 %v8517_v54 }
 0x488   : > { %v6444_v41 = vpop.f32.mrf.mxu1 }
 0x489   : > { %v7466_v6 = vpack.c.bf16 %v6690_v46, %v6689_v49  ;;  %v6628_v30 = vadd.f32 %v6564_v22, %v6443_v8  ;;  %v6445_v11 = vadd.f32 %v6444_v41, %v10546_v57  ;;  %v6691_v0 = vmax.f32 %v6627_v10, 0.0  ;;  %v8518_v22 = vld [vmem:[%s8593_s30 + $0x90] sm:$0xff] }
 0x48a   : > { %v6446_v52 = vpop.f32.mrf.mxu1  ;;  %v6575_v42 = vunpack.c.l.bf16 %v8518_v22 }
 0x48b   : > { %6934 = vst [vmem:[%s8598_s10 + $0x58] sm:$0xff] %v7466_v6  ;;  %v6692_v43 = vmax.f32 %v6628_v30, 0.0  ;;  %v6629_v31 = vadd.f32 %v6565_v5, %v6445_v11  ;;  %v6447_v23 = vadd.f32 %v6446_v52, %v10549_v2  ;;  %v6576_v30 = vunpack.c.h.bf16 %v8518_v22 }
 0x48c   : > { %v6450_v7 = vpop.f32.mrf.mxu1 }
 0x48d   : > { %v7467_v58 = vpack.c.bf16 %v6692_v43, %v6691_v0  ;;  %v6630_v19 = vadd.f32 %v6566_v63, %v6447_v23  ;;  %v6451_v61 = vadd.f32 %v6450_v7, %v10546_v57  ;;  %v6693_v37 = vmax.f32 %v6629_v31, 0.0  ;;  %v8519_v63 = vld [vmem:[%s8593_s30 + $0x98] sm:$0xff] }
 0x48e   : > { %v6452_v35 = vpop.f32.mrf.mxu1  ;;  %v6577_v52 = vunpack.c.l.bf16 %v8519_v63 }
 0x48f   : > { %6935 = vst [vmem:[%s8598_s10 + $0x60] sm:$0xff] %v7467_v58  ;;  %v6694_v53 = vmax.f32 %v6630_v19, 0.0  ;;  %v6631_v4 = vadd.f32 %v6567_v12, %v6451_v61  ;;  %v6453_v15 = vadd.f32 %v6452_v35, %v10549_v2  ;;  %v6578_v19 = vunpack.c.h.bf16 %v8519_v63 }
 0x490   : > { %v6454_v27 = vpop.f32.mrf.mxu1 }
 0x491   : > { %v7468_v33 = vpack.c.bf16 %v6694_v53, %v6693_v37  ;;  %v6632_v44 = vadd.f32 %v6568_v59, %v6453_v15  ;;  %v6455_v38 = vadd.f32 %v6454_v27, %v10546_v57  ;;  %v6695_v51 = vmax.f32 %v6631_v4, 0.0  ;;  %v8520_v59 = vld [vmem:[%s8593_s30 + $0xa0] sm:$0xff] }
 0x492   : > { %v6456_v26 = vpop.f32.mrf.mxu1  ;;  %v6579_v35 = vunpack.c.l.bf16 %v8520_v59 }
 0x493   : > { %6936 = vst [vmem:[%s8598_s10 + $0x68] sm:$0xff] %v7468_v33  ;;  %v6696_v47 = vmax.f32 %v6632_v44, 0.0  ;;  %v6633_v36 = vadd.f32 %v6569_v1, %v6455_v38  ;;  %v6457_v62 = vadd.f32 %v6456_v26, %v10549_v2  ;;  %v6580_v44 = vunpack.c.h.bf16 %v8520_v59 }
 0x494   : > { %v6460_v28 = vpop.f32.mrf.mxu1 }
 0x495   : > { %v7469_v40 = vpack.c.bf16 %v6696_v47, %v6695_v51  ;;  %v6634_v17 = vadd.f32 %v6570_v21, %v6457_v62  ;;  %v6461_v16 = vadd.f32 %v6460_v28, %v10546_v57  ;;  %v6697_v56 = vmax.f32 %v6633_v36, 0.0  ;;  %v8521_v21 = vld [vmem:[%s8593_s30 + $0xa8] sm:$0xff] }
 0x496   : > { %v6462_v25 = vpop.f32.mrf.mxu1  ;;  %v6581_v26 = vunpack.c.l.bf16 %v8521_v21 }
 0x497   : > { %6937 = vst [vmem:[%s8598_s10 + $0x70] sm:$0xff] %v7469_v40  ;;  %v6698_v20 = vmax.f32 %v6634_v17, 0.0  ;;  %v6635_v48 = vadd.f32 %v6571_v9, %v6461_v16  ;;  %v6463_v39 = vadd.f32 %v6462_v25, %v10549_v2  ;;  %v6582_v17 = vunpack.c.h.bf16 %v8521_v21 }
 0x498   : > { %v6464_v3 = vpop.f32.mrf.mxu1 }
 0x499   : > { %v7470_v45 = vpack.c.bf16 %v6698_v20, %v6697_v56  ;;  %v6636_v55 = vadd.f32 %v6572_v29, %v6463_v39  ;;  %v6465_v14 = vadd.f32 %v6464_v3, %v10546_v57  ;;  %v6699_v13 = vmax.f32 %v6635_v48, 0.0  ;;  %v8522_v29 = vld [vmem:[%s8593_s30 + $0xb0] sm:$0xff] }
 0x49a   : > { %v6466_v34 = vpop.f32.mrf.mxu1  ;;  %v6583_v25 = vunpack.c.l.bf16 %v8522_v29 }
 0x49b   : > { %6938 = vst [vmem:[%s8598_s10 + $0x78] sm:$0xff] %v7470_v45  ;;  %v6700_v5 = vmax.f32 %v6636_v55, 0.0  ;;  %v6637_v49 = vadd.f32 %v6573_v60, %v6465_v14  ;;  %v6467_v46 = vadd.f32 %v6466_v34, %v10549_v2  ;;  %v6584_v55 = vunpack.c.h.bf16 %v8522_v29 }
 0x49c   : > { %v6470_v10 = vpop.f32.mrf.mxu1 }
 0x49d   : > { %v7471_v8 = vpack.c.bf16 %v6700_v5, %v6699_v13  ;;  %v6638_v41 = vadd.f32 %v6574_v18, %v6467_v46  ;;  %v6471_v6 = vadd.f32 %v6470_v10, %v10546_v57  ;;  %v6701_v24 = vmax.f32 %v6637_v49, 0.0  ;;  %v8523_v18 = vld [vmem:[%s8593_s30 + $0xb8] sm:$0xff] }
 0x49e   : > { %v6472_v11 = vpop.f32.mrf.mxu1  ;;  %v6585_v34 = vunpack.c.l.bf16 %v8523_v18 }
 0x49f   : > { %6939 = vst [vmem:[%s8598_s10 + $0x80] sm:$0xff] %v7471_v8  ;;  %v6702_v12 = vmax.f32 %v6638_v41, 0.0  ;;  %v6639_v0 = vadd.f32 %v6575_v42, %v6471_v6  ;;  %v6473_v43 = vadd.f32 %v6472_v11, %v10549_v2  ;;  %v6586_v41 = vunpack.c.h.bf16 %v8523_v18 }
 0x4a0   : > { %v6474_v31 = vpop.f32.mrf.mxu1 }
 0x4a1   : > { %v7472_v23 = vpack.c.bf16 %v6702_v12, %v6701_v24  ;;  %v6640_v7 = vadd.f32 %v6576_v30, %v6473_v43  ;;  %v6475_v58 = vadd.f32 %v6474_v31, %v10546_v57  ;;  %v6703_v50 = vmax.f32 %v6639_v0, 0.0  ;;  %v8524_v30 = vld [vmem:[%s8593_s30 + $0xc0] sm:$0xff] }
 0x4a2   : > { %v6476_v61 = vpop.f32.mrf.mxu1  ;;  %v6587_v11 = vunpack.c.l.bf16 %v8524_v30 }
 0x4a3   : > { %6940 = vst [vmem:[%s8598_s10 + $0x88] sm:$0xff] %v7472_v23  ;;  %v6704_v1 = vmax.f32 %v6640_v7, 0.0  ;;  %v6641_v37 = vadd.f32 %v6577_v52, %v6475_v58  ;;  %v6477_v53 = vadd.f32 %v6476_v61, %v10549_v2  ;;  %v6588_v7 = vunpack.c.h.bf16 %v8524_v30 }
 0x4a4   : > { %v6480_v4 = vpop.f32.mrf.mxu1 }
 0x4a5   : > { %v7473_v15 = vpack.c.bf16 %v6704_v1, %v6703_v50  ;;  %v6642_v27 = vadd.f32 %v6578_v19, %v6477_v53  ;;  %v6481_v33 = vadd.f32 %v6480_v4, %v10546_v57  ;;  %v6705_v32 = vmax.f32 %v6641_v37, 0.0  ;;  %v8525_v19 = vld [vmem:[%s8593_s30 + $0xc8] sm:$0xff] }
 0x4a6   : > { %v6482_v38 = vpop.f32.mrf.mxu1  ;;  %v6589_v61 = vunpack.c.l.bf16 %v8525_v19 }
 0x4a7   : > { %6941 = vst [vmem:[%s8598_s10 + $0x90] sm:$0xff] %v7473_v15  ;;  %v6706_v9 = vmax.f32 %v6642_v27, 0.0  ;;  %v6643_v51 = vadd.f32 %v6579_v35, %v6481_v33  ;;  %v6483_v47 = vadd.f32 %v6482_v38, %v10549_v2  ;;  %v6590_v27 = vunpack.c.h.bf16 %v8525_v19 }
 0x4a8   : > { %v6484_v36 = vpop.f32.mrf.mxu1 }
 0x4a9   : > { %v7474_v62 = vpack.c.bf16 %v6706_v9, %v6705_v32  ;;  %v6644_v28 = vadd.f32 %v6580_v44, %v6483_v47  ;;  %v6485_v40 = vadd.f32 %v6484_v36, %v10546_v57  ;;  %v6707_v54 = vmax.f32 %v6643_v51, 0.0  ;;  %v8526_v44 = vld [vmem:[%s8593_s30 + $0xd0] sm:$0xff] }
 0x4aa   : > { %v6486_v16 = vpop.f32.mrf.mxu1  ;;  %v6591_v38 = vunpack.c.l.bf16 %v8526_v44 }
 0x4ab   : > { %6942 = vst [vmem:[%s8598_s10 + $0x98] sm:$0xff] %v7474_v62  ;;  %v6708_v60 = vmax.f32 %v6644_v28, 0.0  ;;  %v6645_v56 = vadd.f32 %v6581_v26, %v6485_v40  ;;  %v6487_v20 = vadd.f32 %v6486_v16, %v10549_v2  ;;  %v6592_v28 = vunpack.c.h.bf16 %v8526_v44 }
 0x4ac   : > { %v6490_v48 = vpop.f32.mrf.mxu1 }
 0x4ad   : > { %v7475_v39 = vpack.c.bf16 %v6708_v60, %v6707_v54  ;;  %v6646_v3 = vadd.f32 %v6582_v17, %v6487_v20  ;;  %v6491_v45 = vadd.f32 %v6490_v48, %v10546_v57  ;;  %v6709_v22 = vmax.f32 %v6645_v56, 0.0  ;;  %v8527_v17 = vld [vmem:[%s8593_s30 + $0xd8] sm:$0xff] }
 0x4ae   : > { %v6492_v14 = vpop.f32.mrf.mxu1  ;;  %v6593_v16 = vunpack.c.l.bf16 %v8527_v17 }
 0x4af   : > { %6943 = vst [vmem:[%s8598_s10 + $0xa0] sm:$0xff] %v7475_v39  ;;  %v6710_v42 = vmax.f32 %v6646_v3, 0.0  ;;  %v6647_v13 = vadd.f32 %v6583_v25, %v6491_v45  ;;  %v6493_v5 = vadd.f32 %v6492_v14, %v10549_v2  ;;  %v6594_v3 = vunpack.c.h.bf16 %v8527_v17 }
 0x4b0   : > { %v6494_v49 = vpop.f32.mrf.mxu1 }
 0x4b1   : > { %v7476_v46 = vpack.c.bf16 %v6710_v42, %v6709_v22  ;;  %v6648_v10 = vadd.f32 %v6584_v55, %v6493_v5  ;;  %v6495_v8 = vadd.f32 %v6494_v49, %v10546_v57  ;;  %v6711_v63 = vmax.f32 %v6647_v13, 0.0  ;;  %v8528_v55 = vld [vmem:[%s8593_s30 + $0xe0] sm:$0xff] }
 0x4b2   : > { %v6496_v6 = vpop.f32.mrf.mxu1  ;;  %v6595_v14 = vunpack.c.l.bf16 %v8528_v55 }
 0x4b3   : > { %6944 = vst [vmem:[%s8598_s10 + $0xa8] sm:$0xff] %v7476_v46  ;;  %v6712_v52 = vmax.f32 %v6648_v10, 0.0  ;;  %v6649_v24 = vadd.f32 %v6585_v34, %v6495_v8  ;;  %v6497_v12 = vadd.f32 %v6496_v6, %v10549_v2  ;;  %v6596_v10 = vunpack.c.h.bf16 %v8528_v55 }
 0x4b4   : > { %v6500_v0 = vpop.f32.mrf.mxu1 }
 0x4b5   : > { %v7477_v43 = vpack.c.bf16 %v6712_v52, %v6711_v63  ;;  %v6650_v31 = vadd.f32 %v6586_v41, %v6497_v12  ;;  %v6501_v23 = vadd.f32 %v6500_v0, %v10546_v57  ;;  %v6713_v59 = vmax.f32 %v6649_v24, 0.0  ;;  %v8529_v41 = vld [vmem:[%s8593_s30 + $0xe8] sm:$0xff] }
 0x4b6   : > { %v6502_v58 = vpop.f32.mrf.mxu1  ;;  %v6597_v6 = vunpack.c.l.bf16 %v8529_v41 }
 0x4b7   : > { %6945 = vst [vmem:[%s8598_s10 + $0xb0] sm:$0xff] %v7477_v43  ;;  %v6714_v35 = vmax.f32 %v6650_v31, 0.0  ;;  %v6651_v50 = vadd.f32 %v6587_v11, %v6501_v23  ;;  %v6503_v1 = vadd.f32 %v6502_v58, %v10549_v2  ;;  %v6598_v31 = vunpack.c.h.bf16 %v8529_v41 }
 0x4b8   : > { %v6504_v37 = vpop.f32.mrf.mxu1 }
 0x4b9   : > { %v7478_v53 = vpack.c.bf16 %v6714_v35, %v6713_v59  ;;  %v6652_v4 = vadd.f32 %v6588_v7, %v6503_v1  ;;  %v6505_v15 = vadd.f32 %v6504_v37, %v10546_v57  ;;  %v6715_v21 = vmax.f32 %v6651_v50, 0.0  ;;  %v8530_v7 = vld [vmem:[%s8593_s30 + $0xf0] sm:$0xff] }
 0x4ba   : > { %v6506_v33 = vpop.f32.mrf.mxu1  ;;  %v6599_v58 = vunpack.c.l.bf16 %v8530_v7 }
 0x4bb   : > { %6946 = vst [vmem:[%s8598_s10 + $0xb8] sm:$0xff] %v7478_v53  ;;  %v6716_v26 = vmax.f32 %v6652_v4, 0.0  ;;  %v6653_v32 = vadd.f32 %v6589_v61, %v6505_v15  ;;  %v6507_v9 = vadd.f32 %v6506_v33, %v10549_v2  ;;  %v6600_v4 = vunpack.c.h.bf16 %v8530_v7 }
 0x4bc   : > { %v6510_v51 = vpop.f32.mrf.mxu1 }
 0x4bd   : > { %v7479_v47 = vpack.c.bf16 %v6716_v26, %v6715_v21  ;;  %v6654_v36 = vadd.f32 %v6590_v27, %v6507_v9  ;;  %v6511_v62 = vadd.f32 %v6510_v51, %v10546_v57  ;;  %v6717_v29 = vmax.f32 %v6653_v32, 0.0  ;;  %v8531_v27 = vld [vmem:[%s8593_s30 + $0xf8] sm:$0xff] }
 0x4be   : > { %v6512_v40 = vpop.f32.mrf.mxu1  ;;  %v6601_v33 = vunpack.c.l.bf16 %v8531_v27 }
 0x4bf   : > { %6947 = vst [vmem:[%s8598_s10 + $0xc0] sm:$0xff] %v7479_v47  ;;  %v6718_v25 = vmax.f32 %v6654_v36, 0.0  ;;  %v6655_v54 = vadd.f32 %v6591_v38, %v6511_v62  ;;  %v6513_v60 = vadd.f32 %v6512_v40, %v10549_v2  ;;  %v6602_v36 = vunpack.c.h.bf16 %v8531_v27 }
 0x4c0   : > { %v6514_v56 = vpop.f32.mrf.mxu1 }
 0x4c1   : > { %v7480_v20 = vpack.c.bf16 %v6718_v25, %v6717_v29  ;;  %v6656_v48 = vadd.f32 %v6592_v28, %v6513_v60  ;;  %v6515_v39 = vadd.f32 %v6514_v56, %v10546_v57  ;;  %v6719_v18 = vmax.f32 %v6655_v54, 0.0 }
 0x4c2   : > { %v6516_v45 = vpop.f32.mrf.mxu1 }
 0x4c3   : > { %6948 = vst [vmem:[%s8598_s10 + $0xc8] sm:$0xff] %v7480_v20  ;;  %v6720_v34 = vmax.f32 %v6656_v48, 0.0  ;;  %v6657_v22 = vadd.f32 %v6593_v16, %v6515_v39  ;;  %v6517_v42 = vadd.f32 %v6516_v45, %v10549_v2 }
 0x4c4   : > { %v6520_v13 = vpop.f32.mrf.mxu1 }
 0x4c5   : > { %v7481_v5 = vpack.c.bf16 %v6720_v34, %v6719_v18  ;;  %v6658_v49 = vadd.f32 %v6594_v3, %v6517_v42  ;;  %v6521_v46 = vadd.f32 %v6520_v13, %v10546_v57  ;;  %v6721_v30 = vmax.f32 %v6657_v22, 0.0 }
 0x4c6   : > { %v6522_v8 = vpop.f32.mrf.mxu1 }
 0x4c7   : > { %6949 = vst [vmem:[%s8598_s10 + $0xd0] sm:$0xff] %v7481_v5  ;;  %v6722_v11 = vmax.f32 %v6658_v49, 0.0  ;;  %v6659_v63 = vadd.f32 %v6595_v14, %v6521_v46  ;;  %v6523_v52 = vadd.f32 %v6522_v8, %v10549_v2 }
 0x4c8   : > { %v6524_v24 = vpop.f32.mrf.mxu1 }
 0x4c9   : > { %v7482_v12 = vpack.c.bf16 %v6722_v11, %v6721_v30  ;;  %v6660_v0 = vadd.f32 %v6596_v10, %v6523_v52  ;;  %v6525_v43 = vadd.f32 %v6524_v24, %v10546_v57  ;;  %v6723_v19 = vmax.f32 %v6659_v63, 0.0 }
 0x4ca   : > { %v6526_v23 = vpop.f32.mrf.mxu1 }
 0x4cb   : > { %6950 = vst [vmem:[%s8598_s10 + $0xd8] sm:$0xff] %v7482_v12  ;;  %v6724_v61 = vmax.f32 %v6660_v0, 0.0  ;;  %v6661_v59 = vadd.f32 %v6597_v6, %v6525_v43  ;;  %v6527_v35 = vadd.f32 %v6526_v23, %v10549_v2 }
 0x4cc   : > { %v6530_v50 = vpop.f32.mrf.mxu1 }
 0x4cd   : > { %v7483_v1 = vpack.c.bf16 %v6724_v61, %v6723_v19  ;;  %v6662_v37 = vadd.f32 %v6598_v31, %v6527_v35  ;;  %v6531_v53 = vadd.f32 %v6530_v50, %v10546_v57  ;;  %v6725_v44 = vmax.f32 %v6661_v59, 0.0 }
 0x4ce   : > { %v6532_v15 = vpop.f32.mrf.mxu1 }
 0x4cf   : > { %6951 = vst [vmem:[%s8598_s10 + $0xe0] sm:$0xff] %v7483_v1  ;;  %v6726_v38 = vmax.f32 %v6662_v37, 0.0  ;;  %v6663_v21 = vadd.f32 %v6599_v58, %v6531_v53  ;;  %v6533_v26 = vadd.f32 %v6532_v15, %v10549_v2 }
 0x4d0   : > { %v6534_v32 = vpop.f32.mrf.mxu1 }
 0x4d1   : > { %v7484_v9 = vpack.c.bf16 %v6726_v38, %v6725_v44  ;;  %v6664_v51 = vadd.f32 %v6600_v4, %v6533_v26  ;;  %v6535_v47 = vadd.f32 %v6534_v32, %v10546_v57  ;;  %v6727_v28 = vmax.f32 %v6663_v21, 0.0 }
 0x4d2   : > { %v6536_v62 = vpop.f32.mrf.mxu1 }
 0x4d3   : > { %6952 = vst [vmem:[%s8598_s10 + $0xe8] sm:$0xff] %v7484_v9  ;;  %v6728_v40 = vmax.f32 %v6664_v51, 0.0  ;;  %v6665_v17 = vadd.f32 %v6601_v33, %v6535_v47  ;;  %v6537_v16 = vadd.f32 %v6536_v62, %v10549_v2 }
 0x4d5   : > { %v7485_v29 = vpack.c.bf16 %v6728_v40, %v6727_v28  ;;  %v6666_v25 = vadd.f32 %v6602_v36, %v6537_v16  ;;  %v6729_v54 = vmax.f32 %v6665_v17, 0.0 }
 0x4d7   : > { %6953 = vst [vmem:[%s8598_s10 + $0xf0] sm:$0xff] %v7485_v29  ;;  %v6730_v60 = vmax.f32 %v6666_v25, 0.0 }
 0x4d9   : > { %v7486_v56 = vpack.c.bf16 %v6730_v60, %v6729_v54 }
 0x4db   : > { %6954 = vst [vmem:[%s8598_s10 + $0xf8] sm:$0xff] %v7486_v56 }
 0x4dc PF: > { %s17_s24 = sadd.s32 1, %s8538_s24  }
 0x4dd   : > { %p14_p5 = scmp.ge.s32.totalorder %s17_s24, 4  }
 0x4df   :  { %16 = sbr.rel (!%p14_p5) target bundleno = 1 (0x1), region = 84 }

</bundles_post_ra>
